<compile_context>
chip_gen: v6e
topology: v6e:2x2x1
jax: 0.10.0
libtpu: 0.0.40
codegen_flags: <defaults>
</compile_context>

<pallas_src>
import functools

import jax
import jax.numpy as jnp
import numpy as np
from jax.experimental import pallas as pl
from jax.experimental.pallas import tpu as pltpu

KH = KW = 4
STRIDE = 2
PAD = 2
LANES = 128  # Cout padded to a full lane tile -> dense (unmasked) output stores.


def _conv_out(n):
    return (n + 2 * PAD - KH) // STRIDE + 1


def _pad8(n):
    return ((n + 7) // 8) * 8


def _make_plan(B, H, n_fea):
    chans = [3, 2 * n_fea, 4 * n_fea, 8 * n_fea, 8 * n_fea, 8 * n_fea]
    plan = []
    h = H
    for l in range(5):
        oh = _conv_out(h)
        plan.append(dict(B=B, cin=chans[l], cout=chans[l + 1], ih=h, oh=oh,
                         l8=_pad8(2 * oh - 1)))
        h = oh
    return plan


# ------------------------------ fused Pallas kernel ------------------------------
def _disgin_kernel(plan, *refs):
    nl = len(plan)
    xe_ref, xo_ref = refs[0], refs[1]
    w_refs = refs[2:2 + nl]                    # (4, 4*Cin, 128) bf16 each
    b_refs = refs[2 + nl:2 + 2 * nl]           # (1, 128) f32 each
    s_refs = refs[2 + 2 * nl:2 + 3 * nl]       # (OH*OW, OH*L8) f32 0/1 selection
    out_refs = refs[2 + 3 * nl:2 + 4 * nl]     # (B, OH*OW, 128) f32 each
    buf_refs = refs[2 + 4 * nl:]               # 2*(nl-1) VMEM activation buffers

    cur_e, cur_o = xe_ref, xo_ref              # layer-1 input buffers (even/odd rows)
    for l, cfg in enumerate(plan):
        B, oh, l8, cout = cfg["B"], cfg["oh"], cfg["l8"], cfg["cout"]
        ow = oh
        w_ref, b_ref, sel_ref, out_ref = w_refs[l], b_refs[l], s_refs[l], out_refs[l]

        sel = sel_ref[...]                     # (oh*ow, oh*l8) f32
        bias = b_ref[...]                      # (1, 128) f32
        acts = []
        for b in range(B):
            acc = jnp.zeros((oh * l8, LANES), jnp.float32)
            # Conv as 4 accumulating GEMMs (one per kernel row kh); the kw taps are
            # already unrolled into the K dimension by the buffer layout.
            for kh in range(KH):
                src = cur_e if kh % 2 == 0 else cur_o
                r0 = (kh // 2) * l8
                patch = src[b, r0:r0 + oh * l8, :]                 # (oh*l8, 4*cin)
                acc = acc + jnp.dot(patch.astype(jnp.bfloat16), w_ref[kh],
                                    preferred_element_type=jnp.float32)
            # Stride-2 column subsample via constant 0/1 selection matmul.
            y = jnp.dot(sel, acc, preferred_element_type=jnp.float32)  # (oh*ow, 128)
            y = y + bias
            acts.append(jnp.maximum(y, 0.2 * y))                   # LeakyReLU(0.2)
        act = jnp.stack(acts, axis=0)                              # (B, oh*ow, 128)
        out_ref[...] = act

        # Scatter this layer's activation into the next layer's VMEM input buffers
        # (zero-padded border, kw taps expanded along channels, rows split by parity).
        if l + 1 < nl:
            n_l8 = plan[l + 1]["l8"]
            ne_ref = buf_refs[2 * l]
            no_ref = buf_refs[2 * l + 1]
            ne_ref[...] = jnp.zeros(ne_ref.shape, ne_ref.dtype)
            no_ref[...] = jnp.zeros(no_ref.shape, no_ref.dtype)
            for r in range(oh):
                dst = ne_ref if r % 2 == 0 else no_ref
                base = ((r + 2) // 2) * n_l8                       # padded row -> buffer row
                row = act[:, r * ow:(r + 1) * ow, :cout]           # (B, ow, cout)
                for kw in range(KW):
                    lo = 2 - kw                                    # column shift of this tap
                    c0 = kw * cout
                    if lo >= 0:
                        dst[:, base + lo:base + lo + ow, c0:c0 + cout] = row
                    else:  # kw == 3: first output column would land at j = -1 (never read)
                        dst[:, base:base + ow - 1, c0:c0 + cout] = row[:, 1:, :]
            cur_e, cur_o = ne_ref, no_ref


# ------------------------------ wrapper / plumbing ------------------------------
def _full_spec(shape):
    nd = len(shape)

    def idx(i):
        return (0,) * nd

    return pl.BlockSpec(shape, idx)


def _prep_layer(w, b):
    """(Cout, Cin, 4, 4) weights -> (4, 4*Cin, 128) bf16 ; bias -> (1, 128) f32."""
    cout, cin = w.shape[0], w.shape[1]
    wm = jnp.transpose(w, (2, 3, 1, 0)).reshape(KH, KW * cin, cout)
    wm = jnp.pad(wm, ((0, 0), (0, 0), (0, LANES - cout))).astype(jnp.bfloat16)
    bp = jnp.pad(b, (0, LANES - cout)).reshape(1, LANES).astype(jnp.float32)
    return wm, bp


@functools.partial(jax.jit, static_argnames=("n_fea",))
def disgin_forward(x_nchw, params, n_fea=8):
    B, _, H, W = x_nchw.shape
    assert H == W and H % 2 == 0, "driver assumes square inputs with even spatial size"
    plan = _make_plan(B, H, n_fea)
    wms, bps = zip(*[_prep_layer(w, b) for (w, b) in params])

    # ---- layer-1 input: pad, expand the 4 kw taps along channels, split rows by parity ----
    l8_0 = plan[0]["l8"]
    x = jnp.transpose(x_nchw, (0, 2, 3, 1)).astype(jnp.float32)        # NCHW -> NHWC
    xp = jnp.pad(x, ((0, 0), (PAD, PAD), (PAD, PAD), (0, 0)))
    wpad = l8_0 + (KW - 1) - (W + 2 * PAD)
    xp = jnp.pad(xp, ((0, 0), (0, 0), (0, max(wpad, 0)), (0, 0)))
    xkw = jnp.concatenate([xp[:, :, kw:kw + l8_0, :] for kw in range(KW)], axis=-1)
    rows0 = (H + 2 * PAD) // 2
    xe = xkw[:, 0::2].reshape(B, rows0 * l8_0, KW * 3)
    xo = xkw[:, 1::2].reshape(B, rows0 * l8_0, KW * 3)

    # ---- constant 0/1 selection matrices (stride-2 column picks) ----
    sels = []
    for p in plan:
        oh, l8 = p["oh"], p["l8"]
        s = np.zeros((oh * oh, oh * l8), np.float32)
        for r in range(oh):
            for c in range(oh):
                s[r * oh + c, r * l8 + 2 * c] = 1.0
        sels.append(jnp.asarray(s))

    # ---- single fused pallas_call ----
    in_arrays = [xe, xo] + list(wms) + list(bps) + sels
    in_specs = [_full_spec(a.shape) for a in in_arrays]
    out_shapes = tuple(jax.ShapeDtypeStruct((B, p["oh"] * p["oh"], LANES), jnp.float32)
                       for p in plan)
    out_specs = tuple(_full_spec(s.shape) for s in out_shapes)
    scratch = []
    for p in plan[1:]:
        shp = (B, (p["oh"] + 2) * p["l8"], KW * p["cin"])
        scratch += [pltpu.VMEM(shp, jnp.float32), pltpu.VMEM(shp, jnp.float32)]

    flops = 0
    for p in plan:
        oh, l8, cin = p["oh"], p["l8"], p["cin"]
        flops += B * (KH * 2 * (oh * l8) * (KW * cin) * LANES
                      + 2 * (oh * oh) * (oh * l8) * LANES)
    bytes_accessed = sum(int(np.prod(a.shape)) * a.dtype.itemsize for a in in_arrays)
    bytes_accessed += sum(int(np.prod(s.shape)) * 4 for s in out_shapes)

    outs = pl.pallas_call(
        functools.partial(_disgin_kernel, plan),
        grid=(1,),
        in_specs=in_specs,
        out_specs=out_specs,
        out_shape=out_shapes,
        scratch_shapes=scratch,
        compiler_params=pltpu.CompilerParams(
            dimension_semantics=("arbitrary",),
            vmem_limit_bytes=32 * 1024 * 1024,
        ),
        cost_estimate=pl.CostEstimate(flops=flops, transcendentals=0,
                                      bytes_accessed=bytes_accessed),
    )(*in_arrays)

    # ---- slice off channel padding, back to PyTorch NCHW flatten order ----
    flats = []
    for p, o in zip(plan, outs):
        oh, cout = p["oh"], p["cout"]
        t = o[:, :, :cout].reshape(B, oh, oh, cout)
        flats.append(jnp.transpose(t, (0, 3, 1, 2)).reshape(B, -1))
    x_out = flats[4]
    fea = jnp.concatenate(flats[:4], axis=1)
    return x_out, fea


# ------------------------------ parameter init (plain JAX) ------------------------------
def spectral_normalize(w, key, n_iter=10):
    """Forward-time spectral norm: divide W by its largest singular value (power iteration
    on the (Cout, Cin*KH*KW) matrix). Note: torch persists u and runs 1 iter/forward."""
    cout = w.shape[0]
    w_mat = w.reshape(cout, -1)
    u = jax.random.normal(key, (cout,), jnp.float32)
    u = u / (jnp.linalg.norm(u) + 1e-12)
    v = None
    for _ in range(n_iter):
        v = w_mat.T @ u
        v = v / (jnp.linalg.norm(v) + 1e-12)
        u = w_mat @ v
        u = u / (jnp.linalg.norm(u) + 1e-12)
    sigma = u @ (w_mat @ v)
    return w / sigma


def init_disgin_params(key, n_fea=8):
    chans = [3, 2 * n_fea, 4 * n_fea, 8 * n_fea, 8 * n_fea, 8 * n_fea]
    params = []
    for i in range(5):
        key, kw_, kb, ku = jax.random.split(key, 4)
        cin, cout = chans[i], chans[i + 1]
        w = jax.random.normal(kw_, (cout, cin, 4, 4), jnp.float32) * 0.1
        b = jax.random.normal(kb, (cout,), jnp.float32) * 0.01
        w = spectral_normalize(w, ku)
        params.append((w, b))
    return params


if __name__ == "__main__":
    key = jax.random.PRNGKey(0)
    kx, kp = jax.random.split(key)
    # small shapes: B=2, 3 input channels, 16x16 spatial
    x = jax.random.normal(kx, (2, 3, 16, 16), jnp.float32)
    params = init_disgin_params(kp, n_fea=8)

    x_out, fea = disgin_forward(x, params)
    jax.block_until_ready((x_out, fea))

    # spatial sizes with k=4, s=2, p=2: 16 -> 9 -> 5 -> 3 -> 2 -> 2
    assert x_out.shape == (2, 64 * 2 * 2), x_out.shape
    assert fea.shape == (2, 16 * 9 * 9 + 32 * 5 * 5 + 64 * 3 * 3 + 64 * 2 * 2), fea.shape
    print("KERNEL_OK")
</pallas_src>

<mosaic_0001>
module attributes {stable_mosaic.version = 11 : i64} {
  func.func @_disgin_kernel(%arg0: i32, %arg1: memref<2x240x12xf32, #tpu.memory_space<vmem>>, %arg2: memref<2x240x12xf32, #tpu.memory_space<vmem>>, %arg3: memref<4x12x128xbf16, #tpu.memory_space<vmem>>, %arg4: memref<4x64x128xbf16, #tpu.memory_space<vmem>>, %arg5: memref<4x128x128xbf16, #tpu.memory_space<vmem>>, %arg6: memref<4x256x128xbf16, #tpu.memory_space<vmem>>, %arg7: memref<4x256x128xbf16, #tpu.memory_space<vmem>>, %arg8: memref<1x128xf32, #tpu.memory_space<vmem>>, %arg9: memref<1x128xf32, #tpu.memory_space<vmem>>, %arg10: memref<1x128xf32, #tpu.memory_space<vmem>>, %arg11: memref<1x128xf32, #tpu.memory_space<vmem>>, %arg12: memref<1x128xf32, #tpu.memory_space<vmem>>, %arg13: memref<81x216xf32, #tpu.memory_space<vmem>>, %arg14: memref<25x80xf32, #tpu.memory_space<vmem>>, %arg15: memref<9x24xf32, #tpu.memory_space<vmem>>, %arg16: memref<4x16xf32, #tpu.memory_space<vmem>>, %arg17: memref<4x16xf32, #tpu.memory_space<vmem>>, %arg18: memref<2x81x128xf32, #tpu.memory_space<vmem>>, %arg19: memref<2x25x128xf32, #tpu.memory_space<vmem>>, %arg20: memref<2x9x128xf32, #tpu.memory_space<vmem>>, %arg21: memref<2x4x128xf32, #tpu.memory_space<vmem>>, %arg22: memref<2x4x128xf32, #tpu.memory_space<vmem>>, %arg23: memref<2x112x64xf32, #tpu.memory_space<vmem>>, %arg24: memref<2x112x64xf32, #tpu.memory_space<vmem>>, %arg25: memref<2x40x128xf32, #tpu.memory_space<vmem>>, %arg26: memref<2x40x128xf32, #tpu.memory_space<vmem>>, %arg27: memref<2x32x256xf32, #tpu.memory_space<vmem>>, %arg28: memref<2x32x256xf32, #tpu.memory_space<vmem>>, %arg29: memref<2x32x256xf32, #tpu.memory_space<vmem>>, %arg30: memref<2x32x256xf32, #tpu.memory_space<vmem>>) attributes {dimension_semantics = [#tpu.dimension_semantics<arbitrary>], iteration_bounds = array<i64: 1>, scalar_prefetch = 0 : i64, scratch_operands = 8 : i64, tpu.core_type = #tpu.core_type<tc>, window_params = [{pipeline_mode = #tpu.pipeline_mode<synchronous>, transform_indices = @transform_0, window_bounds = array<i64: 2, 240, 12>}, {pipeline_mode = #tpu.pipeline_mode<synchronous>, transform_indices = @transform_1, window_bounds = array<i64: 2, 240, 12>}, {pipeline_mode = #tpu.pipeline_mode<synchronous>, transform_indices = @transform_2, window_bounds = array<i64: 4, 12, 128>}, {pipeline_mode = #tpu.pipeline_mode<synchronous>, transform_indices = @transform_3, window_bounds = array<i64: 4, 64, 128>}, {pipeline_mode = #tpu.pipeline_mode<synchronous>, transform_indices = @transform_4, window_bounds = array<i64: 4, 128, 128>}, {pipeline_mode = #tpu.pipeline_mode<synchronous>, transform_indices = @transform_5, window_bounds = array<i64: 4, 256, 128>}, {pipeline_mode = #tpu.pipeline_mode<synchronous>, transform_indices = @transform_6, window_bounds = array<i64: 4, 256, 128>}, {pipeline_mode = #tpu.pipeline_mode<synchronous>, transform_indices = @transform_7, window_bounds = array<i64: 1, 128>}, {pipeline_mode = #tpu.pipeline_mode<synchronous>, transform_indices = @transform_8, window_bounds = array<i64: 1, 128>}, {pipeline_mode = #tpu.pipeline_mode<synchronous>, transform_indices = @transform_9, window_bounds = array<i64: 1, 128>}, {pipeline_mode = #tpu.pipeline_mode<synchronous>, transform_indices = @transform_10, window_bounds = array<i64: 1, 128>}, {pipeline_mode = #tpu.pipeline_mode<synchronous>, transform_indices = @transform_11, window_bounds = array<i64: 1, 128>}, {pipeline_mode = #tpu.pipeline_mode<synchronous>, transform_indices = @transform_12, window_bounds = array<i64: 81, 216>}, {pipeline_mode = #tpu.pipeline_mode<synchronous>, transform_indices = @transform_13, window_bounds = array<i64: 25, 80>}, {pipeline_mode = #tpu.pipeline_mode<synchronous>, transform_indices = @transform_14, window_bounds = array<i64: 9, 24>}, {pipeline_mode = #tpu.pipeline_mode<synchronous>, transform_indices = @transform_15, window_bounds = array<i64: 4, 16>}, {pipeline_mode = #tpu.pipeline_mode<synchronous>, transform_indices = @transform_16, window_bounds = array<i64: 4, 16>}, {pipeline_mode = #tpu.pipeline_mode<synchronous>, transform_indices = @transform_17, window_bounds = array<i64: 2, 81, 128>}, {pipeline_mode = #tpu.pipeline_mode<synchronous>, transform_indices = @transform_18, window_bounds = array<i64: 2, 25, 128>}, {pipeline_mode = #tpu.pipeline_mode<synchronous>, transform_indices = @transform_19, window_bounds = array<i64: 2, 9, 128>}, {pipeline_mode = #tpu.pipeline_mode<synchronous>, transform_indices = @transform_20, window_bounds = array<i64: 2, 4, 128>}, {pipeline_mode = #tpu.pipeline_mode<synchronous>, transform_indices = @transform_21, window_bounds = array<i64: 2, 4, 128>}]} {
    %c0 = arith.constant 0 : index
    %c0_0 = arith.constant 0 : index
    %0 = vector.load %arg13[%c0, %c0_0] : memref<81x216xf32, #tpu.memory_space<vmem>>, vector<81x216xf32>
    %c0_1 = arith.constant 0 : index
    %c0_2 = arith.constant 0 : index
    %1 = vector.load %arg8[%c0_1, %c0_2] : memref<1x128xf32, #tpu.memory_space<vmem>>, vector<1x128xf32>
    %cst = arith.constant 0.000000e+00 : f32
    %2 = vector.broadcast %cst : f32 to vector<216x128xf32>
    %c0_3 = arith.constant 0 : index
    %c0_4 = arith.constant 0 : index
    %c0_5 = arith.constant 0 : index
    %3 = vector.load %arg1[%c0_3, %c0_4, %c0_5] : memref<2x240x12xf32, #tpu.memory_space<vmem>>, vector<1x216x12xf32>
    %4 = vector.shape_cast %3 : vector<1x216x12xf32> to vector<216x12xf32>
    %5 = arith.truncf %4 : vector<216x12xf32> to vector<216x12xbf16>
    %c0_6 = arith.constant 0 : index
    %c0_7 = arith.constant 0 : index
    %c0_8 = arith.constant 0 : index
    %6 = vector.load %arg3[%c0_6, %c0_7, %c0_8] : memref<4x12x128xbf16, #tpu.memory_space<vmem>>, vector<1x12x128xbf16>
    %7 = vector.shape_cast %6 : vector<1x12x128xbf16> to vector<12x128xbf16>
    %cst_9 = arith.constant dense<0.000000e+00> : vector<216x128xf32>
    %8 = tpu.matmul %5, %7, %cst_9 {dimension_numbers = #tpu.dot_dimension_numbers<[1], [0], [0], [1], [0, 0, 1, 1], [], []>} : vector<216x12xbf16>, vector<12x128xbf16>, vector<216x128xf32> -> vector<216x128xf32>
    %9 = arith.addf %2, %8 : vector<216x128xf32>
    %c0_10 = arith.constant 0 : index
    %c0_11 = arith.constant 0 : index
    %c0_12 = arith.constant 0 : index
    %10 = vector.load %arg2[%c0_10, %c0_11, %c0_12] : memref<2x240x12xf32, #tpu.memory_space<vmem>>, vector<1x216x12xf32>
    %11 = vector.shape_cast %10 : vector<1x216x12xf32> to vector<216x12xf32>
    %12 = arith.truncf %11 : vector<216x12xf32> to vector<216x12xbf16>
    %c1 = arith.constant 1 : index
    %c0_13 = arith.constant 0 : index
    %c0_14 = arith.constant 0 : index
    %13 = vector.load %arg3[%c1, %c0_13, %c0_14] : memref<4x12x128xbf16, #tpu.memory_space<vmem>>, vector<1x12x128xbf16>
    %14 = vector.shape_cast %13 : vector<1x12x128xbf16> to vector<12x128xbf16>
    %cst_15 = arith.constant dense<0.000000e+00> : vector<216x128xf32>
    %15 = tpu.matmul %12, %14, %cst_15 {dimension_numbers = #tpu.dot_dimension_numbers<[1], [0], [0], [1], [0, 0, 1, 1], [], []>} : vector<216x12xbf16>, vector<12x128xbf16>, vector<216x128xf32> -> vector<216x128xf32>
    %16 = arith.addf %9, %15 : vector<216x128xf32>
    %c0_16 = arith.constant 0 : index
    %c24 = arith.constant 24 : index
    %c0_17 = arith.constant 0 : index
    %17 = vector.load %arg1[%c0_16, %c24, %c0_17] : memref<2x240x12xf32, #tpu.memory_space<vmem>>, vector<1x216x12xf32>
    %18 = vector.shape_cast %17 : vector<1x216x12xf32> to vector<216x12xf32>
    %19 = arith.truncf %18 : vector<216x12xf32> to vector<216x12xbf16>
    %c2 = arith.constant 2 : index
    %c0_18 = arith.constant 0 : index
    %c0_19 = arith.constant 0 : index
    %20 = vector.load %arg3[%c2, %c0_18, %c0_19] : memref<4x12x128xbf16, #tpu.memory_space<vmem>>, vector<1x12x128xbf16>
    %21 = vector.shape_cast %20 : vector<1x12x128xbf16> to vector<12x128xbf16>
    %cst_20 = arith.constant dense<0.000000e+00> : vector<216x128xf32>
    %22 = tpu.matmul %19, %21, %cst_20 {dimension_numbers = #tpu.dot_dimension_numbers<[1], [0], [0], [1], [0, 0, 1, 1], [], []>} : vector<216x12xbf16>, vector<12x128xbf16>, vector<216x128xf32> -> vector<216x128xf32>
    %23 = arith.addf %16, %22 : vector<216x128xf32>
    %c0_21 = arith.constant 0 : index
    %c24_22 = arith.constant 24 : index
    %c0_23 = arith.constant 0 : index
    %24 = vector.load %arg2[%c0_21, %c24_22, %c0_23] : memref<2x240x12xf32, #tpu.memory_space<vmem>>, vector<1x216x12xf32>
    %25 = vector.shape_cast %24 : vector<1x216x12xf32> to vector<216x12xf32>
    %26 = arith.truncf %25 : vector<216x12xf32> to vector<216x12xbf16>
    %c3 = arith.constant 3 : index
    %c0_24 = arith.constant 0 : index
    %c0_25 = arith.constant 0 : index
    %27 = vector.load %arg3[%c3, %c0_24, %c0_25] : memref<4x12x128xbf16, #tpu.memory_space<vmem>>, vector<1x12x128xbf16>
    %28 = vector.shape_cast %27 : vector<1x12x128xbf16> to vector<12x128xbf16>
    %cst_26 = arith.constant dense<0.000000e+00> : vector<216x128xf32>
    %29 = tpu.matmul %26, %28, %cst_26 {dimension_numbers = #tpu.dot_dimension_numbers<[1], [0], [0], [1], [0, 0, 1, 1], [], []>} : vector<216x12xbf16>, vector<12x128xbf16>, vector<216x128xf32> -> vector<216x128xf32>
    %30 = arith.addf %23, %29 : vector<216x128xf32>
    %cst_27 = arith.constant dense<0.000000e+00> : vector<81x128xf32>
    %31 = tpu.matmul %0, %30, %cst_27 {dimension_numbers = #tpu.dot_dimension_numbers<[1], [0], [0], [1], [0, 0, 1, 1], [], []>} : vector<81x216xf32>, vector<216x128xf32>, vector<81x128xf32> -> vector<81x128xf32>
    %32 = vector.broadcast %1 : vector<1x128xf32> to vector<81x128xf32>
    %33 = arith.addf %31, %32 : vector<81x128xf32>
    %cst_28 = arith.constant 2.000000e-01 : f32
    %34 = vector.broadcast %cst_28 : f32 to vector<81x128xf32>
    %35 = arith.mulf %34, %33 : vector<81x128xf32>
    %36 = arith.maximumf %33, %35 : vector<81x128xf32>
    %cst_29 = arith.constant 0.000000e+00 : f32
    %37 = vector.broadcast %cst_29 : f32 to vector<216x128xf32>
    %c1_30 = arith.constant 1 : index
    %c0_31 = arith.constant 0 : index
    %c0_32 = arith.constant 0 : index
    %38 = vector.load %arg1[%c1_30, %c0_31, %c0_32] : memref<2x240x12xf32, #tpu.memory_space<vmem>>, vector<1x216x12xf32>
    %39 = vector.shape_cast %38 : vector<1x216x12xf32> to vector<216x12xf32>
    %40 = arith.truncf %39 : vector<216x12xf32> to vector<216x12xbf16>
    %c0_33 = arith.constant 0 : index
    %c0_34 = arith.constant 0 : index
    %c0_35 = arith.constant 0 : index
    %41 = vector.load %arg3[%c0_33, %c0_34, %c0_35] : memref<4x12x128xbf16, #tpu.memory_space<vmem>>, vector<1x12x128xbf16>
    %42 = vector.shape_cast %41 : vector<1x12x128xbf16> to vector<12x128xbf16>
    %cst_36 = arith.constant dense<0.000000e+00> : vector<216x128xf32>
    %43 = tpu.matmul %40, %42, %cst_36 {dimension_numbers = #tpu.dot_dimension_numbers<[1], [0], [0], [1], [0, 0, 1, 1], [], []>} : vector<216x12xbf16>, vector<12x128xbf16>, vector<216x128xf32> -> vector<216x128xf32>
    %44 = arith.addf %37, %43 : vector<216x128xf32>
    %c1_37 = arith.constant 1 : index
    %c0_38 = arith.constant 0 : index
    %c0_39 = arith.constant 0 : index
    %45 = vector.load %arg2[%c1_37, %c0_38, %c0_39] : memref<2x240x12xf32, #tpu.memory_space<vmem>>, vector<1x216x12xf32>
    %46 = vector.shape_cast %45 : vector<1x216x12xf32> to vector<216x12xf32>
    %47 = arith.truncf %46 : vector<216x12xf32> to vector<216x12xbf16>
    %c1_40 = arith.constant 1 : index
    %c0_41 = arith.constant 0 : index
    %c0_42 = arith.constant 0 : index
    %48 = vector.load %arg3[%c1_40, %c0_41, %c0_42] : memref<4x12x128xbf16, #tpu.memory_space<vmem>>, vector<1x12x128xbf16>
    %49 = vector.shape_cast %48 : vector<1x12x128xbf16> to vector<12x128xbf16>
    %cst_43 = arith.constant dense<0.000000e+00> : vector<216x128xf32>
    %50 = tpu.matmul %47, %49, %cst_43 {dimension_numbers = #tpu.dot_dimension_numbers<[1], [0], [0], [1], [0, 0, 1, 1], [], []>} : vector<216x12xbf16>, vector<12x128xbf16>, vector<216x128xf32> -> vector<216x128xf32>
    %51 = arith.addf %44, %50 : vector<216x128xf32>
    %c1_44 = arith.constant 1 : index
    %c24_45 = arith.constant 24 : index
    %c0_46 = arith.constant 0 : index
    %52 = vector.load %arg1[%c1_44, %c24_45, %c0_46] : memref<2x240x12xf32, #tpu.memory_space<vmem>>, vector<1x216x12xf32>
    %53 = vector.shape_cast %52 : vector<1x216x12xf32> to vector<216x12xf32>
    %54 = arith.truncf %53 : vector<216x12xf32> to vector<216x12xbf16>
    %c2_47 = arith.constant 2 : index
    %c0_48 = arith.constant 0 : index
    %c0_49 = arith.constant 0 : index
    %55 = vector.load %arg3[%c2_47, %c0_48, %c0_49] : memref<4x12x128xbf16, #tpu.memory_space<vmem>>, vector<1x12x128xbf16>
    %56 = vector.shape_cast %55 : vector<1x12x128xbf16> to vector<12x128xbf16>
    %cst_50 = arith.constant dense<0.000000e+00> : vector<216x128xf32>
    %57 = tpu.matmul %54, %56, %cst_50 {dimension_numbers = #tpu.dot_dimension_numbers<[1], [0], [0], [1], [0, 0, 1, 1], [], []>} : vector<216x12xbf16>, vector<12x128xbf16>, vector<216x128xf32> -> vector<216x128xf32>
    %58 = arith.addf %51, %57 : vector<216x128xf32>
    %c1_51 = arith.constant 1 : index
    %c24_52 = arith.constant 24 : index
    %c0_53 = arith.constant 0 : index
    %59 = vector.load %arg2[%c1_51, %c24_52, %c0_53] : memref<2x240x12xf32, #tpu.memory_space<vmem>>, vector<1x216x12xf32>
    %60 = vector.shape_cast %59 : vector<1x216x12xf32> to vector<216x12xf32>
    %61 = arith.truncf %60 : vector<216x12xf32> to vector<216x12xbf16>
    %c3_54 = arith.constant 3 : index
    %c0_55 = arith.constant 0 : index
    %c0_56 = arith.constant 0 : index
    %62 = vector.load %arg3[%c3_54, %c0_55, %c0_56] : memref<4x12x128xbf16, #tpu.memory_space<vmem>>, vector<1x12x128xbf16>
    %63 = vector.shape_cast %62 : vector<1x12x128xbf16> to vector<12x128xbf16>
    %cst_57 = arith.constant dense<0.000000e+00> : vector<216x128xf32>
    %64 = tpu.matmul %61, %63, %cst_57 {dimension_numbers = #tpu.dot_dimension_numbers<[1], [0], [0], [1], [0, 0, 1, 1], [], []>} : vector<216x12xbf16>, vector<12x128xbf16>, vector<216x128xf32> -> vector<216x128xf32>
    %65 = arith.addf %58, %64 : vector<216x128xf32>
    %cst_58 = arith.constant dense<0.000000e+00> : vector<81x128xf32>
    %66 = tpu.matmul %0, %65, %cst_58 {dimension_numbers = #tpu.dot_dimension_numbers<[1], [0], [0], [1], [0, 0, 1, 1], [], []>} : vector<81x216xf32>, vector<216x128xf32>, vector<81x128xf32> -> vector<81x128xf32>
    %67 = vector.broadcast %1 : vector<1x128xf32> to vector<81x128xf32>
    %68 = arith.addf %66, %67 : vector<81x128xf32>
    %cst_59 = arith.constant 2.000000e-01 : f32
    %69 = vector.broadcast %cst_59 : f32 to vector<81x128xf32>
    %70 = arith.mulf %69, %68 : vector<81x128xf32>
    %71 = arith.maximumf %68, %70 : vector<81x128xf32>
    %72 = vector.shape_cast %36 : vector<81x128xf32> to vector<1x81x128xf32>
    %73 = vector.shape_cast %71 : vector<81x128xf32> to vector<1x81x128xf32>
    %74 = tpu.concatenate %72, %73 in 0 : vector<1x81x128xf32>, vector<1x81x128xf32> -> vector<2x81x128xf32>
    %c0_60 = arith.constant 0 : index
    %c0_61 = arith.constant 0 : index
    %c0_62 = arith.constant 0 : index
    %75 = vector.load %arg18[%c0_60, %c0_61, %c0_62] : memref<2x81x128xf32, #tpu.memory_space<vmem>>, vector<2x81x128xf32>
    tpu.vector_store %arg18[%c0_60, %c0_61, %c0_62], %74 {strides = array<i32>} : memref<2x81x128xf32, #tpu.memory_space<vmem>>, vector<2x81x128xf32>,
    %cst_63 = arith.constant 0.000000e+00 : f32
    %76 = vector.broadcast %cst_63 : f32 to vector<2x112x64xf32>
    %c0_64 = arith.constant 0 : index
    %c0_65 = arith.constant 0 : index
    %c0_66 = arith.constant 0 : index
    %77 = vector.load %arg23[%c0_64, %c0_65, %c0_66] : memref<2x112x64xf32, #tpu.memory_space<vmem>>, vector<2x112x64xf32>
    tpu.vector_store %arg23[%c0_64, %c0_65, %c0_66], %76 {strides = array<i32>} : memref<2x112x64xf32, #tpu.memory_space<vmem>>, vector<2x112x64xf32>,
    %cst_67 = arith.constant 0.000000e+00 : f32
    %78 = vector.broadcast %cst_67 : f32 to vector<2x112x64xf32>
    %c0_68 = arith.constant 0 : index
    %c0_69 = arith.constant 0 : index
    %c0_70 = arith.constant 0 : index
    %79 = vector.load %arg24[%c0_68, %c0_69, %c0_70] : memref<2x112x64xf32, #tpu.memory_space<vmem>>, vector<2x112x64xf32>
    tpu.vector_store %arg24[%c0_68, %c0_69, %c0_70], %78 {strides = array<i32>} : memref<2x112x64xf32, #tpu.memory_space<vmem>>, vector<2x112x64xf32>,
    %80 = vector.extract_strided_slice %74 {offsets = [0, 0, 0], sizes = [2, 9, 16], strides = [1, 1, 1]} : vector<2x81x128xf32> to vector<2x9x16xf32>
    %c0_71 = arith.constant 0 : index
    %c18 = arith.constant 18 : index
    %c0_72 = arith.constant 0 : index
    %81 = vector.load %arg23[%c0_71, %c18, %c0_72] : memref<2x112x64xf32, #tpu.memory_space<vmem>>, vector<2x9x16xf32>
    tpu.vector_store %arg23[%c0_71, %c18, %c0_72], %80 {strides = array<i32>} : memref<2x112x64xf32, #tpu.memory_space<vmem>>, vector<2x9x16xf32>,
    %c0_73 = arith.constant 0 : index
    %c17 = arith.constant 17 : index
    %c16 = arith.constant 16 : index
    %82 = vector.load %arg23[%c0_73, %c17, %c16] : memref<2x112x64xf32, #tpu.memory_space<vmem>>, vector<2x9x16xf32>
    tpu.vector_store %arg23[%c0_73, %c17, %c16], %80 {strides = array<i32>} : memref<2x112x64xf32, #tpu.memory_space<vmem>>, vector<2x9x16xf32>,
    %c0_74 = arith.constant 0 : index
    %c16_75 = arith.constant 16 : index
    %c32 = arith.constant 32 : index
    %83 = vector.load %arg23[%c0_74, %c16_75, %c32] : memref<2x112x64xf32, #tpu.memory_space<vmem>>, vector<2x9x16xf32>
    tpu.vector_store %arg23[%c0_74, %c16_75, %c32], %80 {strides = array<i32>} : memref<2x112x64xf32, #tpu.memory_space<vmem>>, vector<2x9x16xf32>,
    %84 = vector.extract_strided_slice %80 {offsets = [0, 1, 0], sizes = [2, 8, 16], strides = [1, 1, 1]} : vector<2x9x16xf32> to vector<2x8x16xf32>
    %c0_76 = arith.constant 0 : index
    %c16_77 = arith.constant 16 : index
    %c48 = arith.constant 48 : index
    %85 = vector.load %arg23[%c0_76, %c16_77, %c48] : memref<2x112x64xf32, #tpu.memory_space<vmem>>, vector<2x8x16xf32>
    tpu.vector_store %arg23[%c0_76, %c16_77, %c48], %84 {strides = array<i32>} : memref<2x112x64xf32, #tpu.memory_space<vmem>>, vector<2x8x16xf32>,
    %86 = vector.extract_strided_slice %74 {offsets = [0, 9, 0], sizes = [2, 9, 16], strides = [1, 1, 1]} : vector<2x81x128xf32> to vector<2x9x16xf32>
    %c0_78 = arith.constant 0 : index
    %c18_79 = arith.constant 18 : index
    %c0_80 = arith.constant 0 : index
    %87 = vector.load %arg24[%c0_78, %c18_79, %c0_80] : memref<2x112x64xf32, #tpu.memory_space<vmem>>, vector<2x9x16xf32>
    tpu.vector_store %arg24[%c0_78, %c18_79, %c0_80], %86 {strides = array<i32>} : memref<2x112x64xf32, #tpu.memory_space<vmem>>, vector<2x9x16xf32>,
    %c0_81 = arith.constant 0 : index
    %c17_82 = arith.constant 17 : index
    %c16_83 = arith.constant 16 : index
    %88 = vector.load %arg24[%c0_81, %c17_82, %c16_83] : memref<2x112x64xf32, #tpu.memory_space<vmem>>, vector<2x9x16xf32>
    tpu.vector_store %arg24[%c0_81, %c17_82, %c16_83], %86 {strides = array<i32>} : memref<2x112x64xf32, #tpu.memory_space<vmem>>, vector<2x9x16xf32>,
    %c0_84 = arith.constant 0 : index
    %c16_85 = arith.constant 16 : index
    %c32_86 = arith.constant 32 : index
    %89 = vector.load %arg24[%c0_84, %c16_85, %c32_86] : memref<2x112x64xf32, #tpu.memory_space<vmem>>, vector<2x9x16xf32>
    tpu.vector_store %arg24[%c0_84, %c16_85, %c32_86], %86 {strides = array<i32>} : memref<2x112x64xf32, #tpu.memory_space<vmem>>, vector<2x9x16xf32>,
    %90 = vector.extract_strided_slice %86 {offsets = [0, 1, 0], sizes = [2, 8, 16], strides = [1, 1, 1]} : vector<2x9x16xf32> to vector<2x8x16xf32>
    %c0_87 = arith.constant 0 : index
    %c16_88 = arith.constant 16 : index
    %c48_89 = arith.constant 48 : index
    %91 = vector.load %arg24[%c0_87, %c16_88, %c48_89] : memref<2x112x64xf32, #tpu.memory_space<vmem>>, vector<2x8x16xf32>
    tpu.vector_store %arg24[%c0_87, %c16_88, %c48_89], %90 {strides = array<i32>} : memref<2x112x64xf32, #tpu.memory_space<vmem>>, vector<2x8x16xf32>,
    %92 = vector.extract_strided_slice %74 {offsets = [0, 18, 0], sizes = [2, 9, 16], strides = [1, 1, 1]} : vector<2x81x128xf32> to vector<2x9x16xf32>
    %c0_90 = arith.constant 0 : index
    %c34 = arith.constant 34 : index
    %c0_91 = arith.constant 0 : index
    %93 = vector.load %arg23[%c0_90, %c34, %c0_91] : memref<2x112x64xf32, #tpu.memory_space<vmem>>, vector<2x9x16xf32>
    tpu.vector_store %arg23[%c0_90, %c34, %c0_91], %92 {strides = array<i32>} : memref<2x112x64xf32, #tpu.memory_space<vmem>>, vector<2x9x16xf32>,
    %c0_92 = arith.constant 0 : index
    %c33 = arith.constant 33 : index
    %c16_93 = arith.constant 16 : index
    %94 = vector.load %arg23[%c0_92, %c33, %c16_93] : memref<2x112x64xf32, #tpu.memory_space<vmem>>, vector<2x9x16xf32>
    tpu.vector_store %arg23[%c0_92, %c33, %c16_93], %92 {strides = array<i32>} : memref<2x112x64xf32, #tpu.memory_space<vmem>>, vector<2x9x16xf32>,
    %c0_94 = arith.constant 0 : index
    %c32_95 = arith.constant 32 : index
    %c32_96 = arith.constant 32 : index
    %95 = vector.load %arg23[%c0_94, %c32_95, %c32_96] : memref<2x112x64xf32, #tpu.memory_space<vmem>>, vector<2x9x16xf32>
    tpu.vector_store %arg23[%c0_94, %c32_95, %c32_96], %92 {strides = array<i32>} : memref<2x112x64xf32, #tpu.memory_space<vmem>>, vector<2x9x16xf32>,
    %96 = vector.extract_strided_slice %92 {offsets = [0, 1, 0], sizes = [2, 8, 16], strides = [1, 1, 1]} : vector<2x9x16xf32> to vector<2x8x16xf32>
    %c0_97 = arith.constant 0 : index
    %c32_98 = arith.constant 32 : index
    %c48_99 = arith.constant 48 : index
    %97 = vector.load %arg23[%c0_97, %c32_98, %c48_99] : memref<2x112x64xf32, #tpu.memory_space<vmem>>, vector<2x8x16xf32>
    tpu.vector_store %arg23[%c0_97, %c32_98, %c48_99], %96 {strides = array<i32>} : memref<2x112x64xf32, #tpu.memory_space<vmem>>, vector<2x8x16xf32>,
    %98 = vector.extract_strided_slice %74 {offsets = [0, 27, 0], sizes = [2, 9, 16], strides = [1, 1, 1]} : vector<2x81x128xf32> to vector<2x9x16xf32>
    %c0_100 = arith.constant 0 : index
    %c34_101 = arith.constant 34 : index
    %c0_102 = arith.constant 0 : index
    %99 = vector.load %arg24[%c0_100, %c34_101, %c0_102] : memref<2x112x64xf32, #tpu.memory_space<vmem>>, vector<2x9x16xf32>
    tpu.vector_store %arg24[%c0_100, %c34_101, %c0_102], %98 {strides = array<i32>} : memref<2x112x64xf32, #tpu.memory_space<vmem>>, vector<2x9x16xf32>,
    %c0_103 = arith.constant 0 : index
    %c33_104 = arith.constant 33 : index
    %c16_105 = arith.constant 16 : index
    %100 = vector.load %arg24[%c0_103, %c33_104, %c16_105] : memref<2x112x64xf32, #tpu.memory_space<vmem>>, vector<2x9x16xf32>
    tpu.vector_store %arg24[%c0_103, %c33_104, %c16_105], %98 {strides = array<i32>} : memref<2x112x64xf32, #tpu.memory_space<vmem>>, vector<2x9x16xf32>,
    %c0_106 = arith.constant 0 : index
    %c32_107 = arith.constant 32 : index
    %c32_108 = arith.constant 32 : index
    %101 = vector.load %arg24[%c0_106, %c32_107, %c32_108] : memref<2x112x64xf32, #tpu.memory_space<vmem>>, vector<2x9x16xf32>
    tpu.vector_store %arg24[%c0_106, %c32_107, %c32_108], %98 {strides = array<i32>} : memref<2x112x64xf32, #tpu.memory_space<vmem>>, vector<2x9x16xf32>,
    %102 = vector.extract_strided_slice %98 {offsets = [0, 1, 0], sizes = [2, 8, 16], strides = [1, 1, 1]} : vector<2x9x16xf32> to vector<2x8x16xf32>
    %c0_109 = arith.constant 0 : index
    %c32_110 = arith.constant 32 : index
    %c48_111 = arith.constant 48 : index
    %103 = vector.load %arg24[%c0_109, %c32_110, %c48_111] : memref<2x112x64xf32, #tpu.memory_space<vmem>>, vector<2x8x16xf32>
    tpu.vector_store %arg24[%c0_109, %c32_110, %c48_111], %102 {strides = array<i32>} : memref<2x112x64xf32, #tpu.memory_space<vmem>>, vector<2x8x16xf32>,
    %104 = vector.extract_strided_slice %74 {offsets = [0, 36, 0], sizes = [2, 9, 16], strides = [1, 1, 1]} : vector<2x81x128xf32> to vector<2x9x16xf32>
    %c0_112 = arith.constant 0 : index
    %c50 = arith.constant 50 : index
    %c0_113 = arith.constant 0 : index
    %105 = vector.load %arg23[%c0_112, %c50, %c0_113] : memref<2x112x64xf32, #tpu.memory_space<vmem>>, vector<2x9x16xf32>
    tpu.vector_store %arg23[%c0_112, %c50, %c0_113], %104 {strides = array<i32>} : memref<2x112x64xf32, #tpu.memory_space<vmem>>, vector<2x9x16xf32>,
    %c0_114 = arith.constant 0 : index
    %c49 = arith.constant 49 : index
    %c16_115 = arith.constant 16 : index
    %106 = vector.load %arg23[%c0_114, %c49, %c16_115] : memref<2x112x64xf32, #tpu.memory_space<vmem>>, vector<2x9x16xf32>
    tpu.vector_store %arg23[%c0_114, %c49, %c16_115], %104 {strides = array<i32>} : memref<2x112x64xf32, #tpu.memory_space<vmem>>, vector<2x9x16xf32>,
    %c0_116 = arith.constant 0 : index
    %c48_117 = arith.constant 48 : index
    %c32_118 = arith.constant 32 : index
    %107 = vector.load %arg23[%c0_116, %c48_117, %c32_118] : memref<2x112x64xf32, #tpu.memory_space<vmem>>, vector<2x9x16xf32>
    tpu.vector_store %arg23[%c0_116, %c48_117, %c32_118], %104 {strides = array<i32>} : memref<2x112x64xf32, #tpu.memory_space<vmem>>, vector<2x9x16xf32>,
    %108 = vector.extract_strided_slice %104 {offsets = [0, 1, 0], sizes = [2, 8, 16], strides = [1, 1, 1]} : vector<2x9x16xf32> to vector<2x8x16xf32>
    %c0_119 = arith.constant 0 : index
    %c48_120 = arith.constant 48 : index
    %c48_121 = arith.constant 48 : index
    %109 = vector.load %arg23[%c0_119, %c48_120, %c48_121] : memref<2x112x64xf32, #tpu.memory_space<vmem>>, vector<2x8x16xf32>
    tpu.vector_store %arg23[%c0_119, %c48_120, %c48_121], %108 {strides = array<i32>} : memref<2x112x64xf32, #tpu.memory_space<vmem>>, vector<2x8x16xf32>,
    %110 = vector.extract_strided_slice %74 {offsets = [0, 45, 0], sizes = [2, 9, 16], strides = [1, 1, 1]} : vector<2x81x128xf32> to vector<2x9x16xf32>
    %c0_122 = arith.constant 0 : index
    %c50_123 = arith.constant 50 : index
    %c0_124 = arith.constant 0 : index
    %111 = vector.load %arg24[%c0_122, %c50_123, %c0_124] : memref<2x112x64xf32, #tpu.memory_space<vmem>>, vector<2x9x16xf32>
    tpu.vector_store %arg24[%c0_122, %c50_123, %c0_124], %110 {strides = array<i32>} : memref<2x112x64xf32, #tpu.memory_space<vmem>>, vector<2x9x16xf32>,
    %c0_125 = arith.constant 0 : index
    %c49_126 = arith.constant 49 : index
    %c16_127 = arith.constant 16 : index
    %112 = vector.load %arg24[%c0_125, %c49_126, %c16_127] : memref<2x112x64xf32, #tpu.memory_space<vmem>>, vector<2x9x16xf32>
    tpu.vector_store %arg24[%c0_125, %c49_126, %c16_127], %110 {strides = array<i32>} : memref<2x112x64xf32, #tpu.memory_space<vmem>>, vector<2x9x16xf32>,
    %c0_128 = arith.constant 0 : index
    %c48_129 = arith.constant 48 : index
    %c32_130 = arith.constant 32 : index
    %113 = vector.load %arg24[%c0_128, %c48_129, %c32_130] : memref<2x112x64xf32, #tpu.memory_space<vmem>>, vector<2x9x16xf32>
    tpu.vector_store %arg24[%c0_128, %c48_129, %c32_130], %110 {strides = array<i32>} : memref<2x112x64xf32, #tpu.memory_space<vmem>>, vector<2x9x16xf32>,
    %114 = vector.extract_strided_slice %110 {offsets = [0, 1, 0], sizes = [2, 8, 16], strides = [1, 1, 1]} : vector<2x9x16xf32> to vector<2x8x16xf32>
    %c0_131 = arith.constant 0 : index
    %c48_132 = arith.constant 48 : index
    %c48_133 = arith.constant 48 : index
    %115 = vector.load %arg24[%c0_131, %c48_132, %c48_133] : memref<2x112x64xf32, #tpu.memory_space<vmem>>, vector<2x8x16xf32>
    tpu.vector_store %arg24[%c0_131, %c48_132, %c48_133], %114 {strides = array<i32>} : memref<2x112x64xf32, #tpu.memory_space<vmem>>, vector<2x8x16xf32>,
    %116 = vector.extract_strided_slice %74 {offsets = [0, 54, 0], sizes = [2, 9, 16], strides = [1, 1, 1]} : vector<2x81x128xf32> to vector<2x9x16xf32>
    %c0_134 = arith.constant 0 : index
    %c66 = arith.constant 66 : index
    %c0_135 = arith.constant 0 : index
    %117 = vector.load %arg23[%c0_134, %c66, %c0_135] : memref<2x112x64xf32, #tpu.memory_space<vmem>>, vector<2x9x16xf32>
    tpu.vector_store %arg23[%c0_134, %c66, %c0_135], %116 {strides = array<i32>} : memref<2x112x64xf32, #tpu.memory_space<vmem>>, vector<2x9x16xf32>,
    %c0_136 = arith.constant 0 : index
    %c65 = arith.constant 65 : index
    %c16_137 = arith.constant 16 : index
    %118 = vector.load %arg23[%c0_136, %c65, %c16_137] : memref<2x112x64xf32, #tpu.memory_space<vmem>>, vector<2x9x16xf32>
    tpu.vector_store %arg23[%c0_136, %c65, %c16_137], %116 {strides = array<i32>} : memref<2x112x64xf32, #tpu.memory_space<vmem>>, vector<2x9x16xf32>,
    %c0_138 = arith.constant 0 : index
    %c64 = arith.constant 64 : index
    %c32_139 = arith.constant 32 : index
    %119 = vector.load %arg23[%c0_138, %c64, %c32_139] : memref<2x112x64xf32, #tpu.memory_space<vmem>>, vector<2x9x16xf32>
    tpu.vector_store %arg23[%c0_138, %c64, %c32_139], %116 {strides = array<i32>} : memref<2x112x64xf32, #tpu.memory_space<vmem>>, vector<2x9x16xf32>,
    %120 = vector.extract_strided_slice %116 {offsets = [0, 1, 0], sizes = [2, 8, 16], strides = [1, 1, 1]} : vector<2x9x16xf32> to vector<2x8x16xf32>
    %c0_140 = arith.constant 0 : index
    %c64_141 = arith.constant 64 : index
    %c48_142 = arith.constant 48 : index
    %121 = vector.load %arg23[%c0_140, %c64_141, %c48_142] : memref<2x112x64xf32, #tpu.memory_space<vmem>>, vector<2x8x16xf32>
    tpu.vector_store %arg23[%c0_140, %c64_141, %c48_142], %120 {strides = array<i32>} : memref<2x112x64xf32, #tpu.memory_space<vmem>>, vector<2x8x16xf32>,
    %122 = vector.extract_strided_slice %74 {offsets = [0, 63, 0], sizes = [2, 9, 16], strides = [1, 1, 1]} : vector<2x81x128xf32> to vector<2x9x16xf32>
    %c0_143 = arith.constant 0 : index
    %c66_144 = arith.constant 66 : index
    %c0_145 = arith.constant 0 : index
    %123 = vector.load %arg24[%c0_143, %c66_144, %c0_145] : memref<2x112x64xf32, #tpu.memory_space<vmem>>, vector<2x9x16xf32>
    tpu.vector_store %arg24[%c0_143, %c66_144, %c0_145], %122 {strides = array<i32>} : memref<2x112x64xf32, #tpu.memory_space<vmem>>, vector<2x9x16xf32>,
    %c0_146 = arith.constant 0 : index
    %c65_147 = arith.constant 65 : index
    %c16_148 = arith.constant 16 : index
    %124 = vector.load %arg24[%c0_146, %c65_147, %c16_148] : memref<2x112x64xf32, #tpu.memory_space<vmem>>, vector<2x9x16xf32>
    tpu.vector_store %arg24[%c0_146, %c65_147, %c16_148], %122 {strides = array<i32>} : memref<2x112x64xf32, #tpu.memory_space<vmem>>, vector<2x9x16xf32>,
    %c0_149 = arith.constant 0 : index
    %c64_150 = arith.constant 64 : index
    %c32_151 = arith.constant 32 : index
    %125 = vector.load %arg24[%c0_149, %c64_150, %c32_151] : memref<2x112x64xf32, #tpu.memory_space<vmem>>, vector<2x9x16xf32>
    tpu.vector_store %arg24[%c0_149, %c64_150, %c32_151], %122 {strides = array<i32>} : memref<2x112x64xf32, #tpu.memory_space<vmem>>, vector<2x9x16xf32>,
    %126 = vector.extract_strided_slice %122 {offsets = [0, 1, 0], sizes = [2, 8, 16], strides = [1, 1, 1]} : vector<2x9x16xf32> to vector<2x8x16xf32>
    %c0_152 = arith.constant 0 : index
    %c64_153 = arith.constant 64 : index
    %c48_154 = arith.constant 48 : index
    %127 = vector.load %arg24[%c0_152, %c64_153, %c48_154] : memref<2x112x64xf32, #tpu.memory_space<vmem>>, vector<2x8x16xf32>
    tpu.vector_store %arg24[%c0_152, %c64_153, %c48_154], %126 {strides = array<i32>} : memref<2x112x64xf32, #tpu.memory_space<vmem>>, vector<2x8x16xf32>,
    %128 = vector.extract_strided_slice %74 {offsets = [0, 72, 0], sizes = [2, 9, 16], strides = [1, 1, 1]} : vector<2x81x128xf32> to vector<2x9x16xf32>
    %c0_155 = arith.constant 0 : index
    %c82 = arith.constant 82 : index
    %c0_156 = arith.constant 0 : index
    %129 = vector.load %arg23[%c0_155, %c82, %c0_156] : memref<2x112x64xf32, #tpu.memory_space<vmem>>, vector<2x9x16xf32>
    tpu.vector_store %arg23[%c0_155, %c82, %c0_156], %128 {strides = array<i32>} : memref<2x112x64xf32, #tpu.memory_space<vmem>>, vector<2x9x16xf32>,
    %c0_157 = arith.constant 0 : index
    %c81 = arith.constant 81 : index
    %c16_158 = arith.constant 16 : index
    %130 = vector.load %arg23[%c0_157, %c81, %c16_158] : memref<2x112x64xf32, #tpu.memory_space<vmem>>, vector<2x9x16xf32>
    tpu.vector_store %arg23[%c0_157, %c81, %c16_158], %128 {strides = array<i32>} : memref<2x112x64xf32, #tpu.memory_space<vmem>>, vector<2x9x16xf32>,
    %c0_159 = arith.constant 0 : index
    %c80 = arith.constant 80 : index
    %c32_160 = arith.constant 32 : index
    %131 = vector.load %arg23[%c0_159, %c80, %c32_160] : memref<2x112x64xf32, #tpu.memory_space<vmem>>, vector<2x9x16xf32>
    tpu.vector_store %arg23[%c0_159, %c80, %c32_160], %128 {strides = array<i32>} : memref<2x112x64xf32, #tpu.memory_space<vmem>>, vector<2x9x16xf32>,
    %132 = vector.extract_strided_slice %128 {offsets = [0, 1, 0], sizes = [2, 8, 16], strides = [1, 1, 1]} : vector<2x9x16xf32> to vector<2x8x16xf32>
    %c0_161 = arith.constant 0 : index
    %c80_162 = arith.constant 80 : index
    %c48_163 = arith.constant 48 : index
    %133 = vector.load %arg23[%c0_161, %c80_162, %c48_163] : memref<2x112x64xf32, #tpu.memory_space<vmem>>, vector<2x8x16xf32>
    tpu.vector_store %arg23[%c0_161, %c80_162, %c48_163], %132 {strides = array<i32>} : memref<2x112x64xf32, #tpu.memory_space<vmem>>, vector<2x8x16xf32>,
    %c0_164 = arith.constant 0 : index
    %c0_165 = arith.constant 0 : index
    %134 = vector.load %arg14[%c0_164, %c0_165] : memref<25x80xf32, #tpu.memory_space<vmem>>, vector<25x80xf32>
    %c0_166 = arith.constant 0 : index
    %c0_167 = arith.constant 0 : index
    %135 = vector.load %arg9[%c0_166, %c0_167] : memref<1x128xf32, #tpu.memory_space<vmem>>, vector<1x128xf32>
    %cst_168 = arith.constant 0.000000e+00 : f32
    %136 = vector.broadcast %cst_168 : f32 to vector<80x128xf32>
    %c0_169 = arith.constant 0 : index
    %c0_170 = arith.constant 0 : index
    %c0_171 = arith.constant 0 : index
    %137 = vector.load %arg23[%c0_169, %c0_170, %c0_171] : memref<2x112x64xf32, #tpu.memory_space<vmem>>, vector<1x80x64xf32>
    %138 = vector.shape_cast %137 : vector<1x80x64xf32> to vector<80x64xf32>
    %139 = arith.truncf %138 : vector<80x64xf32> to vector<80x64xbf16>
    %c0_172 = arith.constant 0 : index
    %c0_173 = arith.constant 0 : index
    %c0_174 = arith.constant 0 : index
    %140 = vector.load %arg4[%c0_172, %c0_173, %c0_174] : memref<4x64x128xbf16, #tpu.memory_space<vmem>>, vector<1x64x128xbf16>
    %141 = vector.shape_cast %140 : vector<1x64x128xbf16> to vector<64x128xbf16>
    %cst_175 = arith.constant dense<0.000000e+00> : vector<80x128xf32>
    %142 = tpu.matmul %139, %141, %cst_175 {dimension_numbers = #tpu.dot_dimension_numbers<[1], [0], [0], [1], [0, 0, 1, 1], [], []>} : vector<80x64xbf16>, vector<64x128xbf16>, vector<80x128xf32> -> vector<80x128xf32>
    %143 = arith.addf %136, %142 : vector<80x128xf32>
    %c0_176 = arith.constant 0 : index
    %c0_177 = arith.constant 0 : index
    %c0_178 = arith.constant 0 : index
    %144 = vector.load %arg24[%c0_176, %c0_177, %c0_178] : memref<2x112x64xf32, #tpu.memory_space<vmem>>, vector<1x80x64xf32>
    %145 = vector.shape_cast %144 : vector<1x80x64xf32> to vector<80x64xf32>
    %146 = arith.truncf %145 : vector<80x64xf32> to vector<80x64xbf16>
    %c1_179 = arith.constant 1 : index
    %c0_180 = arith.constant 0 : index
    %c0_181 = arith.constant 0 : index
    %147 = vector.load %arg4[%c1_179, %c0_180, %c0_181] : memref<4x64x128xbf16, #tpu.memory_space<vmem>>, vector<1x64x128xbf16>
    %148 = vector.shape_cast %147 : vector<1x64x128xbf16> to vector<64x128xbf16>
    %cst_182 = arith.constant dense<0.000000e+00> : vector<80x128xf32>
    %149 = tpu.matmul %146, %148, %cst_182 {dimension_numbers = #tpu.dot_dimension_numbers<[1], [0], [0], [1], [0, 0, 1, 1], [], []>} : vector<80x64xbf16>, vector<64x128xbf16>, vector<80x128xf32> -> vector<80x128xf32>
    %150 = arith.addf %143, %149 : vector<80x128xf32>
    %c0_183 = arith.constant 0 : index
    %c16_184 = arith.constant 16 : index
    %c0_185 = arith.constant 0 : index
    %151 = vector.load %arg23[%c0_183, %c16_184, %c0_185] : memref<2x112x64xf32, #tpu.memory_space<vmem>>, vector<1x80x64xf32>
    %152 = vector.shape_cast %151 : vector<1x80x64xf32> to vector<80x64xf32>
    %153 = arith.truncf %152 : vector<80x64xf32> to vector<80x64xbf16>
    %c2_186 = arith.constant 2 : index
    %c0_187 = arith.constant 0 : index
    %c0_188 = arith.constant 0 : index
    %154 = vector.load %arg4[%c2_186, %c0_187, %c0_188] : memref<4x64x128xbf16, #tpu.memory_space<vmem>>, vector<1x64x128xbf16>
    %155 = vector.shape_cast %154 : vector<1x64x128xbf16> to vector<64x128xbf16>
    %cst_189 = arith.constant dense<0.000000e+00> : vector<80x128xf32>
    %156 = tpu.matmul %153, %155, %cst_189 {dimension_numbers = #tpu.dot_dimension_numbers<[1], [0], [0], [1], [0, 0, 1, 1], [], []>} : vector<80x64xbf16>, vector<64x128xbf16>, vector<80x128xf32> -> vector<80x128xf32>
    %157 = arith.addf %150, %156 : vector<80x128xf32>
    %c0_190 = arith.constant 0 : index
    %c16_191 = arith.constant 16 : index
    %c0_192 = arith.constant 0 : index
    %158 = vector.load %arg24[%c0_190, %c16_191, %c0_192] : memref<2x112x64xf32, #tpu.memory_space<vmem>>, vector<1x80x64xf32>
    %159 = vector.shape_cast %158 : vector<1x80x64xf32> to vector<80x64xf32>
    %160 = arith.truncf %159 : vector<80x64xf32> to vector<80x64xbf16>
    %c3_193 = arith.constant 3 : index
    %c0_194 = arith.constant 0 : index
    %c0_195 = arith.constant 0 : index
    %161 = vector.load %arg4[%c3_193, %c0_194, %c0_195] : memref<4x64x128xbf16, #tpu.memory_space<vmem>>, vector<1x64x128xbf16>
    %162 = vector.shape_cast %161 : vector<1x64x128xbf16> to vector<64x128xbf16>
    %cst_196 = arith.constant dense<0.000000e+00> : vector<80x128xf32>
    %163 = tpu.matmul %160, %162, %cst_196 {dimension_numbers = #tpu.dot_dimension_numbers<[1], [0], [0], [1], [0, 0, 1, 1], [], []>} : vector<80x64xbf16>, vector<64x128xbf16>, vector<80x128xf32> -> vector<80x128xf32>
    %164 = arith.addf %157, %163 : vector<80x128xf32>
    %cst_197 = arith.constant dense<0.000000e+00> : vector<25x128xf32>
    %165 = tpu.matmul %134, %164, %cst_197 {dimension_numbers = #tpu.dot_dimension_numbers<[1], [0], [0], [1], [0, 0, 1, 1], [], []>} : vector<25x80xf32>, vector<80x128xf32>, vector<25x128xf32> -> vector<25x128xf32>
    %166 = vector.broadcast %135 : vector<1x128xf32> to vector<25x128xf32>
    %167 = arith.addf %165, %166 : vector<25x128xf32>
    %cst_198 = arith.constant 2.000000e-01 : f32
    %168 = vector.broadcast %cst_198 : f32 to vector<25x128xf32>
    %169 = arith.mulf %168, %167 : vector<25x128xf32>
    %170 = arith.maximumf %167, %169 : vector<25x128xf32>
    %cst_199 = arith.constant 0.000000e+00 : f32
    %171 = vector.broadcast %cst_199 : f32 to vector<80x128xf32>
    %c1_200 = arith.constant 1 : index
    %c0_201 = arith.constant 0 : index
    %c0_202 = arith.constant 0 : index
    %172 = vector.load %arg23[%c1_200, %c0_201, %c0_202] : memref<2x112x64xf32, #tpu.memory_space<vmem>>, vector<1x80x64xf32>
    %173 = vector.shape_cast %172 : vector<1x80x64xf32> to vector<80x64xf32>
    %174 = arith.truncf %173 : vector<80x64xf32> to vector<80x64xbf16>
    %c0_203 = arith.constant 0 : index
    %c0_204 = arith.constant 0 : index
    %c0_205 = arith.constant 0 : index
    %175 = vector.load %arg4[%c0_203, %c0_204, %c0_205] : memref<4x64x128xbf16, #tpu.memory_space<vmem>>, vector<1x64x128xbf16>
    %176 = vector.shape_cast %175 : vector<1x64x128xbf16> to vector<64x128xbf16>
    %cst_206 = arith.constant dense<0.000000e+00> : vector<80x128xf32>
    %177 = tpu.matmul %174, %176, %cst_206 {dimension_numbers = #tpu.dot_dimension_numbers<[1], [0], [0], [1], [0, 0, 1, 1], [], []>} : vector<80x64xbf16>, vector<64x128xbf16>, vector<80x128xf32> -> vector<80x128xf32>
    %178 = arith.addf %171, %177 : vector<80x128xf32>
    %c1_207 = arith.constant 1 : index
    %c0_208 = arith.constant 0 : index
    %c0_209 = arith.constant 0 : index
    %179 = vector.load %arg24[%c1_207, %c0_208, %c0_209] : memref<2x112x64xf32, #tpu.memory_space<vmem>>, vector<1x80x64xf32>
    %180 = vector.shape_cast %179 : vector<1x80x64xf32> to vector<80x64xf32>
    %181 = arith.truncf %180 : vector<80x64xf32> to vector<80x64xbf16>
    %c1_210 = arith.constant 1 : index
    %c0_211 = arith.constant 0 : index
    %c0_212 = arith.constant 0 : index
    %182 = vector.load %arg4[%c1_210, %c0_211, %c0_212] : memref<4x64x128xbf16, #tpu.memory_space<vmem>>, vector<1x64x128xbf16>
    %183 = vector.shape_cast %182 : vector<1x64x128xbf16> to vector<64x128xbf16>
    %cst_213 = arith.constant dense<0.000000e+00> : vector<80x128xf32>
    %184 = tpu.matmul %181, %183, %cst_213 {dimension_numbers = #tpu.dot_dimension_numbers<[1], [0], [0], [1], [0, 0, 1, 1], [], []>} : vector<80x64xbf16>, vector<64x128xbf16>, vector<80x128xf32> -> vector<80x128xf32>
    %185 = arith.addf %178, %184 : vector<80x128xf32>
    %c1_214 = arith.constant 1 : index
    %c16_215 = arith.constant 16 : index
    %c0_216 = arith.constant 0 : index
    %186 = vector.load %arg23[%c1_214, %c16_215, %c0_216] : memref<2x112x64xf32, #tpu.memory_space<vmem>>, vector<1x80x64xf32>
    %187 = vector.shape_cast %186 : vector<1x80x64xf32> to vector<80x64xf32>
    %188 = arith.truncf %187 : vector<80x64xf32> to vector<80x64xbf16>
    %c2_217 = arith.constant 2 : index
    %c0_218 = arith.constant 0 : index
    %c0_219 = arith.constant 0 : index
    %189 = vector.load %arg4[%c2_217, %c0_218, %c0_219] : memref<4x64x128xbf16, #tpu.memory_space<vmem>>, vector<1x64x128xbf16>
    %190 = vector.shape_cast %189 : vector<1x64x128xbf16> to vector<64x128xbf16>
    %cst_220 = arith.constant dense<0.000000e+00> : vector<80x128xf32>
    %191 = tpu.matmul %188, %190, %cst_220 {dimension_numbers = #tpu.dot_dimension_numbers<[1], [0], [0], [1], [0, 0, 1, 1], [], []>} : vector<80x64xbf16>, vector<64x128xbf16>, vector<80x128xf32> -> vector<80x128xf32>
    %192 = arith.addf %185, %191 : vector<80x128xf32>
    %c1_221 = arith.constant 1 : index
    %c16_222 = arith.constant 16 : index
    %c0_223 = arith.constant 0 : index
    %193 = vector.load %arg24[%c1_221, %c16_222, %c0_223] : memref<2x112x64xf32, #tpu.memory_space<vmem>>, vector<1x80x64xf32>
    %194 = vector.shape_cast %193 : vector<1x80x64xf32> to vector<80x64xf32>
    %195 = arith.truncf %194 : vector<80x64xf32> to vector<80x64xbf16>
    %c3_224 = arith.constant 3 : index
    %c0_225 = arith.constant 0 : index
    %c0_226 = arith.constant 0 : index
    %196 = vector.load %arg4[%c3_224, %c0_225, %c0_226] : memref<4x64x128xbf16, #tpu.memory_space<vmem>>, vector<1x64x128xbf16>
    %197 = vector.shape_cast %196 : vector<1x64x128xbf16> to vector<64x128xbf16>
    %cst_227 = arith.constant dense<0.000000e+00> : vector<80x128xf32>
    %198 = tpu.matmul %195, %197, %cst_227 {dimension_numbers = #tpu.dot_dimension_numbers<[1], [0], [0], [1], [0, 0, 1, 1], [], []>} : vector<80x64xbf16>, vector<64x128xbf16>, vector<80x128xf32> -> vector<80x128xf32>
    %199 = arith.addf %192, %198 : vector<80x128xf32>
    %cst_228 = arith.constant dense<0.000000e+00> : vector<25x128xf32>
    %200 = tpu.matmul %134, %199, %cst_228 {dimension_numbers = #tpu.dot_dimension_numbers<[1], [0], [0], [1], [0, 0, 1, 1], [], []>} : vector<25x80xf32>, vector<80x128xf32>, vector<25x128xf32> -> vector<25x128xf32>
    %201 = vector.broadcast %135 : vector<1x128xf32> to vector<25x128xf32>
    %202 = arith.addf %200, %201 : vector<25x128xf32>
    %cst_229 = arith.constant 2.000000e-01 : f32
    %203 = vector.broadcast %cst_229 : f32 to vector<25x128xf32>
    %204 = arith.mulf %203, %202 : vector<25x128xf32>
    %205 = arith.maximumf %202, %204 : vector<25x128xf32>
    %206 = vector.shape_cast %170 : vector<25x128xf32> to vector<1x25x128xf32>
    %207 = vector.shape_cast %205 : vector<25x128xf32> to vector<1x25x128xf32>
    %208 = tpu.concatenate %206, %207 in 0 : vector<1x25x128xf32>, vector<1x25x128xf32> -> vector<2x25x128xf32>
    %c0_230 = arith.constant 0 : index
    %c0_231 = arith.constant 0 : index
    %c0_232 = arith.constant 0 : index
    %209 = vector.load %arg19[%c0_230, %c0_231, %c0_232] : memref<2x25x128xf32, #tpu.memory_space<vmem>>, vector<2x25x128xf32>
    tpu.vector_store %arg19[%c0_230, %c0_231, %c0_232], %208 {strides = array<i32>} : memref<2x25x128xf32, #tpu.memory_space<vmem>>, vector<2x25x128xf32>,
    %cst_233 = arith.constant 0.000000e+00 : f32
    %210 = vector.broadcast %cst_233 : f32 to vector<2x40x128xf32>
    %c0_234 = arith.constant 0 : index
    %c0_235 = arith.constant 0 : index
    %c0_236 = arith.constant 0 : index
    %211 = vector.load %arg25[%c0_234, %c0_235, %c0_236] : memref<2x40x128xf32, #tpu.memory_space<vmem>>, vector<2x40x128xf32>
    tpu.vector_store %arg25[%c0_234, %c0_235, %c0_236], %210 {strides = array<i32>} : memref<2x40x128xf32, #tpu.memory_space<vmem>>, vector<2x40x128xf32>,
    %cst_237 = arith.constant 0.000000e+00 : f32
    %212 = vector.broadcast %cst_237 : f32 to vector<2x40x128xf32>
    %c0_238 = arith.constant 0 : index
    %c0_239 = arith.constant 0 : index
    %c0_240 = arith.constant 0 : index
    %213 = vector.load %arg26[%c0_238, %c0_239, %c0_240] : memref<2x40x128xf32, #tpu.memory_space<vmem>>, vector<2x40x128xf32>
    tpu.vector_store %arg26[%c0_238, %c0_239, %c0_240], %212 {strides = array<i32>} : memref<2x40x128xf32, #tpu.memory_space<vmem>>, vector<2x40x128xf32>,
    %214 = vector.extract_strided_slice %208 {offsets = [0, 0, 0], sizes = [2, 5, 32], strides = [1, 1, 1]} : vector<2x25x128xf32> to vector<2x5x32xf32>
    %c0_241 = arith.constant 0 : index
    %c10 = arith.constant 10 : index
    %c0_242 = arith.constant 0 : index
    %215 = vector.load %arg25[%c0_241, %c10, %c0_242] : memref<2x40x128xf32, #tpu.memory_space<vmem>>, vector<2x5x32xf32>
    tpu.vector_store %arg25[%c0_241, %c10, %c0_242], %214 {strides = array<i32>} : memref<2x40x128xf32, #tpu.memory_space<vmem>>, vector<2x5x32xf32>,
    %c0_243 = arith.constant 0 : index
    %c9 = arith.constant 9 : index
    %c32_244 = arith.constant 32 : index
    %216 = vector.load %arg25[%c0_243, %c9, %c32_244] : memref<2x40x128xf32, #tpu.memory_space<vmem>>, vector<2x5x32xf32>
    tpu.vector_store %arg25[%c0_243, %c9, %c32_244], %214 {strides = array<i32>} : memref<2x40x128xf32, #tpu.memory_space<vmem>>, vector<2x5x32xf32>,
    %c0_245 = arith.constant 0 : index
    %c8 = arith.constant 8 : index
    %c64_246 = arith.constant 64 : index
    %217 = vector.load %arg25[%c0_245, %c8, %c64_246] : memref<2x40x128xf32, #tpu.memory_space<vmem>>, vector<2x5x32xf32>
    tpu.vector_store %arg25[%c0_245, %c8, %c64_246], %214 {strides = array<i32>} : memref<2x40x128xf32, #tpu.memory_space<vmem>>, vector<2x5x32xf32>,
    %218 = vector.extract_strided_slice %214 {offsets = [0, 1, 0], sizes = [2, 4, 32], strides = [1, 1, 1]} : vector<2x5x32xf32> to vector<2x4x32xf32>
    %c0_247 = arith.constant 0 : index
    %c8_248 = arith.constant 8 : index
    %c96 = arith.constant 96 : index
    %219 = vector.load %arg25[%c0_247, %c8_248, %c96] : memref<2x40x128xf32, #tpu.memory_space<vmem>>, vector<2x4x32xf32>
    tpu.vector_store %arg25[%c0_247, %c8_248, %c96], %218 {strides = array<i32>} : memref<2x40x128xf32, #tpu.memory_space<vmem>>, vector<2x4x32xf32>,
    %220 = vector.extract_strided_slice %208 {offsets = [0, 5, 0], sizes = [2, 5, 32], strides = [1, 1, 1]} : vector<2x25x128xf32> to vector<2x5x32xf32>
    %c0_249 = arith.constant 0 : index
    %c10_250 = arith.constant 10 : index
    %c0_251 = arith.constant 0 : index
    %221 = vector.load %arg26[%c0_249, %c10_250, %c0_251] : memref<2x40x128xf32, #tpu.memory_space<vmem>>, vector<2x5x32xf32>
    tpu.vector_store %arg26[%c0_249, %c10_250, %c0_251], %220 {strides = array<i32>} : memref<2x40x128xf32, #tpu.memory_space<vmem>>, vector<2x5x32xf32>,
    %c0_252 = arith.constant 0 : index
    %c9_253 = arith.constant 9 : index
    %c32_254 = arith.constant 32 : index
    %222 = vector.load %arg26[%c0_252, %c9_253, %c32_254] : memref<2x40x128xf32, #tpu.memory_space<vmem>>, vector<2x5x32xf32>
    tpu.vector_store %arg26[%c0_252, %c9_253, %c32_254], %220 {strides = array<i32>} : memref<2x40x128xf32, #tpu.memory_space<vmem>>, vector<2x5x32xf32>,
    %c0_255 = arith.constant 0 : index
    %c8_256 = arith.constant 8 : index
    %c64_257 = arith.constant 64 : index
    %223 = vector.load %arg26[%c0_255, %c8_256, %c64_257] : memref<2x40x128xf32, #tpu.memory_space<vmem>>, vector<2x5x32xf32>
    tpu.vector_store %arg26[%c0_255, %c8_256, %c64_257], %220 {strides = array<i32>} : memref<2x40x128xf32, #tpu.memory_space<vmem>>, vector<2x5x32xf32>,
    %224 = vector.extract_strided_slice %220 {offsets = [0, 1, 0], sizes = [2, 4, 32], strides = [1, 1, 1]} : vector<2x5x32xf32> to vector<2x4x32xf32>
    %c0_258 = arith.constant 0 : index
    %c8_259 = arith.constant 8 : index
    %c96_260 = arith.constant 96 : index
    %225 = vector.load %arg26[%c0_258, %c8_259, %c96_260] : memref<2x40x128xf32, #tpu.memory_space<vmem>>, vector<2x4x32xf32>
    tpu.vector_store %arg26[%c0_258, %c8_259, %c96_260], %224 {strides = array<i32>} : memref<2x40x128xf32, #tpu.memory_space<vmem>>, vector<2x4x32xf32>,
    %226 = vector.extract_strided_slice %208 {offsets = [0, 10, 0], sizes = [2, 5, 32], strides = [1, 1, 1]} : vector<2x25x128xf32> to vector<2x5x32xf32>
    %c0_261 = arith.constant 0 : index
    %c18_262 = arith.constant 18 : index
    %c0_263 = arith.constant 0 : index
    %227 = vector.load %arg25[%c0_261, %c18_262, %c0_263] : memref<2x40x128xf32, #tpu.memory_space<vmem>>, vector<2x5x32xf32>
    tpu.vector_store %arg25[%c0_261, %c18_262, %c0_263], %226 {strides = array<i32>} : memref<2x40x128xf32, #tpu.memory_space<vmem>>, vector<2x5x32xf32>,
    %c0_264 = arith.constant 0 : index
    %c17_265 = arith.constant 17 : index
    %c32_266 = arith.constant 32 : index
    %228 = vector.load %arg25[%c0_264, %c17_265, %c32_266] : memref<2x40x128xf32, #tpu.memory_space<vmem>>, vector<2x5x32xf32>
    tpu.vector_store %arg25[%c0_264, %c17_265, %c32_266], %226 {strides = array<i32>} : memref<2x40x128xf32, #tpu.memory_space<vmem>>, vector<2x5x32xf32>,
    %c0_267 = arith.constant 0 : index
    %c16_268 = arith.constant 16 : index
    %c64_269 = arith.constant 64 : index
    %229 = vector.load %arg25[%c0_267, %c16_268, %c64_269] : memref<2x40x128xf32, #tpu.memory_space<vmem>>, vector<2x5x32xf32>
    tpu.vector_store %arg25[%c0_267, %c16_268, %c64_269], %226 {strides = array<i32>} : memref<2x40x128xf32, #tpu.memory_space<vmem>>, vector<2x5x32xf32>,
    %230 = vector.extract_strided_slice %226 {offsets = [0, 1, 0], sizes = [2, 4, 32], strides = [1, 1, 1]} : vector<2x5x32xf32> to vector<2x4x32xf32>
    %c0_270 = arith.constant 0 : index
    %c16_271 = arith.constant 16 : index
    %c96_272 = arith.constant 96 : index
    %231 = vector.load %arg25[%c0_270, %c16_271, %c96_272] : memref<2x40x128xf32, #tpu.memory_space<vmem>>, vector<2x4x32xf32>
    tpu.vector_store %arg25[%c0_270, %c16_271, %c96_272], %230 {strides = array<i32>} : memref<2x40x128xf32, #tpu.memory_space<vmem>>, vector<2x4x32xf32>,
    %232 = vector.extract_strided_slice %208 {offsets = [0, 15, 0], sizes = [2, 5, 32], strides = [1, 1, 1]} : vector<2x25x128xf32> to vector<2x5x32xf32>
    %c0_273 = arith.constant 0 : index
    %c18_274 = arith.constant 18 : index
    %c0_275 = arith.constant 0 : index
    %233 = vector.load %arg26[%c0_273, %c18_274, %c0_275] : memref<2x40x128xf32, #tpu.memory_space<vmem>>, vector<2x5x32xf32>
    tpu.vector_store %arg26[%c0_273, %c18_274, %c0_275], %232 {strides = array<i32>} : memref<2x40x128xf32, #tpu.memory_space<vmem>>, vector<2x5x32xf32>,
    %c0_276 = arith.constant 0 : index
    %c17_277 = arith.constant 17 : index
    %c32_278 = arith.constant 32 : index
    %234 = vector.load %arg26[%c0_276, %c17_277, %c32_278] : memref<2x40x128xf32, #tpu.memory_space<vmem>>, vector<2x5x32xf32>
    tpu.vector_store %arg26[%c0_276, %c17_277, %c32_278], %232 {strides = array<i32>} : memref<2x40x128xf32, #tpu.memory_space<vmem>>, vector<2x5x32xf32>,
    %c0_279 = arith.constant 0 : index
    %c16_280 = arith.constant 16 : index
    %c64_281 = arith.constant 64 : index
    %235 = vector.load %arg26[%c0_279, %c16_280, %c64_281] : memref<2x40x128xf32, #tpu.memory_space<vmem>>, vector<2x5x32xf32>
    tpu.vector_store %arg26[%c0_279, %c16_280, %c64_281], %232 {strides = array<i32>} : memref<2x40x128xf32, #tpu.memory_space<vmem>>, vector<2x5x32xf32>,
    %236 = vector.extract_strided_slice %232 {offsets = [0, 1, 0], sizes = [2, 4, 32], strides = [1, 1, 1]} : vector<2x5x32xf32> to vector<2x4x32xf32>
    %c0_282 = arith.constant 0 : index
    %c16_283 = arith.constant 16 : index
    %c96_284 = arith.constant 96 : index
    %237 = vector.load %arg26[%c0_282, %c16_283, %c96_284] : memref<2x40x128xf32, #tpu.memory_space<vmem>>, vector<2x4x32xf32>
    tpu.vector_store %arg26[%c0_282, %c16_283, %c96_284], %236 {strides = array<i32>} : memref<2x40x128xf32, #tpu.memory_space<vmem>>, vector<2x4x32xf32>,
    %238 = vector.extract_strided_slice %208 {offsets = [0, 20, 0], sizes = [2, 5, 32], strides = [1, 1, 1]} : vector<2x25x128xf32> to vector<2x5x32xf32>
    %c0_285 = arith.constant 0 : index
    %c26 = arith.constant 26 : index
    %c0_286 = arith.constant 0 : index
    %239 = vector.load %arg25[%c0_285, %c26, %c0_286] : memref<2x40x128xf32, #tpu.memory_space<vmem>>, vector<2x5x32xf32>
    tpu.vector_store %arg25[%c0_285, %c26, %c0_286], %238 {strides = array<i32>} : memref<2x40x128xf32, #tpu.memory_space<vmem>>, vector<2x5x32xf32>,
    %c0_287 = arith.constant 0 : index
    %c25 = arith.constant 25 : index
    %c32_288 = arith.constant 32 : index
    %240 = vector.load %arg25[%c0_287, %c25, %c32_288] : memref<2x40x128xf32, #tpu.memory_space<vmem>>, vector<2x5x32xf32>
    tpu.vector_store %arg25[%c0_287, %c25, %c32_288], %238 {strides = array<i32>} : memref<2x40x128xf32, #tpu.memory_space<vmem>>, vector<2x5x32xf32>,
    %c0_289 = arith.constant 0 : index
    %c24_290 = arith.constant 24 : index
    %c64_291 = arith.constant 64 : index
    %241 = vector.load %arg25[%c0_289, %c24_290, %c64_291] : memref<2x40x128xf32, #tpu.memory_space<vmem>>, vector<2x5x32xf32>
    tpu.vector_store %arg25[%c0_289, %c24_290, %c64_291], %238 {strides = array<i32>} : memref<2x40x128xf32, #tpu.memory_space<vmem>>, vector<2x5x32xf32>,
    %242 = vector.extract_strided_slice %238 {offsets = [0, 1, 0], sizes = [2, 4, 32], strides = [1, 1, 1]} : vector<2x5x32xf32> to vector<2x4x32xf32>
    %c0_292 = arith.constant 0 : index
    %c24_293 = arith.constant 24 : index
    %c96_294 = arith.constant 96 : index
    %243 = vector.load %arg25[%c0_292, %c24_293, %c96_294] : memref<2x40x128xf32, #tpu.memory_space<vmem>>, vector<2x4x32xf32>
    tpu.vector_store %arg25[%c0_292, %c24_293, %c96_294], %242 {strides = array<i32>} : memref<2x40x128xf32, #tpu.memory_space<vmem>>, vector<2x4x32xf32>,
    %c0_295 = arith.constant 0 : index
    %c0_296 = arith.constant 0 : index
    %244 = vector.load %arg15[%c0_295, %c0_296] : memref<9x24xf32, #tpu.memory_space<vmem>>, vector<9x24xf32>
    %c0_297 = arith.constant 0 : index
    %c0_298 = arith.constant 0 : index
    %245 = vector.load %arg10[%c0_297, %c0_298] : memref<1x128xf32, #tpu.memory_space<vmem>>, vector<1x128xf32>
    %cst_299 = arith.constant 0.000000e+00 : f32
    %246 = vector.broadcast %cst_299 : f32 to vector<24x128xf32>
    %c0_300 = arith.constant 0 : index
    %c0_301 = arith.constant 0 : index
    %c0_302 = arith.constant 0 : index
    %247 = vector.load %arg25[%c0_300, %c0_301, %c0_302] : memref<2x40x128xf32, #tpu.memory_space<vmem>>, vector<1x24x128xf32>
    %248 = vector.shape_cast %247 : vector<1x24x128xf32> to vector<24x128xf32>
    %249 = arith.truncf %248 : vector<24x128xf32> to vector<24x128xbf16>
    %c0_303 = arith.constant 0 : index
    %c0_304 = arith.constant 0 : index
    %c0_305 = arith.constant 0 : index
    %250 = vector.load %arg5[%c0_303, %c0_304, %c0_305] : memref<4x128x128xbf16, #tpu.memory_space<vmem>>, vector<1x128x128xbf16>
    %251 = vector.shape_cast %250 : vector<1x128x128xbf16> to vector<128x128xbf16>
    %cst_306 = arith.constant dense<0.000000e+00> : vector<24x128xf32>
    %252 = tpu.matmul %249, %251, %cst_306 {dimension_numbers = #tpu.dot_dimension_numbers<[1], [0], [0], [1], [0, 0, 1, 1], [], []>} : vector<24x128xbf16>, vector<128x128xbf16>, vector<24x128xf32> -> vector<24x128xf32>
    %253 = arith.addf %246, %252 : vector<24x128xf32>
    %c0_307 = arith.constant 0 : index
    %c0_308 = arith.constant 0 : index
    %c0_309 = arith.constant 0 : index
    %254 = vector.load %arg26[%c0_307, %c0_308, %c0_309] : memref<2x40x128xf32, #tpu.memory_space<vmem>>, vector<1x24x128xf32>
    %255 = vector.shape_cast %254 : vector<1x24x128xf32> to vector<24x128xf32>
    %256 = arith.truncf %255 : vector<24x128xf32> to vector<24x128xbf16>
    %c1_310 = arith.constant 1 : index
    %c0_311 = arith.constant 0 : index
    %c0_312 = arith.constant 0 : index
    %257 = vector.load %arg5[%c1_310, %c0_311, %c0_312] : memref<4x128x128xbf16, #tpu.memory_space<vmem>>, vector<1x128x128xbf16>
    %258 = vector.shape_cast %257 : vector<1x128x128xbf16> to vector<128x128xbf16>
    %cst_313 = arith.constant dense<0.000000e+00> : vector<24x128xf32>
    %259 = tpu.matmul %256, %258, %cst_313 {dimension_numbers = #tpu.dot_dimension_numbers<[1], [0], [0], [1], [0, 0, 1, 1], [], []>} : vector<24x128xbf16>, vector<128x128xbf16>, vector<24x128xf32> -> vector<24x128xf32>
    %260 = arith.addf %253, %259 : vector<24x128xf32>
    %c0_314 = arith.constant 0 : index
    %c8_315 = arith.constant 8 : index
    %c0_316 = arith.constant 0 : index
    %261 = vector.load %arg25[%c0_314, %c8_315, %c0_316] : memref<2x40x128xf32, #tpu.memory_space<vmem>>, vector<1x24x128xf32>
    %262 = vector.shape_cast %261 : vector<1x24x128xf32> to vector<24x128xf32>
    %263 = arith.truncf %262 : vector<24x128xf32> to vector<24x128xbf16>
    %c2_317 = arith.constant 2 : index
    %c0_318 = arith.constant 0 : index
    %c0_319 = arith.constant 0 : index
    %264 = vector.load %arg5[%c2_317, %c0_318, %c0_319] : memref<4x128x128xbf16, #tpu.memory_space<vmem>>, vector<1x128x128xbf16>
    %265 = vector.shape_cast %264 : vector<1x128x128xbf16> to vector<128x128xbf16>
    %cst_320 = arith.constant dense<0.000000e+00> : vector<24x128xf32>
    %266 = tpu.matmul %263, %265, %cst_320 {dimension_numbers = #tpu.dot_dimension_numbers<[1], [0], [0], [1], [0, 0, 1, 1], [], []>} : vector<24x128xbf16>, vector<128x128xbf16>, vector<24x128xf32> -> vector<24x128xf32>
    %267 = arith.addf %260, %266 : vector<24x128xf32>
    %c0_321 = arith.constant 0 : index
    %c8_322 = arith.constant 8 : index
    %c0_323 = arith.constant 0 : index
    %268 = vector.load %arg26[%c0_321, %c8_322, %c0_323] : memref<2x40x128xf32, #tpu.memory_space<vmem>>, vector<1x24x128xf32>
    %269 = vector.shape_cast %268 : vector<1x24x128xf32> to vector<24x128xf32>
    %270 = arith.truncf %269 : vector<24x128xf32> to vector<24x128xbf16>
    %c3_324 = arith.constant 3 : index
    %c0_325 = arith.constant 0 : index
    %c0_326 = arith.constant 0 : index
    %271 = vector.load %arg5[%c3_324, %c0_325, %c0_326] : memref<4x128x128xbf16, #tpu.memory_space<vmem>>, vector<1x128x128xbf16>
    %272 = vector.shape_cast %271 : vector<1x128x128xbf16> to vector<128x128xbf16>
    %cst_327 = arith.constant dense<0.000000e+00> : vector<24x128xf32>
    %273 = tpu.matmul %270, %272, %cst_327 {dimension_numbers = #tpu.dot_dimension_numbers<[1], [0], [0], [1], [0, 0, 1, 1], [], []>} : vector<24x128xbf16>, vector<128x128xbf16>, vector<24x128xf32> -> vector<24x128xf32>
    %274 = arith.addf %267, %273 : vector<24x128xf32>
    %cst_328 = arith.constant dense<0.000000e+00> : vector<9x128xf32>
    %275 = tpu.matmul %244, %274, %cst_328 {dimension_numbers = #tpu.dot_dimension_numbers<[1], [0], [0], [1], [0, 0, 1, 1], [], []>} : vector<9x24xf32>, vector<24x128xf32>, vector<9x128xf32> -> vector<9x128xf32>
    %276 = vector.broadcast %245 : vector<1x128xf32> to vector<9x128xf32>
    %277 = arith.addf %275, %276 : vector<9x128xf32>
    %cst_329 = arith.constant 2.000000e-01 : f32
    %278 = vector.broadcast %cst_329 : f32 to vector<9x128xf32>
    %279 = arith.mulf %278, %277 : vector<9x128xf32>
    %280 = arith.maximumf %277, %279 : vector<9x128xf32>
    %cst_330 = arith.constant 0.000000e+00 : f32
    %281 = vector.broadcast %cst_330 : f32 to vector<24x128xf32>
    %c1_331 = arith.constant 1 : index
    %c0_332 = arith.constant 0 : index
    %c0_333 = arith.constant 0 : index
    %282 = vector.load %arg25[%c1_331, %c0_332, %c0_333] : memref<2x40x128xf32, #tpu.memory_space<vmem>>, vector<1x24x128xf32>
    %283 = vector.shape_cast %282 : vector<1x24x128xf32> to vector<24x128xf32>
    %284 = arith.truncf %283 : vector<24x128xf32> to vector<24x128xbf16>
    %c0_334 = arith.constant 0 : index
    %c0_335 = arith.constant 0 : index
    %c0_336 = arith.constant 0 : index
    %285 = vector.load %arg5[%c0_334, %c0_335, %c0_336] : memref<4x128x128xbf16, #tpu.memory_space<vmem>>, vector<1x128x128xbf16>
    %286 = vector.shape_cast %285 : vector<1x128x128xbf16> to vector<128x128xbf16>
    %cst_337 = arith.constant dense<0.000000e+00> : vector<24x128xf32>
    %287 = tpu.matmul %284, %286, %cst_337 {dimension_numbers = #tpu.dot_dimension_numbers<[1], [0], [0], [1], [0, 0, 1, 1], [], []>} : vector<24x128xbf16>, vector<128x128xbf16>, vector<24x128xf32> -> vector<24x128xf32>
    %288 = arith.addf %281, %287 : vector<24x128xf32>
    %c1_338 = arith.constant 1 : index
    %c0_339 = arith.constant 0 : index
    %c0_340 = arith.constant 0 : index
    %289 = vector.load %arg26[%c1_338, %c0_339, %c0_340] : memref<2x40x128xf32, #tpu.memory_space<vmem>>, vector<1x24x128xf32>
    %290 = vector.shape_cast %289 : vector<1x24x128xf32> to vector<24x128xf32>
    %291 = arith.truncf %290 : vector<24x128xf32> to vector<24x128xbf16>
    %c1_341 = arith.constant 1 : index
    %c0_342 = arith.constant 0 : index
    %c0_343 = arith.constant 0 : index
    %292 = vector.load %arg5[%c1_341, %c0_342, %c0_343] : memref<4x128x128xbf16, #tpu.memory_space<vmem>>, vector<1x128x128xbf16>
    %293 = vector.shape_cast %292 : vector<1x128x128xbf16> to vector<128x128xbf16>
    %cst_344 = arith.constant dense<0.000000e+00> : vector<24x128xf32>
    %294 = tpu.matmul %291, %293, %cst_344 {dimension_numbers = #tpu.dot_dimension_numbers<[1], [0], [0], [1], [0, 0, 1, 1], [], []>} : vector<24x128xbf16>, vector<128x128xbf16>, vector<24x128xf32> -> vector<24x128xf32>
    %295 = arith.addf %288, %294 : vector<24x128xf32>
    %c1_345 = arith.constant 1 : index
    %c8_346 = arith.constant 8 : index
    %c0_347 = arith.constant 0 : index
    %296 = vector.load %arg25[%c1_345, %c8_346, %c0_347] : memref<2x40x128xf32, #tpu.memory_space<vmem>>, vector<1x24x128xf32>
    %297 = vector.shape_cast %296 : vector<1x24x128xf32> to vector<24x128xf32>
    %298 = arith.truncf %297 : vector<24x128xf32> to vector<24x128xbf16>
    %c2_348 = arith.constant 2 : index
    %c0_349 = arith.constant 0 : index
    %c0_350 = arith.constant 0 : index
    %299 = vector.load %arg5[%c2_348, %c0_349, %c0_350] : memref<4x128x128xbf16, #tpu.memory_space<vmem>>, vector<1x128x128xbf16>
    %300 = vector.shape_cast %299 : vector<1x128x128xbf16> to vector<128x128xbf16>
    %cst_351 = arith.constant dense<0.000000e+00> : vector<24x128xf32>
    %301 = tpu.matmul %298, %300, %cst_351 {dimension_numbers = #tpu.dot_dimension_numbers<[1], [0], [0], [1], [0, 0, 1, 1], [], []>} : vector<24x128xbf16>, vector<128x128xbf16>, vector<24x128xf32> -> vector<24x128xf32>
    %302 = arith.addf %295, %301 : vector<24x128xf32>
    %c1_352 = arith.constant 1 : index
    %c8_353 = arith.constant 8 : index
    %c0_354 = arith.constant 0 : index
    %303 = vector.load %arg26[%c1_352, %c8_353, %c0_354] : memref<2x40x128xf32, #tpu.memory_space<vmem>>, vector<1x24x128xf32>
    %304 = vector.shape_cast %303 : vector<1x24x128xf32> to vector<24x128xf32>
    %305 = arith.truncf %304 : vector<24x128xf32> to vector<24x128xbf16>
    %c3_355 = arith.constant 3 : index
    %c0_356 = arith.constant 0 : index
    %c0_357 = arith.constant 0 : index
    %306 = vector.load %arg5[%c3_355, %c0_356, %c0_357] : memref<4x128x128xbf16, #tpu.memory_space<vmem>>, vector<1x128x128xbf16>
    %307 = vector.shape_cast %306 : vector<1x128x128xbf16> to vector<128x128xbf16>
    %cst_358 = arith.constant dense<0.000000e+00> : vector<24x128xf32>
    %308 = tpu.matmul %305, %307, %cst_358 {dimension_numbers = #tpu.dot_dimension_numbers<[1], [0], [0], [1], [0, 0, 1, 1], [], []>} : vector<24x128xbf16>, vector<128x128xbf16>, vector<24x128xf32> -> vector<24x128xf32>
    %309 = arith.addf %302, %308 : vector<24x128xf32>
    %cst_359 = arith.constant dense<0.000000e+00> : vector<9x128xf32>
    %310 = tpu.matmul %244, %309, %cst_359 {dimension_numbers = #tpu.dot_dimension_numbers<[1], [0], [0], [1], [0, 0, 1, 1], [], []>} : vector<9x24xf32>, vector<24x128xf32>, vector<9x128xf32> -> vector<9x128xf32>
    %311 = vector.broadcast %245 : vector<1x128xf32> to vector<9x128xf32>
    %312 = arith.addf %310, %311 : vector<9x128xf32>
    %cst_360 = arith.constant 2.000000e-01 : f32
    %313 = vector.broadcast %cst_360 : f32 to vector<9x128xf32>
    %314 = arith.mulf %313, %312 : vector<9x128xf32>
    %315 = arith.maximumf %312, %314 : vector<9x128xf32>
    %316 = vector.shape_cast %280 : vector<9x128xf32> to vector<1x9x128xf32>
    %317 = vector.shape_cast %315 : vector<9x128xf32> to vector<1x9x128xf32>
    %318 = tpu.concatenate %316, %317 in 0 : vector<1x9x128xf32>, vector<1x9x128xf32> -> vector<2x9x128xf32>
    %c0_361 = arith.constant 0 : index
    %c0_362 = arith.constant 0 : index
    %c0_363 = arith.constant 0 : index
    %319 = vector.load %arg20[%c0_361, %c0_362, %c0_363] : memref<2x9x128xf32, #tpu.memory_space<vmem>>, vector<2x9x128xf32>
    tpu.vector_store %arg20[%c0_361, %c0_362, %c0_363], %318 {strides = array<i32>} : memref<2x9x128xf32, #tpu.memory_space<vmem>>, vector<2x9x128xf32>,
    %cst_364 = arith.constant 0.000000e+00 : f32
    %320 = vector.broadcast %cst_364 : f32 to vector<2x32x256xf32>
    %c0_365 = arith.constant 0 : index
    %c0_366 = arith.constant 0 : index
    %c0_367 = arith.constant 0 : index
    %321 = vector.load %arg27[%c0_365, %c0_366, %c0_367] : memref<2x32x256xf32, #tpu.memory_space<vmem>>, vector<2x32x256xf32>
    tpu.vector_store %arg27[%c0_365, %c0_366, %c0_367], %320 {strides = array<i32>} : memref<2x32x256xf32, #tpu.memory_space<vmem>>, vector<2x32x256xf32>,
    %cst_368 = arith.constant 0.000000e+00 : f32
    %322 = vector.broadcast %cst_368 : f32 to vector<2x32x256xf32>
    %c0_369 = arith.constant 0 : index
    %c0_370 = arith.constant 0 : index
    %c0_371 = arith.constant 0 : index
    %323 = vector.load %arg28[%c0_369, %c0_370, %c0_371] : memref<2x32x256xf32, #tpu.memory_space<vmem>>, vector<2x32x256xf32>
    tpu.vector_store %arg28[%c0_369, %c0_370, %c0_371], %322 {strides = array<i32>} : memref<2x32x256xf32, #tpu.memory_space<vmem>>, vector<2x32x256xf32>,
    %324 = vector.extract_strided_slice %318 {offsets = [0, 0, 0], sizes = [2, 3, 64], strides = [1, 1, 1]} : vector<2x9x128xf32> to vector<2x3x64xf32>
    %c0_372 = arith.constant 0 : index
    %c10_373 = arith.constant 10 : index
    %c0_374 = arith.constant 0 : index
    %325 = vector.load %arg27[%c0_372, %c10_373, %c0_374] : memref<2x32x256xf32, #tpu.memory_space<vmem>>, vector<2x3x64xf32>
    tpu.vector_store %arg27[%c0_372, %c10_373, %c0_374], %324 {strides = array<i32>} : memref<2x32x256xf32, #tpu.memory_space<vmem>>, vector<2x3x64xf32>,
    %c0_375 = arith.constant 0 : index
    %c9_376 = arith.constant 9 : index
    %c64_377 = arith.constant 64 : index
    %326 = vector.load %arg27[%c0_375, %c9_376, %c64_377] : memref<2x32x256xf32, #tpu.memory_space<vmem>>, vector<2x3x64xf32>
    tpu.vector_store %arg27[%c0_375, %c9_376, %c64_377], %324 {strides = array<i32>} : memref<2x32x256xf32, #tpu.memory_space<vmem>>, vector<2x3x64xf32>,
    %c0_378 = arith.constant 0 : index
    %c8_379 = arith.constant 8 : index
    %c128 = arith.constant 128 : index
    %327 = vector.load %arg27[%c0_378, %c8_379, %c128] : memref<2x32x256xf32, #tpu.memory_space<vmem>>, vector<2x3x64xf32>
    tpu.vector_store %arg27[%c0_378, %c8_379, %c128], %324 {strides = array<i32>} : memref<2x32x256xf32, #tpu.memory_space<vmem>>, vector<2x3x64xf32>,
    %328 = vector.extract_strided_slice %324 {offsets = [0, 1, 0], sizes = [2, 2, 64], strides = [1, 1, 1]} : vector<2x3x64xf32> to vector<2x2x64xf32>
    %c0_380 = arith.constant 0 : index
    %c8_381 = arith.constant 8 : index
    %c192 = arith.constant 192 : index
    %329 = vector.load %arg27[%c0_380, %c8_381, %c192] : memref<2x32x256xf32, #tpu.memory_space<vmem>>, vector<2x2x64xf32>
    tpu.vector_store %arg27[%c0_380, %c8_381, %c192], %328 {strides = array<i32>} : memref<2x32x256xf32, #tpu.memory_space<vmem>>, vector<2x2x64xf32>,
    %330 = vector.extract_strided_slice %318 {offsets = [0, 3, 0], sizes = [2, 3, 64], strides = [1, 1, 1]} : vector<2x9x128xf32> to vector<2x3x64xf32>
    %c0_382 = arith.constant 0 : index
    %c10_383 = arith.constant 10 : index
    %c0_384 = arith.constant 0 : index
    %331 = vector.load %arg28[%c0_382, %c10_383, %c0_384] : memref<2x32x256xf32, #tpu.memory_space<vmem>>, vector<2x3x64xf32>
    tpu.vector_store %arg28[%c0_382, %c10_383, %c0_384], %330 {strides = array<i32>} : memref<2x32x256xf32, #tpu.memory_space<vmem>>, vector<2x3x64xf32>,
    %c0_385 = arith.constant 0 : index
    %c9_386 = arith.constant 9 : index
    %c64_387 = arith.constant 64 : index
    %332 = vector.load %arg28[%c0_385, %c9_386, %c64_387] : memref<2x32x256xf32, #tpu.memory_space<vmem>>, vector<2x3x64xf32>
    tpu.vector_store %arg28[%c0_385, %c9_386, %c64_387], %330 {strides = array<i32>} : memref<2x32x256xf32, #tpu.memory_space<vmem>>, vector<2x3x64xf32>,
    %c0_388 = arith.constant 0 : index
    %c8_389 = arith.constant 8 : index
    %c128_390 = arith.constant 128 : index
    %333 = vector.load %arg28[%c0_388, %c8_389, %c128_390] : memref<2x32x256xf32, #tpu.memory_space<vmem>>, vector<2x3x64xf32>
    tpu.vector_store %arg28[%c0_388, %c8_389, %c128_390], %330 {strides = array<i32>} : memref<2x32x256xf32, #tpu.memory_space<vmem>>, vector<2x3x64xf32>,
    %334 = vector.extract_strided_slice %330 {offsets = [0, 1, 0], sizes = [2, 2, 64], strides = [1, 1, 1]} : vector<2x3x64xf32> to vector<2x2x64xf32>
    %c0_391 = arith.constant 0 : index
    %c8_392 = arith.constant 8 : index
    %c192_393 = arith.constant 192 : index
    %335 = vector.load %arg28[%c0_391, %c8_392, %c192_393] : memref<2x32x256xf32, #tpu.memory_space<vmem>>, vector<2x2x64xf32>
    tpu.vector_store %arg28[%c0_391, %c8_392, %c192_393], %334 {strides = array<i32>} : memref<2x32x256xf32, #tpu.memory_space<vmem>>, vector<2x2x64xf32>,
    %336 = vector.extract_strided_slice %318 {offsets = [0, 6, 0], sizes = [2, 3, 64], strides = [1, 1, 1]} : vector<2x9x128xf32> to vector<2x3x64xf32>
    %c0_394 = arith.constant 0 : index
    %c18_395 = arith.constant 18 : index
    %c0_396 = arith.constant 0 : index
    %337 = vector.load %arg27[%c0_394, %c18_395, %c0_396] : memref<2x32x256xf32, #tpu.memory_space<vmem>>, vector<2x3x64xf32>
    tpu.vector_store %arg27[%c0_394, %c18_395, %c0_396], %336 {strides = array<i32>} : memref<2x32x256xf32, #tpu.memory_space<vmem>>, vector<2x3x64xf32>,
    %c0_397 = arith.constant 0 : index
    %c17_398 = arith.constant 17 : index
    %c64_399 = arith.constant 64 : index
    %338 = vector.load %arg27[%c0_397, %c17_398, %c64_399] : memref<2x32x256xf32, #tpu.memory_space<vmem>>, vector<2x3x64xf32>
    tpu.vector_store %arg27[%c0_397, %c17_398, %c64_399], %336 {strides = array<i32>} : memref<2x32x256xf32, #tpu.memory_space<vmem>>, vector<2x3x64xf32>,
    %c0_400 = arith.constant 0 : index
    %c16_401 = arith.constant 16 : index
    %c128_402 = arith.constant 128 : index
    %339 = vector.load %arg27[%c0_400, %c16_401, %c128_402] : memref<2x32x256xf32, #tpu.memory_space<vmem>>, vector<2x3x64xf32>
    tpu.vector_store %arg27[%c0_400, %c16_401, %c128_402], %336 {strides = array<i32>} : memref<2x32x256xf32, #tpu.memory_space<vmem>>, vector<2x3x64xf32>,
    %340 = vector.extract_strided_slice %336 {offsets = [0, 1, 0], sizes = [2, 2, 64], strides = [1, 1, 1]} : vector<2x3x64xf32> to vector<2x2x64xf32>
    %c0_403 = arith.constant 0 : index
    %c16_404 = arith.constant 16 : index
    %c192_405 = arith.constant 192 : index
    %341 = vector.load %arg27[%c0_403, %c16_404, %c192_405] : memref<2x32x256xf32, #tpu.memory_space<vmem>>, vector<2x2x64xf32>
    tpu.vector_store %arg27[%c0_403, %c16_404, %c192_405], %340 {strides = array<i32>} : memref<2x32x256xf32, #tpu.memory_space<vmem>>, vector<2x2x64xf32>,
    %c0_406 = arith.constant 0 : index
    %c0_407 = arith.constant 0 : index
    %342 = vector.load %arg16[%c0_406, %c0_407] : memref<4x16xf32, #tpu.memory_space<vmem>>, vector<4x16xf32>
    %c0_408 = arith.constant 0 : index
    %c0_409 = arith.constant 0 : index
    %343 = vector.load %arg11[%c0_408, %c0_409] : memref<1x128xf32, #tpu.memory_space<vmem>>, vector<1x128xf32>
    %cst_410 = arith.constant 0.000000e+00 : f32
    %344 = vector.broadcast %cst_410 : f32 to vector<16x128xf32>
    %c0_411 = arith.constant 0 : index
    %c0_412 = arith.constant 0 : index
    %c0_413 = arith.constant 0 : index
    %345 = vector.load %arg27[%c0_411, %c0_412, %c0_413] : memref<2x32x256xf32, #tpu.memory_space<vmem>>, vector<1x16x256xf32>
    %346 = vector.shape_cast %345 : vector<1x16x256xf32> to vector<16x256xf32>
    %347 = arith.truncf %346 : vector<16x256xf32> to vector<16x256xbf16>
    %c0_414 = arith.constant 0 : index
    %c0_415 = arith.constant 0 : index
    %c0_416 = arith.constant 0 : index
    %348 = vector.load %arg6[%c0_414, %c0_415, %c0_416] : memref<4x256x128xbf16, #tpu.memory_space<vmem>>, vector<1x256x128xbf16>
    %349 = vector.shape_cast %348 : vector<1x256x128xbf16> to vector<256x128xbf16>
    %cst_417 = arith.constant dense<0.000000e+00> : vector<16x128xf32>
    %350 = tpu.matmul %347, %349, %cst_417 {dimension_numbers = #tpu.dot_dimension_numbers<[1], [0], [0], [1], [0, 0, 1, 1], [], []>} : vector<16x256xbf16>, vector<256x128xbf16>, vector<16x128xf32> -> vector<16x128xf32>
    %351 = arith.addf %344, %350 : vector<16x128xf32>
    %c0_418 = arith.constant 0 : index
    %c0_419 = arith.constant 0 : index
    %c0_420 = arith.constant 0 : index
    %352 = vector.load %arg28[%c0_418, %c0_419, %c0_420] : memref<2x32x256xf32, #tpu.memory_space<vmem>>, vector<1x16x256xf32>
    %353 = vector.shape_cast %352 : vector<1x16x256xf32> to vector<16x256xf32>
    %354 = arith.truncf %353 : vector<16x256xf32> to vector<16x256xbf16>
    %c1_421 = arith.constant 1 : index
    %c0_422 = arith.constant 0 : index
    %c0_423 = arith.constant 0 : index
    %355 = vector.load %arg6[%c1_421, %c0_422, %c0_423] : memref<4x256x128xbf16, #tpu.memory_space<vmem>>, vector<1x256x128xbf16>
    %356 = vector.shape_cast %355 : vector<1x256x128xbf16> to vector<256x128xbf16>
    %cst_424 = arith.constant dense<0.000000e+00> : vector<16x128xf32>
    %357 = tpu.matmul %354, %356, %cst_424 {dimension_numbers = #tpu.dot_dimension_numbers<[1], [0], [0], [1], [0, 0, 1, 1], [], []>} : vector<16x256xbf16>, vector<256x128xbf16>, vector<16x128xf32> -> vector<16x128xf32>
    %358 = arith.addf %351, %357 : vector<16x128xf32>
    %c0_425 = arith.constant 0 : index
    %c8_426 = arith.constant 8 : index
    %c0_427 = arith.constant 0 : index
    %359 = vector.load %arg27[%c0_425, %c8_426, %c0_427] : memref<2x32x256xf32, #tpu.memory_space<vmem>>, vector<1x16x256xf32>
    %360 = vector.shape_cast %359 : vector<1x16x256xf32> to vector<16x256xf32>
    %361 = arith.truncf %360 : vector<16x256xf32> to vector<16x256xbf16>
    %c2_428 = arith.constant 2 : index
    %c0_429 = arith.constant 0 : index
    %c0_430 = arith.constant 0 : index
    %362 = vector.load %arg6[%c2_428, %c0_429, %c0_430] : memref<4x256x128xbf16, #tpu.memory_space<vmem>>, vector<1x256x128xbf16>
    %363 = vector.shape_cast %362 : vector<1x256x128xbf16> to vector<256x128xbf16>
    %cst_431 = arith.constant dense<0.000000e+00> : vector<16x128xf32>
    %364 = tpu.matmul %361, %363, %cst_431 {dimension_numbers = #tpu.dot_dimension_numbers<[1], [0], [0], [1], [0, 0, 1, 1], [], []>} : vector<16x256xbf16>, vector<256x128xbf16>, vector<16x128xf32> -> vector<16x128xf32>
    %365 = arith.addf %358, %364 : vector<16x128xf32>
    %c0_432 = arith.constant 0 : index
    %c8_433 = arith.constant 8 : index
    %c0_434 = arith.constant 0 : index
    %366 = vector.load %arg28[%c0_432, %c8_433, %c0_434] : memref<2x32x256xf32, #tpu.memory_space<vmem>>, vector<1x16x256xf32>
    %367 = vector.shape_cast %366 : vector<1x16x256xf32> to vector<16x256xf32>
    %368 = arith.truncf %367 : vector<16x256xf32> to vector<16x256xbf16>
    %c3_435 = arith.constant 3 : index
    %c0_436 = arith.constant 0 : index
    %c0_437 = arith.constant 0 : index
    %369 = vector.load %arg6[%c3_435, %c0_436, %c0_437] : memref<4x256x128xbf16, #tpu.memory_space<vmem>>, vector<1x256x128xbf16>
    %370 = vector.shape_cast %369 : vector<1x256x128xbf16> to vector<256x128xbf16>
    %cst_438 = arith.constant dense<0.000000e+00> : vector<16x128xf32>
    %371 = tpu.matmul %368, %370, %cst_438 {dimension_numbers = #tpu.dot_dimension_numbers<[1], [0], [0], [1], [0, 0, 1, 1], [], []>} : vector<16x256xbf16>, vector<256x128xbf16>, vector<16x128xf32> -> vector<16x128xf32>
    %372 = arith.addf %365, %371 : vector<16x128xf32>
    %cst_439 = arith.constant dense<0.000000e+00> : vector<4x128xf32>
    %373 = tpu.matmul %342, %372, %cst_439 {dimension_numbers = #tpu.dot_dimension_numbers<[1], [0], [0], [1], [0, 0, 1, 1], [], []>} : vector<4x16xf32>, vector<16x128xf32>, vector<4x128xf32> -> vector<4x128xf32>
    %374 = vector.broadcast %343 : vector<1x128xf32> to vector<4x128xf32>
    %375 = arith.addf %373, %374 : vector<4x128xf32>
    %cst_440 = arith.constant 2.000000e-01 : f32
    %376 = vector.broadcast %cst_440 : f32 to vector<4x128xf32>
    %377 = arith.mulf %376, %375 : vector<4x128xf32>
    %378 = arith.maximumf %375, %377 : vector<4x128xf32>
    %cst_441 = arith.constant 0.000000e+00 : f32
    %379 = vector.broadcast %cst_441 : f32 to vector<16x128xf32>
    %c1_442 = arith.constant 1 : index
    %c0_443 = arith.constant 0 : index
    %c0_444 = arith.constant 0 : index
    %380 = vector.load %arg27[%c1_442, %c0_443, %c0_444] : memref<2x32x256xf32, #tpu.memory_space<vmem>>, vector<1x16x256xf32>
    %381 = vector.shape_cast %380 : vector<1x16x256xf32> to vector<16x256xf32>
    %382 = arith.truncf %381 : vector<16x256xf32> to vector<16x256xbf16>
    %c0_445 = arith.constant 0 : index
    %c0_446 = arith.constant 0 : index
    %c0_447 = arith.constant 0 : index
    %383 = vector.load %arg6[%c0_445, %c0_446, %c0_447] : memref<4x256x128xbf16, #tpu.memory_space<vmem>>, vector<1x256x128xbf16>
    %384 = vector.shape_cast %383 : vector<1x256x128xbf16> to vector<256x128xbf16>
    %cst_448 = arith.constant dense<0.000000e+00> : vector<16x128xf32>
    %385 = tpu.matmul %382, %384, %cst_448 {dimension_numbers = #tpu.dot_dimension_numbers<[1], [0], [0], [1], [0, 0, 1, 1], [], []>} : vector<16x256xbf16>, vector<256x128xbf16>, vector<16x128xf32> -> vector<16x128xf32>
    %386 = arith.addf %379, %385 : vector<16x128xf32>
    %c1_449 = arith.constant 1 : index
    %c0_450 = arith.constant 0 : index
    %c0_451 = arith.constant 0 : index
    %387 = vector.load %arg28[%c1_449, %c0_450, %c0_451] : memref<2x32x256xf32, #tpu.memory_space<vmem>>, vector<1x16x256xf32>
    %388 = vector.shape_cast %387 : vector<1x16x256xf32> to vector<16x256xf32>
    %389 = arith.truncf %388 : vector<16x256xf32> to vector<16x256xbf16>
    %c1_452 = arith.constant 1 : index
    %c0_453 = arith.constant 0 : index
    %c0_454 = arith.constant 0 : index
    %390 = vector.load %arg6[%c1_452, %c0_453, %c0_454] : memref<4x256x128xbf16, #tpu.memory_space<vmem>>, vector<1x256x128xbf16>
    %391 = vector.shape_cast %390 : vector<1x256x128xbf16> to vector<256x128xbf16>
    %cst_455 = arith.constant dense<0.000000e+00> : vector<16x128xf32>
    %392 = tpu.matmul %389, %391, %cst_455 {dimension_numbers = #tpu.dot_dimension_numbers<[1], [0], [0], [1], [0, 0, 1, 1], [], []>} : vector<16x256xbf16>, vector<256x128xbf16>, vector<16x128xf32> -> vector<16x128xf32>
    %393 = arith.addf %386, %392 : vector<16x128xf32>
    %c1_456 = arith.constant 1 : index
    %c8_457 = arith.constant 8 : index
    %c0_458 = arith.constant 0 : index
    %394 = vector.load %arg27[%c1_456, %c8_457, %c0_458] : memref<2x32x256xf32, #tpu.memory_space<vmem>>, vector<1x16x256xf32>
    %395 = vector.shape_cast %394 : vector<1x16x256xf32> to vector<16x256xf32>
    %396 = arith.truncf %395 : vector<16x256xf32> to vector<16x256xbf16>
    %c2_459 = arith.constant 2 : index
    %c0_460 = arith.constant 0 : index
    %c0_461 = arith.constant 0 : index
    %397 = vector.load %arg6[%c2_459, %c0_460, %c0_461] : memref<4x256x128xbf16, #tpu.memory_space<vmem>>, vector<1x256x128xbf16>
    %398 = vector.shape_cast %397 : vector<1x256x128xbf16> to vector<256x128xbf16>
    %cst_462 = arith.constant dense<0.000000e+00> : vector<16x128xf32>
    %399 = tpu.matmul %396, %398, %cst_462 {dimension_numbers = #tpu.dot_dimension_numbers<[1], [0], [0], [1], [0, 0, 1, 1], [], []>} : vector<16x256xbf16>, vector<256x128xbf16>, vector<16x128xf32> -> vector<16x128xf32>
    %400 = arith.addf %393, %399 : vector<16x128xf32>
    %c1_463 = arith.constant 1 : index
    %c8_464 = arith.constant 8 : index
    %c0_465 = arith.constant 0 : index
    %401 = vector.load %arg28[%c1_463, %c8_464, %c0_465] : memref<2x32x256xf32, #tpu.memory_space<vmem>>, vector<1x16x256xf32>
    %402 = vector.shape_cast %401 : vector<1x16x256xf32> to vector<16x256xf32>
    %403 = arith.truncf %402 : vector<16x256xf32> to vector<16x256xbf16>
    %c3_466 = arith.constant 3 : index
    %c0_467 = arith.constant 0 : index
    %c0_468 = arith.constant 0 : index
    %404 = vector.load %arg6[%c3_466, %c0_467, %c0_468] : memref<4x256x128xbf16, #tpu.memory_space<vmem>>, vector<1x256x128xbf16>
    %405 = vector.shape_cast %404 : vector<1x256x128xbf16> to vector<256x128xbf16>
    %cst_469 = arith.constant dense<0.000000e+00> : vector<16x128xf32>
    %406 = tpu.matmul %403, %405, %cst_469 {dimension_numbers = #tpu.dot_dimension_numbers<[1], [0], [0], [1], [0, 0, 1, 1], [], []>} : vector<16x256xbf16>, vector<256x128xbf16>, vector<16x128xf32> -> vector<16x128xf32>
    %407 = arith.addf %400, %406 : vector<16x128xf32>
    %cst_470 = arith.constant dense<0.000000e+00> : vector<4x128xf32>
    %408 = tpu.matmul %342, %407, %cst_470 {dimension_numbers = #tpu.dot_dimension_numbers<[1], [0], [0], [1], [0, 0, 1, 1], [], []>} : vector<4x16xf32>, vector<16x128xf32>, vector<4x128xf32> -> vector<4x128xf32>
    %409 = vector.broadcast %343 : vector<1x128xf32> to vector<4x128xf32>
    %410 = arith.addf %408, %409 : vector<4x128xf32>
    %cst_471 = arith.constant 2.000000e-01 : f32
    %411 = vector.broadcast %cst_471 : f32 to vector<4x128xf32>
    %412 = arith.mulf %411, %410 : vector<4x128xf32>
    %413 = arith.maximumf %410, %412 : vector<4x128xf32>
    %414 = vector.shape_cast %378 : vector<4x128xf32> to vector<1x4x128xf32>
    %415 = vector.shape_cast %413 : vector<4x128xf32> to vector<1x4x128xf32>
    %416 = tpu.concatenate %414, %415 in 0 : vector<1x4x128xf32>, vector<1x4x128xf32> -> vector<2x4x128xf32>
    %c0_472 = arith.constant 0 : index
    %c0_473 = arith.constant 0 : index
    %c0_474 = arith.constant 0 : index
    %417 = vector.load %arg21[%c0_472, %c0_473, %c0_474] : memref<2x4x128xf32, #tpu.memory_space<vmem>>, vector<2x4x128xf32>
    tpu.vector_store %arg21[%c0_472, %c0_473, %c0_474], %416 {strides = array<i32>} : memref<2x4x128xf32, #tpu.memory_space<vmem>>, vector<2x4x128xf32>,
    %cst_475 = arith.constant 0.000000e+00 : f32
    %418 = vector.broadcast %cst_475 : f32 to vector<2x32x256xf32>
    %c0_476 = arith.constant 0 : index
    %c0_477 = arith.constant 0 : index
    %c0_478 = arith.constant 0 : index
    %419 = vector.load %arg29[%c0_476, %c0_477, %c0_478] : memref<2x32x256xf32, #tpu.memory_space<vmem>>, vector<2x32x256xf32>
    tpu.vector_store %arg29[%c0_476, %c0_477, %c0_478], %418 {strides = array<i32>} : memref<2x32x256xf32, #tpu.memory_space<vmem>>, vector<2x32x256xf32>,
    %cst_479 = arith.constant 0.000000e+00 : f32
    %420 = vector.broadcast %cst_479 : f32 to vector<2x32x256xf32>
    %c0_480 = arith.constant 0 : index
    %c0_481 = arith.constant 0 : index
    %c0_482 = arith.constant 0 : index
    %421 = vector.load %arg30[%c0_480, %c0_481, %c0_482] : memref<2x32x256xf32, #tpu.memory_space<vmem>>, vector<2x32x256xf32>
    tpu.vector_store %arg30[%c0_480, %c0_481, %c0_482], %420 {strides = array<i32>} : memref<2x32x256xf32, #tpu.memory_space<vmem>>, vector<2x32x256xf32>,
    %422 = vector.extract_strided_slice %416 {offsets = [0, 0, 0], sizes = [2, 2, 64], strides = [1, 1, 1]} : vector<2x4x128xf32> to vector<2x2x64xf32>
    %c0_483 = arith.constant 0 : index
    %c10_484 = arith.constant 10 : index
    %c0_485 = arith.constant 0 : index
    %423 = vector.load %arg29[%c0_483, %c10_484, %c0_485] : memref<2x32x256xf32, #tpu.memory_space<vmem>>, vector<2x2x64xf32>
    tpu.vector_store %arg29[%c0_483, %c10_484, %c0_485], %422 {strides = array<i32>} : memref<2x32x256xf32, #tpu.memory_space<vmem>>, vector<2x2x64xf32>,
    %c0_486 = arith.constant 0 : index
    %c9_487 = arith.constant 9 : index
    %c64_488 = arith.constant 64 : index
    %424 = vector.load %arg29[%c0_486, %c9_487, %c64_488] : memref<2x32x256xf32, #tpu.memory_space<vmem>>, vector<2x2x64xf32>
    tpu.vector_store %arg29[%c0_486, %c9_487, %c64_488], %422 {strides = array<i32>} : memref<2x32x256xf32, #tpu.memory_space<vmem>>, vector<2x2x64xf32>,
    %c0_489 = arith.constant 0 : index
    %c8_490 = arith.constant 8 : index
    %c128_491 = arith.constant 128 : index
    %425 = vector.load %arg29[%c0_489, %c8_490, %c128_491] : memref<2x32x256xf32, #tpu.memory_space<vmem>>, vector<2x2x64xf32>
    tpu.vector_store %arg29[%c0_489, %c8_490, %c128_491], %422 {strides = array<i32>} : memref<2x32x256xf32, #tpu.memory_space<vmem>>, vector<2x2x64xf32>,
    %426 = vector.extract_strided_slice %422 {offsets = [0, 1, 0], sizes = [2, 1, 64], strides = [1, 1, 1]} : vector<2x2x64xf32> to vector<2x1x64xf32>
    %c0_492 = arith.constant 0 : index
    %c8_493 = arith.constant 8 : index
    %c192_494 = arith.constant 192 : index
    %427 = vector.load %arg29[%c0_492, %c8_493, %c192_494] : memref<2x32x256xf32, #tpu.memory_space<vmem>>, vector<2x1x64xf32>
    tpu.vector_store %arg29[%c0_492, %c8_493, %c192_494], %426 {strides = array<i32>} : memref<2x32x256xf32, #tpu.memory_space<vmem>>, vector<2x1x64xf32>,
    %428 = vector.extract_strided_slice %416 {offsets = [0, 2, 0], sizes = [2, 2, 64], strides = [1, 1, 1]} : vector<2x4x128xf32> to vector<2x2x64xf32>
    %c0_495 = arith.constant 0 : index
    %c10_496 = arith.constant 10 : index
    %c0_497 = arith.constant 0 : index
    %429 = vector.load %arg30[%c0_495, %c10_496, %c0_497] : memref<2x32x256xf32, #tpu.memory_space<vmem>>, vector<2x2x64xf32>
    tpu.vector_store %arg30[%c0_495, %c10_496, %c0_497], %428 {strides = array<i32>} : memref<2x32x256xf32, #tpu.memory_space<vmem>>, vector<2x2x64xf32>,
    %c0_498 = arith.constant 0 : index
    %c9_499 = arith.constant 9 : index
    %c64_500 = arith.constant 64 : index
    %430 = vector.load %arg30[%c0_498, %c9_499, %c64_500] : memref<2x32x256xf32, #tpu.memory_space<vmem>>, vector<2x2x64xf32>
    tpu.vector_store %arg30[%c0_498, %c9_499, %c64_500], %428 {strides = array<i32>} : memref<2x32x256xf32, #tpu.memory_space<vmem>>, vector<2x2x64xf32>,
    %c0_501 = arith.constant 0 : index
    %c8_502 = arith.constant 8 : index
    %c128_503 = arith.constant 128 : index
    %431 = vector.load %arg30[%c0_501, %c8_502, %c128_503] : memref<2x32x256xf32, #tpu.memory_space<vmem>>, vector<2x2x64xf32>
    tpu.vector_store %arg30[%c0_501, %c8_502, %c128_503], %428 {strides = array<i32>} : memref<2x32x256xf32, #tpu.memory_space<vmem>>, vector<2x2x64xf32>,
    %432 = vector.extract_strided_slice %428 {offsets = [0, 1, 0], sizes = [2, 1, 64], strides = [1, 1, 1]} : vector<2x2x64xf32> to vector<2x1x64xf32>
    %c0_504 = arith.constant 0 : index
    %c8_505 = arith.constant 8 : index
    %c192_506 = arith.constant 192 : index
    %433 = vector.load %arg30[%c0_504, %c8_505, %c192_506] : memref<2x32x256xf32, #tpu.memory_space<vmem>>, vector<2x1x64xf32>
    tpu.vector_store %arg30[%c0_504, %c8_505, %c192_506], %432 {strides = array<i32>} : memref<2x32x256xf32, #tpu.memory_space<vmem>>, vector<2x1x64xf32>,
    %c0_507 = arith.constant 0 : index
    %c0_508 = arith.constant 0 : index
    %434 = vector.load %arg17[%c0_507, %c0_508] : memref<4x16xf32, #tpu.memory_space<vmem>>, vector<4x16xf32>
    %c0_509 = arith.constant 0 : index
    %c0_510 = arith.constant 0 : index
    %435 = vector.load %arg12[%c0_509, %c0_510] : memref<1x128xf32, #tpu.memory_space<vmem>>, vector<1x128xf32>
    %cst_511 = arith.constant 0.000000e+00 : f32
    %436 = vector.broadcast %cst_511 : f32 to vector<16x128xf32>
    %c0_512 = arith.constant 0 : index
    %c0_513 = arith.constant 0 : index
    %c0_514 = arith.constant 0 : index
    %437 = vector.load %arg29[%c0_512, %c0_513, %c0_514] : memref<2x32x256xf32, #tpu.memory_space<vmem>>, vector<1x16x256xf32>
    %438 = vector.shape_cast %437 : vector<1x16x256xf32> to vector<16x256xf32>
    %439 = arith.truncf %438 : vector<16x256xf32> to vector<16x256xbf16>
    %c0_515 = arith.constant 0 : index
    %c0_516 = arith.constant 0 : index
    %c0_517 = arith.constant 0 : index
    %440 = vector.load %arg7[%c0_515, %c0_516, %c0_517] : memref<4x256x128xbf16, #tpu.memory_space<vmem>>, vector<1x256x128xbf16>
    %441 = vector.shape_cast %440 : vector<1x256x128xbf16> to vector<256x128xbf16>
    %cst_518 = arith.constant dense<0.000000e+00> : vector<16x128xf32>
    %442 = tpu.matmul %439, %441, %cst_518 {dimension_numbers = #tpu.dot_dimension_numbers<[1], [0], [0], [1], [0, 0, 1, 1], [], []>} : vector<16x256xbf16>, vector<256x128xbf16>, vector<16x128xf32> -> vector<16x128xf32>
    %443 = arith.addf %436, %442 : vector<16x128xf32>
    %c0_519 = arith.constant 0 : index
    %c0_520 = arith.constant 0 : index
    %c0_521 = arith.constant 0 : index
    %444 = vector.load %arg30[%c0_519, %c0_520, %c0_521] : memref<2x32x256xf32, #tpu.memory_space<vmem>>, vector<1x16x256xf32>
    %445 = vector.shape_cast %444 : vector<1x16x256xf32> to vector<16x256xf32>
    %446 = arith.truncf %445 : vector<16x256xf32> to vector<16x256xbf16>
    %c1_522 = arith.constant 1 : index
    %c0_523 = arith.constant 0 : index
    %c0_524 = arith.constant 0 : index
    %447 = vector.load %arg7[%c1_522, %c0_523, %c0_524] : memref<4x256x128xbf16, #tpu.memory_space<vmem>>, vector<1x256x128xbf16>
    %448 = vector.shape_cast %447 : vector<1x256x128xbf16> to vector<256x128xbf16>
    %cst_525 = arith.constant dense<0.000000e+00> : vector<16x128xf32>
    %449 = tpu.matmul %446, %448, %cst_525 {dimension_numbers = #tpu.dot_dimension_numbers<[1], [0], [0], [1], [0, 0, 1, 1], [], []>} : vector<16x256xbf16>, vector<256x128xbf16>, vector<16x128xf32> -> vector<16x128xf32>
    %450 = arith.addf %443, %449 : vector<16x128xf32>
    %c0_526 = arith.constant 0 : index
    %c8_527 = arith.constant 8 : index
    %c0_528 = arith.constant 0 : index
    %451 = vector.load %arg29[%c0_526, %c8_527, %c0_528] : memref<2x32x256xf32, #tpu.memory_space<vmem>>, vector<1x16x256xf32>
    %452 = vector.shape_cast %451 : vector<1x16x256xf32> to vector<16x256xf32>
    %453 = arith.truncf %452 : vector<16x256xf32> to vector<16x256xbf16>
    %c2_529 = arith.constant 2 : index
    %c0_530 = arith.constant 0 : index
    %c0_531 = arith.constant 0 : index
    %454 = vector.load %arg7[%c2_529, %c0_530, %c0_531] : memref<4x256x128xbf16, #tpu.memory_space<vmem>>, vector<1x256x128xbf16>
    %455 = vector.shape_cast %454 : vector<1x256x128xbf16> to vector<256x128xbf16>
    %cst_532 = arith.constant dense<0.000000e+00> : vector<16x128xf32>
    %456 = tpu.matmul %453, %455, %cst_532 {dimension_numbers = #tpu.dot_dimension_numbers<[1], [0], [0], [1], [0, 0, 1, 1], [], []>} : vector<16x256xbf16>, vector<256x128xbf16>, vector<16x128xf32> -> vector<16x128xf32>
    %457 = arith.addf %450, %456 : vector<16x128xf32>
    %c0_533 = arith.constant 0 : index
    %c8_534 = arith.constant 8 : index
    %c0_535 = arith.constant 0 : index
    %458 = vector.load %arg30[%c0_533, %c8_534, %c0_535] : memref<2x32x256xf32, #tpu.memory_space<vmem>>, vector<1x16x256xf32>
    %459 = vector.shape_cast %458 : vector<1x16x256xf32> to vector<16x256xf32>
    %460 = arith.truncf %459 : vector<16x256xf32> to vector<16x256xbf16>
    %c3_536 = arith.constant 3 : index
    %c0_537 = arith.constant 0 : index
    %c0_538 = arith.constant 0 : index
    %461 = vector.load %arg7[%c3_536, %c0_537, %c0_538] : memref<4x256x128xbf16, #tpu.memory_space<vmem>>, vector<1x256x128xbf16>
    %462 = vector.shape_cast %461 : vector<1x256x128xbf16> to vector<256x128xbf16>
    %cst_539 = arith.constant dense<0.000000e+00> : vector<16x128xf32>
    %463 = tpu.matmul %460, %462, %cst_539 {dimension_numbers = #tpu.dot_dimension_numbers<[1], [0], [0], [1], [0, 0, 1, 1], [], []>} : vector<16x256xbf16>, vector<256x128xbf16>, vector<16x128xf32> -> vector<16x128xf32>
    %464 = arith.addf %457, %463 : vector<16x128xf32>
    %cst_540 = arith.constant dense<0.000000e+00> : vector<4x128xf32>
    %465 = tpu.matmul %434, %464, %cst_540 {dimension_numbers = #tpu.dot_dimension_numbers<[1], [0], [0], [1], [0, 0, 1, 1], [], []>} : vector<4x16xf32>, vector<16x128xf32>, vector<4x128xf32> -> vector<4x128xf32>
    %466 = vector.broadcast %435 : vector<1x128xf32> to vector<4x128xf32>
    %467 = arith.addf %465, %466 : vector<4x128xf32>
    %cst_541 = arith.constant 2.000000e-01 : f32
    %468 = vector.broadcast %cst_541 : f32 to vector<4x128xf32>
    %469 = arith.mulf %468, %467 : vector<4x128xf32>
    %470 = arith.maximumf %467, %469 : vector<4x128xf32>
    %cst_542 = arith.constant 0.000000e+00 : f32
    %471 = vector.broadcast %cst_542 : f32 to vector<16x128xf32>
    %c1_543 = arith.constant 1 : index
    %c0_544 = arith.constant 0 : index
    %c0_545 = arith.constant 0 : index
    %472 = vector.load %arg29[%c1_543, %c0_544, %c0_545] : memref<2x32x256xf32, #tpu.memory_space<vmem>>, vector<1x16x256xf32>
    %473 = vector.shape_cast %472 : vector<1x16x256xf32> to vector<16x256xf32>
    %474 = arith.truncf %473 : vector<16x256xf32> to vector<16x256xbf16>
    %c0_546 = arith.constant 0 : index
    %c0_547 = arith.constant 0 : index
    %c0_548 = arith.constant 0 : index
    %475 = vector.load %arg7[%c0_546, %c0_547, %c0_548] : memref<4x256x128xbf16, #tpu.memory_space<vmem>>, vector<1x256x128xbf16>
    %476 = vector.shape_cast %475 : vector<1x256x128xbf16> to vector<256x128xbf16>
    %cst_549 = arith.constant dense<0.000000e+00> : vector<16x128xf32>
    %477 = tpu.matmul %474, %476, %cst_549 {dimension_numbers = #tpu.dot_dimension_numbers<[1], [0], [0], [1], [0, 0, 1, 1], [], []>} : vector<16x256xbf16>, vector<256x128xbf16>, vector<16x128xf32> -> vector<16x128xf32>
    %478 = arith.addf %471, %477 : vector<16x128xf32>
    %c1_550 = arith.constant 1 : index
    %c0_551 = arith.constant 0 : index
    %c0_552 = arith.constant 0 : index
    %479 = vector.load %arg30[%c1_550, %c0_551, %c0_552] : memref<2x32x256xf32, #tpu.memory_space<vmem>>, vector<1x16x256xf32>
    %480 = vector.shape_cast %479 : vector<1x16x256xf32> to vector<16x256xf32>
    %481 = arith.truncf %480 : vector<16x256xf32> to vector<16x256xbf16>
    %c1_553 = arith.constant 1 : index
    %c0_554 = arith.constant 0 : index
    %c0_555 = arith.constant 0 : index
    %482 = vector.load %arg7[%c1_553, %c0_554, %c0_555] : memref<4x256x128xbf16, #tpu.memory_space<vmem>>, vector<1x256x128xbf16>
    %483 = vector.shape_cast %482 : vector<1x256x128xbf16> to vector<256x128xbf16>
    %cst_556 = arith.constant dense<0.000000e+00> : vector<16x128xf32>
    %484 = tpu.matmul %481, %483, %cst_556 {dimension_numbers = #tpu.dot_dimension_numbers<[1], [0], [0], [1], [0, 0, 1, 1], [], []>} : vector<16x256xbf16>, vector<256x128xbf16>, vector<16x128xf32> -> vector<16x128xf32>
    %485 = arith.addf %478, %484 : vector<16x128xf32>
    %c1_557 = arith.constant 1 : index
    %c8_558 = arith.constant 8 : index
    %c0_559 = arith.constant 0 : index
    %486 = vector.load %arg29[%c1_557, %c8_558, %c0_559] : memref<2x32x256xf32, #tpu.memory_space<vmem>>, vector<1x16x256xf32>
    %487 = vector.shape_cast %486 : vector<1x16x256xf32> to vector<16x256xf32>
    %488 = arith.truncf %487 : vector<16x256xf32> to vector<16x256xbf16>
    %c2_560 = arith.constant 2 : index
    %c0_561 = arith.constant 0 : index
    %c0_562 = arith.constant 0 : index
    %489 = vector.load %arg7[%c2_560, %c0_561, %c0_562] : memref<4x256x128xbf16, #tpu.memory_space<vmem>>, vector<1x256x128xbf16>
    %490 = vector.shape_cast %489 : vector<1x256x128xbf16> to vector<256x128xbf16>
    %cst_563 = arith.constant dense<0.000000e+00> : vector<16x128xf32>
    %491 = tpu.matmul %488, %490, %cst_563 {dimension_numbers = #tpu.dot_dimension_numbers<[1], [0], [0], [1], [0, 0, 1, 1], [], []>} : vector<16x256xbf16>, vector<256x128xbf16>, vector<16x128xf32> -> vector<16x128xf32>
    %492 = arith.addf %485, %491 : vector<16x128xf32>
    %c1_564 = arith.constant 1 : index
    %c8_565 = arith.constant 8 : index
    %c0_566 = arith.constant 0 : index
    %493 = vector.load %arg30[%c1_564, %c8_565, %c0_566] : memref<2x32x256xf32, #tpu.memory_space<vmem>>, vector<1x16x256xf32>
    %494 = vector.shape_cast %493 : vector<1x16x256xf32> to vector<16x256xf32>
    %495 = arith.truncf %494 : vector<16x256xf32> to vector<16x256xbf16>
    %c3_567 = arith.constant 3 : index
    %c0_568 = arith.constant 0 : index
    %c0_569 = arith.constant 0 : index
    %496 = vector.load %arg7[%c3_567, %c0_568, %c0_569] : memref<4x256x128xbf16, #tpu.memory_space<vmem>>, vector<1x256x128xbf16>
    %497 = vector.shape_cast %496 : vector<1x256x128xbf16> to vector<256x128xbf16>
    %cst_570 = arith.constant dense<0.000000e+00> : vector<16x128xf32>
    %498 = tpu.matmul %495, %497, %cst_570 {dimension_numbers = #tpu.dot_dimension_numbers<[1], [0], [0], [1], [0, 0, 1, 1], [], []>} : vector<16x256xbf16>, vector<256x128xbf16>, vector<16x128xf32> -> vector<16x128xf32>
    %499 = arith.addf %492, %498 : vector<16x128xf32>
    %cst_571 = arith.constant dense<0.000000e+00> : vector<4x128xf32>
    %500 = tpu.matmul %434, %499, %cst_571 {dimension_numbers = #tpu.dot_dimension_numbers<[1], [0], [0], [1], [0, 0, 1, 1], [], []>} : vector<4x16xf32>, vector<16x128xf32>, vector<4x128xf32> -> vector<4x128xf32>
    %501 = vector.broadcast %435 : vector<1x128xf32> to vector<4x128xf32>
    %502 = arith.addf %500, %501 : vector<4x128xf32>
    %cst_572 = arith.constant 2.000000e-01 : f32
    %503 = vector.broadcast %cst_572 : f32 to vector<4x128xf32>
    %504 = arith.mulf %503, %502 : vector<4x128xf32>
    %505 = arith.maximumf %502, %504 : vector<4x128xf32>
    %506 = vector.shape_cast %470 : vector<4x128xf32> to vector<1x4x128xf32>
    %507 = vector.shape_cast %505 : vector<4x128xf32> to vector<1x4x128xf32>
    %508 = tpu.concatenate %506, %507 in 0 : vector<1x4x128xf32>, vector<1x4x128xf32> -> vector<2x4x128xf32>
    %c0_573 = arith.constant 0 : index
    %c0_574 = arith.constant 0 : index
    %c0_575 = arith.constant 0 : index
    %509 = vector.load %arg22[%c0_573, %c0_574, %c0_575] : memref<2x4x128xf32, #tpu.memory_space<vmem>>, vector<2x4x128xf32>
    tpu.vector_store %arg22[%c0_573, %c0_574, %c0_575], %508 {strides = array<i32>} : memref<2x4x128xf32, #tpu.memory_space<vmem>>, vector<2x4x128xf32>,
    return
  }
  func.func @transform_0(%arg0: i32) -> (i32, i32, i32) {
    %c0_i32 = arith.constant 0 : i32
    %c0_i32_0 = arith.constant 0 : i32
    %c0_i32_1 = arith.constant 0 : i32
    %c0_i32_2 = arith.constant 0 : i32
    return %c0_i32, %c0_i32_0, %c0_i32_1 : i32, i32, i32
  }
  func.func @transform_1(%arg0: i32) -> (i32, i32, i32) {
    %c0_i32 = arith.constant 0 : i32
    %c0_i32_0 = arith.constant 0 : i32
    %c0_i32_1 = arith.constant 0 : i32
    %c0_i32_2 = arith.constant 0 : i32
    return %c0_i32, %c0_i32_0, %c0_i32_1 : i32, i32, i32
  }
  func.func @transform_2(%arg0: i32) -> (i32, i32, i32) {
    %c0_i32 = arith.constant 0 : i32
    %c0_i32_0 = arith.constant 0 : i32
    %c0_i32_1 = arith.constant 0 : i32
    %c0_i32_2 = arith.constant 0 : i32
    return %c0_i32, %c0_i32_0, %c0_i32_1 : i32, i32, i32
  }
  func.func @transform_3(%arg0: i32) -> (i32, i32, i32) {
    %c0_i32 = arith.constant 0 : i32
    %c0_i32_0 = arith.constant 0 : i32
    %c0_i32_1 = arith.constant 0 : i32
    %c0_i32_2 = arith.constant 0 : i32
    return %c0_i32, %c0_i32_0, %c0_i32_1 : i32, i32, i32
  }
  func.func @transform_4(%arg0: i32) -> (i32, i32, i32) {
    %c0_i32 = arith.constant 0 : i32
    %c0_i32_0 = arith.constant 0 : i32
    %c0_i32_1 = arith.constant 0 : i32
    %c0_i32_2 = arith.constant 0 : i32
    return %c0_i32, %c0_i32_0, %c0_i32_1 : i32, i32, i32
  }
  func.func @transform_5(%arg0: i32) -> (i32, i32, i32) {
    %c0_i32 = arith.constant 0 : i32
    %c0_i32_0 = arith.constant 0 : i32
    %c0_i32_1 = arith.constant 0 : i32
    %c0_i32_2 = arith.constant 0 : i32
    return %c0_i32, %c0_i32_0, %c0_i32_1 : i32, i32, i32
  }
  func.func @transform_6(%arg0: i32) -> (i32, i32, i32) {
    %c0_i32 = arith.constant 0 : i32
    %c0_i32_0 = arith.constant 0 : i32
    %c0_i32_1 = arith.constant 0 : i32
    %c0_i32_2 = arith.constant 0 : i32
    return %c0_i32, %c0_i32_0, %c0_i32_1 : i32, i32, i32
  }
  func.func @transform_7(%arg0: i32) -> (i32, i32) {
    %c0_i32 = arith.constant 0 : i32
    %c0_i32_0 = arith.constant 0 : i32
    %c0_i32_1 = arith.constant 0 : i32
    return %c0_i32, %c0_i32_0 : i32, i32
  }
  func.func @transform_8(%arg0: i32) -> (i32, i32) {
    %c0_i32 = arith.constant 0 : i32
    %c0_i32_0 = arith.constant 0 : i32
    %c0_i32_1 = arith.constant 0 : i32
    return %c0_i32, %c0_i32_0 : i32, i32
  }
  func.func @transform_9(%arg0: i32) -> (i32, i32) {
    %c0_i32 = arith.constant 0 : i32
    %c0_i32_0 = arith.constant 0 : i32
    %c0_i32_1 = arith.constant 0 : i32
    return %c0_i32, %c0_i32_0 : i32, i32
  }
  func.func @transform_10(%arg0: i32) -> (i32, i32) {
    %c0_i32 = arith.constant 0 : i32
    %c0_i32_0 = arith.constant 0 : i32
    %c0_i32_1 = arith.constant 0 : i32
    return %c0_i32, %c0_i32_0 : i32, i32
  }
  func.func @transform_11(%arg0: i32) -> (i32, i32) {
    %c0_i32 = arith.constant 0 : i32
    %c0_i32_0 = arith.constant 0 : i32
    %c0_i32_1 = arith.constant 0 : i32
    return %c0_i32, %c0_i32_0 : i32, i32
  }
  func.func @transform_12(%arg0: i32) -> (i32, i32) {
    %c0_i32 = arith.constant 0 : i32
    %c0_i32_0 = arith.constant 0 : i32
    %c0_i32_1 = arith.constant 0 : i32
    return %c0_i32, %c0_i32_0 : i32, i32
  }
  func.func @transform_13(%arg0: i32) -> (i32, i32) {
    %c0_i32 = arith.constant 0 : i32
    %c0_i32_0 = arith.constant 0 : i32
    %c0_i32_1 = arith.constant 0 : i32
    return %c0_i32, %c0_i32_0 : i32, i32
  }
  func.func @transform_14(%arg0: i32) -> (i32, i32) {
    %c0_i32 = arith.constant 0 : i32
    %c0_i32_0 = arith.constant 0 : i32
    %c0_i32_1 = arith.constant 0 : i32
    return %c0_i32, %c0_i32_0 : i32, i32
  }
  func.func @transform_15(%arg0: i32) -> (i32, i32) {
    %c0_i32 = arith.constant 0 : i32
    %c0_i32_0 = arith.constant 0 : i32
    %c0_i32_1 = arith.constant 0 : i32
    return %c0_i32, %c0_i32_0 : i32, i32
  }
  func.func @transform_16(%arg0: i32) -> (i32, i32) {
    %c0_i32 = arith.constant 0 : i32
    %c0_i32_0 = arith.constant 0 : i32
    %c0_i32_1 = arith.constant 0 : i32
    return %c0_i32, %c0_i32_0 : i32, i32
  }
  func.func @transform_17(%arg0: i32) -> (i32, i32, i32) {
    %c0_i32 = arith.constant 0 : i32
    %c0_i32_0 = arith.constant 0 : i32
    %c0_i32_1 = arith.constant 0 : i32
    %c0_i32_2 = arith.constant 0 : i32
    return %c0_i32, %c0_i32_0, %c0_i32_1 : i32, i32, i32
  }
  func.func @transform_18(%arg0: i32) -> (i32, i32, i32) {
    %c0_i32 = arith.constant 0 : i32
    %c0_i32_0 = arith.constant 0 : i32
    %c0_i32_1 = arith.constant 0 : i32
    %c0_i32_2 = arith.constant 0 : i32
    return %c0_i32, %c0_i32_0, %c0_i32_1 : i32, i32, i32
  }
  func.func @transform_19(%arg0: i32) -> (i32, i32, i32) {
    %c0_i32 = arith.constant 0 : i32
    %c0_i32_0 = arith.constant 0 : i32
    %c0_i32_1 = arith.constant 0 : i32
    %c0_i32_2 = arith.constant 0 : i32
    return %c0_i32, %c0_i32_0, %c0_i32_1 : i32, i32, i32
  }
  func.func @transform_20(%arg0: i32) -> (i32, i32, i32) {
    %c0_i32 = arith.constant 0 : i32
    %c0_i32_0 = arith.constant 0 : i32
    %c0_i32_1 = arith.constant 0 : i32
    %c0_i32_2 = arith.constant 0 : i32
    return %c0_i32, %c0_i32_0, %c0_i32_1 : i32, i32, i32
  }
  func.func @transform_21(%arg0: i32) -> (i32, i32, i32) {
    %c0_i32 = arith.constant 0 : i32
    %c0_i32_0 = arith.constant 0 : i32
    %c0_i32_1 = arith.constant 0 : i32
    %c0_i32_2 = arith.constant 0 : i32
    return %c0_i32, %c0_i32_0, %c0_i32_1 : i32, i32, i32
  }
}

</mosaic_0001>

<bundles_post_ra>
// kernel: disgin_forward.1
= control target key start
LH: loop header
LB: loop body
LE: loop exit
PB: predicated region body
PF: predicated region fallthrough
CT: control target
= control target key end

     0   :  { %vm220_vm0 = vcmask 1045504   ;;  %vm177_vm1 = vcmask 97280   ;;  %vm1098_vm2 = vcmask 719872   ;;  %vm2402_vm3 = vcmask 523264   ;;  %s9915_s28 = smov 16   ;;  %s9919_s29 = smov 64   ;;  %s14127_s2 = inlined_call_operand.vmem [shape: bf16[4,12,128], index: 2, kind: input, shape index: {}]   ;;  %s14128_s1 = inlined_call_operand.vmem [shape: f32[2,240,12], index: 1, kind: input, shape index: {}]   ;;  %s14129_s0 = inlined_call_operand.vmem [shape: f32[2,240,12], index: 0, kind: input, shape index: {}]   ;;  %s14130_s12 = inlined_call_operand.vmem [shape: f32[81,216], index: 12, kind: input, shape index: {}]   ;;  %s14131_s7 = inlined_call_operand.vmem [shape: f32[1,128], index: 7, kind: input, shape index: {}]   ;;  %s14132_s3 = inlined_call_operand.vmem [shape: bf16[4,64,128], index: 3, kind: input, shape index: {}]   ;;  %s14133_s17 = inlined_call_operand.vmem [shape: f32[2,81,128], index: 17, kind: output, shape index: {0}]   ;;  %s14134_s13 = inlined_call_operand.vmem [shape: f32[25,80], index: 13, kind: input, shape index: {}]   ;;  %s14135_s4 = inlined_call_operand.vmem [shape: bf16[4,128,128], index: 4, kind: input, shape index: {}]   ;;  %s14136_s8 = inlined_call_operand.vmem [shape: f32[1,128], index: 8, kind: input, shape index: {}]   ;;  %s14137_s18 = inlined_call_operand.vmem [shape: f32[2,25,128], index: 18, kind: output, shape index: {1}]   ;;  %s14138_s14 = inlined_call_operand.vmem [shape: f32[9,24], index: 14, kind: input, shape index: {}]   ;;  %s14139_s5 = inlined_call_operand.vmem [shape: bf16[4,256,128], index: 5, kind: input, shape index: {}]   ;;  %s14140_s9 = inlined_call_operand.vmem [shape: f32[1,128], index: 9, kind: input, shape index: {}]   ;;  %s14141_s19 = inlined_call_operand.vmem [shape: f32[2,9,128], index: 19, kind: output, shape index: {2}]   ;;  %s14142_s15 = inlined_call_operand.vmem [shape: f32[4,16], index: 15, kind: input, shape index: {}, may-alias: {15,16}]   ;;  %s14143_s6 = inlined_call_operand.vmem [shape: bf16[4,256,128], index: 6, kind: input, shape index: {}]   ;;  %s14144_s10 = inlined_call_operand.vmem [shape: f32[1,128], index: 10, kind: input, shape index: {}]   ;;  %s14145_s20 = inlined_call_operand.vmem [shape: f32[2,4,128], index: 20, kind: output, shape index: {3}]   ;;  %s14146_s16 = inlined_call_operand.vmem [shape: f32[4,16], index: 16, kind: input, shape index: {}, may-alias: {15,16}]   ;;  %s14147_s11 = inlined_call_operand.vmem [shape: f32[1,128], index: 11, kind: input, shape index: {}]   ;;  %s14148_s21 = inlined_call_operand.vmem [shape: f32[2,4,128], index: 21, kind: output, shape index: {4}]  }
   0x1   :  { %14298 = sst [smem:[#allocation73_spill]] %s14127_s2  ;;  %vm14215_vm4 = vcmask 130048   ;;  %vm14211_vm5 = vcmask 122880   ;;  %vm14210_vm6 = vcmask 130049   ;;  %vm14209_vm7 = vcmask 123904  }
   0x2   :  { %14299 = sst [smem:[#allocation74_spill]] %s14128_s1  ;;  %s9916_s1 = smov 48   ;;  %vm14208_vm8 = vcmask 130050   ;;  %vm14250_vm9 = vmmov 0   ;;  %vm14207_vm10 = vcmask 124928   ;;  %vm14206_vm11 = vcmask 130051  }
   0x3   :  { %14300 = sst [smem:[#allocation75_spill]] %s14129_s0  ;;  %vm14205_vm12 = vcmask 125952   ;;  %vm14204_vm13 = vcmask 130052   ;;  %vm14199_vm14 = vcmask 126976   ;;  %vm14198_vm15 = vcmask 130053  }
   0x4   :  { %14301 = sst [smem:[#allocation76_spill]] %s14130_s12  ;;  %s9914_s12 = smov 32  }
   0x5   :  { %14302 = sst [smem:[#allocation77_spill]] %s14131_s7 }
   0x6   :  { %14303 = sst [smem:[#allocation78_spill]] %s14132_s3 }
   0x7   :  { %s14304_s26 = sld [smem:[#allocation73_spill]] }
   0x8   :  { %s14305_s2 = sld [smem:[#allocation74_spill]] }
   0x9   :  { %s14306_s23 = sld [smem:[#allocation75_spill]] }
   0xa   :  { %s14314_s27 = sld [smem:[#allocation76_spill]] }
   0xb   :  { %s14467_s7 = sld [smem:[#allocation78_spill]] }
   0xc   :  { %s14468_s22 = sld [smem:[#allocation77_spill]] }
   0xd   :  { %v10033_v0 = vld [vmem:[%s14304_s26 + $0x8] sm:$0x3f]   ;;  %v9695_v1 = vld [vmem:[%s14304_s26] sm:$0x3f]   ;;  %v10155_v31 = vld [vmem:[%s14304_s26 + $0x10] sm:$0x3f]  }
   0xe   :  { %9679 = vmatprep.subr.msk.bf16.mxu0 %vm220_vm0, %v10033_v0  ;;  %v10042_v2 = vsel %vm220_vm0, %v10033_v0, 0  ;;  %v128_v3 = vld [vmem:[%s14305_s2] sm:$0xff]  ;;  %v129_v4 = vld [vmem:[%s14305_s2 + $0x8] sm:$0xff]  ;;  %9680 = vmatprep.subr.msk.bf16.mxu1 %vm220_vm0, %v9695_v1  ;;  %v10056_v6 = vsel %vm220_vm0, %v9695_v1, 0  ;;  %v130_v9 = vld [vmem:[%s14305_s2 + $0x10] sm:$0xff]  ;;  %v10170_v36 = vsel %vm220_vm0, %v10155_v31, 0 }
   0xf   :  { %v85_v5 = vld [vmem:[%s14306_s23] sm:$0xff]  ;;  %8958 = vmatpush3.bf16.msra.mxu0 %v10042_v2  ;;  %14307 = vst [vmem:[#allocation10_spill] sm:$0xff] %v10056_v6  ;;  %v155_v7 = vpack.c.bf16 %v129_v4, %v128_v3  ;;  %v86_v8 = vld [vmem:[%s14306_s23 + $0x8] sm:$0xff]  ;;  %v10067_v10 = vld [vmem:[%s14305_s2 + $0x18] sm:$0xff]  ;;  %8988 = vmatpush3.bf16.msra.mxu1 %v10056_v6 }
  0x10   :  { %v112_v11 = vpack.c.bf16 %v86_v8, %v85_v5  ;;  %v156_v12 = vpack.c.bf16 %v10067_v10, %v130_v9  ;;  %v87_v13 = vld [vmem:[%s14306_s23 + $0x10] sm:$0xff]  ;;  %v10077_v14 = vld [vmem:[%s14306_s23 + $0x18] sm:$0xff]  ;;  %v10082_v15 = vld [vmem:[%s14305_s2 + $0x20] sm:$0xff]  ;;  %9681 = vmatprep.subr.msk.bf16.mxu0 %vm220_vm0, %v10155_v31 }
  0x11   :  { %8959 = vmatprep.mubr.msk.bf16.mxu0 %vm177_vm1, %v155_v7  ;;  %v113_v16 = vpack.c.bf16 %v10077_v14, %v87_v13  ;;  %v10089_v17 = vld [vmem:[%s14305_s2 + $0x28] sm:$0xff]  ;;  %v10094_v18 = vld [vmem:[%s14306_s23 + $0x20] sm:$0xff]  ;;  %v10111_v22 = vld [vmem:[%s14305_s2 + $0x30] sm:$0xff] }
  0x12   :  { %v10099_v19 = vld [vmem:[%s14306_s23 + $0x28] sm:$0xff]  ;;  %8989 = vmatprep.mubr.msk.bf16.mxu1 %vm177_vm1, %v112_v11  ;;  %8960 = vmatmul.mubr.msk.bf16.vlgmr.msra.gmra.mxu0 %vm177_vm1, %v156_v12  ;;  %v157_v20 = vpack.c.bf16 %v10089_v17, %v10082_v15  ;;  %v10116_v23 = vld [vmem:[%s14305_s2 + $0x38] sm:$0xff]  ;;  %v10121_v24 = vld [vmem:[%s14306_s23 + $0x30] sm:$0xff] }
  0x13   :  { %v114_v21 = vpack.c.bf16 %v10099_v19, %v10094_v18  ;;  %8990 = vmatmul.mubr.msk.bf16.vlgmr.msra.gmra.mxu1 %vm177_vm1, %v113_v16  ;;  %v10128_v25 = vld [vmem:[%s14306_s23 + $0x38] sm:$0xff]  ;;  %v10133_v26 = vld [vmem:[%s14305_s2 + $0x40] sm:$0xff]  ;;  %v10138_v27 = vld [vmem:[%s14305_s2 + $0x48] sm:$0xff]  ;;  %v158_v30 = vpack.c.bf16 %v10116_v23, %v10111_v22  ;;  %9018 = vmatpush3.bf16.msra.mxu0 %v10170_v36 }
  0x14   :  { %8963 = vmatprep.mubr.msk.bf16.mxu0 %vm177_vm1, %v157_v20  ;;  %v10143_v28 = vld [vmem:[%s14306_s23 + $0x40] sm:$0xff]  ;;  %v10148_v29 = vld [vmem:[%s14306_s23 + $0x48] sm:$0xff]  ;;  %v115_v32 = vpack.c.bf16 %v10128_v25, %v10121_v24  ;;  %v159_v33 = vpack.c.bf16 %v10138_v27, %v10133_v26  ;;  %v9697_v34 = vld [vmem:[%s14304_s26 + $0x18] sm:$0x3f]  }
  0x15   :  { %8993 = vmatprep.mubr.msk.bf16.mxu1 %vm177_vm1, %v114_v21  ;;  %v116_v35 = vpack.c.bf16 %v10148_v29, %v10143_v28  ;;  %9682 = vmatprep.subr.msk.bf16.mxu1 %vm220_vm0, %v9697_v34  ;;  %v10175_v37 = vsel %vm220_vm0, %v9697_v34, 0  ;;  %v10184_v38 = vld [vmem:[%s14305_s2 + $0x50] sm:$0xff]  ;;  %v10189_v39 = vld [vmem:[%s14305_s2 + $0x58] sm:$0xff]  ;;  %v10205_v42 = vld [vmem:[%s14305_s2 + $0x60] sm:$0xff] }
  0x16   :  { %14308 = vst [vmem:[#allocation11_spill] sm:$0xff] %v10175_v37  ;;  %9048 = vmatpush3.bf16.msra.mxu1 %v10175_v37  ;;  %v10194_v40 = vld [vmem:[%s14306_s23 + $0x50] sm:$0xff]  ;;  %v10200_v41 = vld [vmem:[%s14306_s23 + $0x58] sm:$0xff]  ;;  %v10210_v43 = vld [vmem:[%s14305_s2 + $0x68] sm:$0xff]  ;;  %v160_v46 = vpack.c.bf16 %v10189_v39, %v10184_v38 }
  0x17   :  { %9683 = vmatprep.subr.msk.bf16.mxu1 %vm220_vm0, %v10033_v0  ;;  %v10217_v44 = vld [vmem:[%s14306_s23 + $0x60] sm:$0xff]  ;;  %v10222_v45 = vld [vmem:[%s14306_s23 + $0x68] sm:$0xff]  ;;  %v117_v47 = vpack.c.bf16 %v10200_v41, %v10194_v40  ;;  %v161_v48 = vpack.c.bf16 %v10210_v43, %v10205_v42  ;;  %v10238_v50 = vld [vmem:[%s14305_s2 + $0x70] sm:$0xff] }
  0x18   :  { %v118_v49 = vpack.c.bf16 %v10222_v45, %v10217_v44  ;;  %v10243_v51 = vld [vmem:[%s14305_s2 + $0x78] sm:$0xff]  ;;  %v10248_v52 = vld [vmem:[%s14306_s23 + $0x70] sm:$0xff]  ;;  %v10259_v54 = vld [vmem:[%s14305_s2 + $0x80] sm:$0xff] }
  0x19   :  { %v10254_v53 = vld [vmem:[%s14306_s23 + $0x78] sm:$0xff]  ;;  %v10264_v55 = vld [vmem:[%s14305_s2 + $0x88] sm:$0xff]  ;;  %v10269_v56 = vld [vmem:[%s14306_s23 + $0x80] sm:$0xff]  ;;  %v162_v58 = vpack.c.bf16 %v10243_v51, %v10238_v50 }
  0x1a   :  { %8964 = vmatmul.mubr.msk.bf16.gmra.mxu0 %vm177_vm1, %v158_v30  ;;  %v10274_v57 = vld [vmem:[%s14306_s23 + $0x88] sm:$0xff]  ;;  %v119_v59 = vpack.c.bf16 %v10254_v53, %v10248_v52  ;;  %v163_v60 = vpack.c.bf16 %v10264_v55, %v10259_v54  ;;  %v10290_v62 = vld [vmem:[%s14305_s2 + $0x90] sm:$0xff]  ;;  %v10295_v63 = vld [vmem:[%s14305_s2 + $0x98] sm:$0xff] }
  0x1b   :  { %8994 = vmatmul.mubr.msk.bf16.gmra.mxu1 %vm177_vm1, %v115_v32  ;;  %8967 = vmatprep.mubr.msk.bf16.mxu0 %vm177_vm1, %v159_v33  ;;  %v120_v61 = vpack.c.bf16 %v10274_v57, %v10269_v56  ;;  %v10300_v0 = vld [vmem:[%s14306_s23 + $0x90] sm:$0xff]  ;;  %v10306_v1 = vld [vmem:[%s14306_s23 + $0x98] sm:$0xff]  ;;  %v10311_v3 = vld [vmem:[%s14305_s2 + $0xa0] sm:$0xff]  ;;  %v164_v8 = vpack.c.bf16 %v10295_v63, %v10290_v62 }
  0x1c   :  { %8997 = vmatprep.mubr.msk.bf16.mxu1 %vm177_vm1, %v116_v35  ;;  %v10316_v4 = vld [vmem:[%s14305_s2 + $0xa8] sm:$0xff]  ;;  %v10321_v5 = vld [vmem:[%s14306_s23 + $0xa0] sm:$0xff]  ;;  %v121_v9 = vpack.c.bf16 %v10306_v1, %v10300_v0  ;;  %v10342_v13 = vld [vmem:[%s14305_s2 + $0xb0] sm:$0xff] }
  0x1d   :  { %v10326_v7 = vld [vmem:[%s14306_s23 + $0xa8] sm:$0xff]  ;;  %v165_v11 = vpack.c.bf16 %v10316_v4, %v10311_v3  ;;  %v10347_v16 = vld [vmem:[%s14305_s2 + $0xb8] sm:$0xff]  ;;  %v10352_v20 = vld [vmem:[%s14306_s23 + $0xb0] sm:$0xff] }
  0x1e   :  { %v122_v12 = vpack.c.bf16 %v10326_v7, %v10321_v5  ;;  %v10358_v21 = vld [vmem:[%s14306_s23 + $0xb8] sm:$0xff]  ;;  %v10363_v30 = vld [vmem:[%s14305_s2 + $0xc0] sm:$0xff]  ;;  %v10368_v32 = vld [vmem:[%s14305_s2 + $0xc8] sm:$0xff]  ;;  %v166_v35 = vpack.c.bf16 %v10347_v16, %v10342_v13 }
  0x1f   :  { %v109_v33 = vld [vmem:[%s14306_s23 + $0xc0] sm:$0xff]  ;;  %v10376_v34 = vld [vmem:[%s14306_s23 + $0xc8] sm:$0xff] }
  0x22   :  { %8968 = vmatmul.mubr.msk.bf16.gmra.mxu0 %vm177_vm1, %v160_v46  ;;  %v123_v46 = vpack.c.bf16 %v10358_v21, %v10352_v20 }
  0x23   :  { %8998 = vmatmul.mubr.msk.bf16.gmra.mxu1 %vm177_vm1, %v117_v47  ;;  %8971 = vmatprep.mubr.msk.bf16.mxu0 %vm177_vm1, %v161_v48  ;;  %v167_v47 = vpack.c.bf16 %v10368_v32, %v10363_v30  ;;  %v124_v48 = vpack.c.bf16 %v10376_v34, %v109_v33 }
  0x24   :  { %9001 = vmatprep.mubr.msk.bf16.mxu1 %vm177_vm1, %v118_v49  ;;  %v10391_v49 = vld [vmem:[%s14305_s2 + $0xd0] sm:$0xff] }
  0x2a   :  { %8972 = vmatmul.mubr.msk.bf16.gmra.mxu0 %vm177_vm1, %v162_v58  ;;  %v111_v58 = vld [vmem:[%s14306_s23 + $0xd0] sm:$0xff] }
  0x2b   :  { %9002 = vmatmul.mubr.msk.bf16.gmra.mxu1 %vm177_vm1, %v119_v59  ;;  %8975 = vmatprep.mubr.msk.bf16.mxu0 %vm177_vm1, %v163_v60  ;;  %v168_v59 = vpack.c.bf16 %v10391_v49, %v10391_v49  ;;  %v125_v60 = vpack.c.bf16 %v111_v58, %v111_v58 }
  0x2c   :  { %9005 = vmatprep.mubr.msk.bf16.mxu1 %vm177_vm1, %v120_v61  ;;  %v589_v61 = vpack.c.bf16 %v10094_v18, %v10077_v14  ;;  %v591_v14 = vpack.c.bf16 %v10143_v28, %v10128_v25  ;;  %v593_v18 = vpack.c.bf16 %v10217_v44, %v10200_v41  ;;  %v596_v25 = vpack.c.bf16 %v10300_v0, %v10274_v57  ;;  %v587_v41 = vld [vmem:[%s14306_s23 + $0xe0] sm:$0xff]  ;;  %v7636_v0 = vld [vmem:[%s14305_s2 + $0xf8] sm:$0xff] }
  0x2d   :  { %v862_v28 = vpack.c.bf16 %v10311_v3, %v10295_v63  ;;  %v600_v44 = vpack.c.bf16 %v111_v58, %v10376_v34  ;;  %v7635_v63 = vld [vmem:[%s14305_s2 + $0xf0] sm:$0xff]  ;;  %v10583_v58 = vld [vmem:[%s14305_s2 + $0x128] sm:$0xff] }
  0x2e   :  { %14313 = vst [vmem:[#allocation16_spill] sm:$0xff] %v10583_v58 }
  0x32   :  { %8976 = vmatmul.mubr.msk.bf16.gmra.mxu0 %vm177_vm1, %v164_v8  ;;  %v854_v8 = vpack.c.bf16 %v10082_v15, %v10067_v10  ;;  %v856_v10 = vpack.c.bf16 %v10133_v26, %v10116_v23  ;;  %v592_v15 = vpack.c.bf16 %v10194_v40, %v10148_v29  ;;  %v595_v23 = vpack.c.bf16 %v10269_v56, %v10254_v53  ;;  %v586_v40 = vld [vmem:[%s14306_s23 + $0xd8] sm:$0xff]  ;;  %v853_v53 = vld [vmem:[%s14305_s2 + $0xe8] sm:$0xff] }
  0x33   :  { %9006 = vmatmul.mubr.msk.bf16.gmra.mxu1 %vm177_vm1, %v121_v9  ;;  %8979 = vmatprep.mubr.msk.bf16.mxu0 %vm177_vm1, %v165_v11  ;;  %v590_v9 = vpack.c.bf16 %v10121_v24, %v10099_v19  ;;  %v855_v11 = vpack.c.bf16 %v10111_v22, %v10089_v17  ;;  %v857_v17 = vpack.c.bf16 %v10184_v38, %v10138_v27  ;;  %v14155_v56 = vmov 0.0  }
  0x34   :  { %9009 = vmatprep.mubr.msk.bf16.mxu1 %vm177_vm1, %v122_v12  ;;  %v858_v19 = vpack.c.bf16 %v10205_v42, %v10189_v39  ;;  %v859_v22 = vpack.c.bf16 %v10238_v50, %v10210_v43  ;;  %v860_v24 = vpack.c.bf16 %v10259_v54, %v10243_v51  ;;  %v861_v26 = vpack.c.bf16 %v10290_v62, %v10264_v55  ;;  %v851_v42 = vld [vmem:[%s14305_s2 + $0xd8] sm:$0xff]  ;;  %v852_v43 = vld [vmem:[%s14305_s2 + $0xe0] sm:$0xff] }
  0x35   :  { %v597_v27 = vpack.c.bf16 %v10321_v5, %v10306_v1  ;;  %v598_v29 = vpack.c.bf16 %v10352_v20, %v10326_v7  ;;  %v599_v38 = vpack.c.bf16 %v109_v33, %v10358_v21  ;;  %v864_v39 = vpack.c.bf16 %v10363_v30, %v10347_v16  ;;  %1132 = vmatprep.subr.mxu0 %v14155_v56  ;;  %v7637_v5 = vld [vmem:[%s14305_s2 + $0x100] sm:$0xff]  ;;  %v10544_v7 = vld [vmem:[%s14305_s2 + $0x108] sm:$0xff] }
  0x36   :  { %v601_v50 = vpack.c.bf16 %v587_v41, %v586_v40  ;;  %v866_v51 = vpack.c.bf16 %v852_v43, %v851_v42  ;;  %v867_v55 = vpack.c.bf16 %v853_v53, %v853_v53  ;;  %4096 = vst [vmem:[#allocation4] sm:$0xff] %v14155_v56  ;;  %4097 = vst [vmem:[#allocation4 + $0x8] sm:$0xff] %v14155_v56  ;;  %v10649_v42 = vld [vmem:[%s14305_s2 + $0x150] sm:$0xff]  ;;  %v10654_v43 = vld [vmem:[%s14305_s2 + $0x158] sm:$0xff] }
  0x37   :  { %4098 = vst [vmem:[#allocation4 + $0x10] sm:$0xff] %v14155_v56  ;;  %4099 = vst [vmem:[#allocation4 + $0x18] sm:$0xff] %v14155_v56 }
  0x38   :  { %4102 = vst [vmem:[#allocation4 + $0x30] sm:$0xff] %v14155_v56  ;;  %4103 = vst [vmem:[#allocation4 + $0x38] sm:$0xff] %v14155_v56 }
  0x39   :  { %4104 = vst [vmem:[#allocation4 + $0x40] sm:$0xff] %v14155_v56  ;;  %4107 = vst [vmem:[#allocation5 + $0x8] sm:$0xff] %v14155_v56 }
  0x3a   :  { %8980 = vmatmul.mubr.msk.bf16.gmra.mxu0 %vm177_vm1, %v166_v35  ;;  %4108 = vst [vmem:[#allocation5 + $0x10] sm:$0xff] %v14155_v56  ;;  %4112 = vst [vmem:[#allocation5 + $0x30] sm:$0xff] %v14155_v56  ;;  %v10562_v35 = vld [vmem:[%s14305_s2 + $0x110] sm:$0xff] }
  0x3b   :  { %9010 = vmatmul.mubr.msk.bf16.gmra.mxu1 %vm177_vm1, %v123_v46  ;;  %8983 = vmatprep.mubr.msk.bf16.mxu0 %vm177_vm1, %v167_v47  ;;  %4113 = vst [vmem:[#allocation5 + $0x38] sm:$0xff] %v14155_v56  ;;  %5166 = vst [vmem:[#allocation6 + $0x10] sm:$0xff] %v14155_v56  ;;  %v10567_v46 = vld [vmem:[%s14305_s2 + $0x118] sm:$0xff] }
  0x3c   :  { %9013 = vmatprep.mubr.msk.bf16.mxu1 %vm177_vm1, %v124_v48  ;;  %5167 = vst [vmem:[#allocation6 + $0x18] sm:$0xff] %v14155_v56  ;;  %5168 = vst [vmem:[#allocation6 + $0x20] sm:$0xff] %v14155_v56 }
  0x3d   :  { %5169 = vst [vmem:[#allocation6 + $0x28] sm:$0xff] %v14155_v56  ;;  %5174 = vst [vmem:[#allocation6 + $0x50] sm:$0xff] %v14155_v56 }
  0x3e   :  { %5175 = vst [vmem:[#allocation6 + $0x58] sm:$0xff] %v14155_v56  ;;  %5176 = vst [vmem:[#allocation6 + $0x60] sm:$0xff] %v14155_v56 }
  0x3f   :  { %5177 = vst [vmem:[#allocation6 + $0x68] sm:$0xff] %v14155_v56  ;;  %5182 = vst [vmem:[#allocation7 + $0x10] sm:$0xff] %v14155_v56 }
  0x40   :  { %5183 = vst [vmem:[#allocation7 + $0x18] sm:$0xff] %v14155_v56  ;;  %5190 = vst [vmem:[#allocation7 + $0x50] sm:$0xff] %v14155_v56 }
  0x41   :  { %5191 = vst [vmem:[#allocation7 + $0x58] sm:$0xff] %v14155_v56  ;;  %6368 = vst [vmem:[#allocation8 + $0x10] sm:$0xff] %v14155_v56 }
  0x42   :  { %8984 = vmatmul.mubr.msk.bf16.gmra.mxu0 %vm177_vm1, %v168_v59  ;;  %6369 = vst [vmem:[#allocation8 + $0x18] sm:$0xff] %v14155_v56  ;;  %6376 = vst [vmem:[#allocation8 + $0x50] sm:$0xff] %v14155_v56 }
  0x43   :  { %9014 = vmatmul.mubr.msk.bf16.gmra.mxu1 %vm177_vm1, %v125_v60  ;;  %9019 = vmatprep.mubr.msk.bf16.mxu0 %vm177_vm1, %v589_v61  ;;  %6377 = vst [vmem:[#allocation8 + $0x58] sm:$0xff] %v14155_v56  ;;  %6384 = vst [vmem:[#allocation9 + $0x10] sm:$0xff] %v14155_v56 }
  0x44   :  { %9049 = vmatprep.mubr.msk.bf16.mxu1 %vm177_vm1, %v854_v8  ;;  %6385 = vst [vmem:[#allocation9 + $0x18] sm:$0xff] %v14155_v56  ;;  %6392 = vst [vmem:[#allocation9 + $0x50] sm:$0xff] %v14155_v56 }
  0x45   :  { %6393 = vst [vmem:[#allocation9 + $0x58] sm:$0xff] %v14155_v56  ;;  %14309 = vst [vmem:[#allocation12_spill] sm:$0xff] %v10544_v7 }
  0x46   :  { %14310 = vst [vmem:[#allocation13_spill] sm:$0xff] %v10562_v35  ;;  %14311 = vst [vmem:[#allocation14_spill] sm:$0xff] %v10567_v46 }
  0x47   :  { %14319 = vst [vmem:[#allocation21_spill] sm:$0xff] %v10649_v42  ;;  %14320 = vst [vmem:[#allocation22_spill] sm:$0xff] %v10654_v43 }
  0x4a   :  { %9020 = vmatmul.mubr.msk.bf16.vlgmr.msra.gmra.mxu0 %vm177_vm1, %v590_v9  ;;  %v10594_v9 = vld [vmem:[%s14314_s27 + $0x8] sm:$0xff] }
  0x4b   :  { %9050 = vmatmul.mubr.msk.bf16.vlgmr.msra.gmra.mxu1 %vm177_vm1, %v855_v11  ;;  %9023 = vmatprep.mubr.msk.bf16.mxu0 %vm177_vm1, %v591_v14 }
  0x4c   :  { %9053 = vmatprep.mubr.msk.bf16.mxu1 %vm177_vm1, %v856_v10  ;;  %9078 = vmatpush3.bf16.msra.mxu1 %v10042_v2  ;;  %v594_v2 = vpack.c.bf16 %v10248_v52, %v10222_v45  ;;  %v865_v45 = vpack.c.bf16 %v10391_v49, %v10368_v32  ;;  %v588_v52 = vld [vmem:[%s14306_s23 + $0xe8] sm:$0xff]  ;;  %v10578_v49 = vld [vmem:[%s14305_s2 + $0x120] sm:$0xff] }
  0x4d   :  { %9685 = vmatprep.subr.msk.bf16.mxu1 %vm220_vm0, %v10155_v31  ;;  %v863_v31 = vpack.c.bf16 %v10342_v13, %v10316_v4  ;;  %v602_v54 = vpack.c.bf16 %v588_v52, %v588_v52  ;;  %v1344_v4 = vpack.c.bf16 %v7636_v0, %v7635_v63  ;;  %v1345_v13 = vpack.c.bf16 %v10544_v7, %v7637_v5  ;;  %v10692_v5 = vld [vmem:[%s14305_s2 + $0x178] sm:$0xff]  ;;  %v10847_v7 = vld [vmem:[%s14306_s23 + $0x130] sm:$0xff] }
  0x4e   :  { %14312 = vst [vmem:[#allocation15_spill] sm:$0xff] %v10578_v49  ;;  %v1347_v60 = vpack.c.bf16 %v10583_v58, %v10578_v49  ;;  %14324 = vst [vmem:[#allocation26_spill] sm:$0xff] %v10692_v5 }
  0x4f   :  { %14361 = vst [vmem:[#allocation63_spill] sm:$0xff] %v10847_v7 }
  0x52   :  { %9024 = vmatmul.mubr.msk.bf16.gmra.mxu0 %vm177_vm1, %v592_v15 }
  0x53   :  { %9054 = vmatmul.mubr.msk.bf16.gmra.mxu1 %vm177_vm1, %v857_v17  ;;  %9027 = vmatprep.mubr.msk.bf16.mxu0 %vm177_vm1, %v593_v18  ;;  %v10607_v18 = vld [vmem:[%s14305_s2 + $0x130] sm:$0xff] }
  0x54   :  { %9057 = vmatprep.mubr.msk.bf16.mxu1 %vm177_vm1, %v858_v19  ;;  %14315 = vst [vmem:[#allocation17_spill] sm:$0xff] %v10607_v18  ;;  %v10612_v19 = vld [vmem:[%s14305_s2 + $0x138] sm:$0xff] }
  0x55   :  { %14316 = vst [vmem:[#allocation18_spill] sm:$0xff] %v10612_v19 }
  0x5a   :  { %9028 = vmatmul.mubr.msk.bf16.gmra.mxu0 %vm177_vm1, %v594_v2 }
  0x5b   :  { %9058 = vmatmul.mubr.msk.bf16.gmra.mxu1 %vm177_vm1, %v859_v22  ;;  %9031 = vmatprep.mubr.msk.bf16.mxu0 %vm177_vm1, %v595_v23  ;;  %v1348_v23 = vpack.c.bf16 %v10612_v19, %v10607_v18 }
  0x5c   :  { %9061 = vmatprep.mubr.msk.bf16.mxu1 %vm177_vm1, %v860_v24  ;;  %v10623_v24 = vld [vmem:[%s14305_s2 + $0x140] sm:$0xff] }
  0x5d   :  { %14317 = vst [vmem:[#allocation19_spill] sm:$0xff] %v10623_v24 }
  0x62   :  { %9032 = vmatmul.mubr.msk.bf16.gmra.mxu0 %vm177_vm1, %v596_v25  ;;  %v10628_v25 = vld [vmem:[%s14305_s2 + $0x148] sm:$0xff] }
  0x63   :  { %9062 = vmatmul.mubr.msk.bf16.gmra.mxu1 %vm177_vm1, %v861_v26  ;;  %9035 = vmatprep.mubr.msk.bf16.mxu0 %vm177_vm1, %v597_v27  ;;  %14318 = vst [vmem:[#allocation20_spill] sm:$0xff] %v10628_v25  ;;  %v1349_v27 = vpack.c.bf16 %v10628_v25, %v10623_v24  ;;  %v10826_v24 = vld [vmem:[%s14306_s23 + $0x128] sm:$0xff] }
  0x64   :  { %9065 = vmatprep.mubr.msk.bf16.mxu1 %vm177_vm1, %v862_v28  ;;  %14357 = vst [vmem:[#allocation59_spill] sm:$0xff] %v10826_v24  ;;  %v1759_v18 = vpack.c.bf16 %v10847_v7, %v10826_v24  ;;  %v10872_v24 = vld [vmem:[%s14306_s23 + $0x148] sm:$0xff] }
  0x65   :  { %14364 = vst [vmem:[#allocation66_spill] sm:$0xff] %v10872_v24 }
  0x6a   :  { %9036 = vmatmul.mubr.msk.bf16.gmra.mxu0 %vm177_vm1, %v598_v29 }
  0x6b   :  { %9066 = vmatmul.mubr.msk.bf16.gmra.mxu1 %vm177_vm1, %v863_v31  ;;  %9039 = vmatprep.mubr.msk.bf16.mxu0 %vm177_vm1, %v599_v38 }
  0x6c   :  { %9069 = vmatprep.mubr.msk.bf16.mxu1 %vm177_vm1, %v864_v39 }
  0x72   :  { %9040 = vmatmul.mubr.msk.bf16.gmra.mxu0 %vm177_vm1, %v600_v44 }
  0x73   :  { %9070 = vmatmul.mubr.msk.bf16.gmra.mxu1 %vm177_vm1, %v865_v45  ;;  %9043 = vmatprep.mubr.msk.bf16.mxu0 %vm177_vm1, %v601_v50  ;;  %v1350_v45 = vpack.c.bf16 %v10654_v43, %v10649_v42  ;;  %v10663_v50 = vld [vmem:[%s14305_s2 + $0x160] sm:$0xff] }
  0x74   :  { %9073 = vmatprep.mubr.msk.bf16.mxu1 %vm177_vm1, %v866_v51  ;;  %14321 = vst [vmem:[#allocation23_spill] sm:$0xff] %v10663_v50  ;;  %v10668_v51 = vld [vmem:[%s14305_s2 + $0x168] sm:$0xff] }
  0x75   :  { %14322 = vst [vmem:[#allocation24_spill] sm:$0xff] %v10668_v51  ;;  %v1351_v53 = vpack.c.bf16 %v10668_v51, %v10663_v50 }
  0x7a   :  { %9044 = vmatmul.mubr.msk.bf16.gmra.mxu0 %vm177_vm1, %v602_v54 }
  0x7b   :  { %9074 = vmatmul.mubr.msk.bf16.gmra.mxu1 %vm177_vm1, %v867_v55  ;;  %7597 = vmatprep.mubr.msk.f32.mxu0 %vm1098_vm2, %v10594_v9 }
  0x7c   :  { %9079 = vmatprep.mubr.msk.bf16.mxu1 %vm177_vm1, %v1344_v4  ;;  %v10687_v4 = vld [vmem:[%s14305_s2 + $0x170] sm:$0xff] }
  0x7d   :  { %14323 = vst [vmem:[#allocation25_spill] sm:$0xff] %v10687_v4 }
  0x83   :  { %9080 = vmatmul.mubr.msk.bf16.vlgmr.msra.gmra.mxu1 %vm177_vm1, %v1345_v13 }
  0x84   :  { %9138 = vmatpush3.bf16.msra.mxu1 %v10170_v36  ;;  %v1346_v36 = vpack.c.bf16 %v10567_v46, %v10562_v35 }
  0x85   :  { %2238 = vmatprep.subr.mxu1 %v14155_v56 }
  0x86   :  { %9083 = vmatprep.mubr.msk.bf16.mxu1 %vm177_vm1, %v1346_v36 }
  0x8b   :  { %9084 = vmatmul.mubr.msk.bf16.gmra.mxu1 %vm177_vm1, %v1347_v60 }
  0x8c   :  { %9087 = vmatprep.mubr.msk.bf16.mxu1 %vm177_vm1, %v1348_v23 }
  0x93   :  { %9088 = vmatmul.mubr.msk.bf16.gmra.mxu1 %vm177_vm1, %v1349_v27 }
  0x94   :  { %9091 = vmatprep.mubr.msk.bf16.mxu1 %vm177_vm1, %v1350_v45  ;;  %v10730_v45 = vld [vmem:[%s14305_s2 + $0x198] sm:$0xff] }
  0x95   :  { %14334 = vst [vmem:[#allocation36_spill] sm:$0xff] %v10730_v45 }
  0x9b   :  { %9092 = vmatmul.mubr.msk.bf16.gmra.mxu1 %vm177_vm1, %v1351_v53 }
  0xd2   :  { %v8961_v57 = vpop.f32.mrf.mxu0 }
  0xd3   :  { %v8991_v62 = vpop.f32.mrf.mxu1 }
  0xd4   :  { %v10534_v1 = vadd.f32 %v8991_v62, %v8961_v57  ;;  %v10536_v3 = vpop.f32.mrf.mxu0 }
  0xd5   :  { %v10546_v12 = vpop.f32.mrf.mxu1 }
  0xd6   :  { %v8962_v16 = vpop.f32.mrf.mxu0 }
  0xd7   :  { %v8992_v20 = vpop.f32.mrf.mxu1 }
  0xd8   :  { %v10551_v21 = vadd.f32 %v8992_v20, %v8962_v16  ;;  %v10553_v30 = vpop.f32.mrf.mxu0  ;;  %v1352_v20 = vpack.c.bf16 %v10692_v5, %v10687_v4  ;;  %v10761_v4 = vld [vmem:[%s14305_s2 + $0x1b0] sm:$0xff] }
  0xd9   :  { %v10556_v32 = vpop.f32.mrf.mxu1  ;;  %14342 = vst [vmem:[#allocation44_spill] sm:$0xff] %v10761_v4 }
  0xda   :  { %v8965_v33 = vpop.f32.mrf.mxu0  ;;  %9095 = vmatprep.mubr.msk.bf16.mxu1 %vm177_vm1, %v1352_v20  ;;  %v10741_v20 = vld [vmem:[%s14305_s2 + $0x1a0] sm:$0xff] }
  0xdb   :  { %v8995_v34 = vpop.f32.mrf.mxu1  ;;  %14337 = vst [vmem:[#allocation39_spill] sm:$0xff] %v10741_v20 }
  0xdc   :  { %v10569_v47 = vadd.f32 %v8995_v34, %v8965_v33  ;;  %v10571_v48 = vpop.f32.mrf.mxu0  ;;  %v10703_v33 = vld [vmem:[%s14305_s2 + $0x180] sm:$0xff]  ;;  %v10708_v34 = vld [vmem:[%s14305_s2 + $0x188] sm:$0xff] }
  0xdd   :  { %v10585_v59 = vpop.f32.mrf.mxu1  ;;  %14327 = vst [vmem:[#allocation29_spill] sm:$0xff] %v10703_v33  ;;  %14328 = vst [vmem:[#allocation30_spill] sm:$0xff] %v10708_v34  ;;  %v1353_v60 = vpack.c.bf16 %v10708_v34, %v10703_v33 }
  0xde   :  { %v8966_v61 = vpop.f32.mrf.mxu0 }
  0xdf   :  { %v8996_v8 = vpop.f32.mrf.mxu1  ;;  %9096 = vmatmul.mubr.msk.bf16.gmra.mxu1 %vm177_vm1, %v1353_v60  ;;  %v10746_v60 = vld [vmem:[%s14305_s2 + $0x1a8] sm:$0xff] }
  0xe0   :  { %v10596_v11 = vadd.f32 %v8996_v8, %v8966_v61  ;;  %v10598_v14 = vpop.f32.mrf.mxu0  ;;  %14338 = vst [vmem:[#allocation40_spill] sm:$0xff] %v10746_v60 }
  0xe1   :  { %v10602_v10 = vpop.f32.mrf.mxu1 }
  0xe2   :  { %v8969_v15 = vpop.f32.mrf.mxu0 }
  0xe3   :  { %v8999_v17 = vpop.f32.mrf.mxu1 }
  0xe4   :  { %v10614_v2 = vadd.f32 %v8999_v17, %v8969_v15  ;;  %v10616_v22 = vpop.f32.mrf.mxu0 }
  0xe5   :  { %v10630_v26 = vpop.f32.mrf.mxu1 }
  0xe6   :  { %v8970_v28 = vpop.f32.mrf.mxu0 }
  0xe7   :  { %v9000_v29 = vpop.f32.mrf.mxu1 }
  0xe8   :  { %v10636_v31 = vadd.f32 %v9000_v29, %v8970_v28  ;;  %v10638_v38 = vpop.f32.mrf.mxu0  ;;  %v10725_v29 = vld [vmem:[%s14305_s2 + $0x190] sm:$0xff] }
  0xe9   :  { %v10640_v39 = vpop.f32.mrf.mxu1  ;;  %14333 = vst [vmem:[#allocation35_spill] sm:$0xff] %v10725_v29 }
  0xea   :  { %v10642_v40 = vpop.f32.mrf.mxu0 }
  0xeb   :  { %v10644_v41 = vpop.f32.mrf.mxu1 }
  0xec   :  { %v10656_v44 = vpop.f32.mrf.mxu0 }
  0xed   :  { %v10670_v52 = vpop.f32.mrf.mxu1 }
  0xee   :  { %v10674_v54 = vpop.f32.mrf.mxu0 }
  0xef   :  { %v10677_v55 = vpop.f32.mrf.mxu1 }
  0xf0   :  { %v10680_v57 = vpop.f32.mrf.mxu0 }
  0xf1   :  { %v10682_v62 = vpop.f32.mrf.mxu1 }
  0xf2   :  { %v8977_v63 = vpop.f32.mrf.mxu0 }
  0xf3   :  { %v9007_v0 = vpop.f32.mrf.mxu1 }
  0xf4   :  { %v10694_v13 = vadd.f32 %v9007_v0, %v8977_v63  ;;  %v10696_v16 = vpop.f32.mrf.mxu0  ;;  %v1354_v0 = vpack.c.bf16 %v10730_v45, %v10725_v29 }
  0xf5   :  { %14326 = vst [vmem:[#allocation28_spill] sm:$0xff] %v10696_v16  ;;  %v10710_v36 = vpop.f32.mrf.mxu1 }
  0xf6   :  { %14325 = vst [vmem:[#allocation27_spill] sm:$0xff] %v10694_v13  ;;  %14329 = vst [vmem:[#allocation31_spill] sm:$0xff] %v10710_v36  ;;  %v8978_v61 = vpop.f32.mrf.mxu0  ;;  %9099 = vmatprep.mubr.msk.bf16.mxu1 %vm177_vm1, %v1354_v0  ;;  %v10766_v0 = vld [vmem:[%s14305_s2 + $0x1b8] sm:$0xff] }
  0xf7   :  { %v9008_v8 = vpop.f32.mrf.mxu1  ;;  %14343 = vst [vmem:[#allocation45_spill] sm:$0xff] %v10766_v0 }
  0xf8   :  { %v10716_v15 = vadd.f32 %v9008_v8, %v8978_v61  ;;  %v10718_v17 = vpop.f32.mrf.mxu0  ;;  %v1355_v8 = vpack.c.bf16 %v10746_v60, %v10741_v20 }
  0xf9   :  { %14331 = vst [vmem:[#allocation33_spill] sm:$0xff] %v10718_v17  ;;  %v10720_v23 = vpop.f32.mrf.mxu1 }
  0xfa   :  { %14330 = vst [vmem:[#allocation32_spill] sm:$0xff] %v10716_v15  ;;  %14332 = vst [vmem:[#allocation34_spill] sm:$0xff] %v10720_v23  ;;  %v8981_v27 = vpop.f32.mrf.mxu0  ;;  %9100 = vmatmul.mubr.msk.bf16.gmra.mxu1 %vm177_vm1, %v1355_v8  ;;  %v10929_v15 = vld [vmem:[%s14306_s23 + $0x170] sm:$0xff] }
  0xfb   :  { %v9011_v28 = vpop.f32.mrf.mxu1  ;;  %14369 = vst [vmem:[#allocation71_spill] sm:$0xff] %v10929_v15 }
  0xfc   :  { %v10732_v53 = vadd.f32 %v9011_v28, %v8981_v27  ;;  %v10734_v63 = vpop.f32.mrf.mxu0 }
  0xfd   :  { %14336 = vst [vmem:[#allocation38_spill] sm:$0xff] %v10734_v63  ;;  %v10748_v61 = vpop.f32.mrf.mxu1 }
  0xfe   :  { %14335 = vst [vmem:[#allocation37_spill] sm:$0xff] %v10732_v53  ;;  %14339 = vst [vmem:[#allocation41_spill] sm:$0xff] %v10748_v61  ;;  %v8982_v27 = vpop.f32.mrf.mxu0  ;;  %v10936_v61 = vld [vmem:[%s14306_s23 + $0x178] sm:$0xff] }
  0xff   :  { %v9012_v28 = vpop.f32.mrf.mxu1  ;;  %14370 = vst [vmem:[#allocation72_spill] sm:$0xff] %v10936_v61 }
 0x100   :  { %v10754_v56 = vadd.f32 %v9012_v28, %v8982_v27  ;;  %v341_v45 = vpop.f32.mrf.mxu0 }
 0x101   :  { %v535_v29 = vpop.f32.mrf.mxu1 }
 0x102   :  { %14340 = vst [vmem:[#allocation42_spill] sm:$0xff] %v10754_v56  ;;  %v10756_v34 = vadd.f32 %v535_v29, %v341_v45  ;;  %v8985_v33 = vpop.f32.mrf.mxu0  ;;  %v1356_v29 = vpack.c.bf16 %v10766_v0, %v10761_v4  ;;  %v10777_v45 = vld [vmem:[%s14305_s2 + $0x1c0] sm:$0xff]  ;;  %v10792_v0 = vld [vmem:[%s14306_s23 + $0x108] sm:$0xff] }
 0x103   :  { %v9015_v5 = vpop.f32.mrf.mxu1  ;;  %14346 = vst [vmem:[#allocation48_spill] sm:$0xff] %v10777_v45  ;;  %v1357_v28 = vpack.c.bf16 %v10777_v45, %v10777_v45  ;;  %14350 = vst [vmem:[#allocation52_spill] sm:$0xff] %v10792_v0  ;;  %v10815_v45 = vld [vmem:[%s14306_s23 + $0x120] sm:$0xff] }
 0x104   :  { %14341 = vst [vmem:[#allocation43_spill] sm:$0xff] %v10756_v34  ;;  %v10768_v60 = vadd.f32 %v9015_v5, %v8985_v33  ;;  %v10770_v8 = vpop.f32.mrf.mxu0  ;;  %9103 = vmatprep.mubr.msk.bf16.mxu1 %vm177_vm1, %v1356_v29  ;;  %14355 = vst [vmem:[#allocation57_spill] sm:$0xff] %v10815_v45 }
 0x105   :  { %14345 = vst [vmem:[#allocation47_spill] sm:$0xff] %v10770_v8  ;;  %v10779_v27 = vpop.f32.mrf.mxu1  ;;  %9104 = vmatmul.mubr.msk.bf16.gmra.mxu1 %vm177_vm1, %v1357_v28 }
 0x106   :  { %14344 = vst [vmem:[#allocation46_spill] sm:$0xff] %v10768_v60  ;;  %14347 = vst [vmem:[#allocation49_spill] sm:$0xff] %v10779_v27  ;;  %v8986_v20 = vpop.f32.mrf.mxu0 }
 0x107   :  { %v9016_v5 = vpop.f32.mrf.mxu1  ;;  %v10801_v20 = vld [vmem:[%s14306_s23 + $0x110] sm:$0xff] }
 0x108   :  { %v10785_v33 = vpop.f32.mrf.mxu0  ;;  %14352 = vst [vmem:[#allocation54_spill] sm:$0xff] %v10801_v20  ;;  %v1757_v28 = vpack.c.bf16 %v10801_v20, %v10792_v0  ;;  %v10810_v5 = vld [vmem:[%s14306_s23 + $0x118] sm:$0xff] }
 0x109   :  { %14348 = vst [vmem:[#allocation50_spill] sm:$0xff] %v10785_v33  ;;  %v10787_v51 = vpop.f32.mrf.mxu1  ;;  %14354 = vst [vmem:[#allocation56_spill] sm:$0xff] %v10810_v5  ;;  %v1758_v42 = vpack.c.bf16 %v10815_v45, %v10810_v5  ;;  %v10861_v45 = vld [vmem:[%s14306_s23 + $0x140] sm:$0xff] }
 0x10a   :  { %14349 = vst [vmem:[#allocation51_spill] sm:$0xff] %v10787_v51  ;;  %v10794_v4 = vpop.f32.mrf.mxu0  ;;  %9139 = vmatprep.mubr.msk.bf16.mxu1 %vm177_vm1, %v1757_v28  ;;  %14363 = vst [vmem:[#allocation65_spill] sm:$0xff] %v10861_v45 }
 0x10b   :  { %v10796_v50 = vpop.f32.mrf.mxu1 }
 0x10c   :  { %14351 = vst [vmem:[#allocation53_spill] sm:$0xff] %v10796_v50  ;;  %v10803_v29 = vpop.f32.mrf.mxu0 }
 0x10d   :  { %14353 = vst [vmem:[#allocation55_spill] sm:$0xff] %v10803_v29  ;;  %v10817_v43 = vpop.f32.mrf.mxu1  ;;  %9140 = vmatmul.mubr.msk.bf16.vlgmr.msra.gmra.mxu1 %vm177_vm1, %v1758_v42  ;;  %v10856_v42 = vld [vmem:[%s14306_s23 + $0x138] sm:$0xff] }
 0x10e   :  { %14356 = vst [vmem:[#allocation58_spill] sm:$0xff] %v10817_v43  ;;  %v10828_v19 = vpop.f32.mrf.mxu0  ;;  %14362 = vst [vmem:[#allocation64_spill] sm:$0xff] %v10856_v42  ;;  %v1760_v20 = vpack.c.bf16 %v10861_v45, %v10856_v42  ;;  %9143 = vmatprep.mubr.msk.bf16.mxu1 %vm177_vm1, %v1759_v18  ;;  %v10893_v42 = vld [vmem:[%s14306_s23 + $0x150] sm:$0xff]  ;;  %v10907_v45 = vld [vmem:[%s14306_s23 + $0x160] sm:$0xff] }
 0x10f   :  { %v10833_v58 = vpop.f32.mrf.mxu1  ;;  %14365 = vst [vmem:[#allocation67_spill] sm:$0xff] %v10893_v42  ;;  %v1761_v6 = vpack.c.bf16 %v10893_v42, %v10872_v24  ;;  %14367 = vst [vmem:[#allocation69_spill] sm:$0xff] %v10907_v45  ;;  %v10918_v24 = vld [vmem:[%s14306_s23 + $0x168] sm:$0xff] }
 0x110   :  { %14358 = vst [vmem:[#allocation60_spill] sm:$0xff] %v10833_v58  ;;  %v10836_v49 = vpop.f32.mrf.mxu0  ;;  %14368 = vst [vmem:[#allocation70_spill] sm:$0xff] %v10918_v24 }
 0x111   :  { %14359 = vst [vmem:[#allocation61_spill] sm:$0xff] %v10836_v49  ;;  %v10838_v46 = vpop.f32.mrf.mxu1 }
 0x112   :  { %14360 = vst [vmem:[#allocation62_spill] sm:$0xff] %v10838_v46  ;;  %v10840_v25 = vpop.f32.mrf.mxu0  ;;  %v10954_v46 = vld [vmem:[%s14306_s23 + $0x188] sm:$0xff] }
 0x113   :  { %v10842_v35 = vpop.f32.mrf.mxu1 }
 0x114   :  { %v10849_v28 = vpop.f32.mrf.mxu0 }
 0x115   :  { %v10863_v37 = vpop.f32.mrf.mxu1  ;;  %9144 = vmatmul.mubr.msk.bf16.gmra.mxu1 %vm177_vm1, %v1760_v20  ;;  %v10902_v20 = vld [vmem:[%s14306_s23 + $0x158] sm:$0xff] }
 0x116   :  { %v10874_v0 = vpop.f32.mrf.mxu0  ;;  %14366 = vst [vmem:[#allocation68_spill] sm:$0xff] %v10902_v20  ;;  %v1762_v17 = vpack.c.bf16 %v10907_v45, %v10902_v20  ;;  %9147 = vmatprep.mubr.msk.bf16.mxu1 %vm177_vm1, %v1761_v6  ;;  %v1763_v6 = vpack.c.bf16 %v10929_v15, %v10918_v24  ;;  %v509_v45 = vadd.f32 %v10644_v41, %v10642_v40 }
 0x117   :  { %v10879_v36 = vpop.f32.mrf.mxu1  ;;  %v512_v20 = vadd.f32 %v10677_v55, %v10674_v54  ;;  %v504_v41 = vadd.f32 %v10682_v62, %v10680_v57  ;;  %v501_v15 = vadd.f32 %v10670_v52, %v10656_v44  ;;  %v10981_v52 = vld [vmem:[%s14306_s23 + $0x198] sm:$0xff]  ;;  %v10986_v57 = vld [vmem:[%s14306_s23 + $0x1a0] sm:$0xff] }
 0x118   :  { %v10882_v16 = vpop.f32.mrf.mxu0 }
 0x119   :  { %v10884_v13 = vpop.f32.mrf.mxu1 }
 0x11a   :  { %v10886_v5 = vpop.f32.mrf.mxu0 }
 0x11b   :  { %v10888_v7 = vpop.f32.mrf.mxu1 }
 0x11c   :  { %v10895_v18 = vpop.f32.mrf.mxu0 }
 0x11d   :  { %v10909_v23 = vpop.f32.mrf.mxu1  ;;  %9148 = vmatmul.mubr.msk.bf16.gmra.mxu1 %vm177_vm1, %v1762_v17  ;;  %v10941_v17 = vld [vmem:[%s14306_s23 + $0x180] sm:$0xff] }
 0x11e   :  { %v9030_v34 = vpop.f32.mrf.mxu0  ;;  %v1764_v24 = vpack.c.bf16 %v10941_v17, %v10936_v61  ;;  %9151 = vmatprep.mubr.msk.bf16.mxu1 %vm177_vm1, %v1763_v6 }
 0x11f   :  { %v9060_v63 = vpop.f32.mrf.mxu1  ;;  %v811_v62 = vadd.f32 %v9030_v34, %v10636_v31  ;;  %v810_v34 = vadd.f32 %v10886_v5, %v10614_v2  ;;  %v807_v5 = vadd.f32 %v10874_v0, %v10596_v11  ;;  %v472_v11 = vadd.f32 %v10602_v10, %v10598_v14 }
 0x120   :  { %v725_v53 = vpop.f32.mrf.mxu0 }
 0x121   :  { %v10924_v56 = vpop.f32.mrf.mxu1  ;;  %v805_v14 = vadd.f32 %v10882_v16, %v472_v11 }
 0x122   :  { %v9033_v43 = vpop.f32.mrf.mxu0 }
 0x123   :  { %v9063_v27 = vpop.f32.mrf.mxu1  ;;  %v814_v54 = vadd.f32 %v9033_v43, %v509_v45  ;;  %v10971_v43 = vld [vmem:[%s14306_s23 + $0x190] sm:$0xff] }
 0x124   :  { %v738_v42 = vpop.f32.mrf.mxu0  ;;  %v1765_v44 = vpack.c.bf16 %v10971_v43, %v10954_v46  ;;  %v1312_v45 = vpack.c.bf16 %v10981_v52, %v10971_v43 }
 0x125   :  { %v1003_v8 = vpop.f32.mrf.mxu1  ;;  %9152 = vmatmul.mubr.msk.bf16.gmra.mxu1 %vm177_vm1, %v1764_v24  ;;  %v1079_v6 = vadd.f32 %v9063_v27, %v814_v54  ;;  %v812_v58 = vadd.f32 %v738_v42, %v501_v15  ;;  %v10998_v27 = vld [vmem:[%s14306_s23 + $0x1a8] sm:$0xff]  ;;  %v1076_v54 = vadd.f32 %v9060_v63, %v811_v62  ;;  %v11045_v63 = vld [vmem:[%s14306_s23 + $0x1c0] sm:$0xff] }
 0x126   :  { %v9034_v51 = vpop.f32.mrf.mxu0  ;;  %9155 = vmatprep.mubr.msk.bf16.mxu1 %vm177_vm1, %v1765_v44  ;;  %v1313_v31 = vpack.c.bf16 %v10998_v27, %v10986_v57  ;;  %v1315_v43 = vpack.c.bf16 %v11045_v63, %v11045_v63 }
 0x127   :  { %v815_v55 = vadd.f32 %v9034_v51, %v512_v20  ;;  %v9064_v33 = vpop.f32.mrf.mxu1  ;;  %v14371_v51 = vmov 0.0  }
 0x128   :  { %v741_v60 = vpop.f32.mrf.mxu0 }
 0x129   :  { %v1080_v61 = vadd.f32 %v9064_v33, %v815_v55  ;;  %v813_v29 = vadd.f32 %v741_v60, %v504_v41  ;;  %v1006_v50 = vpop.f32.mrf.mxu1  ;;  %v485_v41 = vadd.f32 %v10630_v26, %v10616_v22  ;;  %v11030_v22 = vld [vmem:[%s14306_s23 + $0x1b0] sm:$0xff] }
 0x12a   :  { %v10964_v49 = vpop.f32.mrf.mxu0 }
 0x12b   :  { %1133 = vmatpush1.msra.mxu0 %v1080_v61  ;;  %v10966_v40 = vpop.f32.mrf.mxu1  ;;  %v1078_v15 = vadd.f32 %v1006_v50, %v813_v29  ;;  %v1766_v61 = vpack.c.bf16 %v10986_v57, %v10981_v52  ;;  %v488_v50 = vadd.f32 %v10640_v39, %v10638_v38  ;;  %v1077_v29 = vadd.f32 %v1003_v8, %v812_v58  ;;  %v14420_v52 = vld [vmem:[#allocation12_spill] sm:$0xff] }
 0x12c   :  { %v10973_v24 = vpop.f32.mrf.mxu0  ;;  %1134 = vmatprep.subr.mxu0 %v14371_v51  ;;  %v1075_v58 = vadd.f32 %v10888_v7, %v810_v34  ;;  %v808_v2 = vadd.f32 %v10895_v18, %v485_v41  ;;  %v11040_v7 = vld [vmem:[%s14306_s23 + $0x1b8] sm:$0xff]  ;;  %v469_v34 = vadd.f32 %v10585_v59, %v10571_v48  ;;  %v7714_v48 = vld [vmem:[%s14306_s23 + $0x1c8] sm:$0xff]  ;;  %v7715_v59 = vld [vmem:[%s14306_s23 + $0x1d0] sm:$0xff] }
 0x12d   :  { %1135 = vmatpush1.msra.mxu0 %v1079_v6  ;;  %v10989_v60 = vpop.f32.mrf.mxu1  ;;  %9156 = vmatmul.mubr.msk.bf16.gmra.mxu1 %vm177_vm1, %v1766_v61  ;;  %v809_v55 = vadd.f32 %v725_v53, %v488_v50  ;;  %v1767_v53 = vpack.c.bf16 %v11030_v22, %v10998_v27  ;;  %v1768_v44 = vpack.c.bf16 %v11045_v63, %v11040_v7  ;;  %v14429_v63 = vld [vmem:[#allocation17_spill] sm:$0xff] }
 0x12e   :  { %v11000_v33 = vpop.f32.mrf.mxu0  ;;  %1136 = vmatprep.subr.mxu0 %v14371_v51  ;;  %v1314_v62 = vpack.c.bf16 %v11040_v7, %v11030_v22  ;;  %v1073_v0 = vadd.f32 %v10909_v23, %v808_v2  ;;  %v804_v23 = vadd.f32 %v10849_v28, %v469_v34  ;;  %v803_v28 = vadd.f32 %v10828_v19, %v10551_v21  ;;  %v14426_v22 = vld [vmem:[#allocation14_spill] sm:$0xff]  ;;  %v14427_v7 = vld [vmem:[#allocation15_spill] sm:$0xff] }
 0x12f   :  { %1137 = vmatpush1.msra.mxu0 %v1078_v15  ;;  %v11010_v42 = vpop.f32.mrf.mxu1  ;;  %v1074_v18 = vadd.f32 %v10924_v56, %v809_v55  ;;  %9159 = vmatprep.mubr.msk.bf16.mxu1 %vm177_vm1, %v1767_v53  ;;  %v806_v56 = vadd.f32 %v10840_v25, %v10569_v47  ;;  %v456_v53 = vadd.f32 %v10556_v32, %v10553_v30  ;;  %v14373_v30 = vld [vmem:[#allocation61_spill] sm:$0xff] }
 0x130   :  { %v11013_v20 = vpop.f32.mrf.mxu0  ;;  %1138 = vmatprep.subr.mxu0 %v14371_v51  ;;  %v453_v19 = vadd.f32 %v10546_v12, %v10536_v3  ;;  %v14379_v12 = vld [vmem:[#allocation46_spill] sm:$0xff] }
 0x131   :  { %1139 = vmatpush1.msra.mxu0 %v1077_v29  ;;  %v11018_v38 = vpop.f32.mrf.mxu1  ;;  %v1072_v29 = vadd.f32 %v10879_v36, %v807_v5  ;;  %v1071_v25 = vadd.f32 %v10842_v35, %v806_v56  ;;  %v1769_v36 = vpack.c.bf16 %v7715_v59, %v7714_v48  ;;  %v7716_v35 = vld [vmem:[%s14306_s23 + $0x1d8] sm:$0xff]  ;;  %v802_v5 = vadd.f32 %v10794_v4, %v10534_v1  ;;  %v14375_v4 = vld [vmem:[#allocation55_spill] sm:$0xff]  ;;  %v14382_v59 = vld [vmem:[#allocation58_spill] sm:$0xff] }
 0x132   :  { %v11020_v39 = vpop.f32.mrf.mxu0  ;;  %1140 = vmatprep.subr.mxu0 %v14371_v51  ;;  %v801_v32 = vadd.f32 %v14373_v30, %v456_v53  ;;  %v800_v11 = vadd.f32 %v14375_v4, %v453_v19  ;;  %v14385_v19 = vld [vmem:[#allocation38_spill] sm:$0xff]  ;;  %v14391_v4 = vld [vmem:[#allocation27_spill] sm:$0xff] }
 0x133   :  { %1141 = vmatpush1.msra.mxu0 %v1076_v54  ;;  %v11025_v8 = vpop.f32.mrf.mxu1  ;;  %v1070_v54 = vadd.f32 %v10884_v13, %v805_v14  ;;  %v14372_v13 = vld [vmem:[#allocation60_spill] sm:$0xff] }
 0x134   :  { %v11032_v26 = vpop.f32.mrf.mxu0  ;;  %1142 = vmatprep.subr.mxu0 %v14371_v51 }
 0x135   :  { %1143 = vmatpush1.msra.mxu0 %v1075_v58  ;;  %v11050_v6 = vpop.f32.mrf.mxu1  ;;  %9160 = vmatmul.mubr.msk.bf16.gmra.mxu1 %vm177_vm1, %v1768_v44  ;;  %v1770_v58 = vpack.c.bf16 %v7716_v35, %v7716_v35  ;;  %v1068_v44 = vadd.f32 %v14372_v13, %v803_v28  ;;  %v14387_v13 = vld [vmem:[#allocation43_spill] sm:$0xff] }
 0x136   :  { %v11056_v15 = vpop.f32.mrf.mxu0  ;;  %1144 = vmatprep.subr.mxu0 %v14371_v51  ;;  %9163 = vmatprep.mubr.msk.bf16.mxu1 %vm177_vm1, %v1769_v36  ;;  %v1065_v36 = vadd.f32 %v14382_v59, %v800_v11  ;;  %v818_v11 = vadd.f32 %v10964_v49, %v14391_v4  ;;  %v75_v59 = vld [vmem:[%s14314_s27 + $0x68] sm:$0xff] }
 0x137   :  { %1145 = vmatpush1.msra.mxu0 %v1074_v18  ;;  %v11065_v61 = vpop.f32.mrf.mxu1  ;;  %v1069_v18 = vadd.f32 %v10863_v37, %v804_v23  ;;  %v14374_v37 = vld [vmem:[#allocation53_spill] sm:$0xff] }
 0x138   :  { %v11068_v50 = vpop.f32.mrf.mxu0  ;;  %1146 = vmatprep.subr.mxu0 %v14371_v51  ;;  %v1067_v1 = vadd.f32 %v14374_v37, %v802_v5  ;;  %v14381_v23 = vld [vmem:[#allocation49_spill] sm:$0xff] }
 0x139   :  { %1147 = vmatpush1.msra.mxu0 %v1073_v0  ;;  %v11075_v47 = vpop.f32.mrf.mxu1  ;;  %v14376_v0 = vld [vmem:[#allocation50_spill] sm:$0xff]  ;;  %v14384_v5 = vld [vmem:[#allocation37_spill] sm:$0xff] }
 0x13a   :  { %v9045_v10 = vpop.f32.mrf.mxu0  ;;  %1148 = vmatprep.subr.mxu0 %v14371_v51 }
 0x13b   :  { %1149 = vmatpush1.msra.mxu0 %v1072_v29  ;;  %v9075_v41 = vpop.f32.mrf.mxu1  ;;  %v14378_v29 = vld [vmem:[#allocation62_spill] sm:$0xff]  ;;  %v826_v14 = vadd.f32 %v9045_v10, %v14379_v12  ;;  %v68_v12 = vld [vmem:[%s14314_s27 + $0x30] sm:$0xff] }
 0x13c   :  { %v786_v16 = vpop.f32.mrf.mxu0  ;;  %1150 = vmatprep.subr.mxu0 %v14371_v51  ;;  %v1066_v3 = vadd.f32 %v14378_v29, %v801_v32  ;;  %v66_v29 = vld [vmem:[%s14314_s27 + $0x20] sm:$0xff] }
 0x13d   :  { %1151 = vmatpush1.msra.mxu0 %v1071_v25  ;;  %v1051_v55 = vpop.f32.mrf.mxu1  ;;  %9164 = vmatmul.mubr.msk.bf16.gmra.mxu1 %vm177_vm1, %v1770_v58  ;;  %v14380_v25 = vld [vmem:[#allocation47_spill] sm:$0xff]  ;;  %v1091_v58 = vadd.f32 %v9075_v41, %v826_v14 }
 0x13e   :  { %v9046_v2 = vpop.f32.mrf.mxu0  ;;  %1152 = vmatprep.subr.mxu0 %v14371_v51  ;;  %7772 = vmatprep.mubr.msk.f32.mxu1 %vm1098_vm2, %v10594_v9  ;;  %v14377_v9 = vld [vmem:[#allocation51_spill] sm:$0xff]  ;;  %v549_v48 = vadd.f32 %v14381_v23, %v14380_v25  ;;  %v70_v25 = vld [vmem:[%s14314_s27 + $0x40] sm:$0xff]  ;;  %v73_v23 = vld [vmem:[%s14314_s27 + $0x58] sm:$0xff] }
 0x13f   :  { %1153 = vmatpush1.msra.mxu0 %v1070_v54  ;;  %v9076_v21 = vpop.f32.mrf.mxu1  ;;  %v552_v34 = vadd.f32 %v14377_v9, %v14376_v0  ;;  %v14383_v2 = vld [vmem:[#allocation42_spill] sm:$0xff]  ;;  %v71_v14 = vld [vmem:[%s14314_s27 + $0x48] sm:$0xff] }
 0x140   :  { %1154 = vmatprep.subr.mxu0 %v14371_v51  ;;  %v789_v56 = vpop.f32.mrf.mxu0  ;;  %v824_v54 = vadd.f32 %v786_v16, %v549_v48  ;;  %v823_v10 = vadd.f32 %v11056_v15, %v14383_v2  ;;  %v14386_v16 = vld [vmem:[#allocation41_spill] sm:$0xff]  ;;  %v72_v48 = vld [vmem:[%s14314_s27 + $0x50] sm:$0xff] }
 0x141   :  { %1155 = vmatpush1.msra.mxu0 %v1069_v18  ;;  %v825_v35 = vadd.f32 %v789_v56, %v552_v34  ;;  %v1054_v28 = vpop.f32.mrf.mxu1  ;;  %v822_v18 = vadd.f32 %v11020_v39, %v14384_v5  ;;  %v533_v41 = vadd.f32 %v14386_v16, %v14385_v19  ;;  %v14388_v39 = vld [vmem:[#allocation32_spill] sm:$0xff]  ;;  %v14393_v56 = vld [vmem:[#allocation31_spill] sm:$0xff]  ;;  %v1083_v34 = vadd.f32 %v10966_v40, %v818_v11  ;;  %v65_v40 = vld [vmem:[%s14314_s27 + $0x18] sm:$0xff] }
 0x142   :  { %1156 = vmatprep.subr.mxu0 %v14371_v51  ;;  %v1089_v21 = vadd.f32 %v1051_v55, %v824_v54  ;;  %v1088_v30 = vadd.f32 %v11065_v61, %v823_v10  ;;  %v819_v55 = vadd.f32 %v11000_v33, %v14388_v39  ;;  %v14390_v61 = vld [vmem:[#allocation34_spill] sm:$0xff]  ;;  %v79_v54 = vld [vmem:[%s14314_s27 + $0x88] sm:$0xff]  ;;  %v81_v2 = vld [vmem:[%s14314_s27 + $0x98] sm:$0xff] }
 0x143   :  { %1157 = vmatpush1.msra.mxu0 %v1068_v44  ;;  %v1090_v53 = vadd.f32 %v1054_v28, %v825_v35  ;;  %v821_v44 = vadd.f32 %v11068_v50, %v14387_v13  ;;  %v820_v15 = vadd.f32 %v11032_v26, %v533_v41  ;;  %v1087_v32 = vadd.f32 %v11025_v8, %v822_v18  ;;  %v14389_v50 = vld [vmem:[#allocation33_spill] sm:$0xff]  ;;  %v14392_v8 = vld [vmem:[#allocation28_spill] sm:$0xff]  ;;  %v7610_v16 = vld [vmem:[%s14306_s23 + $0x100] sm:$0xff]  ;;  %v11269_v11 = vpop.f32.mrf.mxu1 }
 0x144   :  { %1158 = vmatprep.subr.mxu0 %v14371_v51  ;;  %v517_v0 = vadd.f32 %v14393_v56, %v14392_v8  ;;  %v77_v35 = vld [vmem:[%s14314_s27 + $0x78] sm:$0xff]  ;;  %v76_v28 = vld [vmem:[%s14314_s27 + $0x70] sm:$0xff]  ;;  %v11258_v39 = vld [vmem:[#allocation4] sm:$0xff] }
 0x145   :  { %1159 = vmatpush1.msra.mxu0 %v1067_v1  ;;  %v1086_v37 = vadd.f32 %v11075_v47, %v821_v44  ;;  %v520_v1 = vadd.f32 %v14390_v61, %v14389_v50  ;;  %v1085_v26 = vadd.f32 %v11050_v6, %v820_v15  ;;  %v1084_v47 = vadd.f32 %v11010_v42, %v819_v55  ;;  %v62_v42 = vld [vmem:[%s14314_s27] sm:$0xff]  ;;  %v80_v10 = vld [vmem:[%s14314_s27 + $0x90] sm:$0xff]  ;;  %v7609_v18 = vld [vmem:[%s14306_s23 + $0xf8] sm:$0xff] }
 0x146   :  { %1160 = vmatprep.subr.mxu0 %v14371_v51  ;;  %v816_v9 = vadd.f32 %v10973_v24, %v517_v0  ;;  %v9874_v24 = vld [vmem:[%s14304_s26] sm:$0x3f]   ;;  %v7608_v5 = vld [vmem:[%s14306_s23 + $0xf0] sm:$0xff]  ;;  %v14400_v55 = vld [vmem:[#allocation59_spill] sm:$0xff]  ;;  %2405 = vst.msk [vmem:[#allocation2 + $0x10] sm:$0xff] %vm2402_vm3, %v11258_v39 }
 0x147   :  { %1161 = vmatpush1.msra.mxu0 %v1066_v3  ;;  %v817_v33 = vadd.f32 %v11013_v20, %v520_v1  ;;  %v14394_v20 = vld [vmem:[#allocation10_spill] sm:$0xff]  ;;  %v69_v3 = vld [vmem:[%s14314_s27 + $0x38] sm:$0xff]  ;;  %v1302_v19 = vpack.c.bf16 %v7609_v18, %v7608_v5  ;;  %v14395_v41 = vld [vmem:[#allocation52_spill] sm:$0xff]  ;;  %2406 = vst.msk [vmem:[#allocation2 + $0x18] sm:$0xff] %vm2402_vm3, %v11258_v39 }
 0x148   :  { %1162 = vmatprep.subr.mxu0 %v14371_v51  ;;  %v1081_v6 = vadd.f32 %v10989_v60, %v816_v9  ;;  %v64_v60 = vld [vmem:[%s14314_s27 + $0x10] sm:$0xff]  ;;  %v1303_v13 = vpack.c.bf16 %v14395_v41, %v7610_v16  ;;  %v14404_v1 = vld [vmem:[#allocation63_spill] sm:$0xff]  ;;  %v14406_v56 = vld [vmem:[#allocation66_spill] sm:$0xff]  ;;  %2403 = vst.msk [vmem:[#allocation2] sm:$0xff] %vm2402_vm3, %v11258_v39 }
 0x149   :  { %1163 = vmatpush1.msra.mxu0 %v1065_v36  ;;  %v1082_v49 = vadd.f32 %v11018_v38, %v817_v33  ;;  %v9875_v38 = vld [vmem:[%s14304_s26 + $0x18] sm:$0x3f]   ;;  %v74_v36 = vld [vmem:[%s14314_s27 + $0x60] sm:$0xff]  ;;  %v14396_v44 = vld [vmem:[#allocation56_spill] sm:$0xff]  ;;  %2404 = vst.msk [vmem:[#allocation2 + $0x8] sm:$0xff] %vm2402_vm3, %v11258_v39 }
 0x14a   :  { %1174 = vmatprep.subr.mxu0 %v14371_v51  ;;  %v14403_v61 = vld [vmem:[#allocation64_spill] sm:$0xff]  ;;  %v14407_v0 = vld [vmem:[#allocation65_spill] sm:$0xff]  ;;  %v14410_v9 = vld [vmem:[#allocation67_spill] sm:$0xff]  ;;  %2407 = vst.msk [vmem:[#allocation2 + $0x20] sm:$0xff] %vm2402_vm3, %v11258_v39 }
 0x14b   :  { %1175 = vmatpush2.msra.mxu0 %v1091_v58  ;;  %v78_v58 = vld [vmem:[%s14314_s27 + $0x80] sm:$0xff]  ;;  %v14405_v4 = vpack.c.bf16 %v14403_v61, %v14404_v1  ;;  %v14408_v33 = vpack.c.bf16 %v14406_v56, %v14407_v0  ;;  %2408 = vst.msk [vmem:[#allocation2 + $0x28] sm:$0xff] %vm2402_vm3, %v11258_v39  ;;  %2409 = vst.msk [vmem:[#allocation2 + $0x30] sm:$0xff] %vm2402_vm3, %v11258_v39  ;;  %v14436_v41 = vld [vmem:[#allocation20_spill] sm:$0xff] }
 0x14c   :  { %1176 = vmatprep.subr.mxu0 %v14371_v51  ;;  %2410 = vst.msk [vmem:[#allocation2 + $0x38] sm:$0xff] %vm2402_vm3, %v11258_v39  ;;  %2411 = vst.msk [vmem:[#allocation2 + $0x40] sm:$0xff] %vm2402_vm3, %v11258_v39  ;;  %v14443_v1 = vld [vmem:[#allocation24_spill] sm:$0xff] }
 0x14d   :  { %1177 = vmatpush2.msra.mxu0 %v1090_v53  ;;  %v83_v53 = vld [vmem:[%s14314_s27 + $0xa8] sm:$0x1]  ;;  %2412 = vst.msk [vmem:[#allocation2 + $0x48] sm:$0xff] %vm2402_vm3, %v11258_v39  ;;  %2413 = vst.msk [vmem:[#allocation2 + $0x50] sm:$0xff] %vm2402_vm3, %v11258_v39 }
 0x14e   :  { %1178 = vmatprep.subr.mxu0 %v14371_v51  ;;  %2414 = vst.msk [vmem:[#allocation2 + $0x58] sm:$0xff] %vm2402_vm3, %v11258_v39  ;;  %2417 = vst.msk [vmem:[#allocation2 + $0x70] sm:$0xff] %vm2402_vm3, %v11258_v39 }
 0x14f   :  { %1179 = vmatpush2.msra.mxu0 %v1089_v21  ;;  %v82_v21 = vld [vmem:[%s14314_s27 + $0xa0] sm:$0x1]  ;;  %2418 = vst.msk [vmem:[#allocation2 + $0x78] sm:$0xff] %vm2402_vm3, %v11258_v39  ;;  %2419 = vst.msk [vmem:[#allocation2 + $0x80] sm:$0xff] %vm2402_vm3, %v11258_v39 }
 0x150   :  { %1180 = vmatprep.subr.mxu0 %v14371_v51  ;;  %2420 = vst.msk [vmem:[#allocation2 + $0x88] sm:$0xff] %vm2402_vm3, %v11258_v39  ;;  %2421 = vst.msk [vmem:[#allocation2 + $0x90] sm:$0xff] %vm2402_vm3, %v11258_v39 }
 0x151   :  { %1181 = vmatpush2.msra.mxu0 %v1088_v30  ;;  %v14397_v30 = vld [vmem:[#allocation54_spill] sm:$0xff]  ;;  %2422 = vst.msk [vmem:[#allocation2 + $0x98] sm:$0xff] %vm2402_vm3, %v11258_v39  ;;  %2423 = vst.msk [vmem:[#allocation2 + $0xa0] sm:$0xff] %vm2402_vm3, %v11258_v39 }
 0x152   :  { %1182 = vmatprep.subr.mxu0 %v14371_v51  ;;  %v14398_v15 = vpack.c.bf16 %v14396_v44, %v14397_v30  ;;  %2424 = vst.msk [vmem:[#allocation2 + $0xa8] sm:$0xff] %vm2402_vm3, %v11258_v39  ;;  %2425 = vst.msk [vmem:[#allocation2 + $0xb0] sm:$0xff] %vm2402_vm3, %v11258_v39 }
 0x153   :  { %1183 = vmatpush2.msra.mxu0 %v1087_v32  ;;  %v14399_v32 = vld [vmem:[#allocation11_spill] sm:$0xff]  ;;  %2426 = vst.msk [vmem:[#allocation2 + $0xb8] sm:$0xff] %vm2402_vm3, %v11258_v39  ;;  %2427 = vst.msk [vmem:[#allocation2 + $0xc0] sm:$0xff] %vm2402_vm3, %v11258_v39 }
 0x154   :  { %1184 = vmatprep.subr.mxu0 %v14371_v51  ;;  %2428 = vst.msk [vmem:[#allocation2 + $0xc8] sm:$0xff] %vm2402_vm3, %v11258_v39  ;;  %2431 = vst.msk [vmem:[#allocation3] sm:$0xff] %vm2402_vm3, %v11258_v39 }
 0x155   :  { %1185 = vmatpush2.msra.mxu0 %v1086_v37  ;;  %v14401_v37 = vld [vmem:[#allocation57_spill] sm:$0xff]  ;;  %2432 = vst.msk [vmem:[#allocation3 + $0x8] sm:$0xff] %vm2402_vm3, %v11258_v39  ;;  %2433 = vst.msk [vmem:[#allocation3 + $0x10] sm:$0xff] %vm2402_vm3, %v11258_v39 }
 0x156   :  { %1186 = vmatprep.subr.mxu0 %v14371_v51  ;;  %v14402_v50 = vpack.c.bf16 %v14400_v55, %v14401_v37  ;;  %2434 = vst.msk [vmem:[#allocation3 + $0x18] sm:$0xff] %vm2402_vm3, %v11258_v39  ;;  %2435 = vst.msk [vmem:[#allocation3 + $0x20] sm:$0xff] %vm2402_vm3, %v11258_v39  ;;  %v14441_v37 = vld [vmem:[#allocation22_spill] sm:$0xff] }
 0x157   :  { %1187 = vmatpush2.msra.mxu0 %v1085_v26  ;;  %v11271_v26 = vpop.f32.mrf.mxu1  ;;  %2436 = vst.msk [vmem:[#allocation3 + $0x28] sm:$0xff] %vm2402_vm3, %v11258_v39  ;;  %2437 = vst.msk [vmem:[#allocation3 + $0x30] sm:$0xff] %vm2402_vm3, %v11258_v39 }
 0x158   :  { %1188 = vmatprep.subr.mxu0 %v14371_v51  ;;  %2438 = vst.msk [vmem:[#allocation3 + $0x38] sm:$0xff] %vm2402_vm3, %v11258_v39  ;;  %2439 = vst.msk [vmem:[#allocation3 + $0x40] sm:$0xff] %vm2402_vm3, %v11258_v39 }
 0x159   :  { %1189 = vmatpush2.msra.mxu0 %v1084_v47  ;;  %v11273_v8 = vpop.f32.mrf.mxu1  ;;  %v14409_v47 = vld [vmem:[#allocation68_spill] sm:$0xff]  ;;  %2440 = vst.msk [vmem:[#allocation3 + $0x48] sm:$0xff] %vm2402_vm3, %v11258_v39  ;;  %2441 = vst.msk [vmem:[#allocation3 + $0x50] sm:$0xff] %vm2402_vm3, %v11258_v39 }
 0x15a   :  { %1190 = vmatprep.subr.mxu0 %v14371_v51  ;;  %2442 = vst.msk [vmem:[#allocation3 + $0x58] sm:$0xff] %vm2402_vm3, %v11258_v39  ;;  %2445 = vst.msk [vmem:[#allocation3 + $0x70] sm:$0xff] %vm2402_vm3, %v11258_v39 }
 0x15b   :  { %1191 = vmatpush2.msra.mxu0 %v1083_v34  ;;  %v14411_v34 = vpack.c.bf16 %v14409_v47, %v14410_v9  ;;  %2446 = vst.msk [vmem:[#allocation3 + $0x78] sm:$0xff] %vm2402_vm3, %v11258_v39  ;;  %2447 = vst.msk [vmem:[#allocation3 + $0x80] sm:$0xff] %vm2402_vm3, %v11258_v39 }
 0x15c   :  { %1192 = vmatprep.subr.mxu0 %v14371_v51  ;;  %2448 = vst.msk [vmem:[#allocation3 + $0x88] sm:$0xff] %vm2402_vm3, %v11258_v39  ;;  %2449 = vst.msk [vmem:[#allocation3 + $0x90] sm:$0xff] %vm2402_vm3, %v11258_v39 }
 0x15d   :  { %1193 = vmatpush2.msra.mxu0 %v1082_v49  ;;  %v11283_v49 = vpop.f32.mrf.mxu1  ;;  %2450 = vst.msk [vmem:[#allocation3 + $0x98] sm:$0xff] %vm2402_vm3, %v11258_v39  ;;  %2451 = vst.msk [vmem:[#allocation3 + $0xa0] sm:$0xff] %vm2402_vm3, %v11258_v39 }
 0x15e   :  { %1194 = vmatprep.subr.mxu0 %v14371_v51  ;;  %v67_v51 = vld [vmem:[%s14314_s27 + $0x28] sm:$0xff]  ;;  %2452 = vst.msk [vmem:[#allocation3 + $0xa8] sm:$0xff] %vm2402_vm3, %v11258_v39  ;;  %2453 = vst.msk [vmem:[#allocation3 + $0xb0] sm:$0xff] %vm2402_vm3, %v11258_v39 }
 0x15f   :  { %1195 = vmatpush2.msra.mxu0 %v1081_v6  ;;  %v11285_v6 = vpop.f32.mrf.mxu1  ;;  %2454 = vst.msk [vmem:[#allocation3 + $0xb8] sm:$0xff] %vm2402_vm3, %v11258_v39  ;;  %2455 = vst.msk [vmem:[#allocation3 + $0xc0] sm:$0xff] %vm2402_vm3, %v11258_v39 }
 0x160   :  { %1197 = vmatmul.mubr.f32.vlgmr.msra.gmra.mxu0 %v62_v42  ;;  %9684 = vmatprep.subr.msk.bf16.mxu0 %vm220_vm0, %v9874_v24  ;;  %v14412_v24 = vld [vmem:[#allocation70_spill] sm:$0xff]  ;;  %2456 = vst.msk [vmem:[#allocation3 + $0xc8] sm:$0xff] %vm2402_vm3, %v11258_v39 }
 0x161   :  { %7598 = vmatprep.mubr.msk.f32.mxu0 %vm1098_vm2, %v65_v40  ;;  %9108 = vmatpush3.bf16.msra.mxu0 %v14394_v20  ;;  %v11287_v42 = vpop.f32.mrf.mxu1 }
 0x162   :  { %9686 = vmatprep.subr.msk.bf16.mxu0 %vm220_vm0, %v9875_v38  ;;  %v14416_v38 = vld [vmem:[#allocation71_spill] sm:$0xff]  ;;  %vm14203_vm0 = vcmask 128000  }
 0x163   :  { %v11289_v40 = vpop.f32.mrf.mxu1 }
 0x164   :  { %1202 = vmatmul.mubr.f32.gmra.mxu0 %v64_v60  ;;  %v14413_v60 = vld [vmem:[#allocation69_spill] sm:$0xff] }
 0x165   :  { %7599 = vmatprep.mubr.msk.f32.mxu0 %vm1098_vm2, %v67_v51  ;;  %v14414_v20 = vpack.c.bf16 %v14412_v24, %v14413_v60  ;;  %v14415_v51 = vld [vmem:[#allocation72_spill] sm:$0xff]  ;;  %v14448_v24 = vld [vmem:[#allocation29_spill] sm:$0xff] }
 0x168   :  { %1207 = vmatmul.mubr.f32.gmra.mxu0 %v66_v29  ;;  %v14417_v29 = vpack.c.bf16 %v14415_v51, %v14416_v38  ;;  %v14450_v51 = vld [vmem:[#allocation35_spill] sm:$0xff] }
 0x169   :  { %7600 = vmatprep.mubr.msk.f32.mxu0 %vm1098_vm2, %v69_v3  ;;  %v11299_v3 = vpop.f32.mrf.mxu1 }
 0x16c   :  { %1212 = vmatmul.mubr.f32.gmra.mxu0 %v68_v12  ;;  %v11301_v12 = vpop.f32.mrf.mxu1 }
 0x16d   :  { %7601 = vmatprep.mubr.msk.f32.mxu0 %vm1098_vm2, %v71_v14 }
 0x16e   :  { %v11399_v14 = vpop.f32.mrf.mxu1 }
 0x170   :  { %1217 = vmatmul.mubr.f32.gmra.mxu0 %v70_v25  ;;  %v11401_v25 = vpop.f32.mrf.mxu1 }
 0x171   :  { %7602 = vmatprep.mubr.msk.f32.mxu0 %vm1098_vm2, %v73_v23  ;;  %v14418_v23 = vpack.c.bf16 %v10954_v46, %v10941_v17 }
 0x174   :  { %1222 = vmatmul.mubr.f32.gmra.mxu0 %v72_v48  ;;  %v11411_v48 = vpop.f32.mrf.mxu1 }
 0x175   :  { %7603 = vmatprep.mubr.msk.f32.mxu0 %vm1098_vm2, %v75_v59 }
 0x176   :  { %v11413_v59 = vpop.f32.mrf.mxu1 }
 0x178   :  { %1227 = vmatmul.mubr.f32.gmra.mxu0 %v74_v36  ;;  %v11415_v36 = vpop.f32.mrf.mxu1 }
 0x179   :  { %7604 = vmatprep.mubr.msk.f32.mxu0 %vm1098_vm2, %v77_v35 }
 0x17a   :  { %v11417_v35 = vpop.f32.mrf.mxu1 }
 0x17c   :  { %1232 = vmatmul.mubr.f32.gmra.mxu0 %v76_v28  ;;  %v11427_v46 = vpop.f32.mrf.mxu1 }
 0x17d   :  { %7605 = vmatprep.mubr.msk.f32.mxu0 %vm1098_vm2, %v79_v54 }
 0x180   :  { %1237 = vmatmul.mubr.f32.gmra.mxu0 %v78_v58  ;;  %v14428_v58 = vld [vmem:[#allocation16_spill] sm:$0xff] }
 0x181   :  { %7606 = vmatprep.mubr.msk.f32.mxu0 %vm1098_vm2, %v81_v2  ;;  %v2013_v2 = vpack.c.bf16 %v14429_v63, %v14428_v58 }
 0x184   :  { %1242 = vmatmul.mubr.f32.gmra.mxu0 %v80_v10 }
 0x185   :  { %7607 = vmatprep.mubr.msk.f32.mxu0 %vm1098_vm2, %v83_v53 }
 0x188   :  { %1247 = vmatmul.mubr.f32.gmra.mxu0 %v82_v21  ;;  %v14434_v21 = vld [vmem:[#allocation18_spill] sm:$0xff] }
 0x189   :  { %9109 = vmatprep.mubr.msk.bf16.mxu0 %vm177_vm1, %v1302_v19  ;;  %v14435_v19 = vld [vmem:[#allocation19_spill] sm:$0xff] }
 0x18a   :  { %v2014_v16 = vpack.c.bf16 %v14435_v19, %v14434_v21  ;;  %v7755_v19 = vld [vmem:[%s14305_s2 + $0x1c8] sm:$0xff] }
 0x18c   :  { %9110 = vmatmul.mubr.msk.bf16.vlgmr.msra.gmra.mxu0 %vm177_vm1, %v1303_v13  ;;  %v14437_v13 = vld [vmem:[#allocation21_spill] sm:$0xff] }
 0x18d   :  { %9113 = vmatprep.mubr.msk.bf16.mxu0 %vm177_vm1, %v14398_v15  ;;  %9168 = vmatpush3.bf16.msra.mxu0 %v14399_v32  ;;  %v2015_v44 = vpack.c.bf16 %v14437_v13, %v14436_v41  ;;  %v14455_v13 = vld [vmem:[#allocation45_spill] sm:$0xff] }
 0x18e   :  { %9197 = vmatprep.subr.bf16.mxu0 %v11258_v39 }
 0x194   :  { %9114 = vmatmul.mubr.msk.bf16.gmra.mxu0 %vm177_vm1, %v14402_v50  ;;  %v14442_v50 = vld [vmem:[#allocation23_spill] sm:$0xff] }
 0x195   :  { %9117 = vmatprep.mubr.msk.bf16.mxu0 %vm177_vm1, %v14405_v4  ;;  %v2016_v61 = vpack.c.bf16 %v14442_v50, %v14441_v37  ;;  %v14444_v4 = vld [vmem:[#allocation25_spill] sm:$0xff] }
 0x196   :  { %v2017_v56 = vpack.c.bf16 %v14444_v4, %v14443_v1  ;;  %v7757_v1 = vld [vmem:[%s14305_s2 + $0x1d8] sm:$0xff] }
 0x19c   :  { %9118 = vmatmul.mubr.msk.bf16.gmra.mxu0 %vm177_vm1, %v14408_v33 }
 0x19d   :  { %9121 = vmatprep.mubr.msk.bf16.mxu0 %vm177_vm1, %v14411_v34  ;;  %v14447_v34 = vld [vmem:[#allocation26_spill] sm:$0xff] }
 0x19e   :  { %v2018_v60 = vpack.c.bf16 %v14448_v24, %v14447_v34  ;;  %v2024_v34 = vpack.c.bf16 %v7757_v1, %v7757_v1 }
 0x19f   :  { %v11429_v17 = vpop.f32.mrf.mxu1 }
 0x1a0   :  { %14419 = vst [vmem:[#allocation60_spill] sm:$0xff] %v11429_v17 }
 0x1a1   :  { %v11435_v54 = vpop.f32.mrf.mxu1 }
 0x1a2   :  { %14422 = vst [vmem:[#allocation61_spill] sm:$0xff] %v11435_v54 }
 0x1a3   :  { %v11437_v57 = vpop.f32.mrf.mxu1 }
 0x1a4   :  { %9122 = vmatmul.mubr.msk.bf16.gmra.mxu0 %vm177_vm1, %v14414_v20  ;;  %14423 = vst [vmem:[#allocation53_spill] sm:$0xff] %v11437_v57  ;;  %v14449_v20 = vld [vmem:[#allocation30_spill] sm:$0xff] }
 0x1a5   :  { %9125 = vmatprep.mubr.msk.bf16.mxu0 %vm177_vm1, %v14417_v29  ;;  %v11441_v27 = vpop.f32.mrf.mxu1  ;;  %v2019_v38 = vpack.c.bf16 %v14450_v51, %v14449_v20 }
 0x1a6   :  { %14424 = vst [vmem:[#allocation55_spill] sm:$0xff] %v11441_v27 }
 0x1ac   :  { %9126 = vmatmul.mubr.msk.bf16.gmra.mxu0 %vm177_vm1, %v14418_v23 }
 0x1ad   :  { %9129 = vmatprep.mubr.msk.bf16.mxu0 %vm177_vm1, %v1312_v45  ;;  %v14421_v45 = vld [vmem:[#allocation13_spill] sm:$0xff] }
 0x1ae   :  { %v2011_v28 = vpack.c.bf16 %v14421_v45, %v14420_v52  ;;  %v14451_v45 = vld [vmem:[#allocation36_spill] sm:$0xff] }
 0x1b4   :  { %9130 = vmatmul.mubr.msk.bf16.gmra.mxu0 %vm177_vm1, %v1313_v31 }
 0x1b5   :  { %9133 = vmatprep.mubr.msk.bf16.mxu0 %vm177_vm1, %v1314_v62  ;;  %v2012_v62 = vpack.c.bf16 %v14427_v7, %v14426_v22  ;;  %v14453_v7 = vld [vmem:[#allocation40_spill] sm:$0xff] }
 0x1ba   :  { %v11443_v31 = vpop.f32.mrf.mxu1 }
 0x1bb   :  { %14425 = vst [vmem:[#allocation50_spill] sm:$0xff] %v11443_v31 }
 0x1bc   :  { %9134 = vmatmul.mubr.msk.bf16.gmra.mxu0 %vm177_vm1, %v1315_v43  ;;  %v11449_v10 = vpop.f32.mrf.mxu1 }
 0x1bd   :  { %9169 = vmatprep.mubr.msk.bf16.mxu0 %vm177_vm1, %v2011_v28  ;;  %14430 = vst [vmem:[#allocation51_spill] sm:$0xff] %v11449_v10  ;;  %v14452_v28 = vld [vmem:[#allocation39_spill] sm:$0xff] }
 0x1be   :  { %v11451_v53 = vpop.f32.mrf.mxu1  ;;  %v2020_v22 = vpack.c.bf16 %v14452_v28, %v14451_v45 }
 0x1bf   :  { %14431 = vst [vmem:[#allocation62_spill] sm:$0xff] %v11451_v53 }
 0x1c0   :  { %v11455_v5 = vpop.f32.mrf.mxu1 }
 0x1c1   :  { %14432 = vst [vmem:[#allocation46_spill] sm:$0xff] %v11455_v5 }
 0x1c4   :  { %9170 = vmatmul.mubr.msk.bf16.vlgmr.msra.gmra.mxu0 %vm177_vm1, %v2012_v62  ;;  %v14454_v62 = vld [vmem:[#allocation44_spill] sm:$0xff] }
 0x1c5   :  { %9173 = vmatprep.mubr.msk.bf16.mxu0 %vm177_vm1, %v2013_v2  ;;  %v11457_v18 = vpop.f32.mrf.mxu1  ;;  %v2021_v58 = vpack.c.bf16 %v14454_v62, %v14453_v7 }
 0x1c6   :  { %14433 = vst [vmem:[#allocation47_spill] sm:$0xff] %v11457_v18 }
 0x1c7   :  { %v11463_v30 = vpop.f32.mrf.mxu1 }
 0x1c8   :  { %14438 = vst [vmem:[#allocation49_spill] sm:$0xff] %v11463_v30 }
 0x1c9   :  { %v9106_v15 = vpop.f32.mrf.mxu1 }
 0x1cb   :  { %v11467_v32 = vpop.f32.mrf.mxu1 }
 0x1cc   :  { %9174 = vmatmul.mubr.msk.bf16.gmra.mxu0 %vm177_vm1, %v2014_v16  ;;  %14439 = vst [vmem:[#allocation58_spill] sm:$0xff] %v11467_v32  ;;  %v7756_v16 = vld [vmem:[%s14305_s2 + $0x1d0] sm:$0xff] }
 0x1cd   :  { %9177 = vmatprep.mubr.msk.bf16.mxu0 %vm177_vm1, %v2015_v44  ;;  %v11469_v55 = vpop.f32.mrf.mxu1  ;;  %v14456_v44 = vld [vmem:[#allocation48_spill] sm:$0xff]  ;;  %v2023_v37 = vpack.c.bf16 %v7756_v16, %v7755_v19  ;;  %v11559_v19 = vld [vmem:[%s14468_s22] ss:$0 sm:$0xff] }
 0x1ce   :  { %14440 = vst [vmem:[#allocation42_spill] sm:$0xff] %v11469_v55  ;;  %v2022_v15 = vpack.c.bf16 %v14456_v44, %v14455_v13  ;;  %v9699_v13 = vld [vmem:[%s14467_s7 + $0x30] sm:$0xff]  }
 0x1cf   :  { %v11475_v0 = vpop.f32.mrf.mxu1 }
 0x1d0   :  { %14445 = vst [vmem:[#allocation37_spill] sm:$0xff] %v11475_v0 }
 0x1d1   :  { %v11477_v33 = vpop.f32.mrf.mxu1 }
 0x1d3   :  { %v11481_v47 = vpop.f32.mrf.mxu1 }
 0x1d4   :  { %9178 = vmatmul.mubr.msk.bf16.gmra.mxu0 %vm177_vm1, %v2016_v61  ;;  %14446 = vst [vmem:[#allocation38_spill] sm:$0xff] %v11481_v47 }
 0x1d5   :  { %9181 = vmatprep.mubr.msk.bf16.mxu0 %vm177_vm1, %v2017_v56  ;;  %v11483_v9 = vpop.f32.mrf.mxu1 }
 0x1d7   :  { %v11489_v29 = vpop.f32.mrf.mxu1 }
 0x1d9   :  { %v11491_v23 = vpop.f32.mrf.mxu1 }
 0x1db   :  { %v11495_v43 = vpop.f32.mrf.mxu1 }
 0x1dc   :  { %9182 = vmatmul.mubr.msk.bf16.gmra.mxu0 %vm177_vm1, %v2018_v60 }
 0x1dd   :  { %9185 = vmatprep.mubr.msk.bf16.mxu0 %vm177_vm1, %v2019_v38  ;;  %v11497_v52 = vpop.f32.mrf.mxu1 }
 0x1df   :  { %v11503_v63 = vpop.f32.mrf.mxu1 }
 0x1e1   :  { %v11505_v2 = vpop.f32.mrf.mxu1 }
 0x1e3   :  { %v11509_v21 = vpop.f32.mrf.mxu1 }
 0x1e4   :  { %9186 = vmatmul.mubr.msk.bf16.gmra.mxu0 %vm177_vm1, %v2020_v22 }
 0x1e5   :  { %9189 = vmatprep.mubr.msk.bf16.mxu0 %vm177_vm1, %v2021_v58  ;;  %v11517_v41 = vpop.f32.mrf.mxu1  ;;  %v9698_v58 = vld [vmem:[%s14467_s7 + $0x38] sm:$0xff]  }
 0x1e6   :  { %9198 = vmatpush3.bf16.msra.mxu0 %v9698_v58 }
 0x1e7   :  { %v11521_v50 = vpop.f32.mrf.mxu1  ;;  %9199 = vmatprep.subr.bf16.mxu0 %v11258_v39 }
 0x1e9   :  { %v11523_v61 = vpop.f32.mrf.mxu1 }
 0x1ea   :  { %9200 = vmatpush3.bf16.msra.mxu0 %v9699_v13 }
 0x1eb   :  { %v11530_v4 = vpop.f32.mrf.mxu1  ;;  %9201 = vmatprep.subr.bf16.mxu0 %v11258_v39 }
 0x1ec   :  { %9190 = vmatmul.mubr.msk.bf16.gmra.mxu0 %vm177_vm1, %v2022_v15 }
 0x1ed   :  { %9193 = vmatprep.mubr.msk.bf16.mxu0 %vm177_vm1, %v2023_v37  ;;  %v11532_v56 = vpop.f32.mrf.mxu1 }
 0x1ee   :  { %14457 = vst [vmem:[#allocation41_spill] sm:$0xff] %v11532_v56 }
 0x1ef   :  { %v11534_v24 = vpop.f32.mrf.mxu1 }
 0x1f0   :  { %14458 = vst [vmem:[#allocation43_spill] sm:$0xff] %v11534_v24 }
 0x1f1   :  { %v11536_v60 = vpop.f32.mrf.mxu1 }
 0x1f2   :  { %14459 = vst [vmem:[#allocation32_spill] sm:$0xff] %v11536_v60 }
 0x1f3   :  { %v11539_v20 = vpop.f32.mrf.mxu1 }
 0x1f4   :  { %9194 = vmatmul.mubr.msk.bf16.gmra.mxu0 %vm177_vm1, %v2024_v34  ;;  %14460 = vst [vmem:[#allocation33_spill] sm:$0xff] %v11539_v20  ;;  %v9700_v34 = vld [vmem:[%s14467_s7 + $0x28] sm:$0xff]   ;;  %vm14202_vm1 = vcmask 130054  }
 0x1f5   :  { %v11541_v51 = vpop.f32.mrf.mxu1  ;;  %9202 = vmatpush3.bf16.msra.mxu0 %v9700_v34  ;;  %v2910_v34 = vld [vmem:[#allocation3 + $0x8] sm:$0xff]  ;;  %9205 = vmatprep.mubr.msk.bf16.mxu0 %vm14250_vm9, %v11258_v39 }
 0x1f6   :  { %14461 = vst [vmem:[#allocation34_spill] sm:$0xff] %v11541_v51  ;;  %9203 = vmatprep.subr.bf16.mxu0 %v11258_v39 }
 0x1f7   :  { %v11543_v38 = vpop.f32.mrf.mxu1 }
 0x1f8   :  { %14462 = vst [vmem:[#allocation27_spill] sm:$0xff] %v11543_v38 }
 0x1f9   :  { %v11545_v45 = vpop.f32.mrf.mxu1 }
 0x1fa   :  { %14463 = vst [vmem:[#allocation28_spill] sm:$0xff] %v11545_v45 }
 0x1fb   :  { %v11547_v28 = vpop.f32.mrf.mxu1 }
 0x1fc   :  { %14464 = vst [vmem:[#allocation31_spill] sm:$0xff] %v11547_v28 }
 0x1fd   :  { %v11549_v22 = vpop.f32.mrf.mxu1 }
 0x1fe   :  { %14465 = vst [vmem:[#allocation10_spill] sm:$0xff] %v11549_v22 }
 0x1ff   :  { %v11551_v7 = vpop.f32.mrf.mxu1 }
 0x200   :  { %14466 = vst [vmem:[#allocation52_spill] sm:$0xff] %v11551_v7 }
 0x201   :  { %v9166_v62 = vpop.f32.mrf.mxu1 }
 0x220   :  { %v1198_v16 = vpop.f32.mrf.mxu0 }
 0x221   :  { %v1199_v44 = vadd.f32 %v11559_v19, %v1198_v16 }
 0x222   :  { %v1200_v15 = vpop.f32.mrf.mxu0 }
 0x223   :  { %v1252_v37 = vmul.f32 0.2, %v1199_v44 }
 0x224   :  { %v1203_v1 = vpop.f32.mrf.mxu0 }
 0x225   :  { %v1263_v62 = vmax.f32 %v1199_v44, %v1252_v37  ;;  %v1204_v58 = vadd.f32 %v11559_v19, %v1203_v1  ;;  %v2909_v1 = vld [vmem:[#allocation3] sm:$0xff] }
 0x226   :  { %v1205_v24 = vpop.f32.mrf.mxu0 }
 0x227   :  { %2380 = vst [vmem:[%s14133_s17] sm:$0xff] %v1263_v62  ;;  %v1253_v16 = vmul.f32 0.2, %v1204_v58  ;;  %2487 = vrot.lane.b32.xlu1 %v1263_v62, %s9914_s12  ;;  %2469 = vrot.lane.b32.xlu0 %v1263_v62, %s9915_s28  ;;  %2460 = vst.msk [vmem:[#allocation2 + $0x12] sm:$0xff] %vm14215_vm4, %v1263_v62  ;;  %v9701_v24 = vld [vmem:[%s14467_s7 + $0x20] sm:$0xff]  }
 0x228   :  { %v1208_v13 = vpop.f32.mrf.mxu0  ;;  %9204 = vmatpush3.bf16.msra.mxu0 %v9701_v24 }
 0x229   :  { %v1264_v44 = vmax.f32 %v1204_v58, %v1253_v16  ;;  %v1209_v15 = vadd.f32 %v11559_v19, %v1208_v13  ;;  %v2919_v58 = vpack.c.bf16 %v2910_v34, %v2909_v1  ;;  %9253 = vmatprep.subr.bf16.mxu0 %v11258_v39 }
 0x22a   :  { %v1210_v37 = vpop.f32.mrf.mxu0 }
 0x22b   :  { %2381 = vst [vmem:[%s14133_s17 + $0x8] sm:$0xff] %v1264_v44  ;;  %v1254_v20 = vmul.f32 0.2, %v1209_v15  ;;  %2489 = vrot.lane.b32.xlu1 %v1264_v44, %s9914_s12  ;;  %2505 = vrot.lane.b32.xlu0 %v1263_v62, %s9916_s1  ;;  %2462 = vst.msk [vmem:[#allocation2 + $0x1a] sm:$0x1] %vm14211_vm5, %v1264_v44 }
 0x22c   :  { %2524 = vst.msk [vmem:[#allocation3 + $0x11] sm:$0xfe] %vm14210_vm6, %v1264_v44  ;;  %v1213_v16 = vpop.f32.mrf.mxu0  ;;  %9206 = vmatmul.mubr.msk.bf16.vlgmr.msra.gmra.mxu0 %vm2402_vm3, %v2919_v58  ;;  %vm14219_vm6 = vcmask 261250  }
 0x22d   :  { %v1265_v13 = vmax.f32 %v1209_v15, %v1254_v20  ;;  %v1214_v24 = vadd.f32 %v11559_v19, %v1213_v16  ;;  %9209 = vmatprep.mubr.msk.bf16.mxu0 %vm14250_vm9, %v11258_v39 }
 0x22e   :  { %v1215_v62 = vpop.f32.mrf.mxu0 }
 0x22f   :  { %2382 = vst [vmem:[%s14133_s17 + $0x10] sm:$0xff] %v1265_v13  ;;  %v1255_v37 = vmul.f32 0.2, %v1214_v24  ;;  %2507 = vrot.lane.b32.xlu1 %v1264_v44, %s9916_s1  ;;  %2471 = vrot.lane.b32.xlu0 %v1264_v44, %s9915_s28  ;;  %2526 = vst.msk [vmem:[#allocation3 + $0x19] sm:$0x3] %vm14209_vm7, %v1265_v13  ;;  %vm14216_vm7 = vcmask 255104  }
 0x230   :  { %2568 = vst.msk [vmem:[#allocation2 + $0x20] sm:$0xfc] %vm14208_vm8, %v1265_v13  ;;  %v1218_v20 = vpop.f32.mrf.mxu0  ;;  %vm14214_vm8 = vcmask 523650  }
 0x231   :  { %v1266_v15 = vmax.f32 %v1214_v24, %v1255_v37  ;;  %v1219_v1 = vadd.f32 %v11559_v19, %v1218_v20 }
 0x232   :  { %v1220_v34 = vpop.f32.mrf.mxu0 }
 0x233   :  { %2383 = vst [vmem:[%s14133_s17 + $0x18] sm:$0xff] %v1266_v15  ;;  %v1256_v58 = vmul.f32 0.2, %v1219_v1  ;;  %2543 = vrot.lane.b32.xlu1 %v1265_v13, %s9914_s12  ;;  %2531 = vrot.lane.b32.xlu0 %v1265_v13, %s9915_s28  ;;  %2570 = vst.msk [vmem:[#allocation2 + $0x28] sm:$0x7] %vm14207_vm10, %v1266_v15  ;;  %vm14213_vm10 = vcmask 392449  }
 0x234   :  { %2612 = vst.msk [vmem:[#allocation3 + $0x1f] sm:$0xf8] %vm14206_vm11, %v1266_v15  ;;  %v1223_v44 = vpop.f32.mrf.mxu0  ;;  %vm14212_vm11 = vcmask 261249  }
 0x235   :  { %v1267_v16 = vmax.f32 %v1219_v1, %v1256_v58  ;;  %v1224_v24 = vadd.f32 %v11559_v19, %v1223_v44 }
 0x236   :  { %v1225_v62 = vpop.f32.mrf.mxu0 }
 0x237   :  { %2384 = vst [vmem:[%s14133_s17 + $0x20] sm:$0xff] %v1267_v16  ;;  %v1257_v37 = vmul.f32 0.2, %v1224_v24  ;;  %2575 = vrot.lane.b32.xlu1 %v1266_v15, %s9915_s28  ;;  %2555 = vrot.lane.b32.xlu0 %v1265_v13, %s9916_s1  ;;  %2614 = vst.msk [vmem:[#allocation3 + $0x27] sm:$0xf] %vm14205_vm12, %v1267_v16  ;;  %vm2483_vm12 = vcmask 254080  }
 0x238   :  { %2656 = vst.msk [vmem:[#allocation2 + $0x2e] sm:$0xf0] %vm14204_vm13, %v1267_v16  ;;  %v1228_v20 = vpop.f32.mrf.mxu0  ;;  %vm14248_vm13 = vcmask 516480  }
 0x239   :  { %v1268_v1 = vmax.f32 %v1224_v24, %v1257_v37  ;;  %v1229_v34 = vadd.f32 %v11559_v19, %v1228_v20 }
 0x23a   :  { %v1230_v58 = vpop.f32.mrf.mxu0 }
 0x23b   :  { %2385 = vst [vmem:[%s14133_s17 + $0x28] sm:$0xff] %v1268_v1  ;;  %v1258_v44 = vmul.f32 0.2, %v1229_v34  ;;  %2587 = vrot.lane.b32.xlu1 %v1266_v15, %s9914_s12  ;;  %2619 = vrot.lane.b32.xlu0 %v1267_v16, %s9915_s28  ;;  %2658 = vst.msk [vmem:[#allocation2 + $0x36] sm:$0x1f] %vm14199_vm14, %v1268_v1  ;;  %vm14200_vm14 = vcmask 130055  }
 0x23c   :  { %2700 = vst.msk [vmem:[#allocation3 + $0x2d] sm:$0xe0] %vm14198_vm15, %v1268_v1  ;;  %v1233_v13 = vpop.f32.mrf.mxu0  ;;  %vm14201_vm15 = vcmask 129024  }
 0x23d   :  { %v1269_v24 = vmax.f32 %v1229_v34, %v1258_v44  ;;  %v1234_v62 = vadd.f32 %v11559_v19, %v1233_v13 }
 0x23e   :  { %v1235_v37 = vpop.f32.mrf.mxu0 }
 0x23f   :  { %2386 = vst [vmem:[%s14133_s17 + $0x30] sm:$0xff] %v1269_v24  ;;  %v1259_v20 = vmul.f32 0.2, %v1234_v62  ;;  %2599 = vrot.lane.b32.xlu1 %v1266_v15, %s9916_s1  ;;  %2631 = vrot.lane.b32.xlu0 %v1267_v16, %s9914_s12  ;;  %2702 = vst.msk [vmem:[#allocation3 + $0x35] sm:$0x3f] %vm14203_vm0, %v1269_v24  ;;  %vm14249_vm0 = vcmask 523649  }
 0x240   :  { %2744 = vst.msk [vmem:[#allocation2 + $0x3c] sm:$0xc0] %vm14202_vm1, %v1269_v24  ;;  %v1238_v58 = vpop.f32.mrf.mxu0  ;;  %vm2501_vm1 = vcmask 385280  }
 0x241   :  { %v1270_v34 = vmax.f32 %v1234_v62, %v1259_v20  ;;  %v1239_v44 = vadd.f32 %v11559_v19, %v1238_v58 }
 0x242   :  { %v1240_v13 = vpop.f32.mrf.mxu0 }
 0x243   :  { %2387 = vst [vmem:[%s14133_s17 + $0x38] sm:$0xff] %v1270_v34  ;;  %v1260_v37 = vmul.f32 0.2, %v1239_v44  ;;  %2663 = vrot.lane.b32.xlu1 %v1268_v1, %s9915_s28  ;;  %2643 = vrot.lane.b32.xlu0 %v1267_v16, %s9916_s1  ;;  %2746 = vst.msk [vmem:[#allocation2 + $0x44] sm:$0x7f] %vm14201_vm15, %v1270_v34  ;;  %vm14247_vm15 = vcmask 392448  }
 0x244   :  { %2788 = vst.msk [vmem:[#allocation3 + $0x3b] sm:$0x80] %vm14200_vm14, %v1270_v34  ;;  %v1243_v15 = vpop.f32.mrf.mxu0  ;;  %vm2481_vm14 = vcmask 261248  }
 0x245   :  { %v1271_v56 = vmax.f32 %v1239_v44, %v1260_v37  ;;  %v1244_v62 = vadd.f32 %v11559_v19, %v1243_v15 }
 0x246   :  { %v1245_v20 = vpop.f32.mrf.mxu0 }
 0x247   :  { %2388 = vst [vmem:[%s14133_s17 + $0x40] sm:$0xff] %v1271_v56  ;;  %v1261_v58 = vmul.f32 0.2, %v1244_v62  ;;  %2675 = vrot.lane.b32.xlu1 %v1268_v1, %s9914_s12  ;;  %2707 = vrot.lane.b32.xlu0 %v1269_v24, %s9915_s28  ;;  %2789 = vst.msk [vmem:[#allocation3 + $0x43] sm:$0xff] %vm14215_vm4, %v1271_v56 }
 0x248   :  { %v1248_v16 = vpop.f32.mrf.mxu0 }
 0x249   :  { %v1272_v13 = vmax.f32 %v1244_v62, %v1261_v58  ;;  %v1249_v54 = vadd.f32 %v11559_v19, %v1248_v16  ;;  %v9702_v62 = vld [vmem:[%s14467_s7 + $0x58] sm:$0xff]  }
 0x24a   :  { %v1250_v60 = vpop.f32.mrf.mxu0  ;;  %9254 = vmatpush3.bf16.msra.mxu0 %v9702_v62 }
 0x24b   :  { %2389 = vst [vmem:[%s14133_s17 + $0x48] sm:$0xff] %v1272_v13  ;;  %v1262_v44 = vmul.f32 0.2, %v1249_v54  ;;  %2687 = vrot.lane.b32.xlu1 %v1268_v1, %s9916_s1  ;;  %2719 = vrot.lane.b32.xlu0 %v1269_v24, %s9914_s12  ;;  %2825 = vst.msk [vmem:[#allocation2 + $0x52] sm:$0xff] %vm14215_vm4, %v1272_v13  ;;  %vm14223_vm4 = vcmask 517504  }
 0x24c   :  { %v11657_v37 = vpop.f32.mrf.mxu0  ;;  %9255 = vmatprep.subr.bf16.mxu0 %v11258_v39 }
 0x24d   :  { %v1273_v15 = vmax.f32 %v1249_v54, %v1262_v44  ;;  %v9703_v54 = vld [vmem:[%s14467_s7 + $0x50] sm:$0xff]   ;;  %v9705_v44 = vld [vmem:[%s14467_s7 + $0x40] sm:$0xff]  }
 0x24e   :  { %v11662_v19 = vpop.f32.mrf.mxu0  ;;  %9256 = vmatpush3.bf16.msra.mxu0 %v9703_v54 }
 0x24f   :  { %2390 = vst [vmem:[%s14133_s17 + $0x50] sm:$0x1] %v1273_v15  ;;  %2751 = vrot.lane.b32.xlu1 %v1270_v34, %s9915_s28  ;;  %2731 = vrot.lane.b32.xlu0 %v1269_v24, %s9916_s1  ;;  %2826 = vst.msk [vmem:[#allocation2 + $0x5a] sm:$0x1] %vm14211_vm5, %v1273_v15  ;;  %v9704_v24 = vld [vmem:[%s14467_s7 + $0x48] sm:$0xff]   ;;  %vm14218_vm5 = vcmask 386304  }
 0x250   :  { %v11670_v60 = vpop.f32.mrf.mxu0  ;;  %9257 = vmatprep.subr.bf16.mxu0 %v11258_v39 }
 0x252   :  { %v11676_v1 = vpop.f32.mrf.mxu0  ;;  %9258 = vmatpush3.bf16.msra.mxu0 %v9704_v24 }
 0x253   :  { %2763 = vrot.lane.b32.xlu1 %v1270_v34, %s9914_s12  ;;  %2794 = vrot.lane.b32.xlu0 %v1271_v56, %s9915_s28 }
 0x254   :  { %v11680_v20 = vpop.f32.mrf.mxu0  ;;  %9259 = vmatprep.subr.bf16.mxu0 %v11258_v39 }
 0x256   :  { %v11686_v58 = vpop.f32.mrf.mxu0  ;;  %9260 = vmatpush3.bf16.msra.mxu0 %v9705_v44 }
 0x257   :  { %2816 = vrot.lane.b32.xlu1 %v1271_v56, %s9916_s1  ;;  %2805 = vrot.lane.b32.xlu0 %v1271_v56, %s9914_s12 }
 0x258   :  { %v11690_v16 = vpop.f32.mrf.mxu0 }
 0x25a   :  { %v11696_v62 = vpop.f32.mrf.mxu0 }
 0x25b   :  { %2833 = vrot.lane.b32.xlu1 %v1272_v13, %s9915_s28  ;;  %2775 = vrot.lane.b32.xlu0 %v1270_v34, %s9916_s1 }
 0x25c   :  { %v11700_v54 = vpop.f32.mrf.mxu0 }
 0x25e   :  { %v11702_v27 = vpop.f32.mrf.mxu0 }
 0x25f   :  { %2835 = vrot.lane.b32.xlu1 %v1273_v15, %s9915_s28  ;;  %2849 = vrot.lane.b32.xlu0 %v1272_v13, %s9914_s12 }
 0x260   :  { %v11706_v56 = vpop.f32.mrf.mxu0 }
 0x262   :  { %v11708_v24 = vpop.f32.mrf.mxu0 }
 0x263   :  { %2865 = vrot.lane.b32.xlu1 %v1272_v13, %s9916_s1  ;;  %2851 = vrot.lane.b32.xlu0 %v1273_v15, %s9914_s12 }
 0x264   :  { %v9123_v38 = vpop.f32.mrf.mxu0 }
 0x266   :  { %v1668_v17 = vpop.f32.mrf.mxu0 }
 0x267   :  { %2867 = vrot.lane.b32.xlu0 %v1273_v15, %s9916_s1 }
 0x268   :  { %v9124_v34 = vpop.f32.mrf.mxu0 }
 0x269   :  { %v1680_v32 = vadd.f32 %v9124_v34, %v11417_v35 }
 0x26a   :  { %v1671_v44 = vpop.f32.mrf.mxu0 }
 0x26c   :  { %v11713_v28 = vpop.f32.mrf.mxu0 }
 0x26d   :  { %14469 = vst [vmem:[#allocation56_spill] sm:$0xff] %v11713_v28 }
 0x26e   :  { %v11715_v57 = vpop.f32.mrf.mxu0 }
 0x26f   :  { %14470 = vst [vmem:[#allocation54_spill] sm:$0xff] %v11715_v57 }
 0x270   :  { %v11717_v51 = vpop.f32.mrf.mxu0 }
 0x271   :  { %14471 = vst [vmem:[#allocation11_spill] sm:$0xff] %v11717_v51 }
 0x272   :  { %v11719_v10 = vpop.f32.mrf.mxu0 }
 0x273   :  { %14472 = vst [vmem:[#allocation59_spill] sm:$0xff] %v11719_v10 }
 0x274   :  { %v11721_v45 = vpop.f32.mrf.mxu0 }
 0x275   :  { %14473 = vst [vmem:[#allocation57_spill] sm:$0xff] %v11721_v45 }
 0x276   :  { %v11723_v5 = vpop.f32.mrf.mxu0 }
 0x277   :  { %14474 = vst [vmem:[#allocation64_spill] sm:$0xff] %v11723_v5 }
 0x278   :  { %v11725_v13 = vpop.f32.mrf.mxu0 }
 0x279   :  { %14475 = vst [vmem:[#allocation63_spill] sm:$0xff] %v11725_v13 }
 0x27a   :  { %v11727_v7 = vpop.f32.mrf.mxu0 }
 0x27b   :  { %14476 = vst [vmem:[#allocation66_spill] sm:$0xff] %v11727_v7 }
 0x27c   :  { %v11729_v31 = vpop.f32.mrf.mxu0 }
 0x27d   :  { %14477 = vst [vmem:[#allocation65_spill] sm:$0xff] %v11729_v31 }
 0x27e   :  { %v11731_v15 = vpop.f32.mrf.mxu0 }
 0x27f   :  { %14478 = vst [vmem:[#allocation68_spill] sm:$0xff] %v11731_v15 }
 0x280   :  { %v9136_v53 = vpop.f32.mrf.mxu0 }
 0x282   :  { %v11733_v28 = vpop.f32.mrf.mxu0 }
 0x283   :  { %14479 = vst [vmem:[#allocation67_spill] sm:$0xff] %v11733_v28 }
 0x284   :  { %v11735_v57 = vpop.f32.mrf.mxu0 }
 0x285   :  { %14480 = vst [vmem:[#allocation70_spill] sm:$0xff] %v11735_v57  ;;  %v1677_v57 = vadd.f32 %v9123_v38, %v11413_v59 }
 0x286   :  { %v11737_v51 = vpop.f32.mrf.mxu0 }
 0x287   :  { %14481 = vst [vmem:[#allocation69_spill] sm:$0xff] %v11737_v51  ;;  %v1971_v59 = vadd.f32 %v11517_v41, %v1677_v57  ;;  %v1661_v57 = vadd.f32 %v11700_v54, %v11301_v12  ;;  %v1656_v12 = vadd.f32 %v11708_v24, %v11411_v48  ;;  %v1645_v24 = vadd.f32 %v11680_v20, %v11285_v6 }
 0x288   :  { %v11739_v10 = vpop.f32.mrf.mxu0  ;;  %v1640_v6 = vadd.f32 %v11696_v62, %v11299_v3 }
 0x289   :  { %14482 = vst [vmem:[#allocation72_spill] sm:$0xff] %v11739_v10  ;;  %v1972_v10 = vadd.f32 %v11523_v61, %v1680_v32  ;;  %v1967_v54 = vadd.f32 %v11497_v52, %v1661_v57 }
 0x28a   :  { %v11741_v45 = vpop.f32.mrf.mxu0 }
 0x28b   :  { %14483 = vst [vmem:[#allocation71_spill] sm:$0xff] %v11741_v45 }
 0x28c   :  { %v11743_v5 = vpop.f32.mrf.mxu0 }
 0x28e   :  { %v11745_v13 = vpop.f32.mrf.mxu0 }
 0x290   :  { %v11747_v7 = vpop.f32.mrf.mxu0  ;;  %v14485_v57 = vld [vmem:[#allocation72_spill] sm:$0xff] }
 0x292   :  { %v11749_v22 = vpop.f32.mrf.mxu0 }
 0x294   :  { %v11751_v15 = vpop.f32.mrf.mxu0 }
 0x296   :  { %v11753_v53 = vpop.f32.mrf.mxu0 }
 0x298   :  { %v11755_v30 = vpop.f32.mrf.mxu0 }
 0x299   :  { %v2488_v51 = vpop.permute.xlu1 %2487  ;;  %v2470_v28 = vpop.permute.xlu0 %2469 }
 0x29a   :  { %2482 = vst.msk [vmem:[#allocation2 + $0x11] sm:$0xff] %vm2481_vm14, %v2470_v28  ;;  %v11758_v45 = vpop.f32.mrf.mxu0  ;;  %v1672_v28 = vadd.f32 %v1671_v44, %v11427_v46 }
 0x29b   :  { %2500 = vst.msk [vmem:[#allocation2 + $0x10] sm:$0xff] %vm14247_vm15, %v2488_v51  ;;  %v1669_v51 = vadd.f32 %v1668_v17, %v11415_v36 }
 0x29c   :  { %v9183_v0 = vpop.f32.mrf.mxu0  ;;  %v1970_v32 = vadd.f32 %v11530_v4, %v1672_v28  ;;  %v1653_v4 = vadd.f32 %v11702_v27, %v11399_v14  ;;  %v1648_v14 = vadd.f32 %v11690_v16, %v11289_v40  ;;  %v1966_v27 = vadd.f32 %v11509_v21, %v1656_v12  ;;  %v14490_v12 = vld [vmem:[#allocation37_spill] sm:$0xff] }
 0x29d   :  { %v2490_v31 = vpop.permute.xlu1 %2489  ;;  %v2506_v18 = vpop.permute.xlu0 %2505  ;;  %v2225_v36 = vadd.f32 %v9183_v0, %v1971_v59  ;;  %v1637_v16 = vadd.f32 %v11686_v58, %v11287_v42  ;;  %v11842_v42 = vld [vmem:[#allocation4] sm:$0xff]  ;;  %v1962_v58 = vadd.f32 %v11495_v43, %v1640_v6 }
 0x29e   :  { %2502 = vst.msk [vmem:[#allocation2 + $0x18] sm:$0x1] %vm2501_vm1, %v2490_v31  ;;  %v2149_v47 = vpop.f32.mrf.mxu0  ;;  %v1965_v44 = vadd.f32 %v11503_v63, %v1653_v4  ;;  %v2220_v28 = vadd.f32 %v11758_v45, %v1966_v27  ;;  %v1964_v63 = vadd.f32 %v11491_v23, %v1648_v14  ;;  %v14492_v4 = vld [vmem:[#allocation67_spill] sm:$0xff]  ;;  %v14496_v6 = vld [vmem:[#allocation10_spill] sm:$0xff] }
 0x29f   :  { %2518 = vst.msk [vmem:[#allocation2 + $0xf] sm:$0xfe] %vm14249_vm0, %v2506_v18  ;;  %v1664_v18 = vadd.f32 %v11706_v56, %v11401_v25  ;;  %v1969_v25 = vadd.f32 %v11521_v50, %v1669_v51 }
 0x2a0   :  { %v9184_v35 = vpop.f32.mrf.mxu0  ;;  %v2219_v45 = vadd.f32 %v11753_v53, %v1965_v44  ;;  %v2218_v51 = vadd.f32 %v11747_v7, %v1964_v63  ;;  %v1632_v7 = vadd.f32 %v11670_v60, %v11273_v8  ;;  %v2216_v8 = vadd.f32 %v11749_v22, %v1962_v58 }
 0x2a1   :  { %v2226_v38 = vadd.f32 %v9184_v35, %v1972_v10  ;;  %v2508_v34 = vpop.permute.xlu1 %2507  ;;  %v2472_v55 = vpop.permute.xlu0 %2471  ;;  %v1968_v41 = vadd.f32 %v11505_v2, %v1664_v18  ;;  %v2223_v50 = vadd.f32 %v2149_v47, %v1969_v25  ;;  %v1621_v18 = vadd.f32 %v11662_v19, %v11271_v26  ;;  %v14486_v26 = vld [vmem:[#allocation38_spill] sm:$0xff]  ;;  %v14488_v19 = vld [vmem:[#allocation65_spill] sm:$0xff] }
 0x2a2   :  { %2520 = vst.msk [vmem:[#allocation2 + $0x17] sm:$0x1] %vm14248_vm13, %v2508_v34  ;;  %v2152_v46 = vpop.f32.mrf.mxu0 }
 0x2a3   :  { %2484 = vst.msk [vmem:[#allocation2 + $0x19] sm:$0x1] %vm2483_vm12, %v2472_v55  ;;  %2239 = vmatpush1.msra.mxu1 %v2226_v38  ;;  %v2224_v10 = vadd.f32 %v2152_v46, %v1970_v32  ;;  %v2222_v48 = vadd.f32 %v11755_v30, %v1968_v41  ;;  %v2221_v30 = vadd.f32 %v11751_v15, %v1967_v54  ;;  %v14484_v32 = vld [vmem:[#allocation42_spill] sm:$0xff] }
 0x2a4   :  { %2538 = vst.msk [vmem:[#allocation3 + $0x10] sm:$0xfe] %vm14212_vm11, %v2472_v55  ;;  %v11776_v17 = vpop.f32.mrf.mxu0  ;;  %2240 = vmatprep.subr.mxu1 %v11258_v39  ;;  %vm14217_vm11 = vcmask 392450   ;;  %v1963_v15 = vadd.f32 %v11483_v9, %v1645_v24  ;;  %v1961_v46 = vadd.f32 %v11489_v29, %v1637_v16  ;;  %v1960_v29 = vadd.f32 %v11477_v33, %v1632_v7  ;;  %v14487_v33 = vld [vmem:[#allocation47_spill] sm:$0xff]  ;;  %v1946_v24 = vpop.f32.mrf.mxu1 }
 0x2a5   :  { %2550 = vst.msk [vmem:[#allocation3 + $0xf] sm:$0xfe] %vm14213_vm10, %v2490_v31  ;;  %2241 = vmatpush1.msra.mxu1 %v2225_v36  ;;  %v2544_v55 = vpop.permute.xlu1 %2543  ;;  %v2532_v0 = vpop.permute.xlu0 %2531  ;;  %vm14221_vm10 = vcmask 256128   ;;  %v1957_v41 = vadd.f32 %v14490_v12, %v1621_v18 }
 0x2a6   :  { %2562 = vst.msk [vmem:[#allocation3 + $0xe] sm:$0xfc] %vm14214_vm8, %v2508_v34  ;;  %v11785_v31 = vpop.f32.mrf.mxu0  ;;  %2242 = vmatprep.subr.mxu1 %v11258_v39  ;;  %vm14220_vm8 = vcmask 261251   ;;  %v2217_v53 = vadd.f32 %v11743_v5, %v1963_v15  ;;  %v1629_v34 = vadd.f32 %v11657_v37, %v11269_v11  ;;  %v1624_v11 = vadd.f32 %v11676_v1, %v11283_v49 }
 0x2a7   :  { %2540 = vst.msk [vmem:[#allocation3 + $0x18] sm:$0x3] %vm14216_vm7, %v2532_v0  ;;  %2243 = vmatpush1.msra.mxu1 %v2224_v10  ;;  %vm14222_vm7 = vcmask 523651   ;;  %v2215_v22 = vadd.f32 %v11745_v13, %v1961_v46  ;;  %v2214_v25 = vadd.f32 %v14485_v57, %v1960_v29  ;;  %v1725_v1 = vadd.f32 %v14488_v19, %v14487_v33  ;;  %v14489_v13 = vld [vmem:[#allocation70_spill] sm:$0xff]  ;;  %v14502_v46 = vld [vmem:[#allocation52_spill] sm:$0xff]  ;;  %v14506_v57 = vld [vmem:[#allocation51_spill] sm:$0xff] }
 0x2a8   :  { %2582 = vst.msk [vmem:[#allocation2 + $0x1f] sm:$0xfc] %vm14219_vm6, %v2532_v0  ;;  %v11793_v61 = vpop.f32.mrf.mxu0  ;;  %2244 = vmatprep.subr.mxu1 %v11258_v39  ;;  %vm14227_vm6 = vcmask 257152   ;;  %v1959_v36 = vadd.f32 %v14484_v32, %v1629_v34  ;;  %v1958_v49 = vadd.f32 %v14486_v26, %v1624_v11  ;;  %v14501_v34 = vld [vmem:[#allocation57_spill] sm:$0xff]  ;;  %v14504_v11 = vld [vmem:[#allocation66_spill] sm:$0xff]  ;;  %v14510_v33 = vld [vmem:[#allocation11_spill] sm:$0xff] }
 0x2a9   :  { %2552 = vst.msk [vmem:[#allocation3 + $0x17] sm:$0x3] %vm14218_vm5, %v2544_v55  ;;  %2245 = vmatpush1.msra.mxu1 %v2223_v50  ;;  %v2576_v2 = vpop.permute.xlu1 %2575  ;;  %v2556_v47 = vpop.permute.xlu0 %2555  ;;  %vm14224_vm5 = vcmask 392451   ;;  %v14491_v50 = vld [vmem:[#allocation58_spill] sm:$0xff]  ;;  %v1983_v63 = vadd.f32 %v14496_v6, %v1725_v1  ;;  %v14511_v1 = vld [vmem:[#allocation31_spill] sm:$0xff] }
 0x2aa   :  { %2594 = vst.msk [vmem:[#allocation2 + $0x1e] sm:$0xfc] %vm14217_vm11, %v2544_v55  ;;  %v11804_v56 = vpop.f32.mrf.mxu0  ;;  %2246 = vmatprep.subr.mxu1 %v11258_v39  ;;  %vm14225_vm11 = vcmask 387328   ;;  %v2213_v0 = vadd.f32 %v14489_v13, %v1959_v36  ;;  %v1720_v54 = vadd.f32 %v14492_v4, %v14491_v50 }
 0x2ab   :  { %2584 = vst.msk [vmem:[#allocation2 + $0x27] sm:$0x7] %vm14221_vm10, %v2576_v2  ;;  %2247 = vmatpush1.msra.mxu1 %v2222_v48  ;;  %vm14229_vm10 = vcmask 518528   ;;  %v14493_v48 = vld [vmem:[#allocation71_spill] sm:$0xff] }
 0x2ac   :  { %2626 = vst.msk [vmem:[#allocation3 + $0x1e] sm:$0xf8] %vm14220_vm8, %v2576_v2  ;;  %vm14226_vm8 = vcmask 261252   ;;  %v11811_v52 = vpop.f32.mrf.mxu0  ;;  %2248 = vmatprep.subr.mxu1 %v11258_v39  ;;  %v2212_v2 = vadd.f32 %v14493_v48, %v1958_v49  ;;  %v14513_v48 = vld [vmem:[#allocation56_spill] sm:$0xff] }
 0x2ad   :  { %2564 = vst.msk [vmem:[#allocation3 + $0x16] sm:$0x3] %vm14223_vm4, %v2556_v47  ;;  %2249 = vmatpush1.msra.mxu1 %v2221_v30  ;;  %v2588_v35 = vpop.permute.xlu1 %2587  ;;  %v2620_v40 = vpop.permute.xlu0 %2619  ;;  %vm14231_vm4 = vcmask 388352  }
 0x2ae   :  { %2606 = vst.msk [vmem:[#allocation2 + $0x1d] sm:$0xf8] %vm14222_vm7, %v2556_v47  ;;  %v11822_v21 = vpop.f32.mrf.mxu0  ;;  %2250 = vmatprep.subr.mxu1 %v11258_v39  ;;  %vm14228_vm7 = vcmask 523652  }
 0x2af   :  { %2596 = vst.msk [vmem:[#allocation2 + $0x26] sm:$0x7] %vm14225_vm11, %v2588_v35  ;;  %2251 = vmatpush1.msra.mxu1 %v2220_v28  ;;  %vm14233_vm11 = vcmask 258176   ;;  %v14494_v28 = vld [vmem:[#allocation49_spill] sm:$0xff] }
 0x2b0   :  { %2638 = vst.msk [vmem:[#allocation3 + $0x1d] sm:$0xf8] %vm14224_vm5, %v2588_v35  ;;  %vm14230_vm5 = vcmask 392452   ;;  %v11829_v20 = vpop.f32.mrf.mxu0  ;;  %2252 = vmatprep.subr.mxu1 %v11258_v39  ;;  %v2912_v23 = vld [vmem:[#allocation3 + $0x18] sm:$0xff]  ;;  %v14495_v35 = vld [vmem:[#allocation68_spill] sm:$0xff] }
 0x2b1   :  { %2628 = vst.msk [vmem:[#allocation3 + $0x26] sm:$0xf] %vm14227_vm6, %v2620_v40  ;;  %2253 = vmatpush1.msra.mxu1 %v2219_v45  ;;  %v2600_v59 = vpop.permute.xlu1 %2599  ;;  %v2632_v3 = vpop.permute.xlu0 %2631  ;;  %vm14235_vm6 = vcmask 519552   ;;  %v14497_v45 = vld [vmem:[#allocation69_spill] sm:$0xff] }
 0x2b2   :  { %2670 = vst.msk [vmem:[#allocation2 + $0x2d] sm:$0xf0] %vm14226_vm8, %v2620_v40  ;;  %v11840_v39 = vpop.f32.mrf.mxu0  ;;  %2254 = vmatprep.subr.mxu1 %v11842_v42  ;;  %vm14232_vm8 = vcmask 261253   ;;  %v1717_v40 = vadd.f32 %v14495_v35, %v14494_v28  ;;  %v2211_v16 = vadd.f32 %v14497_v45, %v1957_v41  ;;  %v14517_v28 = vld [vmem:[#allocation32_spill] sm:$0xff]  ;;  %v14519_v45 = vld [vmem:[#allocation54_spill] sm:$0xff] }
 0x2b3   :  { %2608 = vst.msk [vmem:[#allocation2 + $0x25] sm:$0x7] %vm14229_vm10, %v2600_v59  ;;  %2255 = vmatpush1.msra.mxu1 %v2218_v51  ;;  %vm14236_vm10 = vcmask 389376   ;;  %v14498_v51 = vld [vmem:[#allocation62_spill] sm:$0xff] }
 0x2b4   :  { %v2911_v62 = vld [vmem:[#allocation3 + $0x10] sm:$0xff]  ;;  %2650 = vst.msk [vmem:[#allocation3 + $0x1c] sm:$0xf0] %vm14228_vm7, %v2600_v59  ;;  %vm14234_vm7 = vcmask 523653   ;;  %v11851_v38 = vpop.f32.mrf.mxu0  ;;  %2256 = vmatprep.subr.mxu1 %v11842_v42  ;;  %v14499_v59 = vld [vmem:[#allocation63_spill] sm:$0xff] }
 0x2b5   :  { %2640 = vst.msk [vmem:[#allocation3 + $0x25] sm:$0xf] %vm14231_vm4, %v2632_v3  ;;  %v11845_v9 = vpack.c.bf16 %v2912_v23, %v2911_v62  ;;  %2257 = vmatpush1.msra.mxu1 %v2217_v53  ;;  %v2664_v43 = vpop.permute.xlu1 %2663  ;;  %v2644_v60 = vpop.permute.xlu0 %2643  ;;  %vm14239_vm4 = vcmask 259200   ;;  %v1982_v62 = vadd.f32 %v1946_v24, %v1720_v54  ;;  %v2237_v23 = vadd.f32 %v11851_v38, %v1983_v63  ;;  %v14500_v53 = vld [vmem:[#allocation50_spill] sm:$0xff]  ;;  %v14512_v54 = vld [vmem:[#allocation60_spill] sm:$0xff] }
 0x2b6   :  { %2682 = vst.msk [vmem:[#allocation2 + $0x2c] sm:$0xf0] %vm14230_vm5, %v2632_v3  ;;  %v11866_v5 = vpop.f32.mrf.mxu0  ;;  %2258 = vmatprep.subr.mxu1 %v11842_v42  ;;  %vm14237_vm5 = vcmask 392453   ;;  %v1712_v3 = vadd.f32 %v14499_v59, %v14498_v51  ;;  %v1709_v38 = vadd.f32 %v14501_v34, %v14500_v53  ;;  %v14522_v34 = vld [vmem:[#allocation43_spill] sm:$0xff] }
 0x2b7   :  { %9210 = vmatmul.mubr.msk.bf16.gmra.mxu0 %vm2402_vm3, %v11845_v9  ;;  %2672 = vst.msk [vmem:[#allocation2 + $0x35] sm:$0x1f] %vm14233_vm11, %v2664_v43  ;;  %2259 = vmatpush1.msra.mxu1 %v2216_v8  ;;  %vm14241_vm11 = vcmask 520576   ;;  %v1981_v8 = vadd.f32 %v14502_v46, %v1717_v40 }
 0x2b8   :  { %9213 = vmatprep.mubr.msk.bf16.mxu0 %vm14250_vm9, %v11842_v42  ;;  %2714 = vst.msk [vmem:[#allocation3 + $0x2c] sm:$0xe0] %vm14232_vm8, %v2664_v43  ;;  %vm14238_vm8 = vcmask 261254   ;;  %v9196_v37 = vpop.f32.mrf.mxu0  ;;  %2260 = vmatprep.subr.mxu1 %v11842_v42 }
 0x2b9   :  { %2652 = vst.msk [vmem:[#allocation3 + $0x24] sm:$0xf] %vm14235_vm6, %v2644_v60  ;;  %2261 = vmatpush1.msra.mxu1 %v2215_v22  ;;  %v2676_v10 = vpop.permute.xlu1 %2675  ;;  %v2708_v55 = vpop.permute.xlu0 %2707  ;;  %vm2727_vm6 = vcmask 390400   ;;  %v14505_v22 = vld [vmem:[#allocation28_spill] sm:$0xff]  ;;  %v2235_v18 = vadd.f32 %v11866_v5, %v1981_v8  ;;  %v14509_v5 = vld [vmem:[#allocation53_spill] sm:$0xff] }
 0x2ba   :  { %2694 = vst.msk [vmem:[#allocation2 + $0x2b] sm:$0xe0] %vm14234_vm7, %v2644_v60  ;;  %2262 = vmatprep.subr.mxu1 %v11842_v42  ;;  %vm14240_vm7 = vcmask 523654   ;;  %v2200_v15 = vpop.f32.mrf.mxu0  ;;  %v14503_v60 = vld [vmem:[#allocation46_spill] sm:$0xff]  ;;  %v1980_v37 = vadd.f32 %v14505_v22, %v1712_v3  ;;  %v1696_v19 = vadd.f32 %v14510_v33, %v14509_v5  ;;  %v9879_v22 = vld [vmem:[%s14314_s27 + $0x18] sm:$0xff]  ;;  %v9884_v33 = vld [vmem:[%s14314_s27 + $0x30] sm:$0xff] }
 0x2bb   :  { %2684 = vst.msk [vmem:[#allocation2 + $0x34] sm:$0x1f] %vm14236_vm10, %v2676_v10  ;;  %2263 = vmatpush1.msra.mxu1 %v2214_v25  ;;  %vm14242_vm10 = vcmask 392454   ;;  %v2236_v43 = vadd.f32 %v2200_v15, %v1982_v62  ;;  %v1704_v29 = vadd.f32 %v14504_v11, %v14503_v60  ;;  %v14507_v25 = vld [vmem:[#allocation64_spill] sm:$0xff]  ;;  %v14520_v15 = vld [vmem:[#allocation41_spill] sm:$0xff] }
 0x2bc   :  { %2726 = vst.msk [vmem:[#allocation3 + $0x2b] sm:$0xe0] %vm14237_vm5, %v2676_v10  ;;  %2264 = vmatprep.subr.mxu1 %v11842_v42  ;;  %v2914_v30 = vld [vmem:[#allocation3 + $0x28] sm:$0xff]  ;;  %vm2759_vm5 = vcmask 260224   ;;  %v1701_v10 = vadd.f32 %v14507_v25, %v14506_v57  ;;  %v2234_v49 = vadd.f32 %v11829_v20, %v1980_v37  ;;  %v1976_v35 = vadd.f32 %v14517_v28, %v1696_v19  ;;  %v11979_v60 = vld [vmem:[%s14467_s7 + $0x18] sm:$0xff]   ;;  %v12000_v37 = vld [vmem:[%s14467_s7 + $0x10] sm:$0xff]  }
 0x2bd   :  { %2716 = vst.msk [vmem:[#allocation3 + $0x34] sm:$0x3f] %vm14239_vm4, %v2708_v55  ;;  %2265 = vmatpush1.msra.mxu1 %v2213_v0  ;;  %v2688_v47 = vpop.permute.xlu1 %2687  ;;  %v2720_v14 = vpop.permute.xlu0 %2719  ;;  %vm2739_vm4 = vcmask 521600   ;;  %v1978_v13 = vadd.f32 %v14511_v1, %v1704_v29  ;;  %v3158_v11 = vld [vmem:[#allocation2 + $0x18] sm:$0xff]  ;;  %v12019_v57 = vld [vmem:[%s14467_s7 + $0x8] sm:$0xff]   ;;  %v9882_v25 = vld [vmem:[%s14314_s27 + $0x20] sm:$0xff] }
 0x2be   :  { %2758 = vst.msk [vmem:[#allocation2 + $0x3b] sm:$0xc0] %vm14238_vm8, %v2708_v55  ;;  %2266 = vmatprep.subr.mxu1 %v11842_v42  ;;  %vm14243_vm8 = vcmask 261255   ;;  %v14508_v55 = vld [vmem:[#allocation34_spill] sm:$0xff]  ;;  %v2230_v59 = vadd.f32 %v11793_v61, %v1976_v35  ;;  %v9885_v19 = vld [vmem:[%s14314_s27 + $0x48] sm:$0xff]  ;;  %v9892_v28 = vld [vmem:[%s14314_s27 + $0x70] sm:$0xff] }
 0x2bf   :  { %2696 = vst.msk [vmem:[#allocation2 + $0x33] sm:$0x1f] %vm14241_vm11, %v2688_v47  ;;  %2267 = vmatpush1.msra.mxu1 %v2212_v2  ;;  %vm2771_vm11 = vcmask 391424   ;;  %v1979_v26 = vadd.f32 %v14508_v55, %v1709_v38  ;;  %v1693_v2 = vadd.f32 %v14513_v48, %v14512_v54  ;;  %v9883_v55 = vld [vmem:[%s14314_s27 + $0x38] sm:$0xff]  ;;  %v9886_v1 = vld [vmem:[%s14314_s27 + $0x40] sm:$0xff]  ;;  %v9893_v35 = vld [vmem:[%s14314_s27 + $0x88] sm:$0xff] }
 0x2c0   :  { %v2913_v27 = vld [vmem:[#allocation3 + $0x20] sm:$0xff]  ;;  %2738 = vst.msk [vmem:[#allocation3 + $0x2a] sm:$0xc0] %vm14240_vm7, %v2688_v47  ;;  %vm2781_vm7 = vcmask 523655   ;;  %2268 = vmatprep.subr.mxu1 %v11842_v42  ;;  %v14514_v47 = vld [vmem:[#allocation27_spill] sm:$0xff] }
 0x2c1   :  { %2728 = vst.msk [vmem:[#allocation3 + $0x33] sm:$0x3f] %vm2727_vm6, %v2720_v14  ;;  %v11897_v44 = vpack.c.bf16 %v2914_v30, %v2913_v27  ;;  %2269 = vmatpush1.msra.mxu1 %v2211_v16  ;;  %v2752_v7 = vpop.permute.xlu1 %2751  ;;  %v2732_v58 = vpop.permute.xlu0 %2731  ;;  %v2233_v0 = vadd.f32 %v11811_v52, %v1979_v26  ;;  %v2232_v27 = vadd.f32 %v11840_v39, %v1978_v13  ;;  %v14515_v52 = vld [vmem:[#allocation55_spill] sm:$0xff]  ;;  %v14518_v39 = vld [vmem:[#allocation61_spill] sm:$0xff] }
 0x2c2   :  { %2770 = vst.msk [vmem:[#allocation2 + $0x3a] sm:$0xc0] %vm14242_vm10, %v2720_v14  ;;  %2280 = vmatprep.subr.mxu1 %v11842_v42  ;;  %vm14244_vm10 = vcmask 392455   ;;  %v1977_v14 = vadd.f32 %v14514_v47, %v1701_v10  ;;  %v14516_v30 = vld [vmem:[#allocation59_spill] sm:$0xff]  ;;  %v1685_v16 = vadd.f32 %v14519_v45, %v14518_v39  ;;  %v1975_v51 = vadd.f32 %v14520_v15, %v1693_v2  ;;  %v3159_v10 = vld [vmem:[#allocation2 + $0x20] sm:$0xff] }
 0x2c3   :  { %9214 = vmatmul.mubr.msk.bf16.gmra.mxu0 %vm2402_vm3, %v11897_v44  ;;  %2760 = vst.msk [vmem:[#allocation2 + $0x43] sm:$0x7f] %vm2759_vm5, %v2752_v7  ;;  %2281 = vmatpush2.msra.mxu1 %v2237_v23  ;;  %v1688_v24 = vadd.f32 %v14516_v30, %v14515_v52  ;;  %v3160_v26 = vld [vmem:[#allocation2 + $0x28] sm:$0xff]  ;;  %v9890_v2 = vld [vmem:[%s14314_s27 + $0x60] sm:$0xff] }
 0x2c4   :  { %9217 = vmatprep.mubr.msk.bf16.mxu0 %vm14250_vm9, %v11842_v42  ;;  %2801 = vst.msk [vmem:[#allocation3 + $0x3a] sm:$0x80] %vm14243_vm8, %v2752_v7  ;;  %2282 = vmatprep.subr.mxu1 %v11842_v42  ;;  %vm14246_vm8 = vcmask 523648   ;;  %v2231_v40 = vadd.f32 %v11822_v21, %v1977_v14  ;;  %v14521_v21 = vld [vmem:[#allocation33_spill] sm:$0xff]  ;;  %v2229_v62 = vadd.f32 %v11776_v17, %v1975_v51  ;;  %v9897_v15 = vld [vmem:[%s14314_s27 + $0xa8] sm:$0x1] }
 0x2c5   :  { %2740 = vst.msk [vmem:[#allocation3 + $0x32] sm:$0x3f] %vm2739_vm4, %v2732_v58  ;;  %2283 = vmatpush2.msra.mxu1 %v2236_v43  ;;  %v2764_v32 = vpop.permute.xlu1 %2763  ;;  %v2795_v36 = vpop.permute.xlu0 %2794  ;;  %v1974_v3 = vadd.f32 %v14521_v21, %v1688_v24  ;;  %v1973_v61 = vadd.f32 %v14522_v34, %v1685_v16  ;;  %v12035_v5 = vpack.c.bf16 %v3160_v26, %v3159_v10  ;;  %v9891_v14 = vld [vmem:[%s14314_s27 + $0x78] sm:$0xff]  ;;  %v9896_v16 = vld [vmem:[%s14314_s27 + $0x90] sm:$0xff]  ;;  %v2886_v51 = vld [vmem:[#allocation2] sm:$0xff] }
 0x2c6   :  { %2782 = vst.msk [vmem:[#allocation2 + $0x39] sm:$0x80] %vm2781_vm7, %v2732_v58  ;;  %2284 = vmatprep.subr.mxu1 %v11842_v42  ;;  %v3161_v13 = vld [vmem:[#allocation2 + $0x30] sm:$0xff]  ;;  %v9898_v21 = vld [vmem:[%s14314_s27 + $0xa0] sm:$0x1] }
 0x2c7   :  { %2772 = vst.msk [vmem:[#allocation2 + $0x42] sm:$0x7f] %vm2771_vm11, %v2764_v32  ;;  %2285 = vmatpush2.msra.mxu1 %v2235_v18  ;;  %v2228_v38 = vadd.f32 %v11804_v56, %v1974_v3  ;;  %v2227_v17 = vadd.f32 %v11785_v31, %v1973_v61  ;;  %v9878_v31 = vld [vmem:[%s14314_s27] sm:$0xff]  ;;  %v3157_v56 = vld [vmem:[#allocation2 + $0x10] sm:$0xff] }
 0x2c8   :  { %2812 = vst.msk [vmem:[#allocation3 + $0x39] sm:$0x80] %vm14244_vm10, %v2764_v32  ;;  %2286 = vmatprep.subr.mxu1 %v11842_v42  ;;  %v2916_v4 = vld [vmem:[#allocation3 + $0x38] sm:$0xff]  ;;  %vm14245_vm10 = vcmask 522624   ;;  %v12002_v18 = vpack.c.bf16 %v3158_v11, %v3157_v56  ;;  %v9880_v32 = vld [vmem:[%s14314_s27 + $0x10] sm:$0xff]  ;;  %v9902_v61 = vld [vmem:[%s14467_s7 + $0x20] sm:$0xff]  }
 0x2c9   :  { %2802 = vst.msk [vmem:[#allocation3 + $0x42] sm:$0xff] %vm2481_vm14, %v2795_v36  ;;  %2287 = vmatpush2.msra.mxu1 %v2234_v49  ;;  %v2817_v12 = vpop.permute.xlu1 %2816  ;;  %v2806_v41 = vpop.permute.xlu0 %2805  ;;  %v9881_v36 = vld [vmem:[%s14314_s27 + $0x28] sm:$0xff]  ;;  %v12033_v49 = vld [vmem:[%s14467_s7] sm:$0xff]   ;;  %v9900_v34 = vld [vmem:[%s14467_s7 + $0x30] sm:$0xff]  }
 0x2ca   :  { %2813 = vst.msk [vmem:[#allocation3 + $0x41] sm:$0xff] %vm14247_vm15, %v2806_v41  ;;  %2288 = vmatprep.subr.mxu1 %v11842_v42  ;;  %v12206_v26 = vld [vmem:[%s14468_s22] ss:$0 sm:$0xff] }
 0x2cb   :  { %2823 = vst.msk [vmem:[#allocation3 + $0x40] sm:$0xff] %vm14246_vm8, %v2817_v12  ;;  %2289 = vmatpush2.msra.mxu1 %v2233_v0  ;;  %v9887_v0 = vld [vmem:[%s14314_s27 + $0x58] sm:$0xff]  ;;  %vm14527_vm8 = vcmask 130050  }
 0x2cc   :  { %v2915_v50 = vld [vmem:[#allocation3 + $0x30] sm:$0xff]  ;;  %2290 = vmatprep.subr.mxu1 %v11842_v42  ;;  %v3162_v12 = vld [vmem:[#allocation2 + $0x38] sm:$0xff] }
 0x2cd   :  { %v11939_v20 = vpack.c.bf16 %v2916_v4, %v2915_v50  ;;  %2291 = vmatpush2.msra.mxu1 %v2232_v27  ;;  %v2834_v6 = vpop.permute.xlu1 %2833  ;;  %v2776_v63 = vpop.permute.xlu0 %2775  ;;  %v3169_v41 = vpack.c.bf16 %v3162_v12, %v3161_v13  ;;  %v9888_v50 = vld [vmem:[%s14314_s27 + $0x50] sm:$0xff]  ;;  %v9889_v4 = vld [vmem:[%s14314_s27 + $0x68] sm:$0xff] }
 0x2ce   :  { %2845 = vst.msk [vmem:[#allocation2 + $0x51] sm:$0xff] %vm2481_vm14, %v2834_v6  ;;  %2292 = vmatprep.subr.mxu1 %v11842_v42  ;;  %v3164_v52 = vld [vmem:[#allocation2 + $0x48] sm:$0xff] }
 0x2cf   :  { %9218 = vmatmul.mubr.msk.bf16.gmra.mxu0 %vm2402_vm3, %v11939_v20  ;;  %2784 = vst.msk [vmem:[#allocation2 + $0x41] sm:$0x7f] %vm14245_vm10, %v2776_v63  ;;  %2293 = vmatpush2.msra.mxu1 %v2231_v40  ;;  %v9894_v40 = vld [vmem:[%s14314_s27 + $0x80] sm:$0xff]  ;;  %v9895_v63 = vld [vmem:[%s14314_s27 + $0x98] sm:$0xff]  ;;  %vm14525_vm10 = vcmask 130049  }
 0x2d0   :  { %9221 = vmatprep.mubr.msk.bf16.mxu0 %vm14250_vm9, %v11842_v42  ;;  %2294 = vmatprep.subr.mxu1 %v11842_v42 }
 0x2d1   :  { %2295 = vmatpush2.msra.mxu1 %v2230_v59  ;;  %v2836_v23 = vpop.permute.xlu1 %2835  ;;  %v2850_v7 = vpop.permute.xlu0 %2849  ;;  %v2918_v58 = vld [vmem:[#allocation3 + $0x48] sm:$0xff] }
 0x2d2   :  { %2846 = vst.msk [vmem:[#allocation2 + $0x59] sm:$0x1] %vm2483_vm12, %v2836_v23  ;;  %2296 = vmatprep.subr.mxu1 %v11842_v42  ;;  %v2917_v53 = vld [vmem:[#allocation3 + $0x40] sm:$0xff]  ;;  %v2887_v59 = vld [vmem:[#allocation2 + $0x8] sm:$0xff]  ;;  %v12121_v23 = vld [vmem:[%s14467_s7 + $0x70] sm:$0xff]  }
 0x2d3   :  { %2861 = vst.msk [vmem:[#allocation2 + $0x50] sm:$0xff] %vm14247_vm15, %v2850_v7  ;;  %2297 = vmatpush2.msra.mxu1 %v2229_v62  ;;  %v11970_v46 = vpack.c.bf16 %v2918_v58, %v2917_v53  ;;  %v2896_v3 = vpack.c.bf16 %v2887_v59, %v2886_v51  ;;  %v12112_v62 = vld [vmem:[%s14467_s7 + $0x78] sm:$0xff]   ;;  %v12128_v7 = vld [vmem:[%s14467_s7 + $0x68] sm:$0xff]   ;;  %v12139_v58 = vld [vmem:[%s14467_s7 + $0x60] sm:$0xff]  }
 0x2d4   :  { %2298 = vmatprep.subr.mxu1 %v11842_v42  ;;  %v9899_v53 = vld [vmem:[%s14467_s7 + $0x38] sm:$0xff]   ;;  %v12237_v59 = vld [vmem:[%s14134_s13] sm:$0xff] }
 0x2d5   :  { %2299 = vmatpush2.msra.mxu1 %v2228_v38  ;;  %v2866_v8 = vpop.permute.xlu1 %2865  ;;  %v2852_v43 = vpop.permute.xlu0 %2851  ;;  %v3312_v38 = vld [vmem:[#allocation3 + $0x58] sm:$0xff] }
 0x2d6   :  { %2877 = vst.msk [vmem:[#allocation2 + $0x4f] sm:$0xfe] %vm14249_vm0, %v2866_v8  ;;  %2300 = vmatprep.subr.mxu1 %v11842_v42  ;;  %v3163_v47 = vld [vmem:[#allocation2 + $0x40] sm:$0xff] }
 0x2d7   :  { %9222 = vmatmul.mubr.msk.bf16.gmra.mxu0 %vm2402_vm3, %v11970_v46  ;;  %2862 = vst.msk [vmem:[#allocation2 + $0x58] sm:$0x1] %vm2501_vm1, %v2852_v43  ;;  %2301 = vmatpush2.msra.mxu1 %v2227_v17  ;;  %v3170_v30 = vpack.c.bf16 %v3164_v52, %v3163_v47 }
 0x2d8   :  { %9261 = vmatprep.mubr.msk.bf16.mxu0 %vm14250_vm9, %v11842_v42  ;;  %2303 = vmatmul.mubr.f32.vlgmr.msra.gmra.mxu1 %v9878_v31 }
 0x2d9   :  { %9225 = vmatprep.subr.bf16.mxu1 %v11842_v42  ;;  %v2868_v29 = vpop.permute.xlu0 %2867  ;;  %7773 = vmatprep.mubr.msk.f32.mxu1 %vm1098_vm2, %v9879_v22 }
 0x2da   :  { %9226 = vmatpush3.bf16.msra.mxu1 %v11979_v60  ;;  %2878 = vst.msk [vmem:[#allocation2 + $0x57] sm:$0x1] %vm14248_vm13, %v2868_v29 }
 0x2db   :  { %9227 = vmatprep.subr.bf16.mxu1 %v11842_v42 }
 0x2dc   :  { %2308 = vmatmul.mubr.f32.gmra.mxu1 %v9880_v32 }
 0x2dd   :  { %7774 = vmatprep.mubr.msk.f32.mxu1 %vm1098_vm2, %v9881_v36 }
 0x2de   :  { %9228 = vmatpush3.bf16.msra.mxu1 %v12000_v37  ;;  %v3166_v39 = vld [vmem:[#allocation2 + $0x58] sm:$0xff] }
 0x2df   :  { %9262 = vmatmul.mubr.msk.bf16.vlgmr.msra.gmra.mxu0 %vm2402_vm3, %v12002_v18  ;;  %9229 = vmatprep.subr.bf16.mxu1 %v11842_v42 }
 0x2e0   :  { %9265 = vmatprep.mubr.msk.bf16.mxu0 %vm14250_vm9, %v11842_v42  ;;  %2313 = vmatmul.mubr.f32.gmra.mxu1 %v9882_v25 }
 0x2e1   :  { %7775 = vmatprep.mubr.msk.f32.mxu1 %vm1098_vm2, %v9883_v55  ;;  %v3165_v6 = vld [vmem:[#allocation2 + $0x50] sm:$0xff] }
 0x2e2   :  { %9230 = vmatpush3.bf16.msra.mxu1 %v12019_v57  ;;  %v3171_v45 = vpack.c.bf16 %v3166_v39, %v3165_v6 }
 0x2e3   :  { %9231 = vmatprep.subr.bf16.mxu1 %v11842_v42 }
 0x2e4   :  { %2318 = vmatmul.mubr.f32.gmra.mxu1 %v9884_v33 }
 0x2e5   :  { %7776 = vmatprep.mubr.msk.f32.mxu1 %vm1098_vm2, %v9885_v19 }
 0x2e6   :  { %9232 = vmatpush3.bf16.msra.mxu1 %v12033_v49 }
 0x2e7   :  { %9266 = vmatmul.mubr.msk.bf16.gmra.mxu0 %vm2402_vm3, %v12035_v5  ;;  %9281 = vmatprep.subr.bf16.mxu1 %v11842_v42 }
 0x2e8   :  { %9269 = vmatprep.mubr.msk.bf16.mxu0 %vm14250_vm9, %v11842_v42  ;;  %2323 = vmatmul.mubr.f32.gmra.mxu1 %v9886_v1 }
 0x2e9   :  { %7777 = vmatprep.mubr.msk.f32.mxu1 %vm1098_vm2, %v9887_v0 }
 0x2ec   :  { %2328 = vmatmul.mubr.f32.gmra.mxu1 %v9888_v50  ;;  %v12066_v54 = vpop.f32.mrf.mxu0 }
 0x2ed   :  { %7778 = vmatprep.mubr.msk.f32.mxu1 %vm1098_vm2, %v9889_v4 }
 0x2ee   :  { %v9207_v48 = vpop.f32.mrf.mxu0 }
 0x2ef   :  { %9270 = vmatmul.mubr.msk.bf16.gmra.mxu0 %vm2402_vm3, %v3169_v41 }
 0x2f0   :  { %9273 = vmatprep.mubr.msk.bf16.mxu0 %vm14250_vm9, %v11842_v42  ;;  %2333 = vmatmul.mubr.f32.gmra.mxu1 %v9890_v2  ;;  %v12077_v27 = vpop.f32.mrf.mxu0 }
 0x2f1   :  { %7779 = vmatprep.mubr.msk.f32.mxu1 %vm1098_vm2, %v9891_v14 }
 0x2f2   :  { %v9208_v24 = vpop.f32.mrf.mxu0 }
 0x2f4   :  { %2338 = vmatmul.mubr.f32.gmra.mxu1 %v9892_v28  ;;  %v3578_v28 = vld [vmem:[#allocation3 + $0x70] sm:$0xff] }
 0x2f5   :  { %7780 = vmatprep.mubr.msk.f32.mxu1 %vm1098_vm2, %v9893_v35  ;;  %v3579_v35 = vld [vmem:[#allocation3 + $0x78] sm:$0xff] }
 0x2f7   :  { %9274 = vmatmul.mubr.msk.bf16.gmra.mxu0 %vm2402_vm3, %v3170_v30 }
 0x2f8   :  { %9277 = vmatprep.mubr.msk.bf16.mxu0 %vm14250_vm9, %v11842_v42  ;;  %2343 = vmatmul.mubr.f32.gmra.mxu1 %v9894_v40 }
 0x2f9   :  { %7781 = vmatprep.mubr.msk.f32.mxu1 %vm1098_vm2, %v9895_v63  ;;  %v3588_v63 = vpack.c.bf16 %v3579_v35, %v3578_v28 }
 0x2fc   :  { %2348 = vmatmul.mubr.f32.gmra.mxu1 %v9896_v16 }
 0x2fd   :  { %7782 = vmatprep.mubr.msk.f32.mxu1 %vm1098_vm2, %v9897_v15  ;;  %vm14523_vm2 = vcmask 130048  }
 0x2ff   :  { %9278 = vmatmul.mubr.msk.bf16.gmra.mxu0 %vm2402_vm3, %v3171_v45 }
 0x300   :  { %2353 = vmatmul.mubr.f32.gmra.mxu1 %v9898_v21  ;;  %v9904_v21 = vld [vmem:[%s14467_s7 + $0x58] sm:$0xff]  }
 0x301   :  { %9233 = vmatprep.mubr.msk.bf16.mxu1 %vm14250_vm9, %v11842_v42 }
 0x304   :  { %9234 = vmatmul.mubr.msk.bf16.vlgmr.msra.gmra.mxu1 %vm2402_vm3, %v2896_v3 }
 0x305   :  { %9237 = vmatprep.mubr.msk.bf16.mxu1 %vm14250_vm9, %v11842_v42  ;;  %9282 = vmatpush3.bf16.msra.mxu1 %v12112_v62 }
 0x306   :  { %9283 = vmatprep.subr.bf16.mxu1 %v11842_v42 }
 0x309   :  { %9284 = vmatpush3.bf16.msra.mxu1 %v12121_v23 }
 0x30a   :  { %9285 = vmatprep.subr.bf16.mxu1 %v11842_v42 }
 0x30c   :  { %9238 = vmatmul.mubr.msk.bf16.gmra.mxu1 %vm2402_vm3, %v12002_v18 }
 0x30d   :  { %9241 = vmatprep.mubr.msk.bf16.mxu1 %vm14250_vm9, %v11842_v42  ;;  %9286 = vmatpush3.bf16.msra.mxu1 %v12128_v7 }
 0x30e   :  { %9287 = vmatprep.subr.bf16.mxu1 %v11842_v42 }
 0x311   :  { %9288 = vmatpush3.bf16.msra.mxu1 %v12139_v58 }
 0x312   :  { %9335 = vmatprep.subr.bf16.mxu1 %v11842_v42 }
 0x314   :  { %9242 = vmatmul.mubr.msk.bf16.gmra.mxu1 %vm2402_vm3, %v12035_v5 }
 0x315   :  { %9245 = vmatprep.mubr.msk.bf16.mxu1 %vm14250_vm9, %v11842_v42 }
 0x31c   :  { %9246 = vmatmul.mubr.msk.bf16.gmra.mxu1 %vm2402_vm3, %v3169_v41 }
 0x31d   :  { %9249 = vmatprep.mubr.msk.bf16.mxu1 %vm14250_vm9, %v11842_v42 }
 0x324   :  { %9250 = vmatmul.mubr.msk.bf16.gmra.mxu1 %vm2402_vm3, %v3170_v30 }
 0x325   :  { %9289 = vmatprep.mubr.msk.bf16.mxu1 %vm14250_vm9, %v11842_v42 }
 0x32c   :  { %9290 = vmatmul.mubr.msk.bf16.vlgmr.msra.gmra.mxu1 %vm2402_vm3, %v11845_v9  ;;  %v9901_v9 = vld [vmem:[%s14467_s7 + $0x28] sm:$0xff]  }
 0x32d   :  { %9293 = vmatprep.mubr.msk.bf16.mxu1 %vm14250_vm9, %v11842_v42  ;;  %9336 = vmatpush3.bf16.msra.mxu1 %v9899_v53 }
 0x32e   :  { %9337 = vmatprep.subr.bf16.mxu1 %v11842_v42 }
 0x331   :  { %9338 = vmatpush3.bf16.msra.mxu1 %v9900_v34 }
 0x332   :  { %9339 = vmatprep.subr.bf16.mxu1 %v11842_v42 }
 0x334   :  { %9294 = vmatmul.mubr.msk.bf16.gmra.mxu1 %vm2402_vm3, %v11897_v44  ;;  %v3311_v44 = vld [vmem:[#allocation3 + $0x50] sm:$0xff] }
 0x335   :  { %9297 = vmatprep.mubr.msk.bf16.mxu1 %vm14250_vm9, %v11842_v42  ;;  %9340 = vmatpush3.bf16.msra.mxu1 %v9901_v9  ;;  %v3317_v17 = vpack.c.bf16 %v3312_v38, %v3311_v44 }
 0x336   :  { %9341 = vmatprep.subr.bf16.mxu1 %v11842_v42 }
 0x339   :  { %9342 = vmatpush3.bf16.msra.mxu1 %v9902_v61 }
 0x33a   :  { %9391 = vmatprep.subr.bf16.mxu1 %v11842_v42 }
 0x33c   :  { %9298 = vmatmul.mubr.msk.bf16.gmra.mxu1 %vm2402_vm3, %v11939_v20 }
 0x33d   :  { %9301 = vmatprep.mubr.msk.bf16.mxu1 %vm14250_vm9, %v11842_v42 }
 0x344   :  { %9302 = vmatmul.mubr.msk.bf16.gmra.mxu1 %vm2402_vm3, %v11970_v46 }
 0x345   :  { %9305 = vmatprep.mubr.msk.bf16.mxu1 %vm14250_vm9, %v11842_v42 }
 0x34c   :  { %9306 = vmatmul.mubr.msk.bf16.gmra.mxu1 %vm2402_vm3, %v3317_v17  ;;  %v9905_v17 = vld [vmem:[%s14467_s7 + $0x50] sm:$0xff]  }
 0x34d   :  { %9343 = vmatprep.mubr.msk.bf16.mxu1 %vm14250_vm9, %v11842_v42 }
 0x354   :  { %9344 = vmatmul.mubr.msk.bf16.vlgmr.msra.gmra.mxu1 %vm2402_vm3, %v3588_v63 }
 0x355   :  { %9347 = vmatprep.mubr.msk.bf16.mxu1 %vm14250_vm9, %v11842_v42  ;;  %9392 = vmatpush3.bf16.msra.mxu1 %v9904_v21 }
 0x356   :  { %9393 = vmatprep.subr.bf16.mxu1 %v11842_v42 }
 0x359   :  { %9394 = vmatpush3.bf16.msra.mxu1 %v9905_v17 }
 0x35a   :  { %9395 = vmatprep.subr.bf16.mxu1 %v11842_v42 }
 0x377   :  { %v12189_v8 = vpop.f32.mrf.mxu0 }
 0x379   :  { %v9211_v20 = vpop.f32.mrf.mxu0 }
 0x37b   :  { %v12191_v43 = vpop.f32.mrf.mxu0 }
 0x37d   :  { %v9212_v31 = vpop.f32.mrf.mxu0 }
 0x383   :  { %v12193_v56 = vpop.f32.mrf.mxu0 }
 0x385   :  { %v9215_v46 = vpop.f32.mrf.mxu0 }
 0x387   :  { %v12195_v11 = vpop.f32.mrf.mxu0 }
 0x389   :  { %v9216_v29 = vpop.f32.mrf.mxu0 }
 0x38f   :  { %v12197_v22 = vpop.f32.mrf.mxu0 }
 0x391   :  { %v9219_v18 = vpop.f32.mrf.mxu0 }
 0x393   :  { %v12199_v32 = vpop.f32.mrf.mxu0 }
 0x395   :  { %v9220_v36 = vpop.f32.mrf.mxu0 }
 0x397   :  { %v12201_v25 = vpop.f32.mrf.mxu0 }
 0x398   :  { %v2304_v55 = vpop.f32.mrf.mxu1 }
 0x399   :  { %v9223_v10 = vpop.f32.mrf.mxu0  ;;  %v2305_v5 = vadd.f32 %v12206_v26, %v2304_v55  ;;  %v9906_v55 = vld [vmem:[%s14467_s7 + $0x48] sm:$0xff]  }
 0x39a   :  { %v2306_v19 = vpop.f32.mrf.mxu1  ;;  %9396 = vmatpush3.bf16.msra.mxu1 %v9906_v55 }
 0x39b   :  { %v12209_v33 = vpop.f32.mrf.mxu0  ;;  %v2358_v1 = vmul.f32 0.2, %v2305_v5  ;;  %9397 = vmatprep.subr.bf16.mxu1 %v11842_v42 }
 0x39c   :  { %v2309_v0 = vpop.f32.mrf.mxu1 }
 0x39d   :  { %v9224_v13 = vpop.f32.mrf.mxu0  ;;  %v2369_v12 = vmax.f32 %v2305_v5, %v2358_v1  ;;  %v2310_v41 = vadd.f32 %v12206_v26, %v2309_v0 }
 0x39e   :  { %v2311_v4 = vpop.f32.mrf.mxu1 }
 0x39f   :  { %v12212_v50 = vpop.f32.mrf.mxu0  ;;  %2391 = vst [vmem:[%s14133_s17 + $0x58] sm:$0xff] %v2369_v12  ;;  %2463 = vst.msk [vmem:[#allocation2 + $0x82] sm:$0xff] %vm14523_vm2, %v2369_v12  ;;  %v2359_v48 = vmul.f32 0.2, %v2310_v41  ;;  %2473 = vrot.lane.b32.xlu1 %v2369_v12, %s9915_s28  ;;  %2491 = vrot.lane.b32.xlu0 %v2369_v12, %s9914_s12  ;;  %vm14524_vm2 = vcmask 122880   ;;  %v9907_v4 = vld [vmem:[%s14467_s7 + $0x40] sm:$0xff]  }
 0x3a0   :  { %v2314_v47 = vpop.f32.mrf.mxu1  ;;  %9398 = vmatpush3.bf16.msra.mxu1 %v9907_v4  ;;  %s9918_s7 = smov 96  }
 0x3a1   :  { %v9263_v2 = vpop.f32.mrf.mxu0  ;;  %v2370_v14 = vmax.f32 %v2310_v41, %v2359_v48  ;;  %v2315_v52 = vadd.f32 %v12206_v26, %v2314_v47 }
 0x3a2   :  { %v2316_v24 = vpop.f32.mrf.mxu1 }
 0x3a3   :  { %v12221_v30 = vpop.f32.mrf.mxu0  ;;  %2392 = vst [vmem:[%s14133_s17 + $0x60] sm:$0xff] %v2370_v14  ;;  %2464 = vst.msk [vmem:[#allocation2 + $0x8a] sm:$0x1] %vm14524_vm2, %v2370_v14  ;;  %v2360_v40 = vmul.f32 0.2, %v2315_v52  ;;  %2509 = vrot.lane.b32.xlu1 %v2369_v12, %s9916_s1  ;;  %2511 = vrot.lane.b32.xlu0 %v2370_v14, %s9916_s1  ;;  %vm14526_vm2 = vcmask 123904  }
 0x3a4   :  { %2527 = vst.msk [vmem:[#allocation3 + $0x81] sm:$0xfe] %vm14525_vm10, %v2370_v14  ;;  %v2319_v39 = vpop.f32.mrf.mxu1  ;;  %vm3455_vm10 = vcmask 654336  }
 0x3a5   :  { %v9264_v6 = vpop.f32.mrf.mxu0  ;;  %v2371_v45 = vmax.f32 %v2315_v52, %v2360_v40  ;;  %v2320_v16 = vadd.f32 %v12206_v26, %v2319_v39  ;;  %9329 = vmatprep.mubr.msk.f32.mxu0 %vm3455_vm10, %v12237_v59 }
 0x3a6   :  { %v2321_v51 = vpop.f32.mrf.mxu1 }
 0x3a7   :  { %v12231_v15 = vpop.f32.mrf.mxu0  ;;  %2393 = vst [vmem:[%s14133_s17 + $0x68] sm:$0xff] %v2371_v45  ;;  %2528 = vst.msk [vmem:[#allocation3 + $0x89] sm:$0x3] %vm14526_vm2, %v2371_v45  ;;  %v2361_v3 = vmul.f32 0.2, %v2320_v16  ;;  %2475 = vrot.lane.b32.xlu1 %v2370_v14, %s9915_s28  ;;  %2533 = vrot.lane.b32.xlu0 %v2371_v45, %s9915_s28  ;;  %vm14529_vm2 = vcmask 130051  }
 0x3a8   :  { %2571 = vst.msk [vmem:[#allocation2 + $0x90] sm:$0xfc] %vm14527_vm8, %v2371_v45  ;;  %v2324_v34 = vpop.f32.mrf.mxu1  ;;  %vm14528_vm8 = vcmask 124928  }
 0x3a9   :  { %v9267_v53 = vpop.f32.mrf.mxu0  ;;  %v2372_v9 = vmax.f32 %v2320_v16, %v2361_v3  ;;  %v2325_v61 = vadd.f32 %v12206_v26, %v2324_v34 }
 0x3aa   :  { %v2326_v38 = vpop.f32.mrf.mxu1 }
 0x3ab   :  { %v12255_v44 = vpop.f32.mrf.mxu0  ;;  %2394 = vst [vmem:[%s14133_s17 + $0x70] sm:$0xff] %v2372_v9  ;;  %2572 = vst.msk [vmem:[#allocation2 + $0x98] sm:$0x7] %vm14528_vm8, %v2372_v9  ;;  %v2362_v20 = vmul.f32 0.2, %v2325_v61  ;;  %2493 = vrot.lane.b32.xlu1 %v2370_v14, %s9914_s12  ;;  %2545 = vrot.lane.b32.xlu0 %v2371_v45, %s9914_s12  ;;  %vm14530_vm8 = vcmask 125952  }
 0x3ac   :  { %2615 = vst.msk [vmem:[#allocation3 + $0x8f] sm:$0xf8] %vm14529_vm2, %v2372_v9  ;;  %v2329_v46 = vpop.f32.mrf.mxu1  ;;  %vm14531_vm2 = vcmask 130052  }
 0x3ad   :  { %v9268_v31 = vpop.f32.mrf.mxu0  ;;  %v2373_v29 = vmax.f32 %v2325_v61, %v2362_v20  ;;  %v2330_v18 = vadd.f32 %v12206_v26, %v2329_v46 }
 0x3ae   :  { %v2331_v10 = vpop.f32.mrf.mxu1 }
 0x3af   :  { %v12269_v36 = vpop.f32.mrf.mxu0  ;;  %2395 = vst [vmem:[%s14133_s17 + $0x78] sm:$0xff] %v2373_v29  ;;  %2616 = vst.msk [vmem:[#allocation3 + $0x97] sm:$0xf] %vm14530_vm8, %v2373_v29  ;;  %v2363_v5 = vmul.f32 0.2, %v2330_v18  ;;  %2557 = vrot.lane.b32.xlu1 %v2371_v45, %s9916_s1  ;;  %2577 = vrot.lane.b32.xlu0 %v2372_v9, %s9915_s28  ;;  %vm14532_vm8 = vcmask 126976  }
 0x3b0   :  { %2659 = vst.msk [vmem:[#allocation2 + $0x9e] sm:$0xf0] %vm14531_vm2, %v2373_v29  ;;  %v2334_v1 = vpop.f32.mrf.mxu1  ;;  %vm14533_vm2 = vcmask 130053  }
 0x3b1   :  { %v9271_v19 = vpop.f32.mrf.mxu0  ;;  %v2374_v13 = vmax.f32 %v2330_v18, %v2363_v5  ;;  %v2335_v0 = vadd.f32 %v12206_v26, %v2334_v1 }
 0x3b2   :  { %v2336_v41 = vpop.f32.mrf.mxu1 }
 0x3b3   :  { %v12283_v12 = vpop.f32.mrf.mxu0  ;;  %2396 = vst [vmem:[%s14133_s17 + $0x80] sm:$0xff] %v2374_v13  ;;  %2660 = vst.msk [vmem:[#allocation2 + $0xa6] sm:$0x1f] %vm14532_vm8, %v2374_v13  ;;  %v2364_v42 = vmul.f32 0.2, %v2335_v0  ;;  %2621 = vrot.lane.b32.xlu1 %v2373_v29, %s9915_s28  ;;  %2589 = vrot.lane.b32.xlu0 %v2372_v9, %s9914_s12  ;;  %vm14534_vm8 = vcmask 128000  }
 0x3b4   :  { %2703 = vst.msk [vmem:[#allocation3 + $0x9d] sm:$0xe0] %vm14533_vm2, %v2374_v13  ;;  %v2339_v2 = vpop.f32.mrf.mxu1  ;;  %vm14535_vm2 = vcmask 130054  }
 0x3b5   :  { %v9272_v48 = vpop.f32.mrf.mxu0  ;;  %v2375_v47 = vmax.f32 %v2335_v0, %v2364_v42  ;;  %v2340_v14 = vadd.f32 %v12206_v26, %v2339_v2 }
 0x3b6   :  { %v2341_v24 = vpop.f32.mrf.mxu1 }
 0x3b7   :  { %v12296_v52 = vpop.f32.mrf.mxu0  ;;  %2397 = vst [vmem:[%s14133_s17 + $0x88] sm:$0xff] %v2375_v47  ;;  %2704 = vst.msk [vmem:[#allocation3 + $0xa5] sm:$0x3f] %vm14534_vm8, %v2375_v47  ;;  %v2365_v28 = vmul.f32 0.2, %v2340_v14  ;;  %2633 = vrot.lane.b32.xlu1 %v2373_v29, %s9914_s12  ;;  %2601 = vrot.lane.b32.xlu0 %v2372_v9, %s9916_s1  ;;  %vm14536_vm8 = vcmask 129024  }
 0x3b8   :  { %2747 = vst.msk [vmem:[#allocation2 + $0xac] sm:$0xc0] %vm14535_vm2, %v2375_v47  ;;  %v2344_v40 = vpop.f32.mrf.mxu1  ;;  %vm14537_vm2 = vcmask 130055  }
 0x3b9   :  { %v9275_v35 = vpop.f32.mrf.mxu0  ;;  %v2376_v6 = vmax.f32 %v2340_v14, %v2365_v28  ;;  %v2345_v63 = vadd.f32 %v12206_v26, %v2344_v40 }
 0x3ba   :  { %v2346_v45 = vpop.f32.mrf.mxu1 }
 0x3bb   :  { %v12306_v39 = vpop.f32.mrf.mxu0  ;;  %2398 = vst [vmem:[%s14133_s17 + $0x90] sm:$0xff] %v2376_v6  ;;  %2748 = vst.msk [vmem:[#allocation2 + $0xb4] sm:$0x7f] %vm14536_vm8, %v2376_v6  ;;  %v2366_v16 = vmul.f32 0.2, %v2345_v63  ;;  %2645 = vrot.lane.b32.xlu1 %v2373_v29, %s9916_s1  ;;  %2665 = vrot.lane.b32.xlu0 %v2374_v13, %s9915_s28  ;;  %vm14538_vm8 = vcmask 130048  }
 0x3bc   :  { %2790 = vst.msk [vmem:[#allocation3 + $0xab] sm:$0x80] %vm14537_vm2, %v2376_v6  ;;  %v2349_v21 = vpop.f32.mrf.mxu1  ;;  %vm14539_vm2 = vmmov %vm14538_vm8 }
 0x3bd   :  { %v9276_v51 = vpop.f32.mrf.mxu0  ;;  %v2377_v3 = vmax.f32 %v2345_v63, %v2366_v16  ;;  %v2350_v53 = vadd.f32 %v12206_v26, %v2349_v21 }
 0x3be   :  { %v2351_v9 = vpop.f32.mrf.mxu1 }
 0x3bf   :  { %v12316_v34 = vpop.f32.mrf.mxu0  ;;  %2399 = vst [vmem:[%s14133_s17 + $0x98] sm:$0xff] %v2377_v3  ;;  %2791 = vst.msk [vmem:[#allocation3 + $0xb3] sm:$0xff] %vm14538_vm8, %v2377_v3  ;;  %v2367_v61 = vmul.f32 0.2, %v2350_v53  ;;  %2709 = vrot.lane.b32.xlu1 %v2375_v47, %s9915_s28  ;;  %2677 = vrot.lane.b32.xlu0 %v2374_v13, %s9914_s12  ;;  %vm14540_vm8 = vcmask 122880  }
 0x3c0   :  { %v2354_v17 = vpop.f32.mrf.mxu1 }
 0x3c1   :  { %v9279_v38 = vpop.f32.mrf.mxu0  ;;  %v2378_v20 = vmax.f32 %v2350_v53, %v2367_v61  ;;  %v2355_v31 = vadd.f32 %v12206_v26, %v2354_v17 }
 0x3c2   :  { %v2356_v29 = vpop.f32.mrf.mxu1 }
 0x3c3   :  { %v12325_v46 = vpop.f32.mrf.mxu0  ;;  %2400 = vst [vmem:[%s14133_s17 + $0xa0] sm:$0xff] %v2378_v20  ;;  %2827 = vst.msk [vmem:[#allocation2 + $0xc2] sm:$0xff] %vm14539_vm2, %v2378_v20  ;;  %v2368_v18 = vmul.f32 0.2, %v2355_v31  ;;  %2721 = vrot.lane.b32.xlu1 %v2375_v47, %s9914_s12  ;;  %2689 = vrot.lane.b32.xlu0 %v2374_v13, %s9916_s1  ;;  %vm14541_vm2 = vcmask 261249  }
 0x3c4   :  { %v3118_v55 = vpop.f32.mrf.mxu1 }
 0x3c5   :  { %v9280_v10 = vpop.f32.mrf.mxu0  ;;  %v2379_v5 = vmax.f32 %v2355_v31, %v2368_v18  ;;  %v3119_v19 = vadd.f32 %v3118_v55, %v12066_v54 }
 0x3c6   :  { %v9235_v26 = vpop.f32.mrf.mxu1 }
 0x3c7   :  { %2401 = vst [vmem:[%s14133_s17 + $0xa8] sm:$0x1] %v2379_v5  ;;  %2828 = vst.msk [vmem:[#allocation2 + $0xca] sm:$0x1] %vm14540_vm8, %v2379_v5  ;;  %2733 = vrot.lane.b32.xlu1 %v2375_v47, %s9916_s1  ;;  %2753 = vrot.lane.b32.xlu0 %v2376_v6, %s9915_s28  ;;  %v12341_v1 = vadd.f32 %v12212_v50, %v3119_v19  ;;  %vm14542_vm8 = vcmask 255104  }
 0x3c8   :  { %v3121_v13 = vpop.f32.mrf.mxu1 }
 0x3c9   :  { %v3122_v0 = vadd.f32 %v3121_v13, %v12077_v27 }
 0x3ca   :  { %v9236_v41 = vpop.f32.mrf.mxu1 }
 0x3cb   :  { %2796 = vrot.lane.b32.xlu1 %v2377_v3, %s9915_s28  ;;  %2765 = vrot.lane.b32.xlu0 %v2376_v6, %s9914_s12  ;;  %v12347_v54 = vadd.f32 %v12221_v30, %v3122_v0 }
 0x3cc   :  { %v3126_v4 = vpop.f32.mrf.mxu1 }
 0x3cd   :  { %v3127_v42 = vadd.f32 %v3126_v4, %v12189_v8 }
 0x3ce   :  { %v9239_v48 = vpop.f32.mrf.mxu1 }
 0x3cf   :  { %2807 = vrot.lane.b32.xlu1 %v2377_v3, %s9914_s12  ;;  %2818 = vrot.lane.b32.xlu0 %v2377_v3, %s9916_s1  ;;  %v12353_v50 = vadd.f32 %v12231_v15, %v3127_v42 }
 0x3d0   :  { %v3129_v27 = vpop.f32.mrf.mxu1 }
 0x3d1   :  { %v3130_v2 = vadd.f32 %v3129_v27, %v12191_v43 }
 0x3d2   :  { %v9240_v47 = vpop.f32.mrf.mxu1 }
 0x3d3   :  { %2777 = vrot.lane.b32.xlu1 %v2376_v6, %s9916_s1  ;;  %2837 = vrot.lane.b32.xlu0 %v2378_v20, %s9915_s28  ;;  %v12359_v30 = vadd.f32 %v12255_v44, %v3130_v2 }
 0x3d4   :  { %v3134_v8 = vpop.f32.mrf.mxu1 }
 0x3d5   :  { %v3135_v14 = vadd.f32 %v3134_v8, %v12193_v56 }
 0x3d6   :  { %v9243_v24 = vpop.f32.mrf.mxu1 }
 0x3d7   :  { %2853 = vrot.lane.b32.xlu1 %v2378_v20, %s9914_s12  ;;  %2839 = vrot.lane.b32.xlu0 %v2379_v5, %s9915_s28  ;;  %v12365_v15 = vadd.f32 %v12269_v36, %v3135_v14 }
 0x3d8   :  { %v3137_v43 = vpop.f32.mrf.mxu1 }
 0x3da   :  { %v9244_v28 = vpop.f32.mrf.mxu1 }
 0x3db   :  { %2855 = vrot.lane.b32.xlu1 %v2379_v5, %s9914_s12  ;;  %2869 = vrot.lane.b32.xlu0 %v2378_v20, %s9916_s1 }
 0x3dc   :  { %v3142_v35 = vpop.f32.mrf.mxu1 }
 0x3dd   :  { %v3143_v48 = vadd.f32 %v3142_v35, %v12197_v22 }
 0x3de   :  { %v9247_v44 = vpop.f32.mrf.mxu1 }
 0x3df   :  { %2871 = vrot.lane.b32.xlu1 %v2379_v5, %s9916_s1 }
 0x3e0   :  { %v3145_v40 = vpop.f32.mrf.mxu1 }
 0x3e1   :  { %v3146_v41 = vadd.f32 %v3145_v40, %v12199_v32  ;;  %v3299_v32 = vadd.f32 %v12296_v52, %v3143_v48 }
 0x3e2   :  { %v9248_v56 = vpop.f32.mrf.mxu1 }
 0x3e4   :  { %v3150_v6 = vpop.f32.mrf.mxu1 }
 0x3e5   :  { %v3151_v13 = vadd.f32 %v3150_v6, %v12201_v25  ;;  %v3300_v25 = vadd.f32 %v12306_v39, %v3146_v41 }
 0x3e6   :  { %v9251_v63 = vpop.f32.mrf.mxu1 }
 0x3e7   :  { %v3301_v27 = vadd.f32 %v12316_v34, %v3151_v13 }
 0x3e8   :  { %v3153_v45 = vpop.f32.mrf.mxu1 }
 0x3e9   :  { %v3154_v19 = vadd.f32 %v3153_v45, %v12209_v33  ;;  %v3138_v33 = vadd.f32 %v3137_v43, %v12195_v11 }
 0x3ea   :  { %v9252_v16 = vpop.f32.mrf.mxu1 }
 0x3eb   :  { %v3302_v4 = vadd.f32 %v12325_v46, %v3154_v19  ;;  %v3298_v11 = vadd.f32 %v12283_v12, %v3138_v33  ;;  %v12419_v16 = vld [vmem:[%s14134_s13 + $0x10] sm:$0xff] }
 0x3ec   :  { %v12370_v51 = vpop.f32.mrf.mxu1 }
 0x3ee   :  { %v9291_v36 = vpop.f32.mrf.mxu1 }
 0x3f0   :  { %v12372_v21 = vpop.f32.mrf.mxu1 }
 0x3f2   :  { %v9292_v3 = vpop.f32.mrf.mxu1 }
 0x3f4   :  { %v12374_v53 = vpop.f32.mrf.mxu1 }
 0x3f5   :  { %v3441_v56 = vadd.f32 %v12374_v53, %v12353_v50  ;;  %v3439_v50 = vadd.f32 %v12370_v51, %v12341_v1  ;;  %v12427_v1 = vld [vmem:[#allocation4] sm:$0xff]  ;;  %v12436_v51 = vld [vmem:[%s14134_s13 + $0x18] sm:$0x1] }
 0x3f6   :  { %v9295_v9 = vpop.f32.mrf.mxu1 }
 0x3f8   :  { %v3411_v61 = vpop.f32.mrf.mxu1 }
 0x3f9   :  { %v3442_v12 = vadd.f32 %v3411_v61, %v12359_v30  ;;  %v3440_v30 = vadd.f32 %v12372_v21, %v12347_v54  ;;  %v12414_v54 = vld [vmem:[%s14134_s13 + $0x8] sm:$0xff] }
 0x3fa   :  { %v9296_v38 = vpop.f32.mrf.mxu1 }
 0x3fb   :  { %v3563_v38 = vld [vmem:[#allocation2 + $0x78] sm:$0xff] }
 0x3fc   :  { %v3416_v17 = vpop.f32.mrf.mxu1 }
 0x3fd   :  { %v3443_v52 = vadd.f32 %v3416_v17, %v12365_v15 }
 0x3fe   :  { %v9299_v20 = vpop.f32.mrf.mxu1 }
 0x400   :  { %v3419_v31 = vpop.f32.mrf.mxu1 }
 0x401   :  { %v3444_v39 = vadd.f32 %v3419_v31, %v3298_v11 }
 0x402   :  { %v9300_v29 = vpop.f32.mrf.mxu1 }
 0x404   :  { %v3424_v18 = vpop.f32.mrf.mxu1 }
 0x405   :  { %v3445_v43 = vadd.f32 %v3424_v18, %v3299_v32 }
 0x406   :  { %v9303_v10 = vpop.f32.mrf.mxu1 }
 0x408   :  { %v3427_v55 = vpop.f32.mrf.mxu1 }
 0x409   :  { %v3446_v22 = vadd.f32 %v3427_v55, %v3300_v25 }
 0x40a   :  { %v9304_v5 = vpop.f32.mrf.mxu1 }
 0x40c   :  { %v3432_v26 = vpop.f32.mrf.mxu1 }
 0x40d   :  { %v3447_v24 = vadd.f32 %v3432_v26, %v3301_v27 }
 0x40e   :  { %v9307_v0 = vpop.f32.mrf.mxu1 }
 0x410   :  { %v3435_v42 = vpop.f32.mrf.mxu1 }
 0x411   :  { %v3448_v2 = vadd.f32 %v3435_v42, %v3302_v4  ;;  %v2474_v47 = vpop.permute.xlu1 %2473  ;;  %v2492_v8 = vpop.permute.xlu0 %2491 }
 0x412   :  { %2485 = vst.msk [vmem:[#allocation2 + $0x81] sm:$0xff] %vm2481_vm14, %v2474_v47  ;;  %v9308_v14 = vpop.f32.mrf.mxu1 }
 0x413   :  { %2503 = vst.msk [vmem:[#allocation2 + $0x80] sm:$0xff] %vm14247_vm15, %v2492_v8  ;;  %9309 = vmatprep.subr.mxu0 %v3448_v2  ;;  %vm14543_vm15 = vcmask 261250  }
 0x414   :  { %9310 = vmatpush3.msra.mxu0 %v3448_v2 }
 0x415   :  { %v2510_v46 = vpop.permute.xlu1 %2509  ;;  %v2512_v34 = vpop.permute.xlu0 %2511  ;;  %9311 = vmatprep.subr.mxu0 %v3447_v24 }
 0x416   :  { %2521 = vst.msk [vmem:[#allocation2 + $0x7f] sm:$0xfe] %vm14249_vm0, %v2510_v46  ;;  %9312 = vmatpush3.msra.mxu0 %v3447_v24  ;;  %vm14545_vm0 = vcmask 386304  }
 0x417   :  { %2522 = vst.msk [vmem:[#allocation2 + $0x87] sm:$0x1] %vm14248_vm13, %v2512_v34  ;;  %9313 = vmatprep.subr.mxu0 %v3446_v22  ;;  %vm14544_vm13 = vcmask 392449  }
 0x418   :  { %9314 = vmatpush3.msra.mxu0 %v3446_v22 }
 0x419   :  { %v2476_v28 = vpop.permute.xlu1 %2475  ;;  %v2534_v35 = vpop.permute.xlu0 %2533  ;;  %9315 = vmatprep.subr.mxu0 %v3445_v43 }
 0x41a   :  { %2486 = vst.msk [vmem:[#allocation2 + $0x89] sm:$0x1] %vm2483_vm12, %v2476_v28  ;;  %9316 = vmatpush3.msra.mxu0 %v3445_v43 }
 0x41b   :  { %2541 = vst.msk [vmem:[#allocation3 + $0x80] sm:$0xfe] %vm14541_vm2, %v2476_v28  ;;  %9317 = vmatprep.subr.mxu0 %v3444_v39  ;;  %vm14546_vm2 = vcmask 392450  }
 0x41c   :  { %2542 = vst.msk [vmem:[#allocation3 + $0x88] sm:$0x3] %vm14542_vm8, %v2534_v35  ;;  %9318 = vmatpush3.msra.mxu0 %v3444_v39  ;;  %vm14548_vm8 = vcmask 517504  }
 0x41d   :  { %2585 = vst.msk [vmem:[#allocation2 + $0x8f] sm:$0xfc] %vm14543_vm15, %v2534_v35  ;;  %v2494_v44 = vpop.permute.xlu1 %2493  ;;  %v2546_v40 = vpop.permute.xlu0 %2545  ;;  %9319 = vmatprep.subr.mxu0 %v3443_v52  ;;  %vm14547_vm15 = vcmask 523650  }
 0x41e   :  { %2504 = vst.msk [vmem:[#allocation2 + $0x88] sm:$0x1] %vm2501_vm1, %v2494_v44  ;;  %9320 = vmatpush3.msra.mxu0 %v3443_v52  ;;  %v3564_v26 = vld [vmem:[#allocation2 + $0x80] sm:$0xff]  ;;  %v12532_v52 = vpop.f32.mrf.mxu1 }
 0x41f   :  { %2553 = vst.msk [vmem:[#allocation3 + $0x7f] sm:$0xfe] %vm14544_vm13, %v2494_v44  ;;  %9321 = vmatprep.subr.mxu0 %v3442_v12  ;;  %vm14549_vm13 = vcmask 523651  }
 0x420   :  { %2554 = vst.msk [vmem:[#allocation3 + $0x87] sm:$0x3] %vm14545_vm0, %v2546_v40  ;;  %9322 = vmatpush3.msra.mxu0 %v3442_v12  ;;  %vm14550_vm0 = vcmask 256128   ;;  %v9345_v12 = vpop.f32.mrf.mxu1 }
 0x421   :  { %2597 = vst.msk [vmem:[#allocation2 + $0x8e] sm:$0xfc] %vm14546_vm2, %v2546_v40  ;;  %v2558_v15 = vpop.permute.xlu1 %2557  ;;  %v2578_v6 = vpop.permute.xlu0 %2577  ;;  %9323 = vmatprep.subr.mxu0 %v3441_v56  ;;  %vm14551_vm2 = vcmask 261251  }
 0x422   :  { %2565 = vst.msk [vmem:[#allocation3 + $0x7e] sm:$0xfc] %vm14547_vm15, %v2512_v34  ;;  %9324 = vmatpush3.msra.mxu0 %v3441_v56  ;;  %vm14552_vm15 = vcmask 257152   ;;  %v12540_v44 = vpop.f32.mrf.mxu1 }
 0x423   :  { %2566 = vst.msk [vmem:[#allocation3 + $0x86] sm:$0x3] %vm14548_vm8, %v2558_v15  ;;  %9325 = vmatprep.subr.mxu0 %v3440_v30  ;;  %vm14553_vm8 = vcmask 261252  }
 0x424   :  { %2609 = vst.msk [vmem:[#allocation2 + $0x8d] sm:$0xf8] %vm14549_vm13, %v2558_v15  ;;  %9326 = vmatpush3.msra.mxu0 %v3440_v30  ;;  %vm14554_vm13 = vcmask 387328   ;;  %v9346_v40 = vpop.f32.mrf.mxu1 }
 0x425   :  { %2586 = vst.msk [vmem:[#allocation2 + $0x97] sm:$0x7] %vm14550_vm0, %v2578_v6  ;;  %v2622_v63 = vpop.permute.xlu1 %2621  ;;  %v2590_v45 = vpop.permute.xlu0 %2589  ;;  %9327 = vmatprep.subr.mxu0 %v3439_v50  ;;  %vm14555_vm0 = vcmask 392451   ;;  %v3565_v19 = vld [vmem:[#allocation2 + $0x88] sm:$0xff] }
 0x426   :  { %2629 = vst.msk [vmem:[#allocation3 + $0x8e] sm:$0xf8] %vm14551_vm2, %v2578_v6  ;;  %9328 = vmatpush3.msra.mxu0 %v3439_v50  ;;  %vm14556_vm2 = vcmask 388352   ;;  %v3573_v41 = vpack.c.bf16 %v3565_v19, %v3564_v26  ;;  %v3890_v6 = vld [vmem:[#allocation3 + $0xc0] sm:$0xff]  ;;  %v3891_v50 = vld [vmem:[#allocation3 + $0xc8] sm:$0xff] }
 0x427   :  { %2630 = vst.msk [vmem:[#allocation3 + $0x96] sm:$0xf] %vm14552_vm15, %v2622_v63  ;;  %9330 = vmatmul.mubr.msk.f32.vlgmr.msra.gmra.mxu0 %vm3455_vm10, %v12414_v54  ;;  %9363 = vmatprep.subr.bf16.mxu0 %v12427_v1  ;;  %v3581_v53 = vld [vmem:[#allocation3 + $0x88] sm:$0xff]  ;;  %vm14557_vm15 = vcmask 392452  }
 0x428   :  { %2673 = vst.msk [vmem:[#allocation2 + $0x9d] sm:$0xf0] %vm14553_vm8, %v2622_v63  ;;  %9364 = vmatpush3.bf16.msra.mxu0 %v11979_v60  ;;  %9332 = vmatprep.mubr.msk.f32.mxu0 %vm3455_vm10, %v12419_v16  ;;  %vm14558_vm8 = vcmask 518528   ;;  %v3896_v63 = vpack.c.bf16 %v3891_v50, %v3890_v6 }
 0x429   :  { %2598 = vst.msk [vmem:[#allocation2 + $0x96] sm:$0x7] %vm14554_vm13, %v2590_v45  ;;  %v2634_v36 = vpop.permute.xlu1 %2633  ;;  %v2602_v21 = vpop.permute.xlu0 %2601  ;;  %9365 = vmatprep.subr.bf16.mxu0 %v12427_v1  ;;  %vm14559_vm13 = vcmask 523652  }
 0x42a   :  { %2641 = vst.msk [vmem:[#allocation3 + $0x8d] sm:$0xf8] %vm14555_vm0, %v2590_v45  ;;  %v3580_v3 = vld [vmem:[#allocation3 + $0x80] sm:$0xff]  ;;  %vm14560_vm0 = vcmask 519552   ;;  %v9714_v45 = vld [vmem:[%s14135_s4 + $0x78] sm:$0xff]  }
 0x42b   :  { %2642 = vst.msk [vmem:[#allocation3 + $0x95] sm:$0xf] %vm14556_vm2, %v2634_v36  ;;  %v12443_v60 = vpack.c.bf16 %v3581_v53, %v3580_v3  ;;  %9333 = vmatmul.mubr.msk.f32.gmra.mxu0 %vm3455_vm10, %v12436_v51  ;;  %vm14561_vm2 = vcmask 523653   ;;  %v12580_v3 = vld [vmem:[%s14135_s4 + $0x60] sm:$0xff]  }
 0x42c   :  { %2685 = vst.msk [vmem:[#allocation2 + $0x9c] sm:$0xf0] %vm14557_vm15, %v2634_v36  ;;  %9366 = vmatpush3.bf16.msra.mxu0 %v12000_v37  ;;  %9371 = vmatprep.mubr.msk.bf16.mxu0 %vm14250_vm9, %v12427_v1  ;;  %vm14562_vm15 = vcmask 258176   ;;  %v3562_v37 = vld [vmem:[#allocation2 + $0x70] sm:$0xff] }
 0x42d   :  { %2610 = vst.msk [vmem:[#allocation2 + $0x95] sm:$0x7] %vm14558_vm8, %v2602_v21  ;;  %9348 = vmatmul.mubr.msk.bf16.gmra.mxu1 %vm2402_vm3, %v12443_v60  ;;  %v2646_v9 = vpop.permute.xlu1 %2645  ;;  %v2666_v61 = vpop.permute.xlu0 %2665  ;;  %9367 = vmatprep.subr.bf16.mxu0 %v12427_v1  ;;  %vm14563_vm8 = vcmask 261253   ;;  %v3572_v31 = vpack.c.bf16 %v3563_v38, %v3562_v37  ;;  %v12561_v36 = vld [vmem:[%s14135_s4 + $0x70] sm:$0xff]  }
 0x42e   :  { %2653 = vst.msk [vmem:[#allocation3 + $0x8c] sm:$0xf0] %vm14559_vm13, %v2602_v21  ;;  %9351 = vmatprep.mubr.msk.bf16.mxu1 %vm14250_vm9, %v12427_v1  ;;  %vm14564_vm13 = vcmask 259200   ;;  %v12575_v21 = vld [vmem:[%s14136_s8] ss:$0 sm:$0xff] }
 0x42f   :  { %2654 = vst.msk [vmem:[#allocation3 + $0x94] sm:$0xf] %vm14560_vm0, %v2646_v9  ;;  %vm14565_vm0 = vcmask 261254  }
 0x430   :  { %2697 = vst.msk [vmem:[#allocation2 + $0x9b] sm:$0xe0] %vm14561_vm2, %v2646_v9  ;;  %9368 = vmatpush3.bf16.msra.mxu0 %v12019_v57  ;;  %vm14566_vm2 = vcmask 389376   ;;  %v3567_v2 = vld [vmem:[#allocation2 + $0x98] sm:$0xff] }
 0x431   :  { %2674 = vst.msk [vmem:[#allocation2 + $0xa5] sm:$0x1f] %vm14562_vm15, %v2666_v61  ;;  %v2710_v17 = vpop.permute.xlu1 %2709  ;;  %v2678_v20 = vpop.permute.xlu0 %2677  ;;  %9369 = vmatprep.subr.bf16.mxu0 %v12427_v1  ;;  %vm14567_vm15 = vcmask 392453  }
 0x432   :  { %2717 = vst.msk [vmem:[#allocation3 + $0x9c] sm:$0xe0] %vm14563_vm8, %v2666_v61  ;;  %v3583_v10 = vld [vmem:[#allocation3 + $0x98] sm:$0xff]  ;;  %vm14568_vm8 = vcmask 392454  }
 0x433   :  { %2718 = vst.msk [vmem:[#allocation3 + $0xa4] sm:$0x3f] %vm14564_vm13, %v2710_v17  ;;  %vm14569_vm13 = vcmask 520576   ;;  %v12588_v61 = vld [vmem:[%s14135_s4 + $0x58] sm:$0xff]  }
 0x434   :  { %2761 = vst.msk [vmem:[#allocation2 + $0xab] sm:$0xc0] %vm14565_vm0, %v2710_v17  ;;  %9370 = vmatpush3.bf16.msra.mxu0 %v12033_v49  ;;  %vm14570_vm0 = vcmask 523654   ;;  %v3566_v27 = vld [vmem:[#allocation2 + $0x90] sm:$0xff] }
 0x435   :  { %2686 = vst.msk [vmem:[#allocation2 + $0xa4] sm:$0x1f] %vm14566_vm2, %v2678_v20  ;;  %v2722_v29 = vpop.permute.xlu1 %2721  ;;  %v2690_v18 = vpop.permute.xlu0 %2689  ;;  %9419 = vmatprep.subr.bf16.mxu0 %v12427_v1  ;;  %v3574_v14 = vpack.c.bf16 %v3567_v2, %v3566_v27  ;;  %v12647_v2 = vld [vmem:[%s14135_s4 + $0xb8] sm:$0xff]  }
 0x436   :  { %2729 = vst.msk [vmem:[#allocation3 + $0x9b] sm:$0xe0] %vm14567_vm15, %v2678_v20  ;;  %v3582_v57 = vld [vmem:[#allocation3 + $0x90] sm:$0xff]  ;;  %vm4204_vm15 = vcmask 261127  }
 0x437   :  { %2730 = vst.msk [vmem:[#allocation3 + $0xa3] sm:$0x3f] %vm2727_vm6, %v2722_v29  ;;  %v12471_v55 = vpack.c.bf16 %v3583_v10, %v3582_v57  ;;  %9372 = vmatmul.mubr.msk.bf16.vlgmr.msra.gmra.mxu0 %vm2402_vm3, %v3572_v31  ;;  %vm14571_vm6 = vcmask 261255   ;;  %v12597_v10 = vld [vmem:[%s14135_s4 + $0x50] sm:$0xff]  }
 0x438   :  { %2773 = vst.msk [vmem:[#allocation2 + $0xaa] sm:$0xc0] %vm14568_vm8, %v2722_v29  ;;  %9375 = vmatprep.mubr.msk.bf16.mxu0 %vm14250_vm9, %v12427_v1  ;;  %9420 = vmatpush3.bf16.msra.mxu0 %v12112_v62  ;;  %vm4148_vm8 = vcmask 261125  }
 0x439   :  { %2698 = vst.msk [vmem:[#allocation2 + $0xa3] sm:$0x1f] %vm14569_vm13, %v2690_v18  ;;  %9352 = vmatmul.mubr.msk.bf16.gmra.mxu1 %vm2402_vm3, %v12471_v55  ;;  %v2734_v49 = vpop.permute.xlu1 %2733  ;;  %v2754_v5 = vpop.permute.xlu0 %2753  ;;  %9421 = vmatprep.subr.bf16.mxu0 %v12427_v1  ;;  %vm4116_vm13 = vcmask 258048  }
 0x43a   :  { %2741 = vst.msk [vmem:[#allocation3 + $0x9a] sm:$0xc0] %vm14570_vm0, %v2690_v18  ;;  %9355 = vmatprep.mubr.msk.bf16.mxu1 %vm14250_vm9, %v12427_v1  ;;  %vm14257_vm0 = vcmask 253952  }
 0x43b   :  { %2742 = vst.msk [vmem:[#allocation3 + $0xa2] sm:$0x3f] %vm2739_vm4, %v2734_v49  ;;  %vm14572_vm4 = vcmask 392455  }
 0x43c   :  { %2785 = vst.msk [vmem:[#allocation2 + $0xa9] sm:$0x80] %vm2781_vm7, %v2734_v49  ;;  %9422 = vmatpush3.bf16.msra.mxu0 %v12121_v23  ;;  %vm14574_vm7 = vcmask 523648  }
 0x43d   :  { %2762 = vst.msk [vmem:[#allocation2 + $0xb3] sm:$0x7f] %vm2759_vm5, %v2754_v5  ;;  %v2797_v13 = vpop.permute.xlu1 %2796  ;;  %v2766_v0 = vpop.permute.xlu0 %2765  ;;  %9423 = vmatprep.subr.bf16.mxu0 %v12427_v1  ;;  %vm14573_vm5 = vcmask 392448  }
 0x43e   :  { %2803 = vst.msk [vmem:[#allocation3 + $0xaa] sm:$0x80] %vm14571_vm6, %v2754_v5  ;;  %v3585_v48 = vld [vmem:[#allocation3 + $0xa8] sm:$0xff]  ;;  %vm14576_vm2 = vmmov %vm14573_vm5  ;;  %vm14256_vm6 = vcmask 257024  }
 0x43f   :  { %2804 = vst.msk [vmem:[#allocation3 + $0xb2] sm:$0xff] %vm2481_vm14, %v2797_v13  ;;  %9376 = vmatmul.mubr.msk.bf16.gmra.mxu0 %vm2402_vm3, %v3573_v41 }
 0x440   :  { %2774 = vst.msk [vmem:[#allocation2 + $0xb2] sm:$0x7f] %vm2771_vm11, %v2766_v0  ;;  %9379 = vmatprep.mubr.msk.bf16.mxu0 %vm14250_vm9, %v12427_v1  ;;  %9424 = vmatpush3.bf16.msra.mxu0 %v12128_v7  ;;  %vm14575_vm11 = vcmask 522624   ;;  %v3568_v32 = vld [vmem:[#allocation2 + $0xa0] sm:$0xff] }
 0x441   :  { %2814 = vst.msk [vmem:[#allocation3 + $0xa9] sm:$0x80] %vm14572_vm4, %v2766_v0  ;;  %v2808_v62 = vpop.permute.xlu1 %2807  ;;  %v2819_v4 = vpop.permute.xlu0 %2818  ;;  %9425 = vmatprep.subr.bf16.mxu0 %v12427_v1  ;;  %vm14252_vm4 = vcmask 261124  }
 0x442   :  { %v3584_v42 = vld [vmem:[#allocation3 + $0xa0] sm:$0xff]  ;;  %2815 = vst.msk [vmem:[#allocation3 + $0xb1] sm:$0xff] %vm14573_vm5, %v2808_v62  ;;  %vm14255_vm5 = vcmask 517376  }
 0x443   :  { %v3591_v23 = vpack.c.bf16 %v3585_v48, %v3584_v42  ;;  %2824 = vst.msk [vmem:[#allocation3 + $0xb0] sm:$0xff] %vm14574_vm7, %v2819_v4  ;;  %v12636_v42 = vld [vmem:[%s14135_s4 + $0x40] sm:$0xff]   ;;  %vm14254_vm7 = vcmask 522498  }
 0x444   :  { %9426 = vmatpush3.bf16.msra.mxu0 %v12139_v58  ;;  %v3569_v58 = vld [vmem:[#allocation2 + $0xa8] sm:$0xff] }
 0x445   :  { %9356 = vmatmul.mubr.msk.bf16.gmra.mxu1 %vm2402_vm3, %v3591_v23  ;;  %v2778_v47 = vpop.permute.xlu1 %2777  ;;  %v2838_v8 = vpop.permute.xlu0 %2837  ;;  %v3575_v11 = vpack.c.bf16 %v3569_v58, %v3568_v32  ;;  %9473 = vmatprep.subr.bf16.mxu0 %v9714_v45 }
 0x446   :  { %9359 = vmatprep.mubr.msk.bf16.mxu1 %vm14250_vm9, %v12427_v1  ;;  %2786 = vst.msk [vmem:[#allocation2 + $0xb1] sm:$0x7f] %vm14575_vm11, %v2778_v47  ;;  %vm14253_vm11 = vcmask 523527  }
 0x447   :  { %2847 = vst.msk [vmem:[#allocation2 + $0xc1] sm:$0xff] %vm2481_vm14, %v2838_v8  ;;  %9380 = vmatmul.mubr.msk.bf16.gmra.mxu0 %vm2402_vm3, %v3574_v14  ;;  %vm14577_vm14 = vcmask 523649   ;;  %v3571_v28 = vld [vmem:[#allocation2 + $0xb8] sm:$0xff] }
 0x448   :  { %9383 = vmatprep.mubr.msk.bf16.mxu0 %vm14250_vm9, %v12427_v1 }
 0x449   :  { %v2854_v7 = vpop.permute.xlu1 %2853  ;;  %v2840_v33 = vpop.permute.xlu0 %2839  ;;  %v3587_v25 = vld [vmem:[#allocation3 + $0xb8] sm:$0xff] }
 0x44a   :  { %2863 = vst.msk [vmem:[#allocation2 + $0xc0] sm:$0xff] %vm14576_vm2, %v2854_v7  ;;  %v3586_v24 = vld [vmem:[#allocation3 + $0xb0] sm:$0xff]  ;;  %vm4198_vm2 = vcmask 784898  }
 0x44b   :  { %2848 = vst.msk [vmem:[#allocation2 + $0xc9] sm:$0x1] %vm2483_vm12, %v2840_v33  ;;  %v3592_v22 = vpack.c.bf16 %v3587_v25, %v3586_v24  ;;  %vm14578_vm12 = vcmask 516480  }
 0x44d   :  { %v2856_v46 = vpop.permute.xlu1 %2855  ;;  %v2870_v34 = vpop.permute.xlu0 %2869  ;;  %9360 = vmatmul.mubr.msk.bf16.gmra.mxu1 %vm2402_vm3, %v3592_v22  ;;  %v3570_v39 = vld [vmem:[#allocation2 + $0xb0] sm:$0xff] }
 0x44e   :  { %2864 = vst.msk [vmem:[#allocation2 + $0xc8] sm:$0x1] %vm2501_vm1, %v2856_v46  ;;  %9399 = vmatprep.mubr.msk.bf16.mxu1 %vm14250_vm9, %v12427_v1  ;;  %v3576_v35 = vpack.c.bf16 %v3571_v28, %v3570_v39  ;;  %vm4192_vm1 = vcmask 260098  }
 0x44f   :  { %2879 = vst.msk [vmem:[#allocation2 + $0xbf] sm:$0xfe] %vm14577_vm14, %v2870_v34  ;;  %9384 = vmatmul.mubr.msk.bf16.gmra.mxu0 %vm2402_vm3, %v3575_v11  ;;  %vm4230_vm14 = vcmask 785927  }
 0x450   :  { %9387 = vmatprep.mubr.msk.bf16.mxu0 %vm14250_vm9, %v12427_v1 }
 0x451   :  { %v2872_v43 = vpop.permute.xlu1 %2871 }
 0x452   :  { %2880 = vst.msk [vmem:[#allocation2 + $0xc7] sm:$0x1] %vm14578_vm12, %v2872_v43  ;;  %vm14260_vm12 = vcmask 523525  }
 0x455   :  { %9400 = vmatmul.mubr.msk.bf16.vlgmr.msra.gmra.mxu1 %vm2402_vm3, %v3573_v41  ;;  %v3778_v30 = vld [vmem:[#allocation2 + $0xc8] sm:$0xff] }
 0x456   :  { %9403 = vmatprep.mubr.msk.bf16.mxu1 %vm14250_vm9, %v12427_v1  ;;  %v12618_v41 = vld [vmem:[%s14135_s4 + $0x48] sm:$0xff]  }
 0x457   :  { %9388 = vmatmul.mubr.msk.bf16.gmra.mxu0 %vm2402_vm3, %v3576_v35 }
 0x458   :  { %9427 = vmatprep.mubr.msk.bf16.mxu0 %vm14250_vm9, %v12427_v1 }
 0x459   :  { %v3777_v56 = vld [vmem:[#allocation2 + $0xc0] sm:$0xff] }
 0x45a   :  { %v3783_v15 = vpack.c.bf16 %v3778_v30, %v3777_v56 }
 0x45d   :  { %9404 = vmatmul.mubr.msk.bf16.gmra.mxu1 %vm2402_vm3, %v3574_v14 }
 0x45e   :  { %9407 = vmatprep.mubr.msk.bf16.mxu1 %vm14250_vm9, %v12427_v1 }
 0x45f   :  { %9428 = vmatmul.mubr.msk.bf16.vlgmr.msra.gmra.mxu0 %vm2402_vm3, %v12443_v60 }
 0x460   :  { %9431 = vmatprep.mubr.msk.bf16.mxu0 %vm14250_vm9, %v12427_v1  ;;  %9474 = vmatpush3.bf16.msra.mxu0 %v9714_v45 }
 0x461   :  { %9475 = vmatprep.subr.bf16.mxu0 %v12561_v36 }
 0x464   :  { %9476 = vmatpush3.bf16.msra.mxu0 %v12561_v36 }
 0x465   :  { %9408 = vmatmul.mubr.msk.bf16.gmra.mxu1 %vm2402_vm3, %v3575_v11 }
 0x466   :  { %9411 = vmatprep.mubr.msk.bf16.mxu1 %vm14250_vm9, %v12427_v1 }
 0x467   :  { %9432 = vmatmul.mubr.msk.bf16.gmra.mxu0 %vm2402_vm3, %v12471_v55 }
 0x468   :  { %9435 = vmatprep.mubr.msk.bf16.mxu0 %vm14250_vm9, %v12427_v1 }
 0x46d   :  { %9412 = vmatmul.mubr.msk.bf16.gmra.mxu1 %vm2402_vm3, %v3576_v35 }
 0x46e   :  { %9415 = vmatprep.mubr.msk.bf16.mxu1 %vm14250_vm9, %v12427_v1 }
 0x46f   :  { %9436 = vmatmul.mubr.msk.bf16.gmra.mxu0 %vm2402_vm3, %v3591_v23 }
 0x470   :  { %9439 = vmatprep.mubr.msk.bf16.mxu0 %vm14250_vm9, %v12427_v1 }
 0x475   :  { %9416 = vmatmul.mubr.msk.bf16.gmra.mxu1 %vm2402_vm3, %v3783_v15 }
 0x476   :  { %9467 = vmatprep.mubr.msk.f32.mxu1 %vm3455_vm10, %v12237_v59  ;;  %v12568_v59 = vld [vmem:[%s14135_s4 + $0x68] sm:$0xff]  }
 0x477   :  { %9440 = vmatmul.mubr.msk.bf16.gmra.mxu0 %vm2402_vm3, %v3592_v22  ;;  %9477 = vmatprep.subr.bf16.mxu0 %v12568_v59 }
 0x478   :  { %9443 = vmatprep.mubr.msk.bf16.mxu0 %vm14250_vm9, %v12427_v1  ;;  %9478 = vmatpush3.bf16.msra.mxu0 %v12568_v59  ;;  %vm14259_vm9 = vcmask 1047299  }
 0x479   :  { %9479 = vmatprep.subr.bf16.mxu0 %v12580_v3 }
 0x47c   :  { %9480 = vmatpush3.bf16.msra.mxu0 %v12580_v3 }
 0x47d   :  { %9481 = vmatprep.subr.bf16.mxu0 %v12588_v61 }
 0x47f   :  { %9444 = vmatmul.mubr.msk.bf16.gmra.mxu0 %vm2402_vm3, %v3896_v63  ;;  %vm4150_vm3 = vcmask 254976  }
 0x480   :  { %9482 = vmatpush3.bf16.msra.mxu0 %v12588_v61 }
 0x481   :  { %9483 = vmatprep.subr.bf16.mxu0 %v12597_v10 }
 0x484   :  { %9484 = vmatpush3.bf16.msra.mxu0 %v12597_v10 }
 0x485   :  { %9485 = vmatprep.subr.bf16.mxu0 %v12618_v41 }
 0x488   :  { %9486 = vmatpush3.bf16.msra.mxu0 %v12618_v41 }
 0x489   :  { %9487 = vmatprep.subr.bf16.mxu0 %v12636_v42 }
 0x48c   :  { %9488 = vmatpush3.bf16.msra.mxu0 %v12636_v42 }
 0x48d   :  { %9513 = vmatprep.subr.bf16.mxu0 %v12647_v2 }
 0x4e7   :  { %v9331_v53 = vpop.f32.mrf.mxu0 }
 0x4e8   :  { %v3540_v60 = vadd.f32 %v9331_v53, %v12575_v21 }
 0x4e9   :  { %v3534_v9 = vpop.f32.mrf.mxu0 }
 0x4ea   :  { %v3554_v37 = vmul.f32 0.2, %v3540_v60  ;;  %v3535_v38 = vadd.f32 %v12575_v21, %v3534_v9 }
 0x4eb   :  { %v9334_v17 = vpop.f32.mrf.mxu0 }
 0x4ec   :  { %v3558_v20 = vmax.f32 %v3540_v60, %v3554_v37  ;;  %v3553_v31 = vmul.f32 0.2, %v3535_v38  ;;  %v3550_v18 = vadd.f32 %v9334_v17, %v12575_v21 }
 0x4ed   :  { %v3650_v29 = vpop.f32.mrf.mxu1  ;;  %v3544_v57 = vpop.f32.mrf.mxu0 }
 0x4ee   :  { %4089 = vst [vmem:[%s14137_s18 + $0x8] sm:$0xff] %v3558_v20  ;;  %v3557_v55 = vmax.f32 %v3535_v38, %v3553_v31  ;;  %4180 = vrot.lane.b32.xlu0 %v3558_v20, %s9918_s7  ;;  %4156 = vrot.lane.b32.xlu1 %v3558_v20, %s9914_s12  ;;  %v3556_v5 = vmul.f32 0.2, %v3550_v18  ;;  %v3545_v19 = vadd.f32 %v12575_v21, %v3544_v57  ;;  %4151 = vst.msk [vmem:[#allocation5 + $0xd] sm:$0x3] %vm4150_vm3, %v3558_v20 }
 0x4ef   :  { %v9349_v49 = vpop.f32.mrf.mxu1  ;;  %4193 = vst.msk [vmem:[#allocation4 + $0x10] sm:$0x7c] %vm4192_vm1, %v3558_v20 }
 0x4f0   :  { %4205 = vst.msk [vmem:[#allocation5 + $0xb] sm:$0x80] %vm4204_vm15, %v3558_v20  ;;  %4088 = vst [vmem:[%s14137_s18] sm:$0xff] %v3557_v55  ;;  %v3560_v26 = vmax.f32 %v3550_v18, %v3556_v5  ;;  %v3555_v0 = vmul.f32 0.2, %v3545_v19 }
 0x4f1   :  { %v3653_v13 = vpop.f32.mrf.mxu1  ;;  %4149 = vst.msk [vmem:[#allocation5 + $0x5] sm:$0xe0] %vm4148_vm8, %v3557_v55 }
 0x4f2   :  { %4117 = vst.msk [vmem:[#allocation4 + $0xa] sm:$0x1f] %vm4116_vm13, %v3557_v55  ;;  %4091 = vst [vmem:[%s14137_s18 + $0x18] sm:$0x1] %v3560_v26  ;;  %v3559_v62 = vmax.f32 %v3545_v19, %v3555_v0  ;;  %4168 = vrot.lane.b32.xlu1 %v3558_v20, %s9919_s29  ;;  %4121 = vrot.lane.b32.xlu0 %v3557_v55, %s9914_s12 }
 0x4f3   :  { %v9350_v4 = vpop.f32.mrf.mxu1  ;;  %4248 = vst.msk [vmem:[#allocation4 + $0x1e] sm:$0x1] %vm14257_vm0, %v3560_v26  ;;  %vm14262_vm0 = vcmask 1042176  }
 0x4f4   :  { %4090 = vst [vmem:[%s14137_s18 + $0x10] sm:$0xff] %v3559_v62  ;;  %4207 = vst.msk [vmem:[#allocation5 + $0x13] sm:$0xf] %vm14256_vm6, %v3559_v62  ;;  %vm14263_vm6 = vcmask 1048326  }
 0x4f5   :  { %4246 = vst.msk [vmem:[#allocation4 + $0x16] sm:$0xf0] %vm14252_vm4, %v3559_v62  ;;  %vm14258_vm4 = vcmask 779776  }
 0x4f6   :  { %4139 = vrot.lane.b32.xlu1 %v3557_v55, %s9918_s7  ;;  %4130 = vrot.lane.b32.xlu0 %v3557_v55, %s9919_s29 }
 0x4f7   :  { %v12640_v48 = vpop.f32.mrf.mxu0 }
 0x4f9   :  { %v3658_v23 = vpop.f32.mrf.mxu1  ;;  %v9373_v27 = vpop.f32.mrf.mxu0 }
 0x4fa   :  { %4224 = vrot.lane.b32.xlu1 %v3559_v62, %s9919_s29  ;;  %4212 = vrot.lane.b32.xlu0 %v3559_v62, %s9914_s12 }
 0x4fb   :  { %v9353_v47 = vpop.f32.mrf.mxu1  ;;  %v12651_v8 = vpop.f32.mrf.mxu0 }
 0x4fd   :  { %v12654_v14 = vpop.f32.mrf.mxu1  ;;  %v9374_v7 = vpop.f32.mrf.mxu0 }
 0x4fe   :  { %4253 = vrot.lane.b32.xlu1 %v3560_v26, %s9914_s12  ;;  %4236 = vrot.lane.b32.xlu0 %v3559_v62, %s9918_s7 }
 0x4ff   :  { %v9354_v33 = vpop.f32.mrf.mxu1  ;;  %v3738_v25 = vpop.f32.mrf.mxu0 }
 0x500   :  { %v12658_v24 = vadd.f32 %v3738_v25, %v3650_v29 }
 0x501   :  { %v9377_v32 = vpop.f32.mrf.mxu0 }
 0x502   :  { %4277 = vrot.lane.b32.xlu1 %v3560_v26, %s9918_s7  ;;  %4265 = vrot.lane.b32.xlu0 %v3560_v26, %s9919_s29 }
 0x503   :  { %v3741_v22 = vpop.f32.mrf.mxu0 }
 0x504   :  { %v12662_v58 = vadd.f32 %v3741_v22, %v3653_v13 }
 0x505   :  { %v12664_v46 = vpop.f32.mrf.mxu1  ;;  %v9378_v34 = vpop.f32.mrf.mxu0 }
 0x507   :  { %v9357_v11 = vpop.f32.mrf.mxu1  ;;  %v3746_v43 = vpop.f32.mrf.mxu0 }
 0x508   :  { %v12666_v39 = vadd.f32 %v3746_v43, %v3658_v23 }
 0x509   :  { %v3669_v28 = vpop.f32.mrf.mxu1  ;;  %v9381_v35 = vpop.f32.mrf.mxu0 }
 0x50b   :  { %v9358_v12 = vpop.f32.mrf.mxu1  ;;  %v12668_v40 = vpop.f32.mrf.mxu0 }
 0x50d   :  { %v3674_v56 = vpop.f32.mrf.mxu1  ;;  %v9382_v30 = vpop.f32.mrf.mxu0 }
 0x50f   :  { %v9361_v15 = vpop.f32.mrf.mxu1  ;;  %v3754_v6 = vpop.f32.mrf.mxu0 }
 0x511   :  { %v3677_v50 = vpop.f32.mrf.mxu1  ;;  %v9385_v63 = vpop.f32.mrf.mxu0 }
 0x513   :  { %v9362_v45 = vpop.f32.mrf.mxu1  ;;  %v3757_v53 = vpop.f32.mrf.mxu0 }
 0x515   :  { %v9386_v60 = vpop.f32.mrf.mxu0  ;;  %v12670_v9 = vpop.f32.mrf.mxu1 }
 0x517   :  { %v3762_v37 = vpop.f32.mrf.mxu0  ;;  %v9401_v38 = vpop.f32.mrf.mxu1 }
 0x519   :  { %v9389_v17 = vpop.f32.mrf.mxu0  ;;  %v12672_v20 = vpop.f32.mrf.mxu1 }
 0x51b   :  { %v3765_v31 = vpop.f32.mrf.mxu0  ;;  %v9402_v29 = vpop.f32.mrf.mxu1 }
 0x51d   :  { %v9390_v18 = vpop.f32.mrf.mxu0  ;;  %v12674_v57 = vpop.f32.mrf.mxu1 }
 0x51f   :  { %v9405_v55 = vpop.f32.mrf.mxu1  ;;  %v12676_v49 = vpop.f32.mrf.mxu0 }
 0x521   :  { %v3844_v5 = vpop.f32.mrf.mxu1  ;;  %v9429_v19 = vpop.f32.mrf.mxu0 }
 0x522   :  { %v3766_v19 = vadd.f32 %v3765_v31, %v3677_v50 }
 0x523   :  { %v9406_v26 = vpop.f32.mrf.mxu1  ;;  %v12678_v13 = vpop.f32.mrf.mxu0 }
 0x525   :  { %v3849_v0 = vpop.f32.mrf.mxu1  ;;  %v9430_v62 = vpop.f32.mrf.mxu0 }
 0x526   :  { %v3763_v62 = vadd.f32 %v3762_v37, %v3674_v56 }
 0x527   :  { %v9409_v4 = vpop.f32.mrf.mxu1  ;;  %v3954_v23 = vpop.f32.mrf.mxu0 }
 0x529   :  { %v3852_v27 = vpop.f32.mrf.mxu1  ;;  %v9433_v47 = vpop.f32.mrf.mxu0 }
 0x52b   :  { %v9410_v7 = vpop.f32.mrf.mxu1  ;;  %v3957_v33 = vpop.f32.mrf.mxu0 }
 0x52c   :  { %v3758_v7 = vadd.f32 %v3757_v53, %v3669_v28  ;;  %v3876_v28 = vadd.f32 %v3849_v0, %v12666_v39  ;;  %v3731_v39 = vadd.f32 %v12640_v48, %v12532_v52  ;;  %v12703_v52 = vld [vmem:[%s14135_s4 + $0x30] sm:$0xff]   ;;  %v12715_v48 = vld [vmem:[%s14135_s4 + $0x28] sm:$0xff]  }
 0x52d   :  { %v3857_v25 = vpop.f32.mrf.mxu1  ;;  %v9434_v32 = vpop.f32.mrf.mxu0 }
 0x52f   :  { %v9413_v22 = vpop.f32.mrf.mxu1  ;;  %v3962_v34 = vpop.f32.mrf.mxu0 }
 0x531   :  { %v3860_v11 = vpop.f32.mrf.mxu1  ;;  %v9437_v43 = vpop.f32.mrf.mxu0 }
 0x533   :  { %v9414_v35 = vpop.f32.mrf.mxu1  ;;  %v3965_v12 = vpop.f32.mrf.mxu0 }
 0x534   :  { %v3755_v35 = vadd.f32 %v3754_v6, %v12664_v46  ;;  %v3875_v46 = vadd.f32 %v3844_v5, %v12662_v58  ;;  %v3989_v6 = vadd.f32 %v3962_v34, %v3876_v28  ;;  %v3872_v58 = vadd.f32 %v12670_v9, %v3731_v39  ;;  %v12866_v28 = vld [vmem:[%s14135_s4 + $0xc8] sm:$0xff]   ;;  %v12915_v39 = vld [vmem:[%s14138_s14] sm:$0xff] }
 0x535   :  { %v3865_v30 = vpop.f32.mrf.mxu1  ;;  %v9438_v15 = vpop.f32.mrf.mxu0 }
 0x536   :  { %v3880_v32 = vadd.f32 %v3865_v30, %v3763_v62  ;;  %v3879_v15 = vadd.f32 %v3860_v11, %v3758_v7  ;;  %v3988_v37 = vadd.f32 %v3957_v33, %v3875_v46  ;;  %v12759_v33 = vld [vmem:[%s14135_s4 + $0x8] sm:$0xff]   ;;  %v12773_v30 = vld [vmem:[%s14135_s4] sm:$0xff]   ;;  %v12791_v7 = vld [vmem:[%s14135_s4 + $0xb0] sm:$0xff]  }
 0x537   :  { %v9417_v63 = vpop.f32.mrf.mxu1  ;;  %v3970_v45 = vpop.f32.mrf.mxu0  ;;  %v12880_v46 = vld [vmem:[%s14135_s4 + $0xc0] sm:$0xff]  }
 0x539   :  { %v3868_v60 = vpop.f32.mrf.mxu1  ;;  %v9441_v38 = vpop.f32.mrf.mxu0 }
 0x53a   :  { %v3881_v4 = vadd.f32 %v3868_v60, %v3766_v19  ;;  %v3750_v38 = vadd.f32 %v12668_v40, %v12654_v14  ;;  %v3734_v14 = vadd.f32 %v12651_v8, %v12540_v44  ;;  %v3874_v40 = vadd.f32 %v12674_v57, %v12658_v24  ;;  %v12698_v8 = vld [vmem:[%s14135_s4 + $0x38] sm:$0xff]  }
 0x53b   :  { %v9418_v17 = vpop.f32.mrf.mxu1  ;;  %v3973_v29 = vpop.f32.mrf.mxu0  ;;  %v3985_v44 = vadd.f32 %v12676_v49, %v3872_v58  ;;  %v12781_v19 = vld [vmem:[%s14135_s4 + $0xf8] sm:$0xff]  }
 0x53c   :  { %v3878_v17 = vadd.f32 %v3857_v25, %v3755_v35  ;;  %v3877_v56 = vadd.f32 %v3852_v27, %v3750_v38  ;;  %v3873_v31 = vadd.f32 %v12672_v20, %v3734_v14  ;;  %v3987_v0 = vadd.f32 %v3954_v23, %v3874_v40  ;;  %v12734_v20 = vld [vmem:[%s14135_s4 + $0x18] sm:$0xff]   ;;  %v12810_v35 = vld [vmem:[%s14135_s4 + $0xe8] sm:$0xff]   ;;  %v12887_v14 = vld [vmem:[#allocation4] sm:$0xff] }
 0x53d   :  { %v9442_v18 = vpop.f32.mrf.mxu0  ;;  %v12832_v38 = vld [vmem:[%s14135_s4 + $0x98] sm:$0xff]   ;;  %v12891_v40 = vpack.c.bf16 %v12887_v14, %v12887_v14 }
 0x53e   :  { %v3992_v18 = vadd.f32 %v3973_v29, %v3879_v15  ;;  %v3991_v50 = vadd.f32 %v3970_v45, %v3878_v17  ;;  %v3990_v53 = vadd.f32 %v3965_v12, %v3877_v56  ;;  %v3986_v5 = vadd.f32 %v12678_v13, %v3873_v31  ;;  %v12747_v13 = vld [vmem:[%s14135_s4 + $0x10] sm:$0xff]   ;;  %v12818_v15 = vld [vmem:[%s14135_s4 + $0xa0] sm:$0xff]   ;;  %v12838_v17 = vld [vmem:[%s14135_s4 + $0xd8] sm:$0xff]  }
 0x53f   :  { %v3978_v55 = vpop.f32.mrf.mxu0  ;;  %v12852_v56 = vld [vmem:[%s14135_s4 + $0xd0] sm:$0xff]  }
 0x540   :  { %v3993_v63 = vadd.f32 %v3978_v55, %v3880_v32 }
 0x541   :  { %v9445_v26 = vpop.f32.mrf.mxu0 }
 0x543   :  { %v3981_v47 = vpop.f32.mrf.mxu0 }
 0x544   :  { %v3994_v22 = vadd.f32 %v3981_v47, %v3881_v4 }
 0x545   :  { %v9446_v43 = vpop.f32.mrf.mxu0 }
 0x546   :  { %9447 = vmatprep.subr.mxu1 %v3994_v22  ;;  %v12804_v43 = vld [vmem:[%s14135_s4 + $0xa8] sm:$0xff]  }
 0x547   :  { %9448 = vmatpush3.msra.mxu1 %v3994_v22  ;;  %v12796_v22 = vld [vmem:[%s14135_s4 + $0xf0] sm:$0xff]  }
 0x548   :  { %9449 = vmatprep.subr.mxu1 %v3993_v63 }
 0x549   :  { %9450 = vmatpush3.msra.mxu1 %v3993_v63  ;;  %v12824_v63 = vld [vmem:[%s14135_s4 + $0xe0] sm:$0xff]  }
 0x54a   :  { %9451 = vmatprep.subr.mxu1 %v3992_v18 }
 0x54b   :  { %9452 = vmatpush3.msra.mxu1 %v3992_v18  ;;  %v12846_v18 = vld [vmem:[%s14135_s4 + $0x90] sm:$0xff]  }
 0x54c   :  { %9453 = vmatprep.subr.mxu1 %v3991_v50 }
 0x54d   :  { %9454 = vmatpush3.msra.mxu1 %v3991_v50  ;;  %v12860_v50 = vld [vmem:[%s14135_s4 + $0x88] sm:$0xff]  }
 0x54e   :  { %9455 = vmatprep.subr.mxu1 %v3990_v53 }
 0x54f   :  { %9456 = vmatpush3.msra.mxu1 %v3990_v53  ;;  %v12874_v53 = vld [vmem:[%s14135_s4 + $0x80] sm:$0xff]  }
 0x550   :  { %9457 = vmatprep.subr.mxu1 %v3989_v6 }
 0x551   :  { %9458 = vmatpush3.msra.mxu1 %v3989_v6 }
 0x552   :  { %9459 = vmatprep.subr.mxu1 %v3988_v37 }
 0x553   :  { %9460 = vmatpush3.msra.mxu1 %v3988_v37 }
 0x554   :  { %9461 = vmatprep.subr.mxu1 %v3987_v0 }
 0x555   :  { %9462 = vmatpush3.msra.mxu1 %v3987_v0 }
 0x556   :  { %9463 = vmatprep.subr.mxu1 %v3986_v5 }
 0x557   :  { %9464 = vmatpush3.msra.mxu1 %v3986_v5 }
 0x558   :  { %9465 = vmatprep.subr.mxu1 %v3985_v44 }
 0x559   :  { %9466 = vmatpush3.msra.mxu1 %v3985_v44 }
 0x55a   :  { %9468 = vmatmul.mubr.msk.f32.vlgmr.msra.gmra.mxu1 %vm3455_vm10, %v12414_v54  ;;  %9493 = vmatprep.subr.bf16.mxu1 %v12698_v8 }
 0x55b   :  { %9494 = vmatpush3.bf16.msra.mxu1 %v12698_v8  ;;  %9470 = vmatprep.mubr.msk.f32.mxu1 %vm3455_vm10, %v12419_v16  ;;  %v12724_v16 = vld [vmem:[%s14135_s4 + $0x20] sm:$0xff]  }
 0x55c   :  { %9495 = vmatprep.subr.bf16.mxu1 %v12703_v52 }
 0x55e   :  { %9471 = vmatmul.mubr.msk.f32.gmra.mxu1 %vm3455_vm10, %v12436_v51  ;;  %vm14261_vm10 = vcmask 520448  }
 0x55f   :  { %9496 = vmatpush3.bf16.msra.mxu1 %v12703_v52 }
 0x560   :  { %v4181_v54 = vpop.permute.xlu0 %4180  ;;  %v4157_v24 = vpop.permute.xlu1 %4156  ;;  %9497 = vmatprep.subr.bf16.mxu1 %v12715_v48 }
 0x561   :  { %4165 = vst.msk [vmem:[#allocation5 + $0xc] sm:$0x3] %vm14255_vm5, %v4157_v24  ;;  %vm14264_vm5 = vcmask 1045249  }
 0x562   :  { %4196 = vst.msk [vmem:[#allocation4 + $0xf] sm:$0x7c] %vm14254_vm7, %v4157_v24  ;;  %vm4174_vm7 = vcmask 785925  }
 0x563   :  { %4219 = vst.msk [vmem:[#allocation5 + $0xa] sm:$0x80] %vm14253_vm11, %v4157_v24  ;;  %9498 = vmatpush3.bf16.msra.mxu1 %v12715_v48  ;;  %vm4136_vm11 = vcmask 782848  }
 0x564   :  { %v4169_v51 = vpop.permute.xlu1 %4168  ;;  %v4122_v9 = vpop.permute.xlu0 %4121  ;;  %9499 = vmatprep.subr.bf16.mxu1 %v12724_v16 }
 0x565   :  { %4199 = vst.msk [vmem:[#allocation4 + $0xe] sm:$0x7c] %vm4198_vm2, %v4169_v51 }
 0x566   :  { %4231 = vst.msk [vmem:[#allocation5 + $0x9] sm:$0x80] %vm4230_vm14, %v4169_v51 }
 0x567   :  { %4128 = vst.msk [vmem:[#allocation4 + $0x9] sm:$0x1f] %vm14261_vm10, %v4122_v9  ;;  %9500 = vmatpush3.bf16.msra.mxu1 %v12724_v16  ;;  %vm14265_vm10 = vcmask 785924  }
 0x568   :  { %4163 = vst.msk [vmem:[#allocation5 + $0x4] sm:$0xe0] %vm14260_vm12, %v4122_v9  ;;  %v4140_v57 = vpop.permute.xlu1 %4139  ;;  %v4131_v49 = vpop.permute.xlu0 %4130  ;;  %9501 = vmatprep.subr.bf16.mxu1 %v12734_v20  ;;  %vm14266_vm12 = vcmask 781824  }
 0x569   :  { %4202 = vst.msk [vmem:[#allocation4 + $0xd] sm:$0x78] %vm14259_vm9, %v4181_v54  ;;  %vm4259_vm9 = vcmask 523524  }
 0x56a   :  { %4177 = vst.msk [vmem:[#allocation5 + $0xb] sm:$0x3] %vm14258_vm4, %v4169_v51  ;;  %vm4220_vm4 = vcmask 519424  }
 0x56b   :  { %4137 = vst.msk [vmem:[#allocation4 + $0x8] sm:$0x1f] %vm4136_vm11, %v4131_v49  ;;  %9502 = vmatpush3.bf16.msra.mxu1 %v12734_v20 }
 0x56c   :  { %4175 = vst.msk [vmem:[#allocation5 + $0x3] sm:$0xe0] %vm4174_vm7, %v4131_v49  ;;  %v4225_v23 = vpop.permute.xlu1 %4224  ;;  %v4213_v27 = vpop.permute.xlu0 %4212  ;;  %9503 = vmatprep.subr.bf16.mxu1 %v12747_v13 }
 0x56d   :  { %4146 = vst.msk [vmem:[#allocation4 + $0x7] sm:$0x1e] %vm14264_vm5, %v4140_v57  ;;  %vm4283_vm5 = vcmask 1048325  }
 0x56e   :  { %4187 = vst.msk [vmem:[#allocation5 + $0x2] sm:$0xc0] %vm14263_vm6, %v4140_v57  ;;  %vm4242_vm6 = vcmask 1044224  }
 0x56f   :  { %4189 = vst.msk [vmem:[#allocation5 + $0xa] sm:$0x3] %vm14262_vm0, %v4181_v54  ;;  %vm4261_vm0 = vcmask 516352   ;;  %9504 = vmatpush3.bf16.msra.mxu1 %v12747_v13 }
 0x570   :  { %4221 = vst.msk [vmem:[#allocation5 + $0x12] sm:$0xf] %vm4220_vm4, %v4213_v27  ;;  %v4254_v25 = vpop.permute.xlu1 %4253  ;;  %v4237_v34 = vpop.permute.xlu0 %4236  ;;  %9505 = vmatprep.subr.bf16.mxu1 %v12759_v33  ;;  %v4294_v26 = vld [vmem:[#allocation4 + $0x10] sm:$0xff] }
 0x571   :  { %4260 = vst.msk [vmem:[#allocation4 + $0x15] sm:$0xf0] %vm4259_vm9, %v4213_v27 }
 0x572   :  { %4233 = vst.msk [vmem:[#allocation5 + $0x11] sm:$0xf] %vm14266_vm12, %v4225_v23  ;;  %vm14267_vm12 = vcmask 778752  }
 0x573   :  { %4272 = vst.msk [vmem:[#allocation4 + $0x14] sm:$0xf0] %vm14265_vm10, %v4225_v23  ;;  %vm14269_vm10 = vcmask 1041152   ;;  %9506 = vmatpush3.bf16.msra.mxu1 %v12759_v33 }
 0x574   :  { %4262 = vst.msk [vmem:[#allocation4 + $0x1d] sm:$0x1] %vm4261_vm0, %v4254_v25  ;;  %v4293_v12 = vld [vmem:[#allocation4 + $0x8] sm:$0xff]  ;;  %v4278_v29 = vpop.permute.xlu1 %4277  ;;  %v4266_v55 = vpop.permute.xlu0 %4265  ;;  %9507 = vmatprep.subr.bf16.mxu1 %v12773_v30 }
 0x575   :  { %4243 = vst.msk [vmem:[#allocation5 + $0x10] sm:$0xf] %vm4242_vm6, %v4237_v34  ;;  %v4295_v60 = vpack.c.bf16 %v4293_v12, %v12427_v1  ;;  %v4530_v32 = vpack.c.bf16 %v4294_v26, %v4293_v12 }
 0x576   :  { %4284 = vst.msk [vmem:[#allocation4 + $0x13] sm:$0xe0] %vm4283_vm5, %v4237_v34  ;;  %v4314_v11 = vld [vmem:[#allocation5 + $0x8] sm:$0xff] }
 0x577   :  { %v4316_v45 = vpack.c.bf16 %v4314_v11, %v12427_v1  ;;  %9509 = vmatprep.mubr.bf16.mxu1 %v4295_v60  ;;  %4286 = vst.msk [vmem:[#allocation4 + $0x1b] sm:$0x1] %vm14269_vm10, %v4278_v29  ;;  %9508 = vmatpush3.bf16.msra.mxu1 %v12773_v30  ;;  %v4296_v1 = vpack.c.bf16 %v4294_v26, %v4294_v26  ;;  %vm14588_vm10 = vcmask 779776  }
 0x578   :  { %4274 = vst.msk [vmem:[#allocation4 + $0x1c] sm:$0x1] %vm14267_vm12, %v4266_v55  ;;  %9533 = vmatprep.subr.bf16.mxu1 %v12781_v19  ;;  %vm14268_vm12 = vcmask 195584  }
 0x579   :  { %9489 = vmatprep.mubr.bf16.mxu0 %v4316_v45 }
 0x57a   :  { %9510 = vmatmul.mubr.bf16.vlgmr.msra.gmra.mxu1 %v4296_v1 }
 0x57b   :  { %9534 = vmatpush3.bf16.msra.mxu1 %v12781_v19 }
 0x57c   :  { %v4315_v62 = vld [vmem:[#allocation5 + $0x10] sm:$0xff]  ;;  %9535 = vmatprep.subr.bf16.mxu1 %v12796_v22 }
 0x57d   :  { %v4317_v4 = vpack.c.bf16 %v4315_v62, %v4315_v62  ;;  %v4651_v47 = vpack.c.bf16 %v4315_v62, %v4314_v11 }
 0x57f   :  { %9490 = vmatmul.mubr.bf16.vlgmr.msra.gmra.mxu0 %v4317_v4  ;;  %9549 = vmatprep.mubr.bf16.mxu1 %v4651_v47  ;;  %v4529_v6 = vld [vmem:[#allocation4 + $0x18] sm:$0xff] }
 0x580   :  { %9514 = vmatpush3.bf16.msra.mxu0 %v12647_v2  ;;  %9529 = vmatprep.mubr.bf16.mxu0 %v4530_v32  ;;  %v4531_v37 = vpack.c.bf16 %v4529_v6, %v4529_v6 }
 0x581   :  { %9515 = vmatprep.subr.bf16.mxu0 %v12791_v7  ;;  %9536 = vmatpush3.bf16.msra.mxu1 %v12796_v22 }
 0x582   :  { %9537 = vmatprep.subr.bf16.mxu1 %v12810_v35 }
 0x584   :  { %9516 = vmatpush3.bf16.msra.mxu0 %v12791_v7 }
 0x585   :  { %9517 = vmatprep.subr.bf16.mxu0 %v12804_v43  ;;  %9538 = vmatpush3.bf16.msra.mxu1 %v12810_v35 }
 0x586   :  { %9539 = vmatprep.subr.bf16.mxu1 %v12824_v63 }
 0x588   :  { %9518 = vmatpush3.bf16.msra.mxu0 %v12804_v43 }
 0x589   :  { %9519 = vmatprep.subr.bf16.mxu0 %v12818_v15  ;;  %9540 = vmatpush3.bf16.msra.mxu1 %v12824_v63 }
 0x58a   :  { %9541 = vmatprep.subr.bf16.mxu1 %v12838_v17 }
 0x58c   :  { %9520 = vmatpush3.bf16.msra.mxu0 %v12818_v15 }
 0x58d   :  { %9521 = vmatprep.subr.bf16.mxu0 %v12832_v38  ;;  %9542 = vmatpush3.bf16.msra.mxu1 %v12838_v17 }
 0x58e   :  { %9543 = vmatprep.subr.bf16.mxu1 %v12852_v56 }
 0x590   :  { %9522 = vmatpush3.bf16.msra.mxu0 %v12832_v38 }
 0x591   :  { %9523 = vmatprep.subr.bf16.mxu0 %v12846_v18  ;;  %9544 = vmatpush3.bf16.msra.mxu1 %v12852_v56 }
 0x592   :  { %9545 = vmatprep.subr.bf16.mxu1 %v12866_v28 }
 0x594   :  { %9524 = vmatpush3.bf16.msra.mxu0 %v12846_v18 }
 0x595   :  { %9525 = vmatprep.subr.bf16.mxu0 %v12860_v50  ;;  %9546 = vmatpush3.bf16.msra.mxu1 %v12866_v28 }
 0x596   :  { %9547 = vmatprep.subr.bf16.mxu1 %v12880_v46 }
 0x598   :  { %9526 = vmatpush3.bf16.msra.mxu0 %v12860_v50 }
 0x599   :  { %9527 = vmatprep.subr.bf16.mxu0 %v12874_v53  ;;  %9548 = vmatpush3.bf16.msra.mxu1 %v12880_v46 }
 0x59a   :  { %9582 = vmatprep.subr.bf16.mxu1 %v12698_v8 }
 0x59c   :  { %9528 = vmatpush3.bf16.msra.mxu0 %v12874_v53  ;;  %9550 = vmatmul.mubr.bf16.vlgmr.msra.gmra.mxu1 %v12891_v40 }
 0x59d   :  { %9583 = vmatpush3.bf16.msra.mxu1 %v12698_v8 }
 0x59e   :  { %9584 = vmatprep.subr.bf16.mxu1 %v12703_v52 }
 0x59f   :  { %9530 = vmatmul.mubr.bf16.vlgmr.msra.gmra.mxu0 %v4531_v37 }
 0x5a0   :  { %9559 = vmatprep.mubr.msk.f32.mxu0 %vm14268_vm12, %v12915_v39 }
 0x5a1   :  { %9585 = vmatpush3.bf16.msra.mxu1 %v12703_v52 }
 0x5a2   :  { %9586 = vmatprep.subr.bf16.mxu1 %v12715_v48 }
 0x5a5   :  { %9587 = vmatpush3.bf16.msra.mxu1 %v12715_v48 }
 0x5a6   :  { %9588 = vmatprep.subr.bf16.mxu1 %v12724_v16 }
 0x5a9   :  { %9589 = vmatpush3.bf16.msra.mxu1 %v12724_v16 }
 0x5aa   :  { %9590 = vmatprep.subr.bf16.mxu1 %v12734_v20 }
 0x5ad   :  { %9591 = vmatpush3.bf16.msra.mxu1 %v12734_v20 }
 0x5ae   :  { %9592 = vmatprep.subr.bf16.mxu1 %v12747_v13 }
 0x5b1   :  { %9593 = vmatpush3.bf16.msra.mxu1 %v12747_v13 }
 0x5b2   :  { %9594 = vmatprep.subr.bf16.mxu1 %v12759_v33 }
 0x5b5   :  { %9595 = vmatpush3.bf16.msra.mxu1 %v12759_v33 }
 0x5b6   :  { %9596 = vmatprep.subr.bf16.mxu1 %v12773_v30 }
 0x5b9   :  { %9597 = vmatpush3.bf16.msra.mxu1 %v12773_v30 }
 0x5ba   :  { %9622 = vmatprep.subr.bf16.mxu1 %v12781_v19 }
 0x61a   :  { %v9469_v31 = vpop.f32.mrf.mxu1 }
 0x61b   :  { %v4067_v0 = vadd.f32 %v9469_v31, %v12575_v21 }
 0x61c   :  { %v4061_v58 = vpop.f32.mrf.mxu1 }
 0x61d   :  { %v4081_v5 = vmul.f32 0.2, %v4067_v0  ;;  %v4062_v44 = vadd.f32 %v12575_v21, %v4061_v58 }
 0x61e   :  { %v9472_v8 = vpop.f32.mrf.mxu1 }
 0x61f   :  { %v4085_v52 = vmax.f32 %v4067_v0, %v4081_v5  ;;  %v4080_v48 = vmul.f32 0.2, %v4062_v44  ;;  %v4077_v54 = vadd.f32 %v9472_v8, %v12575_v21  ;;  %v12958_v5 = vld [vmem:[%s14138_s14 + $0x8] sm:$0x1] }
 0x620   :  { %v4071_v24 = vpop.f32.mrf.mxu1 }
 0x621   :  { %4093 = vst [vmem:[%s14137_s18 + $0x28] sm:$0xff] %v4085_v52  ;;  %4153 = vst.msk [vmem:[#allocation5 + $0x35] sm:$0x3] %vm4150_vm3, %v4085_v52  ;;  %v4084_v16 = vmax.f32 %v4062_v44, %v4080_v48  ;;  %4182 = vrot.lane.b32.xlu0 %v4085_v52, %s9918_s7  ;;  %4158 = vrot.lane.b32.xlu1 %v4085_v52, %s9914_s12  ;;  %v4083_v51 = vmul.f32 0.2, %v4077_v54  ;;  %v4072_v9 = vadd.f32 %v12575_v21, %v4071_v24  ;;  %vm14579_vm3 = vcmask 253952  }
 0x622   :  { %4194 = vst.msk [vmem:[#allocation4 + $0x38] sm:$0x7c] %vm4192_vm1, %v4085_v52  ;;  %vm14580_vm1 = vcmask 257024   ;;  %v9910_v44 = vld [vmem:[%s14135_s4 + $0x78] sm:$0xff]  }
 0x623   :  { %4208 = vst.msk [vmem:[#allocation5 + $0x33] sm:$0x80] %vm4204_vm15, %v4085_v52  ;;  %4092 = vst [vmem:[%s14137_s18 + $0x20] sm:$0xff] %v4084_v16  ;;  %v4087_v20 = vmax.f32 %v4077_v54, %v4083_v51  ;;  %v4082_v57 = vmul.f32 0.2, %v4072_v9  ;;  %vm14581_vm15 = vcmask 261124  }
 0x624   :  { %4118 = vst.msk [vmem:[#allocation4 + $0x32] sm:$0x1f] %vm4116_vm13, %v4084_v16  ;;  %vm14583_vm13 = vcmask 522498  }
 0x625   :  { %4152 = vst.msk [vmem:[#allocation5 + $0x2d] sm:$0xe0] %vm4148_vm8, %v4084_v16  ;;  %4095 = vst [vmem:[%s14137_s18 + $0x38] sm:$0x1] %v4087_v20  ;;  %4170 = vrot.lane.b32.xlu1 %v4085_v52, %s9919_s29  ;;  %4123 = vrot.lane.b32.xlu0 %v4084_v16, %s9914_s12  ;;  %v4086_v21 = vmax.f32 %v4072_v9, %v4082_v57  ;;  %vm14582_vm8 = vcmask 517376  }
 0x626   :  { %4250 = vst.msk [vmem:[#allocation4 + $0x46] sm:$0x1] %vm14579_vm3, %v4087_v20  ;;  %vm14584_vm3 = vcmask 523527  }
 0x627   :  { %4094 = vst [vmem:[%s14137_s18 + $0x30] sm:$0xff] %v4086_v21  ;;  %4209 = vst.msk [vmem:[#allocation5 + $0x3b] sm:$0xf] %vm14580_vm1, %v4086_v21  ;;  %vm14585_vm1 = vcmask 520448  }
 0x628   :  { %4249 = vst.msk [vmem:[#allocation4 + $0x3e] sm:$0xf0] %vm14581_vm15, %v4086_v21  ;;  %vm14586_vm15 = vcmask 523525  }
 0x629   :  { %4141 = vrot.lane.b32.xlu1 %v4084_v16, %s9918_s7  ;;  %4132 = vrot.lane.b32.xlu0 %v4084_v16, %s9919_s29 }
 0x62d   :  { %4226 = vrot.lane.b32.xlu1 %v4086_v21, %s9919_s29  ;;  %4214 = vrot.lane.b32.xlu0 %v4086_v21, %s9914_s12 }
 0x631   :  { %4255 = vrot.lane.b32.xlu1 %v4087_v20, %s9914_s12  ;;  %4238 = vrot.lane.b32.xlu0 %v4086_v21, %s9918_s7 }
 0x635   :  { %4279 = vrot.lane.b32.xlu1 %v4087_v20, %s9918_s7  ;;  %4267 = vrot.lane.b32.xlu0 %v4087_v20, %s9919_s29 }
 0x63a   :  { %v9511_v49 = vpop.f32.mrf.mxu1 }
 0x63c   :  { %v4513_v23 = vpop.f32.mrf.mxu1 }
 0x63e   :  { %v9512_v33 = vpop.f32.mrf.mxu1 }
 0x63f   :  { %v9491_v13 = vpop.f32.mrf.mxu0  ;;  %v13119_v33 = vld [vmem:[%s14139_s5 + $0x48] sm:$0xff]  }
 0x640   :  { %v4522_v11 = vadd.f32 %v9511_v49, %v9491_v13  ;;  %v4516_v12 = vpop.f32.mrf.mxu1 }
 0x641   :  { %v4417_v27 = vpop.f32.mrf.mxu0 }
 0x642   :  { %v4514_v62 = vadd.f32 %v4513_v23, %v4417_v27 }
 0x643   :  { %v9492_v25 = vpop.f32.mrf.mxu0 }
 0x645   :  { %v4420_v34 = vpop.f32.mrf.mxu0 }
 0x646   :  { %v4517_v4 = vadd.f32 %v4516_v12, %v4420_v34 }
 0x65c   :  { %v9551_v60 = vpop.f32.mrf.mxu1 }
 0x65e   :  { %v4752_v26 = vpop.f32.mrf.mxu1 }
 0x65f   :  { %v9531_v30 = vpop.f32.mrf.mxu0 }
 0x660   :  { %v4647_v45 = vadd.f32 %v9531_v30, %v4522_v11  ;;  %v9552_v47 = vpop.f32.mrf.mxu1  ;;  %v13125_v11 = vld [vmem:[%s14139_s5 + $0x8] sm:$0xff]  }
 0x661   :  { %v4631_v29 = vpop.f32.mrf.mxu0 }
 0x662   :  { %v4768_v55 = vadd.f32 %v9551_v60, %v4647_v45  ;;  %v4645_v6 = vadd.f32 %v4631_v29, %v4514_v62  ;;  %v4755_v31 = vpop.f32.mrf.mxu1  ;;  %v13132_v45 = vld [vmem:[%s14139_s5 + $0x40] sm:$0xff]  }
 0x663   :  { %v9532_v1 = vpop.f32.mrf.mxu0 }
 0x664   :  { %9553 = vmatprep.subr.mxu0 %v4768_v55  ;;  %v4766_v58 = vadd.f32 %v4752_v26, %v4645_v6  ;;  %v13151_v6 = vld [vmem:[%s14139_s5 + $0x1f8] sm:$0xff]  }
 0x665   :  { %v4634_v32 = vpop.f32.mrf.mxu0  ;;  %9554 = vmatpush3.msra.mxu0 %v4768_v55  ;;  %v13140_v55 = vld [vmem:[%s14139_s5] sm:$0xff]  }
 0x666   :  { %v4646_v37 = vadd.f32 %v4634_v32, %v4517_v4 }
 0x668   :  { %v4767_v0 = vadd.f32 %v4755_v31, %v4646_v37 }
 0x66a   :  { %9555 = vmatprep.subr.mxu0 %v4767_v0 }
 0x66b   :  { %9556 = vmatpush3.msra.mxu0 %v4767_v0 }
 0x66c   :  { %9557 = vmatprep.subr.mxu0 %v4766_v58 }
 0x66d   :  { %9558 = vmatpush3.msra.mxu0 %v4766_v58 }
 0x66e   :  { %9560 = vmatmul.mubr.msk.f32.vlgmr.msra.gmra.mxu0 %vm14268_vm12, %v12958_v5  ;;  %9562 = vmatprep.subr.bf16.mxu0 %v9910_v44  ;;  %vm14587_vm12 = vcmask 1047299  }
 0x66f   :  { %9563 = vmatpush3.bf16.msra.mxu0 %v9910_v44 }
 0x670   :  { %9564 = vmatprep.subr.bf16.mxu0 %v12561_v36 }
 0x673   :  { %9565 = vmatpush3.bf16.msra.mxu0 %v12561_v36 }
 0x674   :  { %9566 = vmatprep.subr.bf16.mxu0 %v12568_v59 }
 0x677   :  { %9567 = vmatpush3.bf16.msra.mxu0 %v12568_v59 }
 0x678   :  { %9568 = vmatprep.subr.bf16.mxu0 %v12580_v3 }
 0x67b   :  { %9569 = vmatpush3.bf16.msra.mxu0 %v12580_v3 }
 0x67c   :  { %9570 = vmatprep.subr.bf16.mxu0 %v12588_v61 }
 0x67f   :  { %9571 = vmatpush3.bf16.msra.mxu0 %v12588_v61 }
 0x680   :  { %9572 = vmatprep.subr.bf16.mxu0 %v12597_v10 }
 0x683   :  { %9573 = vmatpush3.bf16.msra.mxu0 %v12597_v10 }
 0x684   :  { %9574 = vmatprep.subr.bf16.mxu0 %v12618_v41 }
 0x687   :  { %9575 = vmatpush3.bf16.msra.mxu0 %v12618_v41 }
 0x688   :  { %9576 = vmatprep.subr.bf16.mxu0 %v12636_v42 }
 0x68b   :  { %9577 = vmatpush3.bf16.msra.mxu0 %v12636_v42 }
 0x68c   :  { %9602 = vmatprep.subr.bf16.mxu0 %v12647_v2 }
 0x693   :  { %v4183_v36 = vpop.permute.xlu0 %4182  ;;  %v4159_v59 = vpop.permute.xlu1 %4158 }
 0x694   :  { %4167 = vst.msk [vmem:[#allocation5 + $0x34] sm:$0x3] %vm14582_vm8, %v4159_v59  ;;  %vm14589_vm8 = vcmask 1045249  }
 0x695   :  { %4197 = vst.msk [vmem:[#allocation4 + $0x37] sm:$0x7c] %vm14583_vm13, %v4159_v59  ;;  %vm14590_vm13 = vcmask 1048326  }
 0x696   :  { %4222 = vst.msk [vmem:[#allocation5 + $0x32] sm:$0x80] %vm14584_vm3, %v4159_v59  ;;  %vm5295_vm3 = vcmask 1040384  }
 0x697   :  { %v4171_v3 = vpop.permute.xlu1 %4170  ;;  %v4124_v61 = vpop.permute.xlu0 %4123 }
 0x698   :  { %4200 = vst.msk [vmem:[#allocation4 + $0x36] sm:$0x7c] %vm4198_vm2, %v4171_v3  ;;  %vm14591_vm2 = vcmask 1042176  }
 0x699   :  { %4234 = vst.msk [vmem:[#allocation5 + $0x31] sm:$0x80] %vm4230_vm14, %v4171_v3  ;;  %vm14592_vm14 = vcmask 781824  }
 0x69a   :  { %4129 = vst.msk [vmem:[#allocation4 + $0x31] sm:$0x1f] %vm14585_vm1, %v4124_v61 }
 0x69b   :  { %4166 = vst.msk [vmem:[#allocation5 + $0x2c] sm:$0xe0] %vm14586_vm15, %v4124_v61  ;;  %v4142_v10 = vpop.permute.xlu1 %4141  ;;  %v4133_v41 = vpop.permute.xlu0 %4132  ;;  %vm5213_vm15 = vcmask 1043969  }
 0x69c   :  { %4203 = vst.msk [vmem:[#allocation4 + $0x35] sm:$0x78] %vm14587_vm12, %v4183_v36  ;;  %vm5286_vm12 = vcmask 1041408  }
 0x69d   :  { %4179 = vst.msk [vmem:[#allocation5 + $0x33] sm:$0x3] %vm14588_vm10, %v4171_v3  ;;  %vm14593_vm10 = vcmask 785924  }
 0x69e   :  { %4138 = vst.msk [vmem:[#allocation4 + $0x30] sm:$0x1f] %vm4136_vm11, %v4133_v41  ;;  %vm5202_vm11 = vcmask 520194  }
 0x69f   :  { %4178 = vst.msk [vmem:[#allocation5 + $0x2b] sm:$0xe0] %vm4174_vm7, %v4133_v41  ;;  %v4227_v42 = vpop.permute.xlu1 %4226  ;;  %v4215_v8 = vpop.permute.xlu0 %4214  ;;  %vm5271_vm7 = vcmask 1042432  }
 0x6a0   :  { %4147 = vst.msk [vmem:[#allocation4 + $0x2f] sm:$0x1e] %vm14589_vm8, %v4142_v10  ;;  %vm5227_vm8 = vcmask 1041920  }
 0x6a1   :  { %4190 = vst.msk [vmem:[#allocation5 + $0x2a] sm:$0xc0] %vm14590_vm13, %v4142_v10  ;;  %vm14612_vm13 = vmmov 0  }
 0x6a2   :  { %4191 = vst.msk [vmem:[#allocation5 + $0x32] sm:$0x3] %vm14591_vm2, %v4183_v36  ;;  %vm14613_vm2 = vcmask 130048  }
 0x6a3   :  { %4223 = vst.msk [vmem:[#allocation5 + $0x3a] sm:$0xf] %vm4220_vm4, %v4215_v8  ;;  %v4256_v52 = vpop.permute.xlu1 %4255  ;;  %v4239_v48 = vpop.permute.xlu0 %4238  ;;  %v4864_v54 = vld [vmem:[#allocation4 + $0x38] sm:$0xff]  ;;  %vm14595_vm4 = vcmask 778752  }
 0x6a4   :  { %4263 = vst.msk [vmem:[#allocation4 + $0x3d] sm:$0xf0] %vm4259_vm9, %v4215_v8  ;;  %v4866_v20 = vpack.c.bf16 %v4864_v54, %v4864_v54  ;;  %vm14594_vm9 = vcmask 1041152  }
 0x6a5   :  { %4235 = vst.msk [vmem:[#allocation5 + $0x39] sm:$0xf] %vm14592_vm14, %v4227_v42  ;;  %vm6404_vm14 = vcmask 519170  }
 0x6a6   :  { %4275 = vst.msk [vmem:[#allocation4 + $0x3c] sm:$0xf0] %vm14593_vm10, %v4227_v42  ;;  %vm6418_vm10 = vcmask 517120  }
 0x6a7   :  { %4264 = vst.msk [vmem:[#allocation4 + $0x45] sm:$0x1] %vm4261_vm0, %v4256_v52  ;;  %v4863_v16 = vld [vmem:[#allocation4 + $0x30] sm:$0xff]  ;;  %v4280_v57 = vpop.permute.xlu1 %4279  ;;  %v4268_v21 = vpop.permute.xlu0 %4267  ;;  %vm14596_vm0 = vcmask 195584  }
 0x6a8   :  { %4244 = vst.msk [vmem:[#allocation5 + $0x38] sm:$0xf] %vm4242_vm6, %v4239_v48  ;;  %v4865_v9 = vpack.c.bf16 %v4863_v16, %v12887_v14  ;;  %v4972_v27 = vpack.c.bf16 %v4864_v54, %v4863_v16  ;;  %vm5216_vm6 = vcmask 518144   ;;  %vm14597_vm1 = vmmov %vm14596_vm0 }
 0x6a9   :  { %4287 = vst.msk [vmem:[#allocation4 + $0x3b] sm:$0xe0] %vm4283_vm5, %v4239_v48  ;;  %v4869_v24 = vld [vmem:[#allocation5 + $0x30] sm:$0xff]  ;;  %vm5262_vm5 = vcmask 1043456  }
 0x6aa   :  { %v4871_v51 = vpack.c.bf16 %v4869_v24, %v12887_v14  ;;  %9598 = vmatprep.mubr.bf16.mxu1 %v4865_v9  ;;  %4288 = vst.msk [vmem:[#allocation4 + $0x43] sm:$0x1] %vm14594_vm9, %v4280_v57  ;;  %vm14628_vm9 = vmmov %vm14613_vm2 }
 0x6ab   :  { %4276 = vst.msk [vmem:[#allocation4 + $0x44] sm:$0x1] %vm14595_vm4, %v4268_v21  ;;  %9599 = vmatmul.mubr.bf16.vlgmr.msra.gmra.mxu1 %v4866_v20  ;;  %vm6415_vm4 = vcmask 1042945  }
 0x6ac   :  { %9578 = vmatprep.mubr.bf16.mxu0 %v4871_v51  ;;  %9623 = vmatpush3.bf16.msra.mxu1 %v12781_v19 }
 0x6ad   :  { %9624 = vmatprep.subr.bf16.mxu1 %v12796_v22 }
 0x6af   :  { %v4870_v49 = vld [vmem:[#allocation5 + $0x38] sm:$0xff] }
 0x6b0   :  { %v4872_v13 = vpack.c.bf16 %v4870_v49, %v4870_v49  ;;  %v5028_v23 = vpack.c.bf16 %v4870_v49, %v4869_v24  ;;  %9625 = vmatpush3.bf16.msra.mxu1 %v12796_v22  ;;  %v13046_v22 = vld [vmem:[%s14139_s5 + $0x38] sm:$0xff]  }
 0x6b1   :  { %9626 = vmatprep.subr.bf16.mxu1 %v12810_v35 }
 0x6b2   :  { %9579 = vmatmul.mubr.bf16.vlgmr.msra.gmra.mxu0 %v4872_v13  ;;  %9638 = vmatprep.mubr.bf16.mxu1 %v5028_v23 }
 0x6b3   :  { %9603 = vmatpush3.bf16.msra.mxu0 %v12647_v2  ;;  %9618 = vmatprep.mubr.bf16.mxu0 %v4972_v27  ;;  %v4971_v2 = vld [vmem:[#allocation4 + $0x40] sm:$0xff] }
 0x6b4   :  { %9604 = vmatprep.subr.bf16.mxu0 %v12791_v7  ;;  %9627 = vmatpush3.bf16.msra.mxu1 %v12810_v35  ;;  %v4973_v19 = vpack.c.bf16 %v4971_v2, %v4971_v2  ;;  %v13058_v35 = vld [vmem:[%s14139_s5 + $0x30] sm:$0xff]  }
 0x6b5   :  { %9628 = vmatprep.subr.bf16.mxu1 %v12824_v63 }
 0x6b7   :  { %9605 = vmatpush3.bf16.msra.mxu0 %v12791_v7  ;;  %v13041_v7 = vld [vmem:[%s14139_s5 + $0x78] sm:$0xff]  }
 0x6b8   :  { %9606 = vmatprep.subr.bf16.mxu0 %v12804_v43  ;;  %9629 = vmatpush3.bf16.msra.mxu1 %v12824_v63  ;;  %v13070_v63 = vld [vmem:[%s14139_s5 + $0x28] sm:$0xff]  }
 0x6b9   :  { %9630 = vmatprep.subr.bf16.mxu1 %v12838_v17 }
 0x6bb   :  { %9607 = vmatpush3.bf16.msra.mxu0 %v12804_v43  ;;  %v13053_v43 = vld [vmem:[%s14139_s5 + $0x70] sm:$0xff]  }
 0x6bc   :  { %9608 = vmatprep.subr.bf16.mxu0 %v12818_v15  ;;  %9631 = vmatpush3.bf16.msra.mxu1 %v12838_v17  ;;  %v13082_v17 = vld [vmem:[%s14139_s5 + $0x20] sm:$0xff]  }
 0x6bd   :  { %9632 = vmatprep.subr.bf16.mxu1 %v12852_v56 }
 0x6bf   :  { %9609 = vmatpush3.bf16.msra.mxu0 %v12818_v15  ;;  %v13065_v15 = vld [vmem:[%s14139_s5 + $0x68] sm:$0xff]  }
 0x6c0   :  { %9610 = vmatprep.subr.bf16.mxu0 %v12832_v38  ;;  %9633 = vmatpush3.bf16.msra.mxu1 %v12852_v56  ;;  %v13094_v56 = vld [vmem:[%s14139_s5 + $0x18] sm:$0xff]  }
 0x6c1   :  { %9634 = vmatprep.subr.bf16.mxu1 %v12866_v28 }
 0x6c3   :  { %9611 = vmatpush3.bf16.msra.mxu0 %v12832_v38  ;;  %v13077_v38 = vld [vmem:[%s14139_s5 + $0x60] sm:$0xff]  }
 0x6c4   :  { %9612 = vmatprep.subr.bf16.mxu0 %v12846_v18  ;;  %9635 = vmatpush3.bf16.msra.mxu1 %v12866_v28  ;;  %v13106_v28 = vld [vmem:[%s14139_s5 + $0x50] sm:$0xff]  }
 0x6c5   :  { %9636 = vmatprep.subr.bf16.mxu1 %v12880_v46 }
 0x6c7   :  { %9613 = vmatpush3.bf16.msra.mxu0 %v12846_v18  ;;  %v13089_v18 = vld [vmem:[%s14139_s5 + $0x58] sm:$0xff]  }
 0x6c8   :  { %9614 = vmatprep.subr.bf16.mxu0 %v12860_v50  ;;  %9637 = vmatpush3.bf16.msra.mxu1 %v12880_v46 }
 0x6c9   :  { %8615 = vmatprep.subr.bf16.mxu1 %v13041_v7 }
 0x6cb   :  { %9615 = vmatpush3.bf16.msra.mxu0 %v12860_v50  ;;  %9639 = vmatmul.mubr.bf16.vlgmr.msra.gmra.mxu1 %v12891_v40  ;;  %v13101_v50 = vld [vmem:[%s14140_s9] ss:$0 sm:$0xff] }
 0x6cc   :  { %9616 = vmatprep.subr.bf16.mxu0 %v12874_v53  ;;  %8616 = vmatpush3.bf16.msra.mxu1 %v13046_v22 }
 0x6cd   :  { %8617 = vmatprep.subr.bf16.mxu1 %v13053_v43 }
 0x6cf   :  { %9617 = vmatpush3.bf16.msra.mxu0 %v12874_v53  ;;  %v13111_v53 = vld [vmem:[%s14139_s5 + $0x10] sm:$0xff]  }
 0x6d0   :  { %8618 = vmatpush3.bf16.msra.mxu1 %v13058_v35 }
 0x6d1   :  { %8619 = vmatprep.subr.bf16.mxu1 %v13065_v15 }
 0x6d2   :  { %9619 = vmatmul.mubr.bf16.vlgmr.msra.gmra.mxu0 %v4973_v19 }
 0x6d3   :  { %9648 = vmatprep.mubr.msk.f32.mxu0 %vm14596_vm0, %v12915_v39  ;;  %vm6429_vm0 = vcmask 1040896  }
 0x6d4   :  { %8620 = vmatpush3.bf16.msra.mxu1 %v13070_v63 }
 0x6d5   :  { %8621 = vmatprep.subr.bf16.mxu1 %v13077_v38 }
 0x6d8   :  { %8622 = vmatpush3.bf16.msra.mxu1 %v13082_v17 }
 0x6d9   :  { %8623 = vmatprep.subr.bf16.mxu1 %v13089_v18 }
 0x6dc   :  { %8624 = vmatpush3.bf16.msra.mxu1 %v13094_v56 }
 0x6dd   :  { %8625 = vmatprep.subr.bf16.mxu1 %v13106_v28 }
 0x6e0   :  { %8626 = vmatpush3.bf16.msra.mxu1 %v13111_v53 }
 0x6e1   :  { %8627 = vmatprep.subr.bf16.mxu1 %v13119_v33 }
 0x6e4   :  { %8628 = vmatpush3.bf16.msra.mxu1 %v13125_v11 }
 0x6e5   :  { %8629 = vmatprep.subr.bf16.mxu1 %v13132_v45 }
 0x6e8   :  { %8630 = vmatpush3.bf16.msra.mxu1 %v13140_v55 }
 0x6e9   :  { %8659 = vmatprep.subr.bf16.mxu1 %v13151_v6 }
 0x72e   :  { %v9561_v46 = vpop.f32.mrf.mxu0 }
 0x72f   :  { %v4854_v40 = vadd.f32 %v9561_v46, %v13101_v50 }
 0x730   :  { %v4848_v39 = vpop.f32.mrf.mxu0 }
 0x731   :  { %v4858_v25 = vmul.f32 0.2, %v4854_v40  ;;  %v4849_v34 = vadd.f32 %v13101_v50, %v4848_v39 }
 0x733   :  { %v4860_v12 = vmax.f32 %v4854_v40, %v4858_v25  ;;  %v4857_v30 = vmul.f32 0.2, %v4849_v34 }
 0x735   :  { %5161 = vst [vmem:[%s14141_s19 + $0x8] sm:$0x1] %v4860_v12  ;;  %v4859_v60 = vmax.f32 %v4849_v34, %v4857_v30  ;;  %v5263_v29 = vrot.slane %v4860_v12, 4  ;;  %v5287_v26 = vrot.slane %v4860_v12, 6  ;;  %v5273_v0 = vrot.slane %v4860_v12, 5  ;;  %v13172_v34 = vld [vmem:[%s14139_s5 + $0xf8] sm:$0xff]  }
 0x736   :  { %v5296_v44 = vrot.slane %v4860_v12, 7  ;;  %v13177_v12 = vld [vmem:[%s14139_s5 + $0xb8] sm:$0xff]   ;;  %v13182_v30 = vld [vmem:[%s14139_s5 + $0xf0] sm:$0xff]  }
 0x737   :  { %5160 = vst [vmem:[%s14141_s19] sm:$0xff] %v4859_v60  ;;  %v5234_v1 = vrot.slane %v4859_v60, 2  ;;  %v5250_v62 = vrot.slane %v4859_v60, 4  ;;  %v5219_v4 = vrot.slane %v4859_v60, 1  ;;  %5217 = vst.msk [vmem:[#allocation6 + $0x18] sm:$0x7] %vm5216_vm6, %v4859_v60  ;;  %v5244_v47 = vrot.slane %v4859_v60, 3 }
 0x738   :  { %v5198_v32 = vrot.slane %v4859_v60, 6  ;;  %v5205_v31 = vrot.slane %v4859_v60, 7  ;;  %v5272_v58 = vrot.slane %v4859_v60, 5  ;;  %v13191_v60 = vld [vmem:[%s14139_s5 + $0xb0] sm:$0xff]  }
 0x739   :  { %5236 = vrot.lane.b32.xlu1 %v5234_v1, %s9919_s29  ;;  %v5264_v37 = vsel %vm5262_vm5, %v5250_v62, %v5263_v29  ;;  %5252 = vrot.lane.b32.xlu0 %v5250_v62, %s9919_s29  ;;  %5232 = vst.msk [vmem:[#allocation7 + $0x10] sm:$0x1c] %vm5202_vm11, %v5219_v4  ;;  %v13197_v29 = vld [vmem:[%s14139_s5 + $0xe8] sm:$0xff]   ;;  %v13215_v1 = vld [vmem:[%s14139_s5 + $0xa0] sm:$0xff]  }
 0x73a   :  { %5269 = vst.msk [vmem:[#allocation6 + $0x20] sm:$0x1c] %vm5202_vm11, %v5264_v37  ;;  %5203 = vst.msk [vmem:[#allocation6 + $0x10] sm:$0x1c] %vm5202_vm11, %v5198_v32  ;;  %v5288_v36 = vsel %vm5286_vm12, %v5198_v32, %v5287_v26  ;;  %v5274_v59 = vsel %vm5271_vm7, %v5272_v58, %v5273_v0  ;;  %v5297_v3 = vsel %vm5295_vm3, %v5205_v31, %v5296_v44  ;;  %v13209_v26 = vld [vmem:[%s14139_s5 + $0xe0] sm:$0xff]   ;;  %v13229_v32 = vld [vmem:[%s14139_s5 + $0x98] sm:$0xff]  }
 0x73b   :  { %5248 = vst.msk [vmem:[#allocation7 + $0x18] sm:$0x7] %vm5216_vm6, %v5244_v47  ;;  %5293 = vst.msk [vmem:[#allocation6 + $0x28] sm:$0x7] %vm5216_vm6, %v5288_v36  ;;  %v13221_v47 = vld [vmem:[%s14139_s5 + $0xd8] sm:$0xff]   ;;  %v13235_v0 = vld [vmem:[%s14139_s5 + $0xd0] sm:$0xff]  }
 0x73c   :  { %v13243_v58 = vld [vmem:[%s14139_s5 + $0x90] sm:$0xff]  }
 0x73d   :  { %5207 = vrot.lane.b32.xlu1 %v5205_v31, %s9919_s29  ;;  %5221 = vrot.lane.b32.xlu0 %v5219_v4, %s9919_s29 }
 0x741   :  { %5278 = vrot.lane.b32.xlu1 %v5274_v59, %s9919_s29  ;;  %5300 = vrot.lane.b32.xlu0 %v5297_v3, %s9919_s29  ;;  %v13249_v3 = vld [vmem:[%s14139_s5 + $0xc8] sm:$0xff]  }
 0x76b   :  { %v9600_v61 = vpop.f32.mrf.mxu1 }
 0x76d   :  { %v4955_v10 = vpop.f32.mrf.mxu1 }
 0x76f   :  { %v9601_v41 = vpop.f32.mrf.mxu1 }
 0x771   :  { %v4958_v48 = vpop.f32.mrf.mxu1 }
 0x772   :  { %v9580_v42 = vpop.f32.mrf.mxu0 }
 0x773   :  { %v4964_v9 = vadd.f32 %v9600_v61, %v9580_v42 }
 0x774   :  { %v4907_v8 = vpop.f32.mrf.mxu0 }
 0x775   :  { %v4956_v23 = vadd.f32 %v4955_v10, %v4907_v8  ;;  %v13258_v10 = vld [vmem:[%s14139_s5 + $0x88] sm:$0xff]   ;;  %v13266_v8 = vld [vmem:[%s14139_s5 + $0xc0] sm:$0xff]  }
 0x776   :  { %v9581_v52 = vpop.f32.mrf.mxu0 }
 0x778   :  { %v4910_v16 = vpop.f32.mrf.mxu0 }
 0x779   :  { %v4959_v27 = vadd.f32 %v4958_v48, %v4910_v16 }
 0x78b   :  { %v9640_v54 = vpop.f32.mrf.mxu1 }
 0x78d   :  { %v5064_v24 = vpop.f32.mrf.mxu1 }
 0x78f   :  { %v9641_v51 = vpop.f32.mrf.mxu1 }
 0x790   :  { %v13286_v51 = vld [vmem:[%s14139_s5 + $0x80] sm:$0xff]  }
 0x791   :  { %v5067_v40 = vpop.f32.mrf.mxu1 }
 0x792   :  { %v9620_v20 = vpop.f32.mrf.mxu0 }
 0x793   :  { %v5024_v57 = vadd.f32 %v9620_v20, %v4964_v9  ;;  %v13292_v9 = vld [vmem:[%s14139_s5 + $0x178] sm:$0xff]   ;;  %v13298_v20 = vld [vmem:[%s14139_s5 + $0x1b0] sm:$0xff]  }
 0x794   :  { %v5008_v21 = vpop.f32.mrf.mxu0 }
 0x795   :  { %v5080_v49 = vadd.f32 %v9640_v54, %v5024_v57  ;;  %v5022_v19 = vadd.f32 %v5008_v21, %v4956_v23  ;;  %v13274_v54 = vld [vmem:[%s14139_s5 + $0x1b8] sm:$0xff]  }
 0x796   :  { %v9621_v13 = vpop.f32.mrf.mxu0 }
 0x797   :  { %9642 = vmatprep.subr.mxu0 %v5080_v49  ;;  %v5078_v25 = vadd.f32 %v5064_v24, %v5022_v19  ;;  %v13279_v24 = vld [vmem:[%s14139_s5 + $0x1f0] sm:$0xff]   ;;  %v13312_v13 = vld [vmem:[%s14139_s5 + $0x138] sm:$0xff]   ;;  %v13326_v19 = vld [vmem:[%s14139_s5 + $0x1a8] sm:$0xff]  }
 0x798   :  { %v5011_v2 = vpop.f32.mrf.mxu0  ;;  %9643 = vmatpush3.msra.mxu0 %v5080_v49  ;;  %v13306_v49 = vld [vmem:[%s14139_s5 + $0x1e8] sm:$0xff]  }
 0x799   :  { %v5023_v46 = vadd.f32 %v5011_v2, %v4959_v27  ;;  %v13320_v27 = vld [vmem:[%s14139_s5 + $0x170] sm:$0xff]  }
 0x79b   :  { %v5079_v39 = vadd.f32 %v5067_v40, %v5023_v46  ;;  %v13338_v46 = vld [vmem:[%s14139_s5 + $0x130] sm:$0xff]   ;;  %v13344_v40 = vld [vmem:[%s14139_s5 + $0x168] sm:$0xff]  }
 0x79d   :  { %9644 = vmatprep.subr.mxu0 %v5079_v39 }
 0x79e   :  { %9645 = vmatpush3.msra.mxu0 %v5079_v39  ;;  %v13350_v39 = vld [vmem:[%s14139_s5 + $0x1a0] sm:$0xff]  }
 0x79f   :  { %9646 = vmatprep.subr.mxu0 %v5078_v25 }
 0x7a0   :  { %9647 = vmatpush3.msra.mxu0 %v5078_v25  ;;  %v13356_v25 = vld [vmem:[%s14139_s5 + $0x1d8] sm:$0xff]  }
 0x7a1   :  { %9649 = vmatmul.mubr.msk.f32.vlgmr.msra.gmra.mxu0 %vm14597_vm1, %v12958_v5  ;;  %8593 = vmatprep.subr.bf16.mxu0 %v13172_v34  ;;  %v13203_v5 = vld [vmem:[%s14139_s5 + $0xa8] sm:$0xff]   ;;  %14598 = vst [vmem:[#allocation12_spill] sm:$0xff] %v13356_v25 }
 0x7a2   :  { %8594 = vmatpush3.bf16.msra.mxu0 %v13177_v12 }
 0x7a3   :  { %8595 = vmatprep.subr.bf16.mxu0 %v13182_v30 }
 0x7a6   :  { %8596 = vmatpush3.bf16.msra.mxu0 %v13191_v60 }
 0x7a7   :  { %8597 = vmatprep.subr.bf16.mxu0 %v13197_v29 }
 0x7aa   :  { %8598 = vmatpush3.bf16.msra.mxu0 %v13203_v5 }
 0x7ab   :  { %v5237_v62 = vpop.permute.xlu1 %5236  ;;  %v5253_v4 = vpop.permute.xlu0 %5252  ;;  %8599 = vmatprep.subr.bf16.mxu0 %v13209_v26 }
 0x7ac   :  { %5242 = vst.msk [vmem:[#allocation7 + $0x10] sm:$0xe] %vm5213_vm15, %v5237_v62  ;;  %v13362_v62 = vld [vmem:[%s14139_s5 + $0x128] sm:$0xff]  }
 0x7ad   :  { %5258 = vst.msk [vmem:[#allocation7 + $0x18] sm:$0x3] %vm5227_vm8, %v5253_v4  ;;  %v13368_v4 = vld [vmem:[%s14139_s5 + $0x160] sm:$0xff]  }
 0x7ae   :  { %8600 = vmatpush3.bf16.msra.mxu0 %v13215_v1 }
 0x7af   :  { %v5208_v37 = vpop.permute.xlu1 %5207  ;;  %v5222_v31 = vpop.permute.xlu0 %5221  ;;  %8601 = vmatprep.subr.bf16.mxu0 %v13221_v47 }
 0x7b0   :  { %5214 = vst.msk [vmem:[#allocation6 + $0x10] sm:$0xe] %vm5213_vm15, %v5208_v37  ;;  %v13374_v37 = vld [vmem:[%s14139_s5 + $0x198] sm:$0xff]  }
 0x7b1   :  { %5228 = vst.msk [vmem:[#allocation6 + $0x18] sm:$0x3] %vm5227_vm8, %v5222_v31  ;;  %14599 = vst [vmem:[#allocation13_spill] sm:$0xff] %v13374_v37  ;;  %v13380_v31 = vld [vmem:[%s14139_s5 + $0x1d0] sm:$0xff]  }
 0x7b2   :  { %8602 = vmatpush3.bf16.msra.mxu0 %v13229_v32  ;;  %14600 = vst [vmem:[#allocation14_spill] sm:$0xff] %v13380_v31 }
 0x7b3   :  { %v5279_v44 = vpop.permute.xlu1 %5278  ;;  %v5301_v36 = vpop.permute.xlu0 %5300  ;;  %8603 = vmatprep.subr.bf16.mxu0 %v13235_v0  ;;  %v13300_v57 = vld [vmem:[#allocation7 + $0x10] sm:$0xff] }
 0x7b4   :  { %v5351_v59 = vld [vmem:[#allocation7 + $0x18] sm:$0xff]  ;;  %5284 = vst.msk [vmem:[#allocation6 + $0x20] sm:$0xe] %vm5213_vm15, %v5279_v44  ;;  %v5352_v23 = vpack.c.bf16 %v13300_v57, %v12887_v14  ;;  %v13386_v44 = vld [vmem:[%s14139_s5 + $0x120] sm:$0xff]  }
 0x7b5   :  { %5306 = vst.msk [vmem:[#allocation6 + $0x28] sm:$0x3] %vm5227_vm8, %v5301_v36  ;;  %v5353_v61 = vpack.c.bf16 %v5351_v59, %v12887_v14  ;;  %v5844_v16 = vpack.c.bf16 %v12887_v14, %v5351_v59  ;;  %v13392_v36 = vld [vmem:[%s14139_s5 + $0x158] sm:$0xff]   ;;  %v13398_v59 = vld [vmem:[%s14139_s5 + $0x190] sm:$0xff]  }
 0x7b6   :  { %8604 = vmatpush3.bf16.msra.mxu0 %v13243_v58  ;;  %14601 = vst [vmem:[#allocation15_spill] sm:$0xff] %v13398_v59 }
 0x7b7   :  { %5515 = vmatprep.mubr.bf16.mxu0 %v5353_v61  ;;  %8605 = vmatprep.subr.bf16.mxu0 %v13249_v3  ;;  %v13261_v42 = vld [vmem:[#allocation6 + $0x10] sm:$0xff]  ;;  %v13404_v61 = vld [vmem:[%s14139_s5 + $0x1c8] sm:$0xff]  }
 0x7b8   :  { %v5313_v41 = vld [vmem:[#allocation6 + $0x18] sm:$0xff]  ;;  %v5314_v48 = vpack.c.bf16 %v13261_v42, %v12887_v14  ;;  %14602 = vst [vmem:[#allocation16_spill] sm:$0xff] %v13404_v61 }
 0x7b9   :  { %v5315_v52 = vpack.c.bf16 %v5313_v41, %v12887_v14  ;;  %v13332_v14 = vld [vmem:[%s14139_s5 + $0x1e0] sm:$0xff]  }
 0x7ba   :  { %8606 = vmatpush3.bf16.msra.mxu0 %v13258_v10 }
 0x7bb   :  { %5652 = vmatprep.mubr.bf16.mxu1 %v5315_v52  ;;  %8607 = vmatprep.subr.bf16.mxu0 %v13266_v8  ;;  %v13416_v52 = vld [vmem:[%s14139_s5 + $0x150] sm:$0xff]  }
 0x7bc   :  { %5653 = vmatmul.mubr.bf16.vlgmr.msra.gmra.mxu1 %v5314_v48  ;;  %v5664_v21 = vld [vmem:[#allocation6 + $0x28] sm:$0xff]  ;;  %14603 = vst [vmem:[#allocation17_spill] sm:$0xff] %v13416_v52 }
 0x7bd   :  { %8660 = vmatpush3.bf16.msra.mxu1 %v13274_v54  ;;  %6006 = vmatprep.mubr.bf16.mxu1 %v5844_v16  ;;  %v5666_v2 = vpack.c.bf16 %v5664_v21, %v5313_v41  ;;  %v13410_v41 = vld [vmem:[%s14139_s5 + $0x118] sm:$0xff]   ;;  %v13422_v48 = vld [vmem:[%s14139_s5 + $0x188] sm:$0xff]   ;;  %v13428_v16 = vld [vmem:[%s14139_s5 + $0x1c0] sm:$0xff]  }
 0x7be   :  { %8661 = vmatprep.subr.bf16.mxu1 %v13279_v24  ;;  %8608 = vmatpush3.bf16.msra.mxu0 %v13286_v51  ;;  %14604 = vst [vmem:[#allocation18_spill] sm:$0xff] %v13422_v48  ;;  %14605 = vst [vmem:[#allocation19_spill] sm:$0xff] %v13428_v16  ;;  %v13434_v21 = vld [vmem:[%s14139_s5 + $0x110] sm:$0xff]  }
 0x7bf   :  { %8637 = vmatprep.subr.bf16.mxu0 %v13292_v9  ;;  %14606 = vst [vmem:[#allocation20_spill] sm:$0xff] %v13434_v21 }
 0x7c1   :  { %8662 = vmatpush3.bf16.msra.mxu1 %v13298_v20  ;;  %5516 = vmatmul.mubr.bf16.vlgmr.msra.gmra.mxu0 %v5352_v23  ;;  %v13440_v23 = vld [vmem:[%s14139_s5 + $0x148] sm:$0xff]  }
 0x7c2   :  { %8663 = vmatprep.subr.bf16.mxu1 %v13306_v49  ;;  %8638 = vmatpush3.bf16.msra.mxu0 %v13312_v13  ;;  %14607 = vst [vmem:[#allocation21_spill] sm:$0xff] %v13440_v23 }
 0x7c3   :  { %5828 = vmatprep.mubr.bf16.mxu0 %v5666_v2  ;;  %8639 = vmatprep.subr.bf16.mxu0 %v13320_v27  ;;  %v13446_v2 = vld [vmem:[%s14139_s5 + $0x180] sm:$0xff]  }
 0x7c4   :  { %14608 = vst [vmem:[#allocation22_spill] sm:$0xff] %v13446_v2 }
 0x7c5   :  { %8664 = vmatpush3.bf16.msra.mxu1 %v13326_v19 }
 0x7c6   :  { %8665 = vmatprep.subr.bf16.mxu1 %v13332_v14  ;;  %8640 = vmatpush3.bf16.msra.mxu0 %v13338_v46 }
 0x7c7   :  { %8641 = vmatprep.subr.bf16.mxu0 %v13344_v40 }
 0x7c9   :  { %8666 = vmatpush3.bf16.msra.mxu1 %v13350_v39 }
 0x7ca   :  { %8667 = vmatprep.subr.bf16.mxu1 %v13356_v25  ;;  %8642 = vmatpush3.bf16.msra.mxu0 %v13362_v62 }
 0x7cb   :  { %8643 = vmatprep.subr.bf16.mxu0 %v13368_v4 }
 0x7cd   :  { %8668 = vmatpush3.bf16.msra.mxu1 %v13374_v37 }
 0x7ce   :  { %8669 = vmatprep.subr.bf16.mxu1 %v13380_v31  ;;  %8644 = vmatpush3.bf16.msra.mxu0 %v13386_v44  ;;  %v13471_v31 = vld [vmem:[%s14139_s5 + $0x100] sm:$0xff]  }
 0x7cf   :  { %8645 = vmatprep.subr.bf16.mxu0 %v13392_v36  ;;  %14611 = vst [vmem:[#allocation25_spill] sm:$0xff] %v13471_v31 }
 0x7d1   :  { %8670 = vmatpush3.bf16.msra.mxu1 %v13398_v59  ;;  %v13462_v59 = vld [vmem:[#allocation4] sm:$0xff] }
 0x7d2   :  { %8671 = vmatprep.subr.bf16.mxu1 %v13404_v61  ;;  %8646 = vmatpush3.bf16.msra.mxu0 %v13410_v41  ;;  %v13453_v61 = vld [vmem:[%s14139_s5 + $0x108] sm:$0xff]  }
 0x7d3   :  { %8647 = vmatprep.subr.bf16.mxu0 %v13416_v52  ;;  %14609 = vst [vmem:[#allocation23_spill] sm:$0xff] %v13453_v61 }
 0x7d5   :  { %8672 = vmatpush3.bf16.msra.mxu1 %v13422_v48  ;;  %v13459_v48 = vld [vmem:[%s14139_s5 + $0x140] sm:$0xff]  }
 0x7d6   :  { %8673 = vmatprep.subr.bf16.mxu1 %v13428_v16  ;;  %8648 = vmatpush3.bf16.msra.mxu0 %v13434_v21  ;;  %14610 = vst [vmem:[#allocation24_spill] sm:$0xff] %v13459_v48  ;;  %v5843_v16 = vpack.c.bf16 %v13462_v59, %v13300_v57 }
 0x7d7   :  { %8649 = vmatprep.subr.bf16.mxu0 %v13440_v23  ;;  %v5663_v23 = vld [vmem:[#allocation6 + $0x20] sm:$0xff] }
 0x7d8   :  { %v5665_v57 = vpack.c.bf16 %v5663_v23, %v13261_v42 }
 0x7d9   :  { %8674 = vmatpush3.bf16.msra.mxu1 %v13446_v2 }
 0x7da   :  { %8684 = vmatprep.subr.bf16.mxu1 %v13172_v34  ;;  %8650 = vmatpush3.bf16.msra.mxu0 %v13453_v61 }
 0x7db   :  { %8651 = vmatprep.subr.bf16.mxu0 %v13459_v48 }
 0x7dc   :  { %6007 = vmatmul.mubr.bf16.vlgmr.msra.gmra.mxu1 %v5843_v16 }
 0x7dd   :  { %8685 = vmatpush3.bf16.msra.mxu1 %v13177_v12 }
 0x7de   :  { %8686 = vmatprep.subr.bf16.mxu1 %v13182_v30  ;;  %8652 = vmatpush3.bf16.msra.mxu0 %v13471_v31 }
 0x7df   :  { %9651 = vmatprep.subr.mxu0 %v13462_v59 }
 0x7e1   :  { %8687 = vmatpush3.bf16.msra.mxu1 %v13191_v60  ;;  %5829 = vmatmul.mubr.bf16.vlgmr.msra.gmra.mxu0 %v5665_v57 }
 0x7e2   :  { %8688 = vmatprep.subr.bf16.mxu1 %v13197_v29  ;;  %9655 = vmatprep.mubr.msk.f32.mxu0 %vm14612_vm13, %v13462_v59 }
 0x7e5   :  { %8689 = vmatpush3.bf16.msra.mxu1 %v13203_v5 }
 0x7e6   :  { %8690 = vmatprep.subr.bf16.mxu1 %v13209_v26 }
 0x7e9   :  { %8691 = vmatpush3.bf16.msra.mxu1 %v13215_v1 }
 0x7ea   :  { %8692 = vmatprep.subr.bf16.mxu1 %v13221_v47 }
 0x7ed   :  { %8693 = vmatpush3.bf16.msra.mxu1 %v13229_v32 }
 0x7ee   :  { %8694 = vmatprep.subr.bf16.mxu1 %v13235_v0 }
 0x7f1   :  { %8695 = vmatpush3.bf16.msra.mxu1 %v13243_v58 }
 0x7f2   :  { %8696 = vmatprep.subr.bf16.mxu1 %v13249_v3 }
 0x7f5   :  { %8697 = vmatpush3.bf16.msra.mxu1 %v13258_v10 }
 0x7f6   :  { %8698 = vmatprep.subr.bf16.mxu1 %v13266_v8 }
 0x7f9   :  { %8699 = vmatpush3.bf16.msra.mxu1 %v13286_v51 }
 0x7fa   :  { %8728 = vmatprep.subr.bf16.mxu1 %v13292_v9 }
 0x861   :  { %v9650_v34 = vpop.f32.mrf.mxu0 }
 0x862   :  { %v5153_v12 = vadd.f32 %v9650_v34, %v13101_v50 }
 0x863   :  { %v5147_v30 = vpop.f32.mrf.mxu0 }
 0x864   :  { %v5157_v60 = vmul.f32 0.2, %v5153_v12  ;;  %v5148_v29 = vadd.f32 %v13101_v50, %v5147_v30 }
 0x866   :  { %v5159_v5 = vmax.f32 %v5153_v12, %v5157_v60  ;;  %v5156_v26 = vmul.f32 0.2, %v5148_v29 }
 0x868   :  { %5163 = vst [vmem:[%s14141_s19 + $0x18] sm:$0x1] %v5159_v5  ;;  %v5158_v1 = vmax.f32 %v5148_v29, %v5156_v26  ;;  %v5265_v32 = vrot.slane %v5159_v5, 4  ;;  %v5289_v50 = vrot.slane %v5159_v5, 6  ;;  %v5276_v16 = vrot.slane %v5159_v5, 5 }
 0x869   :  { %v5298_v23 = vrot.slane %v5159_v5, 7 }
 0x86a   :  { %5162 = vst [vmem:[%s14141_s19 + $0x10] sm:$0xff] %v5158_v1  ;;  %5218 = vst.msk [vmem:[#allocation6 + $0x58] sm:$0x7] %vm5216_vm6, %v5158_v1  ;;  %v5251_v47 = vrot.slane %v5158_v1, 4  ;;  %v5235_v0 = vrot.slane %v5158_v1, 2  ;;  %v5220_v58 = vrot.slane %v5158_v1, 1 }
 0x86b   :  { %v5245_v3 = vrot.slane %v5158_v1, 3  ;;  %v5199_v10 = vrot.slane %v5158_v1, 6  ;;  %v5206_v51 = vrot.slane %v5158_v1, 7  ;;  %v5275_v9 = vrot.slane %v5158_v1, 5 }
 0x86c   :  { %5254 = vrot.lane.b32.xlu0 %v5251_v47, %s9919_s29  ;;  %v5266_v42 = vsel %vm5262_vm5, %v5251_v47, %v5265_v32  ;;  %5238 = vrot.lane.b32.xlu1 %v5235_v0, %s9919_s29  ;;  %5233 = vst.msk [vmem:[#allocation7 + $0x50] sm:$0x1c] %vm5202_vm11, %v5220_v58  ;;  %vm14658_vm5 = vmmov %vm14613_vm2 }
 0x86d   :  { %5270 = vst.msk [vmem:[#allocation6 + $0x60] sm:$0x1c] %vm5202_vm11, %v5266_v42  ;;  %5204 = vst.msk [vmem:[#allocation6 + $0x50] sm:$0x1c] %vm5202_vm11, %v5199_v10  ;;  %v5290_v8 = vsel %vm5286_vm12, %v5199_v10, %v5289_v50  ;;  %v5277_v57 = vsel %vm5271_vm7, %v5275_v9, %v5276_v16  ;;  %v5299_v34 = vsel %vm5295_vm3, %v5206_v51, %v5298_v23 }
 0x86e   :  { %5249 = vst.msk [vmem:[#allocation7 + $0x58] sm:$0x7] %vm5216_vm6, %v5245_v3  ;;  %5294 = vst.msk [vmem:[#allocation6 + $0x68] sm:$0x7] %vm5216_vm6, %v5290_v8 }
 0x86f   :  { %vm14643_vm6 = vmmov %vm14613_vm2 }
 0x870   :  { %5223 = vrot.lane.b32.xlu0 %v5220_v58, %s9919_s29  ;;  %5209 = vrot.lane.b32.xlu1 %v5206_v51, %s9919_s29 }
 0x874   :  { %5280 = vrot.lane.b32.xlu1 %v5277_v57, %s9919_s29  ;;  %5302 = vrot.lane.b32.xlu0 %v5299_v34, %s9919_s29 }
 0x87c   :  { %v8631_v12 = vpop.f32.mrf.mxu1 }
 0x87e   :  { %v8632_v30 = vpop.f32.mrf.mxu1 }
 0x87f   :  { %v8633_v51 = vadd.f32 %v8632_v30, %v8631_v12  ;;  %v13633_v12 = vld [vmem:[%s14143_s6 + $0xa0] sm:$0xff]   ;;  %v13640_v30 = vld [vmem:[%s14143_s6 + $0xd8] sm:$0xff]  }
 0x880   :  { %v8634_v29 = vpop.f32.mrf.mxu1 }
 0x881   :  { %v8609_v60 = vpop.f32.mrf.mxu0 }
 0x882   :  { %v8635_v1 = vpop.f32.mrf.mxu1 }
 0x883   :  { %v8610_v26 = vpop.f32.mrf.mxu0  ;;  %v8636_v9 = vadd.f32 %v8635_v1, %v8634_v29  ;;  %v13645_v29 = vld [vmem:[%s14143_s6 + $0x98] sm:$0xff]   ;;  %v13658_v1 = vld [vmem:[%s14143_s6 + $0x90] sm:$0xff]  }
 0x884   :  { %v8611_v50 = vadd.f32 %v8610_v26, %v8609_v60  ;;  %v13522_v60 = vld [vmem:[%s14142_s15] sm:$0xf]  ;;  %v13652_v26 = vld [vmem:[%s14143_s6 + $0xd0] sm:$0xff]  }
 0x885   :  { %v8612_v47 = vpop.f32.mrf.mxu0 }
 0x886   :  { %v5655_v34 = vadd.f32 %v8633_v51, %v8611_v50  ;;  %v13688_v50 = vld [vmem:[%s14143_s6 + $0x80] sm:$0xff]   ;;  %v13694_v51 = vld [vmem:[%s14143_s6 + $0x178] sm:$0xff]  }
 0x887   :  { %v8613_v0 = vpop.f32.mrf.mxu0 }
 0x888   :  { %v8614_v42 = vadd.f32 %v8613_v0, %v8612_v47  ;;  %v13664_v47 = vld [vmem:[%s14143_s6 + $0xc8] sm:$0xff]  }
 0x889   :  { %v13675_v0 = vld [vmem:[%s14143_s6 + $0x88] sm:$0xff]  }
 0x88a   :  { %v5658_v2 = vadd.f32 %v8636_v9, %v8614_v42 }
 0x89c   :  { %v8675_v32 = vpop.f32.mrf.mxu1 }
 0x89e   :  { %v8676_v58 = vpop.f32.mrf.mxu1 }
 0x89f   :  { %v8677_v21 = vadd.f32 %v8676_v58, %v8675_v32  ;;  %v13669_v32 = vld [vmem:[%s14144_s10] ss:$0 sm:$0xff] }
 0x8a0   :  { %v8678_v5 = vpop.f32.mrf.mxu1 }
 0x8a1   :  { %v8653_v3 = vpop.f32.mrf.mxu0 }
 0x8a2   :  { %v8679_v23 = vpop.f32.mrf.mxu1 }
 0x8a3   :  { %v8654_v10 = vpop.f32.mrf.mxu0  ;;  %v8680_v48 = vadd.f32 %v8679_v23, %v8678_v5 }
 0x8a4   :  { %v8655_v16 = vadd.f32 %v8654_v10, %v8653_v3  ;;  %v13681_v3 = vld [vmem:[%s14143_s6 + $0xc0] sm:$0xff]  }
 0x8a5   :  { %v8656_v8 = vpop.f32.mrf.mxu0 }
 0x8a6   :  { %v5837_v61 = vadd.f32 %v8655_v16, %v5655_v34 }
 0x8a7   :  { %v8657_v57 = vpop.f32.mrf.mxu0 }
 0x8a8   :  { %v8658_v31 = vadd.f32 %v8657_v57, %v8656_v8  ;;  %v6015_v52 = vadd.f32 %v8677_v21, %v5837_v61  ;;  %v13597_v61 = vld [vmem:[%s14143_s6 + $0xb8] sm:$0xff]   ;;  %v13621_v21 = vld [vmem:[%s14143_s6 + $0xa8] sm:$0xff]  }
 0x8aa   :  { %v5838_v37 = vadd.f32 %v8658_v31, %v5658_v2  ;;  %v14627_v31 = vld [vmem:[#allocation22_spill] sm:$0xff] }
 0x8ab   :  { %v13628_v2 = vld [vmem:[%s14143_s6 + $0xe0] sm:$0xff]  }
 0x8ac   :  { %v6016_v25 = vadd.f32 %v8680_v48, %v5838_v37  ;;  %v14626_v37 = vld [vmem:[#allocation19_spill] sm:$0xff] }
 0x8ad   :  { %v13616_v48 = vld [vmem:[%s14143_s6 + $0xe8] sm:$0xff]  }
 0x8ae   :  { %9652 = vmatpush3.msra.mxu0 %v6016_v25  ;;  %v14624_v25 = vld [vmem:[#allocation25_spill] sm:$0xff] }
 0x8af   :  { %9653 = vmatprep.subr.mxu0 %v13462_v59 }
 0x8b0   :  { %9654 = vmatpush3.msra.mxu0 %v6015_v52  ;;  %v13609_v52 = vld [vmem:[%s14143_s6 + $0xb0] sm:$0xff]  }
 0x8b1   :  { %9656 = vmatmul.mubr.msk.f32.vlgmr.msra.gmra.mxu0 %vm14613_vm2, %v13522_v60  ;;  %8706 = vmatprep.subr.bf16.mxu0 %v13041_v7 }
 0x8b2   :  { %8707 = vmatpush3.bf16.msra.mxu0 %v13046_v22 }
 0x8b3   :  { %8708 = vmatprep.subr.bf16.mxu0 %v13053_v43 }
 0x8b6   :  { %8709 = vmatpush3.bf16.msra.mxu0 %v13058_v35 }
 0x8b7   :  { %8710 = vmatprep.subr.bf16.mxu0 %v13065_v15 }
 0x8ba   :  { %8711 = vmatpush3.bf16.msra.mxu0 %v13070_v63 }
 0x8bb   :  { %8712 = vmatprep.subr.bf16.mxu0 %v13077_v38 }
 0x8be   :  { %8713 = vmatpush3.bf16.msra.mxu0 %v13082_v17 }
 0x8bf   :  { %8714 = vmatprep.subr.bf16.mxu0 %v13089_v18 }
 0x8c2   :  { %8715 = vmatpush3.bf16.msra.mxu0 %v13094_v56 }
 0x8c3   :  { %8716 = vmatprep.subr.bf16.mxu0 %v13106_v28 }
 0x8c6   :  { %8717 = vmatpush3.bf16.msra.mxu0 %v13111_v53 }
 0x8c7   :  { %8718 = vmatprep.subr.bf16.mxu0 %v13119_v33 }
 0x8ca   :  { %8719 = vmatpush3.bf16.msra.mxu0 %v13125_v11 }
 0x8cb   :  { %8720 = vmatprep.subr.bf16.mxu0 %v13132_v45 }
 0x8ce   :  { %8721 = vmatpush3.bf16.msra.mxu0 %v13140_v55 }
 0x8cf   :  { %8750 = vmatprep.subr.bf16.mxu0 %v13151_v6 }
 0x8de   :  { %v5255_v7 = vpop.permute.xlu0 %5254  ;;  %v5239_v22 = vpop.permute.xlu1 %5238 }
 0x8df   :  { %5259 = vst.msk [vmem:[#allocation7 + $0x58] sm:$0x3] %vm5227_vm8, %v5255_v7 }
 0x8e0   :  { %5243 = vst.msk [vmem:[#allocation7 + $0x50] sm:$0xe] %vm5213_vm15, %v5239_v22 }
 0x8e2   :  { %v5224_v43 = vpop.permute.xlu0 %5223  ;;  %v5210_v35 = vpop.permute.xlu1 %5209 }
 0x8e3   :  { %5229 = vst.msk [vmem:[#allocation6 + $0x58] sm:$0x3] %vm5227_vm8, %v5224_v43 }
 0x8e4   :  { %5215 = vst.msk [vmem:[#allocation6 + $0x50] sm:$0xe] %vm5213_vm15, %v5210_v35 }
 0x8e6   :  { %v5281_v15 = vpop.permute.xlu1 %5280  ;;  %v5303_v63 = vpop.permute.xlu0 %5302  ;;  %v6109_v38 = vld [vmem:[#allocation7 + $0x58] sm:$0xff] }
 0x8e7   :  { %v6108_v17 = vld [vmem:[#allocation7 + $0x50] sm:$0xff]  ;;  %5285 = vst.msk [vmem:[#allocation6 + $0x60] sm:$0xe] %vm5213_vm15, %v5281_v15  ;;  %v6111_v18 = vpack.c.bf16 %v6109_v38, %v13462_v59  ;;  %v6248_v45 = vpack.c.bf16 %v13462_v59, %v6109_v38 }
 0x8e8   :  { %5307 = vst.msk [vmem:[#allocation6 + $0x68] sm:$0x3] %vm5227_vm8, %v5303_v63  ;;  %v6110_v56 = vpack.c.bf16 %v6108_v17, %v13462_v59 }
 0x8e9   :  { %6144 = vmatprep.mubr.bf16.mxu1 %v6111_v18 }
 0x8ea   :  { %6145 = vmatmul.mubr.bf16.vlgmr.msra.gmra.mxu1 %v6110_v56  ;;  %v6102_v28 = vld [vmem:[#allocation6 + $0x58] sm:$0xff] }
 0x8eb   :  { %v6101_v53 = vld [vmem:[#allocation6 + $0x50] sm:$0xff]  ;;  %8729 = vmatpush3.bf16.msra.mxu1 %v13312_v13  ;;  %v6104_v33 = vpack.c.bf16 %v6102_v28, %v13462_v59  ;;  %v14617_v13 = vld [vmem:[#allocation13_spill] sm:$0xff] }
 0x8ec   :  { %v6103_v11 = vpack.c.bf16 %v6101_v53, %v13462_v59  ;;  %8730 = vmatprep.subr.bf16.mxu1 %v13320_v27  ;;  %v14619_v27 = vld [vmem:[#allocation14_spill] sm:$0xff] }
 0x8ed   :  { %6185 = vmatprep.mubr.bf16.mxu0 %v6104_v33 }
 0x8ee   :  { %6186 = vmatmul.mubr.bf16.vlgmr.msra.gmra.mxu0 %v6103_v11 }
 0x8ef   :  { %v6197_v55 = vld [vmem:[#allocation6 + $0x68] sm:$0xff]  ;;  %8731 = vmatpush3.bf16.msra.mxu1 %v13338_v46  ;;  %8751 = vmatpush3.bf16.msra.mxu0 %v13274_v54  ;;  %v14614_v54 = vld [vmem:[#allocation17_spill] sm:$0xff] }
 0x8f0   :  { %v6199_v6 = vpack.c.bf16 %v6197_v55, %v6102_v28  ;;  %6281 = vmatprep.mubr.bf16.mxu0 %v6248_v45  ;;  %8732 = vmatprep.subr.bf16.mxu1 %v13344_v40  ;;  %v14621_v46 = vld [vmem:[#allocation15_spill] sm:$0xff]  ;;  %v14623_v40 = vld [vmem:[#allocation16_spill] sm:$0xff] }
 0x8f1   :  { %8752 = vmatprep.subr.bf16.mxu0 %v13279_v24  ;;  %v14615_v24 = vld [vmem:[#allocation12_spill] sm:$0xff] }
 0x8f2   :  { %6232 = vmatprep.mubr.bf16.mxu1 %v6199_v6 }
 0x8f3   :  { %8733 = vmatpush3.bf16.msra.mxu1 %v13362_v62  ;;  %8753 = vmatpush3.bf16.msra.mxu0 %v13298_v20  ;;  %v14616_v20 = vld [vmem:[#allocation20_spill] sm:$0xff]  ;;  %v14625_v62 = vld [vmem:[#allocation18_spill] sm:$0xff] }
 0x8f4   :  { %8734 = vmatprep.subr.bf16.mxu1 %v13368_v4  ;;  %8754 = vmatprep.subr.bf16.mxu0 %v13306_v49  ;;  %v14618_v49 = vld [vmem:[#allocation21_spill] sm:$0xff] }
 0x8f7   :  { %8735 = vmatpush3.bf16.msra.mxu1 %v13386_v44  ;;  %8755 = vmatpush3.bf16.msra.mxu0 %v13326_v19  ;;  %v14620_v19 = vld [vmem:[#allocation23_spill] sm:$0xff]  ;;  %v6247_v44 = vpack.c.bf16 %v13462_v59, %v6108_v17 }
 0x8f8   :  { %8736 = vmatprep.subr.bf16.mxu1 %v13392_v36  ;;  %8756 = vmatprep.subr.bf16.mxu0 %v13332_v14  ;;  %v14622_v14 = vld [vmem:[#allocation24_spill] sm:$0xff]  ;;  %v13592_v36 = vld [vmem:[%s14143_s6 + $0xf8] sm:$0xff]  }
 0x8fb   :  { %8737 = vmatpush3.bf16.msra.mxu1 %v13410_v41  ;;  %8757 = vmatpush3.bf16.msra.mxu0 %v13350_v39  ;;  %v6196_v39 = vld [vmem:[#allocation6 + $0x60] sm:$0xff]  ;;  %v13604_v41 = vld [vmem:[%s14143_s6 + $0xf0] sm:$0xff]  }
 0x8fc   :  { %8738 = vmatprep.subr.bf16.mxu1 %v14614_v54  ;;  %8758 = vmatprep.subr.bf16.mxu0 %v14615_v24  ;;  %v6198_v4 = vpack.c.bf16 %v6196_v39, %v6101_v53 }
 0x8ff   :  { %8739 = vmatpush3.bf16.msra.mxu1 %v14616_v20  ;;  %8759 = vmatpush3.bf16.msra.mxu0 %v14617_v13 }
 0x900   :  { %8740 = vmatprep.subr.bf16.mxu1 %v14618_v49  ;;  %8760 = vmatprep.subr.bf16.mxu0 %v14619_v27 }
 0x903   :  { %8741 = vmatpush3.bf16.msra.mxu1 %v14620_v19  ;;  %8761 = vmatpush3.bf16.msra.mxu0 %v14621_v46 }
 0x904   :  { %8742 = vmatprep.subr.bf16.mxu1 %v14622_v14  ;;  %8762 = vmatprep.subr.bf16.mxu0 %v14623_v40 }
 0x907   :  { %8743 = vmatpush3.bf16.msra.mxu1 %v14624_v25  ;;  %8763 = vmatpush3.bf16.msra.mxu0 %v14625_v62  ;;  %v13710_v62 = vld [vmem:[%s14143_s6 + $0x78] sm:$0xff]  }
 0x908   :  { %8764 = vmatprep.subr.bf16.mxu0 %v14626_v37  ;;  %9658 = vmatprep.subr.mxu1 %v13462_v59  ;;  %v13715_v37 = vld [vmem:[%s14143_s6 + $0x38] sm:$0xff]  }
 0x90a   :  { %6233 = vmatmul.mubr.bf16.vlgmr.msra.gmra.mxu1 %v6198_v4 }
 0x90b   :  { %8765 = vmatpush3.bf16.msra.mxu0 %v14627_v31  ;;  %9662 = vmatprep.mubr.msk.f32.mxu1 %vm14612_vm13, %v13462_v59  ;;  %v13721_v31 = vld [vmem:[%s14143_s6 + $0x70] sm:$0xff]  }
 0x90c   :  { %8775 = vmatprep.subr.bf16.mxu0 %v13592_v36 }
 0x90e   :  { %6282 = vmatmul.mubr.bf16.vlgmr.msra.gmra.mxu0 %v6247_v44  ;;  %v13730_v44 = vld [vmem:[%s14143_s6 + $0x30] sm:$0xff]  }
 0x90f   :  { %8776 = vmatpush3.bf16.msra.mxu0 %v13597_v61 }
 0x910   :  { %8777 = vmatprep.subr.bf16.mxu0 %v13604_v41 }
 0x913   :  { %8778 = vmatpush3.bf16.msra.mxu0 %v13609_v52 }
 0x914   :  { %8779 = vmatprep.subr.bf16.mxu0 %v13616_v48 }
 0x917   :  { %8780 = vmatpush3.bf16.msra.mxu0 %v13621_v21 }
 0x918   :  { %8781 = vmatprep.subr.bf16.mxu0 %v13628_v2 }
 0x91b   :  { %8782 = vmatpush3.bf16.msra.mxu0 %v13633_v12 }
 0x91c   :  { %8783 = vmatprep.subr.bf16.mxu0 %v13640_v30 }
 0x91f   :  { %8784 = vmatpush3.bf16.msra.mxu0 %v13645_v29 }
 0x920   :  { %8785 = vmatprep.subr.bf16.mxu0 %v13652_v26 }
 0x923   :  { %8786 = vmatpush3.bf16.msra.mxu0 %v13658_v1 }
 0x924   :  { %8787 = vmatprep.subr.bf16.mxu0 %v13664_v47 }
 0x927   :  { %8788 = vmatpush3.bf16.msra.mxu0 %v13675_v0 }
 0x928   :  { %8789 = vmatprep.subr.bf16.mxu0 %v13681_v3 }
 0x92b   :  { %8790 = vmatpush3.bf16.msra.mxu0 %v13688_v50 }
 0x92c   :  { %8819 = vmatprep.subr.bf16.mxu0 %v13694_v51 }
 0x971   :  { %v6092_v58 = vpop.f32.mrf.mxu0 }
 0x972   :  { %v6093_v5 = vadd.f32 %v13669_v32, %v6092_v58  ;;  %v13736_v58 = vld [vmem:[%s14143_s6 + $0x68] sm:$0xff]  }
 0x973   :  { %v9657_v10 = vpop.f32.mrf.mxu0 }
 0x974   :  { %v6096_v42 = vmul.f32 0.2, %v6093_v5  ;;  %v13754_v10 = vld [vmem:[%s14143_s6 + $0x20] sm:$0xff]  }
 0x976   :  { %v6097_v8 = vmax.f32 %v6093_v5, %v6096_v42  ;;  %v13748_v5 = vld [vmem:[%s14143_s6 + $0x60] sm:$0xff]   ;;  %v13760_v42 = vld [vmem:[%s14143_s6 + $0x58] sm:$0xff]  }
 0x978   :  { %6364 = vst [vmem:[%s14145_s20] sm:$0xf] %v6097_v8  ;;  %v6421_v9 = vrot.slane %v6097_v8, 1  ;;  %v6442_v16 = vrot.slane %v6097_v8, 3  ;;  %6419 = vst.msk [vmem:[#allocation8 + $0x18] sm:$0x3] %vm6418_vm10, %v6097_v8  ;;  %v6436_v23 = vrot.slane %v6097_v8, 2 }
 0x979   :  { %6432 = vst.msk [vmem:[#allocation9 + $0x10] sm:$0xc] %vm6404_vm14, %v6097_v8  ;;  %v6400_v57 = vrot.slane %v6097_v8, 6  ;;  %v6407_v34 = vrot.slane %v6097_v8, 7  ;;  %v13766_v8 = vld [vmem:[%s14143_s6 + $0x18] sm:$0xff]  }
 0x97a   :  { %6423 = vrot.lane.b32.xlu1 %v6421_v9, %s9919_s29  ;;  %6444 = vrot.lane.b32.xlu0 %v6442_v16, %s9919_s29  ;;  %6440 = vst.msk [vmem:[#allocation9 + $0x18] sm:$0x3] %vm6418_vm10, %v6436_v23  ;;  %v13772_v9 = vld [vmem:[%s14143_s6 + $0x50] sm:$0xff]  }
 0x97b   :  { %6405 = vst.msk [vmem:[#allocation8 + $0x10] sm:$0xc] %vm6404_vm14, %v6400_v57  ;;  %v13781_v57 = vld [vmem:[%s14143_s6 + $0x10] sm:$0xff]  }
 0x97e   :  { %6409 = vrot.lane.b32.xlu0 %v6407_v34, %s9919_s29  ;;  %v13787_v34 = vld [vmem:[%s14143_s6 + $0x48] sm:$0xff]  }
 0x9aa   :  { %v8700_v7 = vpop.f32.mrf.mxu1 }
 0x9ac   :  { %v8701_v22 = vpop.f32.mrf.mxu1 }
 0x9ad   :  { %v8702_v20 = vadd.f32 %v8701_v22, %v8700_v7  ;;  %v13794_v22 = vld [vmem:[%s14143_s6 + $0x8] sm:$0xff]  }
 0x9ae   :  { %v8722_v43 = vpop.f32.mrf.mxu0  ;;  %v8703_v35 = vpop.f32.mrf.mxu1 }
 0x9b0   :  { %v8723_v15 = vpop.f32.mrf.mxu0  ;;  %v8704_v63 = vpop.f32.mrf.mxu1 }
 0x9b1   :  { %v8705_v55 = vadd.f32 %v8704_v63, %v8703_v35  ;;  %v8724_v6 = vadd.f32 %v8723_v15, %v8722_v43  ;;  %v13800_v43 = vld [vmem:[%s14143_s6 + $0x40] sm:$0xff]  }
 0x9b2   :  { %v8725_v38 = vpop.f32.mrf.mxu0 }
 0x9b3   :  { %v6188_v19 = vadd.f32 %v8724_v6, %v8702_v20  ;;  %v13840_v6 = vld [vmem:[%s14143_s6 + $0x130] sm:$0xff]  }
 0x9b4   :  { %v8726_v18 = vpop.f32.mrf.mxu0  ;;  %v13857_v20 = vld [vmem:[%s14143_s6 + $0x1f0] sm:$0xff]  }
 0x9b5   :  { %v8727_v33 = vadd.f32 %v8726_v18, %v8725_v38 }
 0x9b7   :  { %v6191_v13 = vadd.f32 %v8727_v33, %v8705_v55  ;;  %v13828_v33 = vld [vmem:[%s14143_s6 + $0x1f8] sm:$0xff]  }
 0x9ca   :  { %v8744_v17 = vpop.f32.mrf.mxu1 }
 0x9cc   :  { %v8745_v56 = vpop.f32.mrf.mxu1 }
 0x9cd   :  { %v8746_v49 = vadd.f32 %v8745_v56, %v8744_v17  ;;  %v13812_v56 = vld [vmem:[%s14143_s6] sm:$0xff]  }
 0x9ce   :  { %v8747_v28 = vpop.f32.mrf.mxu1  ;;  %v8766_v53 = vpop.f32.mrf.mxu0 }
 0x9cf   :  { %v6241_v39 = vadd.f32 %v8746_v49, %v6188_v19  ;;  %v13865_v49 = vld [vmem:[%s14143_s6 + $0x128] sm:$0xff]  }
 0x9d0   :  { %v8748_v11 = vpop.f32.mrf.mxu1  ;;  %v8767_v45 = vpop.f32.mrf.mxu0  ;;  %v13881_v19 = vld [vmem:[%s14143_s6 + $0x1e8] sm:$0xff]  }
 0x9d1   :  { %v8749_v54 = vadd.f32 %v8748_v11, %v8747_v28  ;;  %v8768_v14 = vadd.f32 %v8767_v45, %v8766_v53  ;;  %v13817_v28 = vld [vmem:[%s14143_s6 + $0x138] sm:$0xff]   ;;  %v13823_v53 = vld [vmem:[%s14143_s6 + $0x170] sm:$0xff]  }
 0x9d2   :  { %v8769_v24 = vpop.f32.mrf.mxu0 }
 0x9d3   :  { %v6242_v46 = vadd.f32 %v8749_v54, %v6191_v13  ;;  %v6290_v4 = vadd.f32 %v8768_v14, %v6241_v39  ;;  %v13845_v54 = vld [vmem:[%s14143_s6 + $0x1b8] sm:$0xff]   ;;  %v13894_v14 = vld [vmem:[%s14143_s6 + $0x1a8] sm:$0xff]   ;;  %v13906_v39 = vld [vmem:[%s14143_s6 + $0x1e0] sm:$0xff]  }
 0x9d4   :  { %v8770_v27 = vpop.f32.mrf.mxu0 }
 0x9d5   :  { %v8771_v40 = vadd.f32 %v8770_v27, %v8769_v24  ;;  %v13851_v24 = vld [vmem:[%s14143_s6 + $0x168] sm:$0xff]   ;;  %v13870_v27 = vld [vmem:[%s14143_s6 + $0x1b0] sm:$0xff]  }
 0x9d7   :  { %v6291_v25 = vadd.f32 %v8771_v40, %v6242_v46  ;;  %v13889_v46 = vld [vmem:[%s14143_s6 + $0x120] sm:$0xff]   ;;  %v13901_v40 = vld [vmem:[%s14143_s6 + $0x158] sm:$0xff]  }
 0x9d9   :  { %9659 = vmatpush3.msra.mxu1 %v6291_v25  ;;  %v13913_v25 = vld [vmem:[%s14143_s6 + $0x118] sm:$0xff]  }
 0x9da   :  { %9660 = vmatprep.subr.mxu1 %v13462_v59 }
 0x9db   :  { %9661 = vmatpush3.msra.mxu1 %v6290_v4  ;;  %v13918_v4 = vld [vmem:[%s14143_s6 + $0x1a0] sm:$0xff]  }
 0x9dc   :  { %9663 = vmatmul.mubr.msk.f32.vlgmr.msra.gmra.mxu1 %vm14628_vm9, %v13522_v60  ;;  %8797 = vmatprep.subr.bf16.mxu1 %v13710_v62  ;;  %v13742_v60 = vld [vmem:[%s14143_s6 + $0x28] sm:$0xff]  }
 0x9dd   :  { %8798 = vmatpush3.bf16.msra.mxu1 %v13715_v37 }
 0x9de   :  { %8799 = vmatprep.subr.bf16.mxu1 %v13721_v31 }
 0x9e1   :  { %8800 = vmatpush3.bf16.msra.mxu1 %v13730_v44 }
 0x9e2   :  { %8801 = vmatprep.subr.bf16.mxu1 %v13736_v58 }
 0x9e5   :  { %8802 = vmatpush3.bf16.msra.mxu1 %v13742_v60 }
 0x9e6   :  { %8803 = vmatprep.subr.bf16.mxu1 %v13748_v5 }
 0x9e9   :  { %8804 = vmatpush3.bf16.msra.mxu1 %v13754_v10 }
 0x9ea   :  { %8805 = vmatprep.subr.bf16.mxu1 %v13760_v42 }
 0x9ec   :  { %v6424_v16 = vpop.permute.xlu1 %6423  ;;  %v6445_v23 = vpop.permute.xlu0 %6444 }
 0x9ed   :  { %6430 = vst.msk [vmem:[#allocation8 + $0x18] sm:$0x1] %vm6429_vm0, %v6424_v16  ;;  %6450 = vst.msk [vmem:[#allocation9 + $0x18] sm:$0x1] %vm6429_vm0, %v6445_v23  ;;  %8806 = vmatpush3.bf16.msra.mxu1 %v13766_v8  ;;  %v13930_v23 = vld [vmem:[%s14143_s6 + $0x1d8] sm:$0xff]  }
 0x9ee   :  { %6434 = vst.msk [vmem:[#allocation9 + $0x10] sm:$0x6] %vm6415_vm4, %v6424_v16  ;;  %8807 = vmatprep.subr.bf16.mxu1 %v13772_v9  ;;  %v13925_v16 = vld [vmem:[%s14143_s6 + $0x150] sm:$0xff]   ;;  %14630 = vst [vmem:[#allocation29_spill] sm:$0xff] %v13930_v23 }
 0x9ef   :  { %14629 = vst [vmem:[#allocation26_spill] sm:$0xff] %v13925_v16 }
 0x9f0   :  { %v6410_v7 = vpop.permute.xlu0 %6409 }
 0x9f1   :  { %6416 = vst.msk [vmem:[#allocation8 + $0x10] sm:$0x6] %vm6415_vm4, %v6410_v7  ;;  %8808 = vmatpush3.bf16.msra.mxu1 %v13781_v57  ;;  %v13937_v7 = vld [vmem:[%s14143_s6 + $0x110] sm:$0xff]  }
 0x9f2   :  { %8809 = vmatprep.subr.bf16.mxu1 %v13787_v34  ;;  %14631 = vst [vmem:[#allocation30_spill] sm:$0xff] %v13937_v7 }
 0x9f4   :  { %v6495_v35 = vld [vmem:[#allocation9 + $0x18] sm:$0xff] }
 0x9f5   :  { %v6457_v15 = vld [vmem:[#allocation8 + $0x18] sm:$0xff]  ;;  %v13802_v63 = vld [vmem:[#allocation9 + $0x10] sm:$0xff]  ;;  %8810 = vmatpush3.bf16.msra.mxu1 %v13794_v22  ;;  %v6497_v38 = vpack.c.bf16 %v6495_v35, %v13462_v59  ;;  %v6988_v13 = vpack.c.bf16 %v13462_v59, %v6495_v35 }
 0x9f6   :  { %v6459_v17 = vpack.c.bf16 %v6457_v15, %v13462_v59  ;;  %v6496_v18 = vpack.c.bf16 %v13802_v63, %v13462_v59  ;;  %8811 = vmatprep.subr.bf16.mxu1 %v13800_v43  ;;  %v6810_v11 = vpack.c.bf16 %v13462_v59, %v6457_v15  ;;  %v13942_v35 = vld [vmem:[%s14143_s6 + $0x198] sm:$0xff]   ;;  %v13949_v15 = vld [vmem:[%s14143_s6 + $0x148] sm:$0xff]  }
 0x9f7   :  { %6659 = vmatprep.mubr.bf16.mxu0 %v6497_v38  ;;  %14632 = vst [vmem:[#allocation35_spill] sm:$0xff] %v13942_v35  ;;  %14633 = vst [vmem:[#allocation36_spill] sm:$0xff] %v13949_v15  ;;  %v13954_v38 = vld [vmem:[%s14143_s6 + $0x1d0] sm:$0xff]  }
 0x9f8   :  { %6796 = vmatprep.mubr.bf16.mxu1 %v6459_v17  ;;  %6660 = vmatmul.mubr.bf16.vlgmr.msra.gmra.mxu0 %v6496_v18  ;;  %v13831_v45 = vld [vmem:[#allocation8 + $0x10] sm:$0xff]  ;;  %14634 = vst [vmem:[#allocation39_spill] sm:$0xff] %v13954_v38  ;;  %v13961_v17 = vld [vmem:[%s14143_s6 + $0x108] sm:$0xff]  }
 0x9f9   :  { %8812 = vmatpush3.bf16.msra.mxu1 %v13812_v56  ;;  %8820 = vmatpush3.bf16.msra.mxu0 %v13817_v28  ;;  %v6458_v55 = vpack.c.bf16 %v13831_v45, %v13462_v59  ;;  %v13876_v59 = vld [vmem:[%s14143_s6 + $0x160] sm:$0xff]   ;;  %14635 = vst [vmem:[#allocation40_spill] sm:$0xff] %v13961_v17  ;;  %v13966_v18 = vld [vmem:[%s14143_s6 + $0x190] sm:$0xff]  }
 0x9fa   :  { %6972 = vmatprep.mubr.bf16.mxu0 %v6810_v11  ;;  %8821 = vmatprep.subr.bf16.mxu0 %v13823_v53  ;;  %14636 = vst [vmem:[#allocation44_spill] sm:$0xff] %v13966_v18  ;;  %v13973_v11 = vld [vmem:[%s14143_s6 + $0x140] sm:$0xff]  }
 0x9fb   :  { %8841 = vmatprep.subr.bf16.mxu1 %v13828_v33  ;;  %14637 = vst [vmem:[#allocation45_spill] sm:$0xff] %v13973_v11 }
 0x9fc   :  { %6797 = vmatmul.mubr.bf16.vlgmr.msra.gmra.mxu1 %v6458_v55  ;;  %v13978_v55 = vld [vmem:[%s14143_s6 + $0x1c8] sm:$0xff]  }
 0x9fd   :  { %8822 = vmatpush3.bf16.msra.mxu0 %v13840_v6  ;;  %8842 = vmatpush3.bf16.msra.mxu1 %v13845_v54  ;;  %14638 = vst [vmem:[#allocation48_spill] sm:$0xff] %v13978_v55 }
 0x9fe   :  { %7150 = vmatprep.mubr.bf16.mxu1 %v6988_v13  ;;  %8823 = vmatprep.subr.bf16.mxu0 %v13851_v24  ;;  %v13985_v13 = vld [vmem:[%s14143_s6 + $0x100] sm:$0xff]  }
 0x9ff   :  { %8843 = vmatprep.subr.bf16.mxu1 %v13857_v20  ;;  %14639 = vst [vmem:[#allocation42_spill] sm:$0xff] %v13985_v13 }
 0xa01   :  { %8824 = vmatpush3.bf16.msra.mxu0 %v13865_v49  ;;  %8844 = vmatpush3.bf16.msra.mxu1 %v13870_v27 }
 0xa02   :  { %8825 = vmatprep.subr.bf16.mxu0 %v13876_v59  ;;  %8845 = vmatprep.subr.bf16.mxu1 %v13881_v19 }
 0xa05   :  { %8826 = vmatpush3.bf16.msra.mxu0 %v13889_v46  ;;  %8846 = vmatpush3.bf16.msra.mxu1 %v13894_v14 }
 0xa06   :  { %8827 = vmatprep.subr.bf16.mxu0 %v13901_v40  ;;  %8847 = vmatprep.subr.bf16.mxu1 %v13906_v39 }
 0xa09   :  { %8828 = vmatpush3.bf16.msra.mxu0 %v13913_v25  ;;  %8848 = vmatpush3.bf16.msra.mxu1 %v13918_v4 }
 0xa0a   :  { %8829 = vmatprep.subr.bf16.mxu0 %v13925_v16  ;;  %8849 = vmatprep.subr.bf16.mxu1 %v13930_v23 }
 0xa0d   :  { %8830 = vmatpush3.bf16.msra.mxu0 %v13937_v7  ;;  %8850 = vmatpush3.bf16.msra.mxu1 %v13942_v35 }
 0xa0e   :  { %8831 = vmatprep.subr.bf16.mxu0 %v13949_v15  ;;  %8851 = vmatprep.subr.bf16.mxu1 %v13954_v38  ;;  %v13990_v15 = vld [vmem:[%s14143_s6 + $0x188] sm:$0xff]   ;;  %v14006_v38 = vld [vmem:[#allocation4] sm:$0xff] }
 0xa0f   :  { %14640 = vst [vmem:[#allocation72_spill] sm:$0xff] %v13990_v15 }
 0xa11   :  { %8832 = vmatpush3.bf16.msra.mxu0 %v13961_v17  ;;  %8852 = vmatpush3.bf16.msra.mxu1 %v13966_v18  ;;  %v13997_v17 = vld [vmem:[%s14143_s6 + $0x1c0] sm:$0xff]  }
 0xa12   :  { %8833 = vmatprep.subr.bf16.mxu0 %v13973_v11  ;;  %8853 = vmatprep.subr.bf16.mxu1 %v13978_v55  ;;  %14641 = vst [vmem:[#allocation38_spill] sm:$0xff] %v13997_v17  ;;  %v14004_v18 = vld [vmem:[%s14143_s6 + $0x180] sm:$0xff]   ;;  %v6809_v11 = vpack.c.bf16 %v14006_v38, %v13831_v45 }
 0xa13   :  { %14642 = vst [vmem:[#allocation47_spill] sm:$0xff] %v14004_v18 }
 0xa15   :  { %8834 = vmatpush3.bf16.msra.mxu0 %v13985_v13  ;;  %8854 = vmatpush3.bf16.msra.mxu1 %v13990_v15  ;;  %v6987_v13 = vpack.c.bf16 %v14006_v38, %v13802_v63 }
 0xa16   :  { %8855 = vmatprep.subr.bf16.mxu1 %v13997_v17  ;;  %9665 = vmatprep.subr.mxu0 %v14006_v38 }
 0xa18   :  { %6973 = vmatmul.mubr.bf16.vlgmr.msra.gmra.mxu0 %v6809_v11 }
 0xa19   :  { %8856 = vmatpush3.bf16.msra.mxu1 %v14004_v18  ;;  %9669 = vmatprep.mubr.msk.f32.mxu0 %vm14612_vm13, %v14006_v38 }
 0xa1a   :  { %8866 = vmatprep.subr.bf16.mxu1 %v13592_v36 }
 0xa1c   :  { %7151 = vmatmul.mubr.bf16.vlgmr.msra.gmra.mxu1 %v6987_v13 }
 0xa1d   :  { %8867 = vmatpush3.bf16.msra.mxu1 %v13597_v61 }
 0xa1e   :  { %8868 = vmatprep.subr.bf16.mxu1 %v13604_v41 }
 0xa21   :  { %8869 = vmatpush3.bf16.msra.mxu1 %v13609_v52 }
 0xa22   :  { %8870 = vmatprep.subr.bf16.mxu1 %v13616_v48 }
 0xa25   :  { %8871 = vmatpush3.bf16.msra.mxu1 %v13621_v21 }
 0xa26   :  { %8872 = vmatprep.subr.bf16.mxu1 %v13628_v2 }
 0xa29   :  { %8873 = vmatpush3.bf16.msra.mxu1 %v13633_v12 }
 0xa2a   :  { %8874 = vmatprep.subr.bf16.mxu1 %v13640_v30 }
 0xa2d   :  { %8875 = vmatpush3.bf16.msra.mxu1 %v13645_v29 }
 0xa2e   :  { %8876 = vmatprep.subr.bf16.mxu1 %v13652_v26 }
 0xa31   :  { %8877 = vmatpush3.bf16.msra.mxu1 %v13658_v1 }
 0xa32   :  { %8878 = vmatprep.subr.bf16.mxu1 %v13664_v47 }
 0xa35   :  { %8879 = vmatpush3.bf16.msra.mxu1 %v13675_v0 }
 0xa36   :  { %8880 = vmatprep.subr.bf16.mxu1 %v13681_v3 }
 0xa39   :  { %8881 = vmatpush3.bf16.msra.mxu1 %v13688_v50 }
 0xa3a   :  { %8910 = vmatprep.subr.bf16.mxu1 %v13694_v51 }
 0xa9c   :  { %v6358_v36 = vpop.f32.mrf.mxu1 }
 0xa9d   :  { %v6359_v61 = vadd.f32 %v13669_v32, %v6358_v36 }
 0xa9e   :  { %v9664_v41 = vpop.f32.mrf.mxu1 }
 0xa9f   :  { %v6362_v52 = vmul.f32 0.2, %v6359_v61 }
 0xaa1   :  { %v6363_v48 = vmax.f32 %v6359_v61, %v6362_v52 }
 0xaa3   :  { %6365 = vst [vmem:[%s14145_s20 + $0x4] sm:$0xf] %v6363_v48  ;;  %6420 = vst.msk [vmem:[#allocation8 + $0x58] sm:$0x3] %vm6418_vm10, %v6363_v48  ;;  %v6443_v21 = vrot.slane %v6363_v48, 3  ;;  %v6422_v2 = vrot.slane %v6363_v48, 1 }
 0xaa4   :  { %6433 = vst.msk [vmem:[#allocation9 + $0x50] sm:$0xc] %vm6404_vm14, %v6363_v48  ;;  %v6437_v12 = vrot.slane %v6363_v48, 2  ;;  %v6401_v30 = vrot.slane %v6363_v48, 6  ;;  %v6408_v29 = vrot.slane %v6363_v48, 7 }
 0xaa5   :  { %6446 = vrot.lane.b32.xlu1 %v6443_v21, %s9919_s29  ;;  %6425 = vrot.lane.b32.xlu0 %v6422_v2, %s9919_s29 }
 0xaa6   :  { %6441 = vst.msk [vmem:[#allocation9 + $0x58] sm:$0x3] %vm6418_vm10, %v6437_v12 }
 0xaa7   :  { %6406 = vst.msk [vmem:[#allocation8 + $0x50] sm:$0xc] %vm6404_vm14, %v6401_v30 }
 0xaa9   :  { %6411 = vrot.lane.b32.xlu1 %v6408_v29, %s9919_s29 }
 0xab8   :  { %v8791_v26 = vpop.f32.mrf.mxu0 }
 0xaba   :  { %v8792_v1 = vpop.f32.mrf.mxu0 }
 0xabb   :  { %v8793_v12 = vadd.f32 %v8792_v1, %v8791_v26 }
 0xabc   :  { %v8813_v47 = vpop.f32.mrf.mxu1  ;;  %v8794_v32 = vpop.f32.mrf.mxu0 }
 0xabe   :  { %v8814_v0 = vpop.f32.mrf.mxu1  ;;  %v8795_v3 = vpop.f32.mrf.mxu0 }
 0xabf   :  { %v8815_v52 = vadd.f32 %v8814_v0, %v8813_v47  ;;  %v8796_v21 = vadd.f32 %v8795_v3, %v8794_v32 }
 0xac0   :  { %v8816_v50 = vpop.f32.mrf.mxu1 }
 0xac1   :  { %v6799_v17 = vadd.f32 %v8815_v52, %v8793_v12 }
 0xac2   :  { %v8817_v63 = vpop.f32.mrf.mxu1 }
 0xac3   :  { %v8818_v36 = vadd.f32 %v8817_v63, %v8816_v50  ;;  %v14048_v50 = vld [vmem:[%s14146_s16] sm:$0xf] }
 0xac5   :  { %v6802_v30 = vadd.f32 %v8818_v36, %v8796_v21 }
 0xad8   :  { %v8835_v51 = vpop.f32.mrf.mxu0 }
 0xada   :  { %v8836_v45 = vpop.f32.mrf.mxu0 }
 0xadb   :  { %v8837_v29 = vadd.f32 %v8836_v45, %v8835_v51 }
 0xadc   :  { %v8838_v11 = vpop.f32.mrf.mxu0  ;;  %v8857_v13 = vpop.f32.mrf.mxu1 }
 0xadd   :  { %v6981_v35 = vadd.f32 %v8837_v29, %v6799_v17 }
 0xade   :  { %v8839_v61 = vpop.f32.mrf.mxu0  ;;  %v8858_v41 = vpop.f32.mrf.mxu1 }
 0xadf   :  { %v8840_v48 = vadd.f32 %v8839_v61, %v8838_v11  ;;  %v8859_v55 = vadd.f32 %v8858_v41, %v8857_v13 }
 0xae0   :  { %v8860_v2 = vpop.f32.mrf.mxu1 }
 0xae1   :  { %v6982_v15 = vadd.f32 %v8840_v48, %v6802_v30  ;;  %v7159_v23 = vadd.f32 %v8859_v55, %v6981_v35 }
 0xae2   :  { %v8861_v18 = vpop.f32.mrf.mxu1 }
 0xae3   :  { %v8862_v7 = vadd.f32 %v8861_v18, %v8860_v2 }
 0xae5   :  { %v7160_v16 = vadd.f32 %v8862_v7, %v6982_v15 }
 0xae7   :  { %9666 = vmatpush3.msra.mxu0 %v7160_v16 }
 0xae8   :  { %9667 = vmatprep.subr.mxu0 %v14006_v38 }
 0xae9   :  { %9668 = vmatpush3.msra.mxu0 %v7159_v23 }
 0xaea   :  { %8888 = vmatprep.subr.bf16.mxu0 %v13710_v62  ;;  %9670 = vmatmul.mubr.msk.f32.vlgmr.msra.gmra.mxu0 %vm14643_vm6, %v14048_v50 }
 0xaeb   :  { %8889 = vmatpush3.bf16.msra.mxu0 %v13715_v37 }
 0xaec   :  { %8890 = vmatprep.subr.bf16.mxu0 %v13721_v31 }
 0xaef   :  { %8891 = vmatpush3.bf16.msra.mxu0 %v13730_v44 }
 0xaf0   :  { %8892 = vmatprep.subr.bf16.mxu0 %v13736_v58 }
 0xaf3   :  { %8893 = vmatpush3.bf16.msra.mxu0 %v13742_v60 }
 0xaf4   :  { %8894 = vmatprep.subr.bf16.mxu0 %v13748_v5 }
 0xaf7   :  { %8895 = vmatpush3.bf16.msra.mxu0 %v13754_v10 }
 0xaf8   :  { %8896 = vmatprep.subr.bf16.mxu0 %v13760_v42 }
 0xafb   :  { %8897 = vmatpush3.bf16.msra.mxu0 %v13766_v8 }
 0xafc   :  { %8898 = vmatprep.subr.bf16.mxu0 %v13772_v9 }
 0xaff   :  { %8899 = vmatpush3.bf16.msra.mxu0 %v13781_v57 }
 0xb00   :  { %8900 = vmatprep.subr.bf16.mxu0 %v13787_v34 }
 0xb03   :  { %8901 = vmatpush3.bf16.msra.mxu0 %v13794_v22  ;;  %v14644_v22 = vld [vmem:[#allocation29_spill] sm:$0xff] }
 0xb04   :  { %8902 = vmatprep.subr.bf16.mxu0 %v13800_v43  ;;  %v14645_v43 = vld [vmem:[#allocation26_spill] sm:$0xff] }
 0xb07   :  { %8903 = vmatpush3.bf16.msra.mxu0 %v13812_v56  ;;  %v14646_v56 = vld [vmem:[#allocation35_spill] sm:$0xff] }
 0xb08   :  { %8932 = vmatprep.subr.bf16.mxu0 %v13828_v33  ;;  %v14649_v33 = vld [vmem:[#allocation36_spill] sm:$0xff] }
 0xb17   :  { %v6447_v62 = vpop.permute.xlu1 %6446  ;;  %v6426_v37 = vpop.permute.xlu0 %6425 }
 0xb18   :  { %6451 = vst.msk [vmem:[#allocation9 + $0x58] sm:$0x1] %vm6429_vm0, %v6447_v62  ;;  %6431 = vst.msk [vmem:[#allocation8 + $0x58] sm:$0x1] %vm6429_vm0, %v6426_v37 }
 0xb19   :  { %6435 = vst.msk [vmem:[#allocation9 + $0x50] sm:$0x6] %vm6415_vm4, %v6426_v37 }
 0xb1b   :  { %v6412_v31 = vpop.permute.xlu1 %6411 }
 0xb1c   :  { %6417 = vst.msk [vmem:[#allocation8 + $0x50] sm:$0x6] %vm6415_vm4, %v6412_v31 }
 0xb1f   :  { %v7253_v44 = vld [vmem:[#allocation9 + $0x58] sm:$0xff] }
 0xb20   :  { %v7246_v58 = vld [vmem:[#allocation8 + $0x58] sm:$0xff]  ;;  %v7252_v60 = vld [vmem:[#allocation9 + $0x50] sm:$0xff]  ;;  %v7255_v5 = vpack.c.bf16 %v7253_v44, %v14006_v38  ;;  %v7392_v34 = vpack.c.bf16 %v14006_v38, %v7253_v44 }
 0xb21   :  { %v7248_v10 = vpack.c.bf16 %v7246_v58, %v14006_v38  ;;  %v7254_v42 = vpack.c.bf16 %v7252_v60, %v14006_v38  ;;  %v7343_v8 = vpack.c.bf16 %v14006_v38, %v7246_v58 }
 0xb22   :  { %7288 = vmatprep.mubr.bf16.mxu1 %v7255_v5 }
 0xb23   :  { %7329 = vmatprep.mubr.bf16.mxu0 %v7248_v10  ;;  %7289 = vmatmul.mubr.bf16.vlgmr.msra.gmra.mxu1 %v7254_v42  ;;  %v7245_v9 = vld [vmem:[#allocation8 + $0x50] sm:$0xff] }
 0xb24   :  { %8911 = vmatpush3.bf16.msra.mxu1 %v13817_v28  ;;  %7376 = vmatprep.mubr.bf16.mxu1 %v7343_v8  ;;  %v7247_v57 = vpack.c.bf16 %v7245_v9, %v14006_v38  ;;  %v14647_v28 = vld [vmem:[#allocation30_spill] sm:$0xff] }
 0xb25   :  { %8912 = vmatprep.subr.bf16.mxu1 %v13823_v53  ;;  %v14648_v53 = vld [vmem:[#allocation39_spill] sm:$0xff] }
 0xb26   :  { %7330 = vmatmul.mubr.bf16.vlgmr.msra.gmra.mxu0 %v7247_v57 }
 0xb27   :  { %8933 = vmatpush3.bf16.msra.mxu0 %v13845_v54  ;;  %7425 = vmatprep.mubr.bf16.mxu0 %v7392_v34  ;;  %v14651_v54 = vld [vmem:[#allocation40_spill] sm:$0xff] }
 0xb28   :  { %8913 = vmatpush3.bf16.msra.mxu1 %v13840_v6  ;;  %8934 = vmatprep.subr.bf16.mxu0 %v13857_v20  ;;  %v14650_v6 = vld [vmem:[#allocation44_spill] sm:$0xff]  ;;  %v14653_v20 = vld [vmem:[#allocation45_spill] sm:$0xff] }
 0xb29   :  { %8914 = vmatprep.subr.bf16.mxu1 %v13851_v24  ;;  %v14652_v24 = vld [vmem:[#allocation48_spill] sm:$0xff] }
 0xb2b   :  { %8935 = vmatpush3.bf16.msra.mxu0 %v13870_v27  ;;  %v14655_v27 = vld [vmem:[#allocation42_spill] sm:$0xff] }
 0xb2c   :  { %8915 = vmatpush3.bf16.msra.mxu1 %v13865_v49  ;;  %8936 = vmatprep.subr.bf16.mxu0 %v13881_v19  ;;  %v14654_v49 = vld [vmem:[#allocation72_spill] sm:$0xff]  ;;  %v7342_v19 = vpack.c.bf16 %v14006_v38, %v7245_v9 }
 0xb2d   :  { %8916 = vmatprep.subr.bf16.mxu1 %v13876_v59  ;;  %v14656_v59 = vld [vmem:[#allocation38_spill] sm:$0xff] }
 0xb2f   :  { %8937 = vmatpush3.bf16.msra.mxu0 %v13894_v14  ;;  %v7391_v14 = vpack.c.bf16 %v14006_v38, %v7252_v60 }
 0xb30   :  { %8917 = vmatpush3.bf16.msra.mxu1 %v13889_v46  ;;  %8938 = vmatprep.subr.bf16.mxu0 %v13906_v39  ;;  %v14657_v46 = vld [vmem:[#allocation47_spill] sm:$0xff] }
 0xb31   :  { %8918 = vmatprep.subr.bf16.mxu1 %v13901_v40  ;;  %v8280_v40 = vld [vmem:[%s14147_s11] ss:$0 sm:$0xff] }
 0xb33   :  { %8939 = vmatpush3.bf16.msra.mxu0 %v13918_v4 }
 0xb34   :  { %8919 = vmatpush3.bf16.msra.mxu1 %v13913_v25  ;;  %8940 = vmatprep.subr.bf16.mxu0 %v14644_v22 }
 0xb35   :  { %8920 = vmatprep.subr.bf16.mxu1 %v14645_v43 }
 0xb37   :  { %8941 = vmatpush3.bf16.msra.mxu0 %v14646_v56 }
 0xb38   :  { %8921 = vmatpush3.bf16.msra.mxu1 %v14647_v28  ;;  %8942 = vmatprep.subr.bf16.mxu0 %v14648_v53 }
 0xb39   :  { %8922 = vmatprep.subr.bf16.mxu1 %v14649_v33 }
 0xb3b   :  { %8943 = vmatpush3.bf16.msra.mxu0 %v14650_v6 }
 0xb3c   :  { %8923 = vmatpush3.bf16.msra.mxu1 %v14651_v54  ;;  %8944 = vmatprep.subr.bf16.mxu0 %v14652_v24 }
 0xb3d   :  { %8924 = vmatprep.subr.bf16.mxu1 %v14653_v20 }
 0xb3f   :  { %8945 = vmatpush3.bf16.msra.mxu0 %v14654_v49 }
 0xb40   :  { %8925 = vmatpush3.bf16.msra.mxu1 %v14655_v27  ;;  %8946 = vmatprep.subr.bf16.mxu0 %v14656_v59 }
 0xb41   :  { %9672 = vmatprep.subr.mxu1 %v14006_v38 }
 0xb43   :  { %7377 = vmatmul.mubr.bf16.vlgmr.msra.gmra.mxu1 %v7342_v19  ;;  %8947 = vmatpush3.bf16.msra.mxu0 %v14657_v46 }
 0xb44   :  { %9676 = vmatprep.mubr.msk.f32.mxu1 %vm14612_vm13, %v14006_v38 }
 0xb46   :  { %7426 = vmatmul.mubr.bf16.vlgmr.msra.gmra.mxu0 %v7391_v14 }
 0xbaa   :  { %v7236_v39 = vpop.f32.mrf.mxu0 }
 0xbab   :  { %v7237_v25 = vadd.f32 %v8280_v40, %v7236_v39 }
 0xbac   :  { %v9671_v4 = vpop.f32.mrf.mxu0 }
 0xbad   :  { %v7240_v16 = vmul.f32 0.2, %v7237_v25 }
 0xbaf   :  { %v7241_v23 = vmax.f32 %v7237_v25, %v7240_v16 }
 0xbb1   :  { %7508 = vst [vmem:[%s14148_s21] sm:$0xf] %v7241_v23 }
 0xbe3   :  { %v8882_v7 = vpop.f32.mrf.mxu1 }
 0xbe5   :  { %v8883_v15 = vpop.f32.mrf.mxu1 }
 0xbe6   :  { %v8904_v35 = vpop.f32.mrf.mxu0  ;;  %v8884_v13 = vadd.f32 %v8883_v15, %v8882_v7 }
 0xbe7   :  { %v8885_v18 = vpop.f32.mrf.mxu1 }
 0xbe8   :  { %v8905_v17 = vpop.f32.mrf.mxu0 }
 0xbe9   :  { %v8886_v26 = vpop.f32.mrf.mxu1  ;;  %v8906_v51 = vadd.f32 %v8905_v17, %v8904_v35 }
 0xbea   :  { %v8907_v55 = vpop.f32.mrf.mxu0  ;;  %v8887_v45 = vadd.f32 %v8886_v26, %v8885_v18 }
 0xbeb   :  { %v7332_v48 = vadd.f32 %v8906_v51, %v8884_v13 }
 0xbec   :  { %v8908_v1 = vpop.f32.mrf.mxu0 }
 0xbed   :  { %v8909_v0 = vadd.f32 %v8908_v1, %v8907_v55 }
 0xbef   :  { %v7335_v41 = vadd.f32 %v8909_v0, %v8887_v45 }
 0xc03   :  { %v8926_v47 = vpop.f32.mrf.mxu1 }
 0xc05   :  { %v8927_v32 = vpop.f32.mrf.mxu1 }
 0xc06   :  { %v8948_v3 = vpop.f32.mrf.mxu0  ;;  %v8928_v36 = vadd.f32 %v8927_v32, %v8926_v47 }
 0xc07   :  { %v8929_v63 = vpop.f32.mrf.mxu1 }
 0xc08   :  { %v8949_v11 = vpop.f32.mrf.mxu0  ;;  %v7385_v30 = vadd.f32 %v8928_v36, %v7332_v48 }
 0xc09   :  { %v8930_v61 = vpop.f32.mrf.mxu1  ;;  %v8950_v29 = vadd.f32 %v8949_v11, %v8948_v3 }
 0xc0a   :  { %v8931_v52 = vadd.f32 %v8930_v61, %v8929_v63  ;;  %v8951_v21 = vpop.f32.mrf.mxu0 }
 0xc0b   :  { %v7434_v31 = vadd.f32 %v8950_v29, %v7385_v30 }
 0xc0c   :  { %v7386_v2 = vadd.f32 %v8931_v52, %v7335_v41  ;;  %v8952_v12 = vpop.f32.mrf.mxu0 }
 0xc0d   :  { %v8953_v62 = vadd.f32 %v8952_v12, %v8951_v21 }
 0xc0f   :  { %v7435_v37 = vadd.f32 %v8953_v62, %v7386_v2 }
 0xc11   :  { %9673 = vmatpush3.msra.mxu1 %v7435_v37 }
 0xc12   :  { %9674 = vmatprep.subr.mxu1 %v14006_v38 }
 0xc13   :  { %9675 = vmatpush3.msra.mxu1 %v7434_v31 }
 0xc14   :  { %9677 = vmatmul.mubr.msk.f32.vlgmr.msra.gmra.mxu1 %vm14658_vm5, %v14048_v50 }
 0xcd4   :  { %v7502_v44 = vpop.f32.mrf.mxu1 }
 0xcd5   :  { %v7503_v58 = vadd.f32 %v8280_v40, %v7502_v44 }
 0xcd6   :  { %v9678_v60 = vpop.f32.mrf.mxu1 }
 0xcd7   :  { %v7506_v5 = vmul.f32 0.2, %v7503_v58 }
 0xcd9   :  { %v7507_v10 = vmax.f32 %v7503_v58, %v7506_v5 }
 0xcdb   :  { %7509 = vst [vmem:[%s14148_s21 + $0x4] sm:$0xf] %v7507_v10 }

</bundles_post_ra>
